<compile_context>
chip_gen: v7x
topology: tpu7x:2x2x1
jax: 0.10.0
libtpu: 0.0.40
codegen_flags: <defaults>
</compile_context>

<pallas_src>
import math

import jax
import jax.numpy as jnp
from jax.experimental import pallas as pl
from jax.experimental.pallas import tpu as pltpu


# -----------------------------------------------------------------------------
# Fused AIST kernel: 3x SAB-LSTM branches + trend attention + fc1
# -----------------------------------------------------------------------------
def make_aist_kernel(Bp, H, branch_cfg):
    """branch_cfg: ((T1, top_k1, every_k1), (T2, ...), (T3, ...)) for sab1..3.

    Bp is the sublane-padded batch (multiple of 8).  Each x input arrives
    pre-flattened to (T*Bp, D) so the whole input projection is one matmul.
    """

    def kernel(x1_ref, x2_ref, x3_ref,
               wih1_ref, whh1_ref, b1_ref, wt1_ref,
               wih2_ref, whh2_ref, b2_ref, wt2_ref,
               wih3_ref, whh3_ref, b3_ref, wt3_ref,
               wv_w_ref, wv_b_ref, wu_ref, fc1_w_ref, fc1_b_ref,
               out_ref, attn_ref):
        eps = 1e-7

        # Fused gate activation constants: sigmoid(x) = 0.5*tanh(0.5*x)+0.5 for
        # the i/f/o gates, tanh(x) for the g gate -> one tanh over 4H lanes.
        lane = jax.lax.broadcasted_iota(jnp.int32, (1, 4 * H), 1)
        is_g = jnp.logical_and(lane >= 2 * H, lane < 3 * H)
        gate_scale = jnp.where(is_g, 1.0, 0.5)   # pre-tanh scale == post-tanh mul
        gate_shift = jnp.where(is_g, 0.0, 0.5)

        def run_sab(x_ref, wih_ref, whh_ref, b_ref, wt_ref,
                    T, top_k, attn_every_k):
            # Reference Sparse_attention does `top_k += 1` and returns the raw
            # scores while the memory still fits; otherwise it keeps the top_k
            # entries (subtract (k+1)-th largest + eps, clamp at 0, normalize).
            eff_k = top_k + 1

            wih_bf = wih_ref[...].astype(jnp.bfloat16)                 # (D, 4H)
            # fold the 0.5 gate pre-scale into Whh (exact: *0.5 / *1.0) so no
            # per-step scale multiply sits on the recurrence chain.
            whh_bf = (whh_ref[...] * gate_scale).astype(jnp.bfloat16)  # (H, 4H)
            bias = b_ref[...]                                          # (1, 4H)
            wt_cur = wt_ref[0:H, :]                                    # (H, 1)
            wt_old = wt_ref[H:2 * H, :]                                # (H, 1)

            # Hoisted, batched input projection: one MXU matmul for the whole
            # sequence (independent of h, so fully off the serial chain).
            proj = (jnp.dot(x_ref[...].astype(jnp.bfloat16), wih_bf,
                            preferred_element_type=jnp.float32)
                    + bias) * gate_scale                               # (T*Bp, 4H)

            h = jnp.zeros((Bp, H), jnp.float32)
            c = jnp.zeros((Bp, H), jnp.float32)
            mem = [h]                                  # past (attended) hidden states
            mem_s = [jnp.zeros((Bp, 1), jnp.float32)]  # cached tanh(m) @ wt_old

            for t in range(T):
                pre = proj[t * Bp:(t + 1) * Bp, :] + jnp.dot(
                    h.astype(jnp.bfloat16), whh_bf,
                    preferred_element_type=jnp.float32)                # (Bp, 4H)
                act = gate_scale * jnp.tanh(pre) + gate_shift          # 1 EUP pass
                i_g = act[:, 0:H]
                f_g = act[:, H:2 * H]
                g_g = act[:, 2 * H:3 * H]
                o_g = act[:, 3 * H:4 * H]
                c = f_g * c + i_g * g_g
                h_new = o_g * jnp.tanh(c)

                # scores: tanh(cat(h_new, h_old)) @ w_t splits additively; the
                # memory-side term was cached when the entry was appended.
                s_cur = jnp.dot(jnp.tanh(h_new), wt_cur,
                                preferred_element_type=jnp.float32)    # (Bp, 1)
                attn_s = jnp.concatenate([s_cur + s for s in mem_s], axis=1)
                M = len(mem)

                if M <= eff_k:
                    attn_w = attn_s                    # raw scores (reference)
                else:
                    # tie-aware eff_k-th largest per row (torch.topk ordering):
                    # rank_i = #(j: s_j > s_i) + #(j < i: s_j == s_i)
                    cols = [attn_s[:, i:i + 1] for i in range(M)]
                    ranks = []
                    for i in range(M):
                        r = jnp.zeros((Bp, 1), jnp.float32)
                        for j in range(M):
                            if j == i:
                                continue
                            r = r + (cols[j] > cols[i]).astype(jnp.float32)
                            if j < i:
                                r = r + (cols[j] == cols[i]).astype(jnp.float32)
                        ranks.append(r)
                    rank = jnp.concatenate(ranks, axis=1)              # (Bp, M)
                    delta = jnp.min(
                        jnp.where(rank < float(eff_k), attn_s, jnp.inf),
                        axis=1, keepdims=True) + eps
                    attn_w = jnp.maximum(attn_s - delta, 0.0)
                    attn_w = attn_w * pl.reciprocal(
                        jnp.sum(attn_w, axis=1, keepdims=True) + eps,
                        approx=True)

                ctx = attn_w[:, 0:1] * mem[0]
                for m_idx in range(1, M):
                    ctx = ctx + attn_w[:, m_idx:m_idx + 1] * mem[m_idx]
                h = h_new + ctx

                if (t + 1) % attn_every_k == 0:
                    mem.append(h)
                    mem_s.append(jnp.dot(jnp.tanh(h), wt_old,
                                         preferred_element_type=jnp.float32))
            return h

        (T1, k1, e1), (T2, k2, e2), (T3, k3, e3) = branch_cfg
        x_con = run_sab(x1_ref, wih1_ref, whh1_ref, b1_ref, wt1_ref, T1, k1, e1)
        x_daily = run_sab(x2_ref, wih2_ref, whh2_ref, b2_ref, wt2_ref, T2, k2, e2)
        x_weekly = run_sab(x3_ref, wih3_ref, whh3_ref, b3_ref, wt3_ref, T3, k3, e3)

        # ---- trend-level attention + fc1 (dropout = identity, eval mode) ----
        wv_w = wv_w_ref[...]                               # (H, A)
        wv_b = wv_b_ref[...]                               # (1, A)
        wu = wu_ref[...]                                   # (Bp, A)
        scores = []
        for xj in (x_con, x_daily, x_weekly):
            um_j = jnp.tanh(jnp.dot(xj, wv_w, preferred_element_type=jnp.float32)
                            + wv_b)                        # (Bp, A)
            scores.append(jnp.sum(wu * um_j, axis=1, keepdims=True))   # (Bp, 1)
        alpha = jnp.concatenate(scores, axis=1)            # (Bp, 3)
        alpha = jnp.exp(alpha - jnp.max(alpha, axis=1, keepdims=True))
        alpha = alpha * pl.reciprocal(jnp.sum(alpha, axis=1, keepdims=True),
                                      approx=True)         # softmax over trends
        attn_ref[...] = alpha

        mix = (alpha[:, 0:1] * x_con
               + alpha[:, 1:2] * x_daily
               + alpha[:, 2:3] * x_weekly)                 # (Bp, H)
        out_ref[...] = jnp.tanh(
            jnp.dot(mix, fc1_w_ref[...], preferred_element_type=jnp.float32)
            + fc1_b_ref[...])                              # (Bp, 1)

    return kernel


def aist_fused_call(params, x_spatial, x_daily, x_weekly):
    B, T1, _ = x_spatial.shape
    _, T2, _ = x_daily.shape
    _, T3, _ = x_weekly.shape
    H = params["sab1"]["whh"].shape[0]
    Bp = ((B + 7) // 8) * 8          # sublane-align the batch (42 -> 48)
    pad = Bp - B

    def prep(x):
        xt = jnp.transpose(x, (1, 0, 2))                  # (T, B, D)
        if pad:
            xt = jnp.pad(xt, ((0, 0), (0, pad), (0, 0)))
        return xt.reshape(xt.shape[0] * Bp, xt.shape[2])  # (T*Bp, D)

    x1, x2, x3 = prep(x_spatial), prep(x_daily), prep(x_weekly)
    wu = params["wu"]
    if pad:
        wu = jnp.pad(wu, ((0, pad), (0, 0)))

    # (top_k, attn_every_k) fixed per-branch in AIST.__init__: (4,5),(4,5),(3,1)
    branch_cfg = ((T1, 4, 5), (T2, 4, 5), (T3, 3, 1))
    kernel = make_aist_kernel(Bp, H, branch_cfg)
    vmem = pl.BlockSpec(memory_space=pltpu.MemorySpace.VMEM)
    p1, p2, p3 = params["sab1"], params["sab2"], params["sab3"]
    out, attn = pl.pallas_call(
        kernel,
        out_shape=(jax.ShapeDtypeStruct((Bp, 1), jnp.float32),
                   jax.ShapeDtypeStruct((Bp, 3), jnp.float32)),
        in_specs=[vmem] * 20,
        out_specs=(vmem, vmem),
    )(x1, x2, x3,
      p1["wih"], p1["whh"], p1["b"], p1["wt"],
      p2["wih"], p2["whh"], p2["b"], p2["wt"],
      p3["wih"], p3["whh"], p3["b"], p3["wt"],
      params["wv_w"], params["wv_b"], wu,
      params["fc1_w"], params["fc1_b"])
    return out[:B], attn[:B]


# -----------------------------------------------------------------------------
# Parameter initialization (deterministic, shapes from AIST.__init__)
# -----------------------------------------------------------------------------
def _uniform(key, shape, a):
    return jax.random.uniform(key, shape, jnp.float32, -a, a)


def init_params(key, *, in_hgat, out_gat, nhid_rnn, att_rnn, vocab=32, B=42):
    keys = jax.random.split(key, 20)
    H = nhid_rnn

    def lstm_params(k0, k1, k2, k3, D):
        a = 1.0 / math.sqrt(H)
        return {
            "wih": _uniform(k0, (D, 4 * H), a),
            "whh": _uniform(k1, (H, 4 * H), a),
            "b": _uniform(k2, (1, 4 * H), a),
            "wt": _uniform(k3, (2 * H, 1), 1.0 / math.sqrt(2 * H)),
        }

    params = {
        # deterministic stand-in embedding for Spatial_Module output features
        "spatial_emb": jax.random.normal(keys[0], (vocab, 2 * out_gat),
                                         jnp.float32) * 0.1,
        "sab1": lstm_params(keys[1], keys[2], keys[3], keys[4], 2 * out_gat),
        "sab2": lstm_params(keys[5], keys[6], keys[7], keys[8], in_hgat),
        "sab3": lstm_params(keys[9], keys[10], keys[11], keys[12], in_hgat),
        "wv_w": _uniform(keys[13], (H, att_rnn), 1.0 / math.sqrt(H)),
        "wv_b": _uniform(keys[14], (1, att_rnn), 1.0 / math.sqrt(H)),
        # wu: nn.Parameter((42, att_rnn)) with xavier_uniform_(gain=1.414)
        "wu": _uniform(keys[15], (B, att_rnn),
                       1.414 * math.sqrt(6.0 / (B + att_rnn))),
        "fc1_w": _uniform(keys[16], (H, 1), 1.0 / math.sqrt(H)),
        "fc1_b": _uniform(keys[17], (1, 1), 1.0 / math.sqrt(H)),
    }
    return params


# -----------------------------------------------------------------------------
# AIST forward
# -----------------------------------------------------------------------------
@jax.jit
def _aist_forward_jit(params, x_crime, x_crime_daily, x_crime_weekly):
    x_spatial = jnp.take(params["spatial_emb"], x_crime, axis=0)  # (B, ts, 2*out_gat)
    return aist_fused_call(params, x_spatial, x_crime_daily, x_crime_weekly)


def aist_forward(params, x_crime, x_crime_daily, x_crime_weekly,
                 x_nei, x_ext, x_sides):
    # TODO(synk): Spatial_Module (GAT over neighbouring regions) round-trips its
    # inputs through np.savetxt/load_data_GAT text files and unprovided
    # GraphAttentionLayer internals; it is replaced by a deterministic embedding
    # of the raw crime counts producing the same (B, ts, 2*out_gat) feature
    # tensor that feeds sab1.  x_nei / x_ext / x_sides are unused.
    del x_nei, x_ext, x_sides
    return _aist_forward_jit(params, x_crime, x_crime_daily, x_crime_weekly)


# -----------------------------------------------------------------------------
if __name__ == "__main__":
    B = 42            # fixed by the wu parameter shape (42, att_rnn) in AIST.__init__
    ts = 8            # spatial / recent-trend time steps
    T_daily = 8
    T_weekly = 4
    in_hgat = 4
    out_gat = 8
    nhid_rnn = 32
    att_rnn = 16

    key = jax.random.PRNGKey(0)
    k_par, kx1, kx2, kx3 = jax.random.split(key, 4)

    params = init_params(k_par, in_hgat=in_hgat, out_gat=out_gat,
                         nhid_rnn=nhid_rnn, att_rnn=att_rnn, B=B)

    x_crime = jax.random.randint(kx1, (B, ts), 0, 32)                     # int counts
    x_crime_daily = jax.random.normal(kx2, (B, T_daily, in_hgat), jnp.float32)
    x_crime_weekly = jax.random.normal(kx3, (B, T_weekly, in_hgat), jnp.float32)
    x_nei, x_ext, x_sides = [], [], []   # consumed only by the (stubbed) Spatial_Module

    out, attn_trend = aist_forward(params, x_crime, x_crime_daily,
                                   x_crime_weekly, x_nei, x_ext, x_sides)
    jax.block_until_ready((out, attn_trend))

    assert out.shape == (B, 1) and attn_trend.shape == (B, 3)
    assert bool(jnp.all(jnp.isfinite(out))) and bool(jnp.all(jnp.isfinite(attn_trend)))
    print("KERNEL_OK")
</pallas_src>

<mosaic_0001>
module attributes {stable_mosaic.version = 11 : i64} {
  func.func @kernel(%arg0: memref<384x16xf32, #tpu.memory_space<vmem>>, %arg1: memref<384x4xf32, #tpu.memory_space<vmem>>, %arg2: memref<192x4xf32, #tpu.memory_space<vmem>>, %arg3: memref<16x128xf32, #tpu.memory_space<vmem>>, %arg4: memref<32x128xf32, #tpu.memory_space<vmem>>, %arg5: memref<1x128xf32, #tpu.memory_space<vmem>>, %arg6: memref<64x1xf32, #tpu.memory_space<vmem>>, %arg7: memref<4x128xf32, #tpu.memory_space<vmem>>, %arg8: memref<32x128xf32, #tpu.memory_space<vmem>>, %arg9: memref<1x128xf32, #tpu.memory_space<vmem>>, %arg10: memref<64x1xf32, #tpu.memory_space<vmem>>, %arg11: memref<4x128xf32, #tpu.memory_space<vmem>>, %arg12: memref<32x128xf32, #tpu.memory_space<vmem>>, %arg13: memref<1x128xf32, #tpu.memory_space<vmem>>, %arg14: memref<64x1xf32, #tpu.memory_space<vmem>>, %arg15: memref<32x16xf32, #tpu.memory_space<vmem>>, %arg16: memref<1x16xf32, #tpu.memory_space<vmem>>, %arg17: memref<48x16xf32, #tpu.memory_space<vmem>>, %arg18: memref<32x1xf32, #tpu.memory_space<vmem>>, %arg19: memref<1x1xf32, #tpu.memory_space<vmem>>, %arg20: memref<48x1xf32, #tpu.memory_space<vmem>>, %arg21: memref<48x3xf32, #tpu.memory_space<vmem>>) attributes {dimension_semantics = [], scalar_prefetch = 0 : i64, scratch_operands = 0 : i64, tpu.core_type = #tpu.core_type<tc>} {
    %0 = tpu.iota {dimensions = array<i32: 1>} : vector<1x128xi32>
    %c64_i32 = arith.constant 64 : i32
    %1 = vector.broadcast %c64_i32 : i32 to vector<1x128xi32>
    %2 = arith.cmpi sge, %0, %1 : vector<1x128xi32>
    %c96_i32 = arith.constant 96 : i32
    %3 = vector.broadcast %c96_i32 : i32 to vector<1x128xi32>
    %4 = arith.cmpi slt, %0, %3 : vector<1x128xi32>
    %5 = arith.andi %2, %4 : vector<1x128xi1>
    %cst = arith.constant 1.000000e+00 : f32
    %cst_0 = arith.constant 5.000000e-01 : f32
    %6 = vector.broadcast %cst : f32 to vector<1x128xf32>
    %7 = vector.broadcast %cst_0 : f32 to vector<1x128xf32>
    %8 = arith.select %5, %6, %7 : vector<1x128xi1>, vector<1x128xf32>
    %cst_1 = arith.constant 0.000000e+00 : f32
    %cst_2 = arith.constant 5.000000e-01 : f32
    %9 = vector.broadcast %cst_1 : f32 to vector<1x128xf32>
    %10 = vector.broadcast %cst_2 : f32 to vector<1x128xf32>
    %11 = arith.select %5, %9, %10 : vector<1x128xi1>, vector<1x128xf32>
    %c0 = arith.constant 0 : index
    %c0_3 = arith.constant 0 : index
    %12 = vector.load %arg3[%c0, %c0_3] : memref<16x128xf32, #tpu.memory_space<vmem>>, vector<16x128xf32>
    %13 = arith.truncf %12 : vector<16x128xf32> to vector<16x128xbf16>
    %c0_4 = arith.constant 0 : index
    %c0_5 = arith.constant 0 : index
    %14 = vector.load %arg4[%c0_4, %c0_5] : memref<32x128xf32, #tpu.memory_space<vmem>>, vector<32x128xf32>
    %15 = vector.broadcast %8 : vector<1x128xf32> to vector<32x128xf32>
    %16 = arith.mulf %14, %15 : vector<32x128xf32>
    %17 = arith.truncf %16 : vector<32x128xf32> to vector<32x128xbf16>
    %c0_6 = arith.constant 0 : index
    %c0_7 = arith.constant 0 : index
    %18 = vector.load %arg5[%c0_6, %c0_7] : memref<1x128xf32, #tpu.memory_space<vmem>>, vector<1x128xf32>
    %c0_8 = arith.constant 0 : index
    %c0_9 = arith.constant 0 : index
    %19 = vector.load %arg6[%c0_8, %c0_9] : memref<64x1xf32, #tpu.memory_space<vmem>>, vector<32x1xf32>
    %c32 = arith.constant 32 : index
    %c0_10 = arith.constant 0 : index
    %20 = vector.load %arg6[%c32, %c0_10] : memref<64x1xf32, #tpu.memory_space<vmem>>, vector<32x1xf32>
    %c0_11 = arith.constant 0 : index
    %c0_12 = arith.constant 0 : index
    %21 = vector.load %arg0[%c0_11, %c0_12] : memref<384x16xf32, #tpu.memory_space<vmem>>, vector<384x16xf32>
    %22 = arith.truncf %21 : vector<384x16xf32> to vector<384x16xbf16>
    %cst_13 = arith.constant dense<0.000000e+00> : vector<384x128xf32>
    %23 = tpu.matmul %22, %13, %cst_13 {dimension_numbers = #tpu.dot_dimension_numbers<[1], [0], [0], [1], [0, 0, 1, 1], [], []>} : vector<384x16xbf16>, vector<16x128xbf16>, vector<384x128xf32> -> vector<384x128xf32>
    %24 = vector.broadcast %18 : vector<1x128xf32> to vector<384x128xf32>
    %25 = arith.addf %23, %24 : vector<384x128xf32>
    %26 = vector.broadcast %8 : vector<1x128xf32> to vector<384x128xf32>
    %27 = arith.mulf %25, %26 : vector<384x128xf32>
    %cst_14 = arith.constant 0.000000e+00 : f32
    %28 = vector.broadcast %cst_14 : f32 to vector<48x32xf32>
    %cst_15 = arith.constant 0.000000e+00 : f32
    %29 = vector.broadcast %cst_15 : f32 to vector<48x32xf32>
    %cst_16 = arith.constant 0.000000e+00 : f32
    %30 = vector.broadcast %cst_16 : f32 to vector<48x1xf32>
    %31 = vector.extract_strided_slice %27 {offsets = [0, 0], sizes = [48, 128], strides = [1, 1]} : vector<384x128xf32> to vector<48x128xf32>
    %32 = arith.truncf %28 : vector<48x32xf32> to vector<48x32xbf16>
    %cst_17 = arith.constant dense<0.000000e+00> : vector<48x128xf32>
    %33 = tpu.matmul %32, %17, %cst_17 {dimension_numbers = #tpu.dot_dimension_numbers<[1], [0], [0], [1], [0, 0, 1, 1], [], []>} : vector<48x32xbf16>, vector<32x128xbf16>, vector<48x128xf32> -> vector<48x128xf32>
    %34 = arith.addf %31, %33 : vector<48x128xf32>
    %35 = math.tanh %34 : vector<48x128xf32>
    %36 = vector.broadcast %8 : vector<1x128xf32> to vector<48x128xf32>
    %37 = arith.mulf %36, %35 : vector<48x128xf32>
    %38 = vector.broadcast %11 : vector<1x128xf32> to vector<48x128xf32>
    %39 = arith.addf %37, %38 : vector<48x128xf32>
    %40 = vector.extract_strided_slice %39 {offsets = [0, 0], sizes = [48, 32], strides = [1, 1]} : vector<48x128xf32> to vector<48x32xf32>
    %41 = vector.extract_strided_slice %39 {offsets = [0, 32], sizes = [48, 32], strides = [1, 1]} : vector<48x128xf32> to vector<48x32xf32>
    %42 = vector.extract_strided_slice %39 {offsets = [0, 64], sizes = [48, 32], strides = [1, 1]} : vector<48x128xf32> to vector<48x32xf32>
    %43 = vector.extract_strided_slice %39 {offsets = [0, 96], sizes = [48, 32], strides = [1, 1]} : vector<48x128xf32> to vector<48x32xf32>
    %44 = arith.mulf %41, %29 : vector<48x32xf32>
    %45 = arith.mulf %40, %42 : vector<48x32xf32>
    %46 = arith.addf %44, %45 : vector<48x32xf32>
    %47 = math.tanh %46 : vector<48x32xf32>
    %48 = arith.mulf %43, %47 : vector<48x32xf32>
    %49 = math.tanh %48 : vector<48x32xf32>
    %cst_18 = arith.constant dense<0.000000e+00> : vector<48x1xf32>
    %50 = tpu.matmul %49, %19, %cst_18 {dimension_numbers = #tpu.dot_dimension_numbers<[1], [0], [0], [1], [0, 0, 1, 1], [], []>} : vector<48x32xf32>, vector<32x1xf32>, vector<48x1xf32> -> vector<48x1xf32>
    %51 = arith.addf %50, %30 : vector<48x1xf32>
    %52 = vector.broadcast %51 : vector<48x1xf32> to vector<48x32xf32>
    %53 = arith.mulf %52, %28 : vector<48x32xf32>
    %54 = arith.addf %48, %53 : vector<48x32xf32>
    %55 = vector.extract_strided_slice %27 {offsets = [48, 0], sizes = [48, 128], strides = [1, 1]} : vector<384x128xf32> to vector<48x128xf32>
    %56 = arith.truncf %54 : vector<48x32xf32> to vector<48x32xbf16>
    %cst_19 = arith.constant dense<0.000000e+00> : vector<48x128xf32>
    %57 = tpu.matmul %56, %17, %cst_19 {dimension_numbers = #tpu.dot_dimension_numbers<[1], [0], [0], [1], [0, 0, 1, 1], [], []>} : vector<48x32xbf16>, vector<32x128xbf16>, vector<48x128xf32> -> vector<48x128xf32>
    %58 = arith.addf %55, %57 : vector<48x128xf32>
    %59 = math.tanh %58 : vector<48x128xf32>
    %60 = vector.broadcast %8 : vector<1x128xf32> to vector<48x128xf32>
    %61 = arith.mulf %60, %59 : vector<48x128xf32>
    %62 = vector.broadcast %11 : vector<1x128xf32> to vector<48x128xf32>
    %63 = arith.addf %61, %62 : vector<48x128xf32>
    %64 = vector.extract_strided_slice %63 {offsets = [0, 0], sizes = [48, 32], strides = [1, 1]} : vector<48x128xf32> to vector<48x32xf32>
    %65 = vector.extract_strided_slice %63 {offsets = [0, 32], sizes = [48, 32], strides = [1, 1]} : vector<48x128xf32> to vector<48x32xf32>
    %66 = vector.extract_strided_slice %63 {offsets = [0, 64], sizes = [48, 32], strides = [1, 1]} : vector<48x128xf32> to vector<48x32xf32>
    %67 = vector.extract_strided_slice %63 {offsets = [0, 96], sizes = [48, 32], strides = [1, 1]} : vector<48x128xf32> to vector<48x32xf32>
    %68 = arith.mulf %65, %46 : vector<48x32xf32>
    %69 = arith.mulf %64, %66 : vector<48x32xf32>
    %70 = arith.addf %68, %69 : vector<48x32xf32>
    %71 = math.tanh %70 : vector<48x32xf32>
    %72 = arith.mulf %67, %71 : vector<48x32xf32>
    %73 = math.tanh %72 : vector<48x32xf32>
    %cst_20 = arith.constant dense<0.000000e+00> : vector<48x1xf32>
    %74 = tpu.matmul %73, %19, %cst_20 {dimension_numbers = #tpu.dot_dimension_numbers<[1], [0], [0], [1], [0, 0, 1, 1], [], []>} : vector<48x32xf32>, vector<32x1xf32>, vector<48x1xf32> -> vector<48x1xf32>
    %75 = arith.addf %74, %30 : vector<48x1xf32>
    %76 = vector.broadcast %75 : vector<48x1xf32> to vector<48x32xf32>
    %77 = arith.mulf %76, %28 : vector<48x32xf32>
    %78 = arith.addf %72, %77 : vector<48x32xf32>
    %79 = vector.extract_strided_slice %27 {offsets = [96, 0], sizes = [48, 128], strides = [1, 1]} : vector<384x128xf32> to vector<48x128xf32>
    %80 = arith.truncf %78 : vector<48x32xf32> to vector<48x32xbf16>
    %cst_21 = arith.constant dense<0.000000e+00> : vector<48x128xf32>
    %81 = tpu.matmul %80, %17, %cst_21 {dimension_numbers = #tpu.dot_dimension_numbers<[1], [0], [0], [1], [0, 0, 1, 1], [], []>} : vector<48x32xbf16>, vector<32x128xbf16>, vector<48x128xf32> -> vector<48x128xf32>
    %82 = arith.addf %79, %81 : vector<48x128xf32>
    %83 = math.tanh %82 : vector<48x128xf32>
    %84 = vector.broadcast %8 : vector<1x128xf32> to vector<48x128xf32>
    %85 = arith.mulf %84, %83 : vector<48x128xf32>
    %86 = vector.broadcast %11 : vector<1x128xf32> to vector<48x128xf32>
    %87 = arith.addf %85, %86 : vector<48x128xf32>
    %88 = vector.extract_strided_slice %87 {offsets = [0, 0], sizes = [48, 32], strides = [1, 1]} : vector<48x128xf32> to vector<48x32xf32>
    %89 = vector.extract_strided_slice %87 {offsets = [0, 32], sizes = [48, 32], strides = [1, 1]} : vector<48x128xf32> to vector<48x32xf32>
    %90 = vector.extract_strided_slice %87 {offsets = [0, 64], sizes = [48, 32], strides = [1, 1]} : vector<48x128xf32> to vector<48x32xf32>
    %91 = vector.extract_strided_slice %87 {offsets = [0, 96], sizes = [48, 32], strides = [1, 1]} : vector<48x128xf32> to vector<48x32xf32>
    %92 = arith.mulf %89, %70 : vector<48x32xf32>
    %93 = arith.mulf %88, %90 : vector<48x32xf32>
    %94 = arith.addf %92, %93 : vector<48x32xf32>
    %95 = math.tanh %94 : vector<48x32xf32>
    %96 = arith.mulf %91, %95 : vector<48x32xf32>
    %97 = math.tanh %96 : vector<48x32xf32>
    %cst_22 = arith.constant dense<0.000000e+00> : vector<48x1xf32>
    %98 = tpu.matmul %97, %19, %cst_22 {dimension_numbers = #tpu.dot_dimension_numbers<[1], [0], [0], [1], [0, 0, 1, 1], [], []>} : vector<48x32xf32>, vector<32x1xf32>, vector<48x1xf32> -> vector<48x1xf32>
    %99 = arith.addf %98, %30 : vector<48x1xf32>
    %100 = vector.broadcast %99 : vector<48x1xf32> to vector<48x32xf32>
    %101 = arith.mulf %100, %28 : vector<48x32xf32>
    %102 = arith.addf %96, %101 : vector<48x32xf32>
    %103 = vector.extract_strided_slice %27 {offsets = [144, 0], sizes = [48, 128], strides = [1, 1]} : vector<384x128xf32> to vector<48x128xf32>
    %104 = arith.truncf %102 : vector<48x32xf32> to vector<48x32xbf16>
    %cst_23 = arith.constant dense<0.000000e+00> : vector<48x128xf32>
    %105 = tpu.matmul %104, %17, %cst_23 {dimension_numbers = #tpu.dot_dimension_numbers<[1], [0], [0], [1], [0, 0, 1, 1], [], []>} : vector<48x32xbf16>, vector<32x128xbf16>, vector<48x128xf32> -> vector<48x128xf32>
    %106 = arith.addf %103, %105 : vector<48x128xf32>
    %107 = math.tanh %106 : vector<48x128xf32>
    %108 = vector.broadcast %8 : vector<1x128xf32> to vector<48x128xf32>
    %109 = arith.mulf %108, %107 : vector<48x128xf32>
    %110 = vector.broadcast %11 : vector<1x128xf32> to vector<48x128xf32>
    %111 = arith.addf %109, %110 : vector<48x128xf32>
    %112 = vector.extract_strided_slice %111 {offsets = [0, 0], sizes = [48, 32], strides = [1, 1]} : vector<48x128xf32> to vector<48x32xf32>
    %113 = vector.extract_strided_slice %111 {offsets = [0, 32], sizes = [48, 32], strides = [1, 1]} : vector<48x128xf32> to vector<48x32xf32>
    %114 = vector.extract_strided_slice %111 {offsets = [0, 64], sizes = [48, 32], strides = [1, 1]} : vector<48x128xf32> to vector<48x32xf32>
    %115 = vector.extract_strided_slice %111 {offsets = [0, 96], sizes = [48, 32], strides = [1, 1]} : vector<48x128xf32> to vector<48x32xf32>
    %116 = arith.mulf %113, %94 : vector<48x32xf32>
    %117 = arith.mulf %112, %114 : vector<48x32xf32>
    %118 = arith.addf %116, %117 : vector<48x32xf32>
    %119 = math.tanh %118 : vector<48x32xf32>
    %120 = arith.mulf %115, %119 : vector<48x32xf32>
    %121 = math.tanh %120 : vector<48x32xf32>
    %cst_24 = arith.constant dense<0.000000e+00> : vector<48x1xf32>
    %122 = tpu.matmul %121, %19, %cst_24 {dimension_numbers = #tpu.dot_dimension_numbers<[1], [0], [0], [1], [0, 0, 1, 1], [], []>} : vector<48x32xf32>, vector<32x1xf32>, vector<48x1xf32> -> vector<48x1xf32>
    %123 = arith.addf %122, %30 : vector<48x1xf32>
    %124 = vector.broadcast %123 : vector<48x1xf32> to vector<48x32xf32>
    %125 = arith.mulf %124, %28 : vector<48x32xf32>
    %126 = arith.addf %120, %125 : vector<48x32xf32>
    %127 = vector.extract_strided_slice %27 {offsets = [192, 0], sizes = [48, 128], strides = [1, 1]} : vector<384x128xf32> to vector<48x128xf32>
    %128 = arith.truncf %126 : vector<48x32xf32> to vector<48x32xbf16>
    %cst_25 = arith.constant dense<0.000000e+00> : vector<48x128xf32>
    %129 = tpu.matmul %128, %17, %cst_25 {dimension_numbers = #tpu.dot_dimension_numbers<[1], [0], [0], [1], [0, 0, 1, 1], [], []>} : vector<48x32xbf16>, vector<32x128xbf16>, vector<48x128xf32> -> vector<48x128xf32>
    %130 = arith.addf %127, %129 : vector<48x128xf32>
    %131 = math.tanh %130 : vector<48x128xf32>
    %132 = vector.broadcast %8 : vector<1x128xf32> to vector<48x128xf32>
    %133 = arith.mulf %132, %131 : vector<48x128xf32>
    %134 = vector.broadcast %11 : vector<1x128xf32> to vector<48x128xf32>
    %135 = arith.addf %133, %134 : vector<48x128xf32>
    %136 = vector.extract_strided_slice %135 {offsets = [0, 0], sizes = [48, 32], strides = [1, 1]} : vector<48x128xf32> to vector<48x32xf32>
    %137 = vector.extract_strided_slice %135 {offsets = [0, 32], sizes = [48, 32], strides = [1, 1]} : vector<48x128xf32> to vector<48x32xf32>
    %138 = vector.extract_strided_slice %135 {offsets = [0, 64], sizes = [48, 32], strides = [1, 1]} : vector<48x128xf32> to vector<48x32xf32>
    %139 = vector.extract_strided_slice %135 {offsets = [0, 96], sizes = [48, 32], strides = [1, 1]} : vector<48x128xf32> to vector<48x32xf32>
    %140 = arith.mulf %137, %118 : vector<48x32xf32>
    %141 = arith.mulf %136, %138 : vector<48x32xf32>
    %142 = arith.addf %140, %141 : vector<48x32xf32>
    %143 = math.tanh %142 : vector<48x32xf32>
    %144 = arith.mulf %139, %143 : vector<48x32xf32>
    %145 = math.tanh %144 : vector<48x32xf32>
    %cst_26 = arith.constant dense<0.000000e+00> : vector<48x1xf32>
    %146 = tpu.matmul %145, %19, %cst_26 {dimension_numbers = #tpu.dot_dimension_numbers<[1], [0], [0], [1], [0, 0, 1, 1], [], []>} : vector<48x32xf32>, vector<32x1xf32>, vector<48x1xf32> -> vector<48x1xf32>
    %147 = arith.addf %146, %30 : vector<48x1xf32>
    %148 = vector.broadcast %147 : vector<48x1xf32> to vector<48x32xf32>
    %149 = arith.mulf %148, %28 : vector<48x32xf32>
    %150 = arith.addf %144, %149 : vector<48x32xf32>
    %151 = math.tanh %150 : vector<48x32xf32>
    %cst_27 = arith.constant dense<0.000000e+00> : vector<48x1xf32>
    %152 = tpu.matmul %151, %20, %cst_27 {dimension_numbers = #tpu.dot_dimension_numbers<[1], [0], [0], [1], [0, 0, 1, 1], [], []>} : vector<48x32xf32>, vector<32x1xf32>, vector<48x1xf32> -> vector<48x1xf32>
    %153 = vector.extract_strided_slice %27 {offsets = [240, 0], sizes = [48, 128], strides = [1, 1]} : vector<384x128xf32> to vector<48x128xf32>
    %154 = arith.truncf %150 : vector<48x32xf32> to vector<48x32xbf16>
    %cst_28 = arith.constant dense<0.000000e+00> : vector<48x128xf32>
    %155 = tpu.matmul %154, %17, %cst_28 {dimension_numbers = #tpu.dot_dimension_numbers<[1], [0], [0], [1], [0, 0, 1, 1], [], []>} : vector<48x32xbf16>, vector<32x128xbf16>, vector<48x128xf32> -> vector<48x128xf32>
    %156 = arith.addf %153, %155 : vector<48x128xf32>
    %157 = math.tanh %156 : vector<48x128xf32>
    %158 = vector.broadcast %8 : vector<1x128xf32> to vector<48x128xf32>
    %159 = arith.mulf %158, %157 : vector<48x128xf32>
    %160 = vector.broadcast %11 : vector<1x128xf32> to vector<48x128xf32>
    %161 = arith.addf %159, %160 : vector<48x128xf32>
    %162 = vector.extract_strided_slice %161 {offsets = [0, 0], sizes = [48, 32], strides = [1, 1]} : vector<48x128xf32> to vector<48x32xf32>
    %163 = vector.extract_strided_slice %161 {offsets = [0, 32], sizes = [48, 32], strides = [1, 1]} : vector<48x128xf32> to vector<48x32xf32>
    %164 = vector.extract_strided_slice %161 {offsets = [0, 64], sizes = [48, 32], strides = [1, 1]} : vector<48x128xf32> to vector<48x32xf32>
    %165 = vector.extract_strided_slice %161 {offsets = [0, 96], sizes = [48, 32], strides = [1, 1]} : vector<48x128xf32> to vector<48x32xf32>
    %166 = arith.mulf %163, %142 : vector<48x32xf32>
    %167 = arith.mulf %162, %164 : vector<48x32xf32>
    %168 = arith.addf %166, %167 : vector<48x32xf32>
    %169 = math.tanh %168 : vector<48x32xf32>
    %170 = arith.mulf %165, %169 : vector<48x32xf32>
    %171 = math.tanh %170 : vector<48x32xf32>
    %cst_29 = arith.constant dense<0.000000e+00> : vector<48x1xf32>
    %172 = tpu.matmul %171, %19, %cst_29 {dimension_numbers = #tpu.dot_dimension_numbers<[1], [0], [0], [1], [0, 0, 1, 1], [], []>} : vector<48x32xf32>, vector<32x1xf32>, vector<48x1xf32> -> vector<48x1xf32>
    %173 = arith.addf %172, %30 : vector<48x1xf32>
    %174 = arith.addf %172, %152 : vector<48x1xf32>
    %175 = tpu.concatenate %173, %174 in 1 : vector<48x1xf32>, vector<48x1xf32> -> vector<48x2xf32>
    %176 = vector.extract_strided_slice %175 {offsets = [0, 0], sizes = [48, 1], strides = [1, 1]} : vector<48x2xf32> to vector<48x1xf32>
    %177 = vector.broadcast %176 : vector<48x1xf32> to vector<48x32xf32>
    %178 = arith.mulf %177, %28 : vector<48x32xf32>
    %179 = vector.extract_strided_slice %175 {offsets = [0, 1], sizes = [48, 1], strides = [1, 1]} : vector<48x2xf32> to vector<48x1xf32>
    %180 = vector.broadcast %179 : vector<48x1xf32> to vector<48x32xf32>
    %181 = arith.mulf %180, %150 : vector<48x32xf32>
    %182 = arith.addf %178, %181 : vector<48x32xf32>
    %183 = arith.addf %170, %182 : vector<48x32xf32>
    %184 = vector.extract_strided_slice %27 {offsets = [288, 0], sizes = [48, 128], strides = [1, 1]} : vector<384x128xf32> to vector<48x128xf32>
    %185 = arith.truncf %183 : vector<48x32xf32> to vector<48x32xbf16>
    %cst_30 = arith.constant dense<0.000000e+00> : vector<48x128xf32>
    %186 = tpu.matmul %185, %17, %cst_30 {dimension_numbers = #tpu.dot_dimension_numbers<[1], [0], [0], [1], [0, 0, 1, 1], [], []>} : vector<48x32xbf16>, vector<32x128xbf16>, vector<48x128xf32> -> vector<48x128xf32>
    %187 = arith.addf %184, %186 : vector<48x128xf32>
    %188 = math.tanh %187 : vector<48x128xf32>
    %189 = vector.broadcast %8 : vector<1x128xf32> to vector<48x128xf32>
    %190 = arith.mulf %189, %188 : vector<48x128xf32>
    %191 = vector.broadcast %11 : vector<1x128xf32> to vector<48x128xf32>
    %192 = arith.addf %190, %191 : vector<48x128xf32>
    %193 = vector.extract_strided_slice %192 {offsets = [0, 0], sizes = [48, 32], strides = [1, 1]} : vector<48x128xf32> to vector<48x32xf32>
    %194 = vector.extract_strided_slice %192 {offsets = [0, 32], sizes = [48, 32], strides = [1, 1]} : vector<48x128xf32> to vector<48x32xf32>
    %195 = vector.extract_strided_slice %192 {offsets = [0, 64], sizes = [48, 32], strides = [1, 1]} : vector<48x128xf32> to vector<48x32xf32>
    %196 = vector.extract_strided_slice %192 {offsets = [0, 96], sizes = [48, 32], strides = [1, 1]} : vector<48x128xf32> to vector<48x32xf32>
    %197 = arith.mulf %194, %168 : vector<48x32xf32>
    %198 = arith.mulf %193, %195 : vector<48x32xf32>
    %199 = arith.addf %197, %198 : vector<48x32xf32>
    %200 = math.tanh %199 : vector<48x32xf32>
    %201 = arith.mulf %196, %200 : vector<48x32xf32>
    %202 = math.tanh %201 : vector<48x32xf32>
    %cst_31 = arith.constant dense<0.000000e+00> : vector<48x1xf32>
    %203 = tpu.matmul %202, %19, %cst_31 {dimension_numbers = #tpu.dot_dimension_numbers<[1], [0], [0], [1], [0, 0, 1, 1], [], []>} : vector<48x32xf32>, vector<32x1xf32>, vector<48x1xf32> -> vector<48x1xf32>
    %204 = arith.addf %203, %30 : vector<48x1xf32>
    %205 = arith.addf %203, %152 : vector<48x1xf32>
    %206 = tpu.concatenate %204, %205 in 1 : vector<48x1xf32>, vector<48x1xf32> -> vector<48x2xf32>
    %207 = vector.extract_strided_slice %206 {offsets = [0, 0], sizes = [48, 1], strides = [1, 1]} : vector<48x2xf32> to vector<48x1xf32>
    %208 = vector.broadcast %207 : vector<48x1xf32> to vector<48x32xf32>
    %209 = arith.mulf %208, %28 : vector<48x32xf32>
    %210 = vector.extract_strided_slice %206 {offsets = [0, 1], sizes = [48, 1], strides = [1, 1]} : vector<48x2xf32> to vector<48x1xf32>
    %211 = vector.broadcast %210 : vector<48x1xf32> to vector<48x32xf32>
    %212 = arith.mulf %211, %150 : vector<48x32xf32>
    %213 = arith.addf %209, %212 : vector<48x32xf32>
    %214 = arith.addf %201, %213 : vector<48x32xf32>
    %215 = vector.extract_strided_slice %27 {offsets = [336, 0], sizes = [48, 128], strides = [1, 1]} : vector<384x128xf32> to vector<48x128xf32>
    %216 = arith.truncf %214 : vector<48x32xf32> to vector<48x32xbf16>
    %cst_32 = arith.constant dense<0.000000e+00> : vector<48x128xf32>
    %217 = tpu.matmul %216, %17, %cst_32 {dimension_numbers = #tpu.dot_dimension_numbers<[1], [0], [0], [1], [0, 0, 1, 1], [], []>} : vector<48x32xbf16>, vector<32x128xbf16>, vector<48x128xf32> -> vector<48x128xf32>
    %218 = arith.addf %215, %217 : vector<48x128xf32>
    %219 = math.tanh %218 : vector<48x128xf32>
    %220 = vector.broadcast %8 : vector<1x128xf32> to vector<48x128xf32>
    %221 = arith.mulf %220, %219 : vector<48x128xf32>
    %222 = vector.broadcast %11 : vector<1x128xf32> to vector<48x128xf32>
    %223 = arith.addf %221, %222 : vector<48x128xf32>
    %224 = vector.extract_strided_slice %223 {offsets = [0, 0], sizes = [48, 32], strides = [1, 1]} : vector<48x128xf32> to vector<48x32xf32>
    %225 = vector.extract_strided_slice %223 {offsets = [0, 32], sizes = [48, 32], strides = [1, 1]} : vector<48x128xf32> to vector<48x32xf32>
    %226 = vector.extract_strided_slice %223 {offsets = [0, 64], sizes = [48, 32], strides = [1, 1]} : vector<48x128xf32> to vector<48x32xf32>
    %227 = vector.extract_strided_slice %223 {offsets = [0, 96], sizes = [48, 32], strides = [1, 1]} : vector<48x128xf32> to vector<48x32xf32>
    %228 = arith.mulf %225, %199 : vector<48x32xf32>
    %229 = arith.mulf %224, %226 : vector<48x32xf32>
    %230 = arith.addf %228, %229 : vector<48x32xf32>
    %231 = math.tanh %230 : vector<48x32xf32>
    %232 = arith.mulf %227, %231 : vector<48x32xf32>
    %233 = math.tanh %232 : vector<48x32xf32>
    %cst_33 = arith.constant dense<0.000000e+00> : vector<48x1xf32>
    %234 = tpu.matmul %233, %19, %cst_33 {dimension_numbers = #tpu.dot_dimension_numbers<[1], [0], [0], [1], [0, 0, 1, 1], [], []>} : vector<48x32xf32>, vector<32x1xf32>, vector<48x1xf32> -> vector<48x1xf32>
    %235 = arith.addf %234, %30 : vector<48x1xf32>
    %236 = arith.addf %234, %152 : vector<48x1xf32>
    %237 = tpu.concatenate %235, %236 in 1 : vector<48x1xf32>, vector<48x1xf32> -> vector<48x2xf32>
    %238 = vector.extract_strided_slice %237 {offsets = [0, 0], sizes = [48, 1], strides = [1, 1]} : vector<48x2xf32> to vector<48x1xf32>
    %239 = vector.broadcast %238 : vector<48x1xf32> to vector<48x32xf32>
    %240 = arith.mulf %239, %28 : vector<48x32xf32>
    %241 = vector.extract_strided_slice %237 {offsets = [0, 1], sizes = [48, 1], strides = [1, 1]} : vector<48x2xf32> to vector<48x1xf32>
    %242 = vector.broadcast %241 : vector<48x1xf32> to vector<48x32xf32>
    %243 = arith.mulf %242, %150 : vector<48x32xf32>
    %244 = arith.addf %240, %243 : vector<48x32xf32>
    %245 = arith.addf %232, %244 : vector<48x32xf32>
    %c0_34 = arith.constant 0 : index
    %c0_35 = arith.constant 0 : index
    %246 = vector.load %arg7[%c0_34, %c0_35] : memref<4x128xf32, #tpu.memory_space<vmem>>, vector<4x128xf32>
    %247 = arith.truncf %246 : vector<4x128xf32> to vector<4x128xbf16>
    %c0_36 = arith.constant 0 : index
    %c0_37 = arith.constant 0 : index
    %248 = vector.load %arg8[%c0_36, %c0_37] : memref<32x128xf32, #tpu.memory_space<vmem>>, vector<32x128xf32>
    %249 = vector.broadcast %8 : vector<1x128xf32> to vector<32x128xf32>
    %250 = arith.mulf %248, %249 : vector<32x128xf32>
    %251 = arith.truncf %250 : vector<32x128xf32> to vector<32x128xbf16>
    %c0_38 = arith.constant 0 : index
    %c0_39 = arith.constant 0 : index
    %252 = vector.load %arg9[%c0_38, %c0_39] : memref<1x128xf32, #tpu.memory_space<vmem>>, vector<1x128xf32>
    %c0_40 = arith.constant 0 : index
    %c0_41 = arith.constant 0 : index
    %253 = vector.load %arg10[%c0_40, %c0_41] : memref<64x1xf32, #tpu.memory_space<vmem>>, vector<32x1xf32>
    %c32_42 = arith.constant 32 : index
    %c0_43 = arith.constant 0 : index
    %254 = vector.load %arg10[%c32_42, %c0_43] : memref<64x1xf32, #tpu.memory_space<vmem>>, vector<32x1xf32>
    %c0_44 = arith.constant 0 : index
    %c0_45 = arith.constant 0 : index
    %255 = vector.load %arg1[%c0_44, %c0_45] : memref<384x4xf32, #tpu.memory_space<vmem>>, vector<384x4xf32>
    %256 = arith.truncf %255 : vector<384x4xf32> to vector<384x4xbf16>
    %cst_46 = arith.constant dense<0.000000e+00> : vector<384x128xf32>
    %257 = tpu.matmul %256, %247, %cst_46 {dimension_numbers = #tpu.dot_dimension_numbers<[1], [0], [0], [1], [0, 0, 1, 1], [], []>} : vector<384x4xbf16>, vector<4x128xbf16>, vector<384x128xf32> -> vector<384x128xf32>
    %258 = vector.broadcast %252 : vector<1x128xf32> to vector<384x128xf32>
    %259 = arith.addf %257, %258 : vector<384x128xf32>
    %260 = vector.broadcast %8 : vector<1x128xf32> to vector<384x128xf32>
    %261 = arith.mulf %259, %260 : vector<384x128xf32>
    %cst_47 = arith.constant 0.000000e+00 : f32
    %262 = vector.broadcast %cst_47 : f32 to vector<48x32xf32>
    %cst_48 = arith.constant 0.000000e+00 : f32
    %263 = vector.broadcast %cst_48 : f32 to vector<48x32xf32>
    %cst_49 = arith.constant 0.000000e+00 : f32
    %264 = vector.broadcast %cst_49 : f32 to vector<48x1xf32>
    %265 = vector.extract_strided_slice %261 {offsets = [0, 0], sizes = [48, 128], strides = [1, 1]} : vector<384x128xf32> to vector<48x128xf32>
    %266 = arith.truncf %262 : vector<48x32xf32> to vector<48x32xbf16>
    %cst_50 = arith.constant dense<0.000000e+00> : vector<48x128xf32>
    %267 = tpu.matmul %266, %251, %cst_50 {dimension_numbers = #tpu.dot_dimension_numbers<[1], [0], [0], [1], [0, 0, 1, 1], [], []>} : vector<48x32xbf16>, vector<32x128xbf16>, vector<48x128xf32> -> vector<48x128xf32>
    %268 = arith.addf %265, %267 : vector<48x128xf32>
    %269 = math.tanh %268 : vector<48x128xf32>
    %270 = vector.broadcast %8 : vector<1x128xf32> to vector<48x128xf32>
    %271 = arith.mulf %270, %269 : vector<48x128xf32>
    %272 = vector.broadcast %11 : vector<1x128xf32> to vector<48x128xf32>
    %273 = arith.addf %271, %272 : vector<48x128xf32>
    %274 = vector.extract_strided_slice %273 {offsets = [0, 0], sizes = [48, 32], strides = [1, 1]} : vector<48x128xf32> to vector<48x32xf32>
    %275 = vector.extract_strided_slice %273 {offsets = [0, 32], sizes = [48, 32], strides = [1, 1]} : vector<48x128xf32> to vector<48x32xf32>
    %276 = vector.extract_strided_slice %273 {offsets = [0, 64], sizes = [48, 32], strides = [1, 1]} : vector<48x128xf32> to vector<48x32xf32>
    %277 = vector.extract_strided_slice %273 {offsets = [0, 96], sizes = [48, 32], strides = [1, 1]} : vector<48x128xf32> to vector<48x32xf32>
    %278 = arith.mulf %275, %263 : vector<48x32xf32>
    %279 = arith.mulf %274, %276 : vector<48x32xf32>
    %280 = arith.addf %278, %279 : vector<48x32xf32>
    %281 = math.tanh %280 : vector<48x32xf32>
    %282 = arith.mulf %277, %281 : vector<48x32xf32>
    %283 = math.tanh %282 : vector<48x32xf32>
    %cst_51 = arith.constant dense<0.000000e+00> : vector<48x1xf32>
    %284 = tpu.matmul %283, %253, %cst_51 {dimension_numbers = #tpu.dot_dimension_numbers<[1], [0], [0], [1], [0, 0, 1, 1], [], []>} : vector<48x32xf32>, vector<32x1xf32>, vector<48x1xf32> -> vector<48x1xf32>
    %285 = arith.addf %284, %264 : vector<48x1xf32>
    %286 = vector.broadcast %285 : vector<48x1xf32> to vector<48x32xf32>
    %287 = arith.mulf %286, %262 : vector<48x32xf32>
    %288 = arith.addf %282, %287 : vector<48x32xf32>
    %289 = vector.extract_strided_slice %261 {offsets = [48, 0], sizes = [48, 128], strides = [1, 1]} : vector<384x128xf32> to vector<48x128xf32>
    %290 = arith.truncf %288 : vector<48x32xf32> to vector<48x32xbf16>
    %cst_52 = arith.constant dense<0.000000e+00> : vector<48x128xf32>
    %291 = tpu.matmul %290, %251, %cst_52 {dimension_numbers = #tpu.dot_dimension_numbers<[1], [0], [0], [1], [0, 0, 1, 1], [], []>} : vector<48x32xbf16>, vector<32x128xbf16>, vector<48x128xf32> -> vector<48x128xf32>
    %292 = arith.addf %289, %291 : vector<48x128xf32>
    %293 = math.tanh %292 : vector<48x128xf32>
    %294 = vector.broadcast %8 : vector<1x128xf32> to vector<48x128xf32>
    %295 = arith.mulf %294, %293 : vector<48x128xf32>
    %296 = vector.broadcast %11 : vector<1x128xf32> to vector<48x128xf32>
    %297 = arith.addf %295, %296 : vector<48x128xf32>
    %298 = vector.extract_strided_slice %297 {offsets = [0, 0], sizes = [48, 32], strides = [1, 1]} : vector<48x128xf32> to vector<48x32xf32>
    %299 = vector.extract_strided_slice %297 {offsets = [0, 32], sizes = [48, 32], strides = [1, 1]} : vector<48x128xf32> to vector<48x32xf32>
    %300 = vector.extract_strided_slice %297 {offsets = [0, 64], sizes = [48, 32], strides = [1, 1]} : vector<48x128xf32> to vector<48x32xf32>
    %301 = vector.extract_strided_slice %297 {offsets = [0, 96], sizes = [48, 32], strides = [1, 1]} : vector<48x128xf32> to vector<48x32xf32>
    %302 = arith.mulf %299, %280 : vector<48x32xf32>
    %303 = arith.mulf %298, %300 : vector<48x32xf32>
    %304 = arith.addf %302, %303 : vector<48x32xf32>
    %305 = math.tanh %304 : vector<48x32xf32>
    %306 = arith.mulf %301, %305 : vector<48x32xf32>
    %307 = math.tanh %306 : vector<48x32xf32>
    %cst_53 = arith.constant dense<0.000000e+00> : vector<48x1xf32>
    %308 = tpu.matmul %307, %253, %cst_53 {dimension_numbers = #tpu.dot_dimension_numbers<[1], [0], [0], [1], [0, 0, 1, 1], [], []>} : vector<48x32xf32>, vector<32x1xf32>, vector<48x1xf32> -> vector<48x1xf32>
    %309 = arith.addf %308, %264 : vector<48x1xf32>
    %310 = vector.broadcast %309 : vector<48x1xf32> to vector<48x32xf32>
    %311 = arith.mulf %310, %262 : vector<48x32xf32>
    %312 = arith.addf %306, %311 : vector<48x32xf32>
    %313 = vector.extract_strided_slice %261 {offsets = [96, 0], sizes = [48, 128], strides = [1, 1]} : vector<384x128xf32> to vector<48x128xf32>
    %314 = arith.truncf %312 : vector<48x32xf32> to vector<48x32xbf16>
    %cst_54 = arith.constant dense<0.000000e+00> : vector<48x128xf32>
    %315 = tpu.matmul %314, %251, %cst_54 {dimension_numbers = #tpu.dot_dimension_numbers<[1], [0], [0], [1], [0, 0, 1, 1], [], []>} : vector<48x32xbf16>, vector<32x128xbf16>, vector<48x128xf32> -> vector<48x128xf32>
    %316 = arith.addf %313, %315 : vector<48x128xf32>
    %317 = math.tanh %316 : vector<48x128xf32>
    %318 = vector.broadcast %8 : vector<1x128xf32> to vector<48x128xf32>
    %319 = arith.mulf %318, %317 : vector<48x128xf32>
    %320 = vector.broadcast %11 : vector<1x128xf32> to vector<48x128xf32>
    %321 = arith.addf %319, %320 : vector<48x128xf32>
    %322 = vector.extract_strided_slice %321 {offsets = [0, 0], sizes = [48, 32], strides = [1, 1]} : vector<48x128xf32> to vector<48x32xf32>
    %323 = vector.extract_strided_slice %321 {offsets = [0, 32], sizes = [48, 32], strides = [1, 1]} : vector<48x128xf32> to vector<48x32xf32>
    %324 = vector.extract_strided_slice %321 {offsets = [0, 64], sizes = [48, 32], strides = [1, 1]} : vector<48x128xf32> to vector<48x32xf32>
    %325 = vector.extract_strided_slice %321 {offsets = [0, 96], sizes = [48, 32], strides = [1, 1]} : vector<48x128xf32> to vector<48x32xf32>
    %326 = arith.mulf %323, %304 : vector<48x32xf32>
    %327 = arith.mulf %322, %324 : vector<48x32xf32>
    %328 = arith.addf %326, %327 : vector<48x32xf32>
    %329 = math.tanh %328 : vector<48x32xf32>
    %330 = arith.mulf %325, %329 : vector<48x32xf32>
    %331 = math.tanh %330 : vector<48x32xf32>
    %cst_55 = arith.constant dense<0.000000e+00> : vector<48x1xf32>
    %332 = tpu.matmul %331, %253, %cst_55 {dimension_numbers = #tpu.dot_dimension_numbers<[1], [0], [0], [1], [0, 0, 1, 1], [], []>} : vector<48x32xf32>, vector<32x1xf32>, vector<48x1xf32> -> vector<48x1xf32>
    %333 = arith.addf %332, %264 : vector<48x1xf32>
    %334 = vector.broadcast %333 : vector<48x1xf32> to vector<48x32xf32>
    %335 = arith.mulf %334, %262 : vector<48x32xf32>
    %336 = arith.addf %330, %335 : vector<48x32xf32>
    %337 = vector.extract_strided_slice %261 {offsets = [144, 0], sizes = [48, 128], strides = [1, 1]} : vector<384x128xf32> to vector<48x128xf32>
    %338 = arith.truncf %336 : vector<48x32xf32> to vector<48x32xbf16>
    %cst_56 = arith.constant dense<0.000000e+00> : vector<48x128xf32>
    %339 = tpu.matmul %338, %251, %cst_56 {dimension_numbers = #tpu.dot_dimension_numbers<[1], [0], [0], [1], [0, 0, 1, 1], [], []>} : vector<48x32xbf16>, vector<32x128xbf16>, vector<48x128xf32> -> vector<48x128xf32>
    %340 = arith.addf %337, %339 : vector<48x128xf32>
    %341 = math.tanh %340 : vector<48x128xf32>
    %342 = vector.broadcast %8 : vector<1x128xf32> to vector<48x128xf32>
    %343 = arith.mulf %342, %341 : vector<48x128xf32>
    %344 = vector.broadcast %11 : vector<1x128xf32> to vector<48x128xf32>
    %345 = arith.addf %343, %344 : vector<48x128xf32>
    %346 = vector.extract_strided_slice %345 {offsets = [0, 0], sizes = [48, 32], strides = [1, 1]} : vector<48x128xf32> to vector<48x32xf32>
    %347 = vector.extract_strided_slice %345 {offsets = [0, 32], sizes = [48, 32], strides = [1, 1]} : vector<48x128xf32> to vector<48x32xf32>
    %348 = vector.extract_strided_slice %345 {offsets = [0, 64], sizes = [48, 32], strides = [1, 1]} : vector<48x128xf32> to vector<48x32xf32>
    %349 = vector.extract_strided_slice %345 {offsets = [0, 96], sizes = [48, 32], strides = [1, 1]} : vector<48x128xf32> to vector<48x32xf32>
    %350 = arith.mulf %347, %328 : vector<48x32xf32>
    %351 = arith.mulf %346, %348 : vector<48x32xf32>
    %352 = arith.addf %350, %351 : vector<48x32xf32>
    %353 = math.tanh %352 : vector<48x32xf32>
    %354 = arith.mulf %349, %353 : vector<48x32xf32>
    %355 = math.tanh %354 : vector<48x32xf32>
    %cst_57 = arith.constant dense<0.000000e+00> : vector<48x1xf32>
    %356 = tpu.matmul %355, %253, %cst_57 {dimension_numbers = #tpu.dot_dimension_numbers<[1], [0], [0], [1], [0, 0, 1, 1], [], []>} : vector<48x32xf32>, vector<32x1xf32>, vector<48x1xf32> -> vector<48x1xf32>
    %357 = arith.addf %356, %264 : vector<48x1xf32>
    %358 = vector.broadcast %357 : vector<48x1xf32> to vector<48x32xf32>
    %359 = arith.mulf %358, %262 : vector<48x32xf32>
    %360 = arith.addf %354, %359 : vector<48x32xf32>
    %361 = vector.extract_strided_slice %261 {offsets = [192, 0], sizes = [48, 128], strides = [1, 1]} : vector<384x128xf32> to vector<48x128xf32>
    %362 = arith.truncf %360 : vector<48x32xf32> to vector<48x32xbf16>
    %cst_58 = arith.constant dense<0.000000e+00> : vector<48x128xf32>
    %363 = tpu.matmul %362, %251, %cst_58 {dimension_numbers = #tpu.dot_dimension_numbers<[1], [0], [0], [1], [0, 0, 1, 1], [], []>} : vector<48x32xbf16>, vector<32x128xbf16>, vector<48x128xf32> -> vector<48x128xf32>
    %364 = arith.addf %361, %363 : vector<48x128xf32>
    %365 = math.tanh %364 : vector<48x128xf32>
    %366 = vector.broadcast %8 : vector<1x128xf32> to vector<48x128xf32>
    %367 = arith.mulf %366, %365 : vector<48x128xf32>
    %368 = vector.broadcast %11 : vector<1x128xf32> to vector<48x128xf32>
    %369 = arith.addf %367, %368 : vector<48x128xf32>
    %370 = vector.extract_strided_slice %369 {offsets = [0, 0], sizes = [48, 32], strides = [1, 1]} : vector<48x128xf32> to vector<48x32xf32>
    %371 = vector.extract_strided_slice %369 {offsets = [0, 32], sizes = [48, 32], strides = [1, 1]} : vector<48x128xf32> to vector<48x32xf32>
    %372 = vector.extract_strided_slice %369 {offsets = [0, 64], sizes = [48, 32], strides = [1, 1]} : vector<48x128xf32> to vector<48x32xf32>
    %373 = vector.extract_strided_slice %369 {offsets = [0, 96], sizes = [48, 32], strides = [1, 1]} : vector<48x128xf32> to vector<48x32xf32>
    %374 = arith.mulf %371, %352 : vector<48x32xf32>
    %375 = arith.mulf %370, %372 : vector<48x32xf32>
    %376 = arith.addf %374, %375 : vector<48x32xf32>
    %377 = math.tanh %376 : vector<48x32xf32>
    %378 = arith.mulf %373, %377 : vector<48x32xf32>
    %379 = math.tanh %378 : vector<48x32xf32>
    %cst_59 = arith.constant dense<0.000000e+00> : vector<48x1xf32>
    %380 = tpu.matmul %379, %253, %cst_59 {dimension_numbers = #tpu.dot_dimension_numbers<[1], [0], [0], [1], [0, 0, 1, 1], [], []>} : vector<48x32xf32>, vector<32x1xf32>, vector<48x1xf32> -> vector<48x1xf32>
    %381 = arith.addf %380, %264 : vector<48x1xf32>
    %382 = vector.broadcast %381 : vector<48x1xf32> to vector<48x32xf32>
    %383 = arith.mulf %382, %262 : vector<48x32xf32>
    %384 = arith.addf %378, %383 : vector<48x32xf32>
    %385 = math.tanh %384 : vector<48x32xf32>
    %cst_60 = arith.constant dense<0.000000e+00> : vector<48x1xf32>
    %386 = tpu.matmul %385, %254, %cst_60 {dimension_numbers = #tpu.dot_dimension_numbers<[1], [0], [0], [1], [0, 0, 1, 1], [], []>} : vector<48x32xf32>, vector<32x1xf32>, vector<48x1xf32> -> vector<48x1xf32>
    %387 = vector.extract_strided_slice %261 {offsets = [240, 0], sizes = [48, 128], strides = [1, 1]} : vector<384x128xf32> to vector<48x128xf32>
    %388 = arith.truncf %384 : vector<48x32xf32> to vector<48x32xbf16>
    %cst_61 = arith.constant dense<0.000000e+00> : vector<48x128xf32>
    %389 = tpu.matmul %388, %251, %cst_61 {dimension_numbers = #tpu.dot_dimension_numbers<[1], [0], [0], [1], [0, 0, 1, 1], [], []>} : vector<48x32xbf16>, vector<32x128xbf16>, vector<48x128xf32> -> vector<48x128xf32>
    %390 = arith.addf %387, %389 : vector<48x128xf32>
    %391 = math.tanh %390 : vector<48x128xf32>
    %392 = vector.broadcast %8 : vector<1x128xf32> to vector<48x128xf32>
    %393 = arith.mulf %392, %391 : vector<48x128xf32>
    %394 = vector.broadcast %11 : vector<1x128xf32> to vector<48x128xf32>
    %395 = arith.addf %393, %394 : vector<48x128xf32>
    %396 = vector.extract_strided_slice %395 {offsets = [0, 0], sizes = [48, 32], strides = [1, 1]} : vector<48x128xf32> to vector<48x32xf32>
    %397 = vector.extract_strided_slice %395 {offsets = [0, 32], sizes = [48, 32], strides = [1, 1]} : vector<48x128xf32> to vector<48x32xf32>
    %398 = vector.extract_strided_slice %395 {offsets = [0, 64], sizes = [48, 32], strides = [1, 1]} : vector<48x128xf32> to vector<48x32xf32>
    %399 = vector.extract_strided_slice %395 {offsets = [0, 96], sizes = [48, 32], strides = [1, 1]} : vector<48x128xf32> to vector<48x32xf32>
    %400 = arith.mulf %397, %376 : vector<48x32xf32>
    %401 = arith.mulf %396, %398 : vector<48x32xf32>
    %402 = arith.addf %400, %401 : vector<48x32xf32>
    %403 = math.tanh %402 : vector<48x32xf32>
    %404 = arith.mulf %399, %403 : vector<48x32xf32>
    %405 = math.tanh %404 : vector<48x32xf32>
    %cst_62 = arith.constant dense<0.000000e+00> : vector<48x1xf32>
    %406 = tpu.matmul %405, %253, %cst_62 {dimension_numbers = #tpu.dot_dimension_numbers<[1], [0], [0], [1], [0, 0, 1, 1], [], []>} : vector<48x32xf32>, vector<32x1xf32>, vector<48x1xf32> -> vector<48x1xf32>
    %407 = arith.addf %406, %264 : vector<48x1xf32>
    %408 = arith.addf %406, %386 : vector<48x1xf32>
    %409 = tpu.concatenate %407, %408 in 1 : vector<48x1xf32>, vector<48x1xf32> -> vector<48x2xf32>
    %410 = vector.extract_strided_slice %409 {offsets = [0, 0], sizes = [48, 1], strides = [1, 1]} : vector<48x2xf32> to vector<48x1xf32>
    %411 = vector.broadcast %410 : vector<48x1xf32> to vector<48x32xf32>
    %412 = arith.mulf %411, %262 : vector<48x32xf32>
    %413 = vector.extract_strided_slice %409 {offsets = [0, 1], sizes = [48, 1], strides = [1, 1]} : vector<48x2xf32> to vector<48x1xf32>
    %414 = vector.broadcast %413 : vector<48x1xf32> to vector<48x32xf32>
    %415 = arith.mulf %414, %384 : vector<48x32xf32>
    %416 = arith.addf %412, %415 : vector<48x32xf32>
    %417 = arith.addf %404, %416 : vector<48x32xf32>
    %418 = vector.extract_strided_slice %261 {offsets = [288, 0], sizes = [48, 128], strides = [1, 1]} : vector<384x128xf32> to vector<48x128xf32>
    %419 = arith.truncf %417 : vector<48x32xf32> to vector<48x32xbf16>
    %cst_63 = arith.constant dense<0.000000e+00> : vector<48x128xf32>
    %420 = tpu.matmul %419, %251, %cst_63 {dimension_numbers = #tpu.dot_dimension_numbers<[1], [0], [0], [1], [0, 0, 1, 1], [], []>} : vector<48x32xbf16>, vector<32x128xbf16>, vector<48x128xf32> -> vector<48x128xf32>
    %421 = arith.addf %418, %420 : vector<48x128xf32>
    %422 = math.tanh %421 : vector<48x128xf32>
    %423 = vector.broadcast %8 : vector<1x128xf32> to vector<48x128xf32>
    %424 = arith.mulf %423, %422 : vector<48x128xf32>
    %425 = vector.broadcast %11 : vector<1x128xf32> to vector<48x128xf32>
    %426 = arith.addf %424, %425 : vector<48x128xf32>
    %427 = vector.extract_strided_slice %426 {offsets = [0, 0], sizes = [48, 32], strides = [1, 1]} : vector<48x128xf32> to vector<48x32xf32>
    %428 = vector.extract_strided_slice %426 {offsets = [0, 32], sizes = [48, 32], strides = [1, 1]} : vector<48x128xf32> to vector<48x32xf32>
    %429 = vector.extract_strided_slice %426 {offsets = [0, 64], sizes = [48, 32], strides = [1, 1]} : vector<48x128xf32> to vector<48x32xf32>
    %430 = vector.extract_strided_slice %426 {offsets = [0, 96], sizes = [48, 32], strides = [1, 1]} : vector<48x128xf32> to vector<48x32xf32>
    %431 = arith.mulf %428, %402 : vector<48x32xf32>
    %432 = arith.mulf %427, %429 : vector<48x32xf32>
    %433 = arith.addf %431, %432 : vector<48x32xf32>
    %434 = math.tanh %433 : vector<48x32xf32>
    %435 = arith.mulf %430, %434 : vector<48x32xf32>
    %436 = math.tanh %435 : vector<48x32xf32>
    %cst_64 = arith.constant dense<0.000000e+00> : vector<48x1xf32>
    %437 = tpu.matmul %436, %253, %cst_64 {dimension_numbers = #tpu.dot_dimension_numbers<[1], [0], [0], [1], [0, 0, 1, 1], [], []>} : vector<48x32xf32>, vector<32x1xf32>, vector<48x1xf32> -> vector<48x1xf32>
    %438 = arith.addf %437, %264 : vector<48x1xf32>
    %439 = arith.addf %437, %386 : vector<48x1xf32>
    %440 = tpu.concatenate %438, %439 in 1 : vector<48x1xf32>, vector<48x1xf32> -> vector<48x2xf32>
    %441 = vector.extract_strided_slice %440 {offsets = [0, 0], sizes = [48, 1], strides = [1, 1]} : vector<48x2xf32> to vector<48x1xf32>
    %442 = vector.broadcast %441 : vector<48x1xf32> to vector<48x32xf32>
    %443 = arith.mulf %442, %262 : vector<48x32xf32>
    %444 = vector.extract_strided_slice %440 {offsets = [0, 1], sizes = [48, 1], strides = [1, 1]} : vector<48x2xf32> to vector<48x1xf32>
    %445 = vector.broadcast %444 : vector<48x1xf32> to vector<48x32xf32>
    %446 = arith.mulf %445, %384 : vector<48x32xf32>
    %447 = arith.addf %443, %446 : vector<48x32xf32>
    %448 = arith.addf %435, %447 : vector<48x32xf32>
    %449 = vector.extract_strided_slice %261 {offsets = [336, 0], sizes = [48, 128], strides = [1, 1]} : vector<384x128xf32> to vector<48x128xf32>
    %450 = arith.truncf %448 : vector<48x32xf32> to vector<48x32xbf16>
    %cst_65 = arith.constant dense<0.000000e+00> : vector<48x128xf32>
    %451 = tpu.matmul %450, %251, %cst_65 {dimension_numbers = #tpu.dot_dimension_numbers<[1], [0], [0], [1], [0, 0, 1, 1], [], []>} : vector<48x32xbf16>, vector<32x128xbf16>, vector<48x128xf32> -> vector<48x128xf32>
    %452 = arith.addf %449, %451 : vector<48x128xf32>
    %453 = math.tanh %452 : vector<48x128xf32>
    %454 = vector.broadcast %8 : vector<1x128xf32> to vector<48x128xf32>
    %455 = arith.mulf %454, %453 : vector<48x128xf32>
    %456 = vector.broadcast %11 : vector<1x128xf32> to vector<48x128xf32>
    %457 = arith.addf %455, %456 : vector<48x128xf32>
    %458 = vector.extract_strided_slice %457 {offsets = [0, 0], sizes = [48, 32], strides = [1, 1]} : vector<48x128xf32> to vector<48x32xf32>
    %459 = vector.extract_strided_slice %457 {offsets = [0, 32], sizes = [48, 32], strides = [1, 1]} : vector<48x128xf32> to vector<48x32xf32>
    %460 = vector.extract_strided_slice %457 {offsets = [0, 64], sizes = [48, 32], strides = [1, 1]} : vector<48x128xf32> to vector<48x32xf32>
    %461 = vector.extract_strided_slice %457 {offsets = [0, 96], sizes = [48, 32], strides = [1, 1]} : vector<48x128xf32> to vector<48x32xf32>
    %462 = arith.mulf %459, %433 : vector<48x32xf32>
    %463 = arith.mulf %458, %460 : vector<48x32xf32>
    %464 = arith.addf %462, %463 : vector<48x32xf32>
    %465 = math.tanh %464 : vector<48x32xf32>
    %466 = arith.mulf %461, %465 : vector<48x32xf32>
    %467 = math.tanh %466 : vector<48x32xf32>
    %cst_66 = arith.constant dense<0.000000e+00> : vector<48x1xf32>
    %468 = tpu.matmul %467, %253, %cst_66 {dimension_numbers = #tpu.dot_dimension_numbers<[1], [0], [0], [1], [0, 0, 1, 1], [], []>} : vector<48x32xf32>, vector<32x1xf32>, vector<48x1xf32> -> vector<48x1xf32>
    %469 = arith.addf %468, %264 : vector<48x1xf32>
    %470 = arith.addf %468, %386 : vector<48x1xf32>
    %471 = tpu.concatenate %469, %470 in 1 : vector<48x1xf32>, vector<48x1xf32> -> vector<48x2xf32>
    %472 = vector.extract_strided_slice %471 {offsets = [0, 0], sizes = [48, 1], strides = [1, 1]} : vector<48x2xf32> to vector<48x1xf32>
    %473 = vector.broadcast %472 : vector<48x1xf32> to vector<48x32xf32>
    %474 = arith.mulf %473, %262 : vector<48x32xf32>
    %475 = vector.extract_strided_slice %471 {offsets = [0, 1], sizes = [48, 1], strides = [1, 1]} : vector<48x2xf32> to vector<48x1xf32>
    %476 = vector.broadcast %475 : vector<48x1xf32> to vector<48x32xf32>
    %477 = arith.mulf %476, %384 : vector<48x32xf32>
    %478 = arith.addf %474, %477 : vector<48x32xf32>
    %479 = arith.addf %466, %478 : vector<48x32xf32>
    %c0_67 = arith.constant 0 : index
    %c0_68 = arith.constant 0 : index
    %480 = vector.load %arg11[%c0_67, %c0_68] : memref<4x128xf32, #tpu.memory_space<vmem>>, vector<4x128xf32>
    %481 = arith.truncf %480 : vector<4x128xf32> to vector<4x128xbf16>
    %c0_69 = arith.constant 0 : index
    %c0_70 = arith.constant 0 : index
    %482 = vector.load %arg12[%c0_69, %c0_70] : memref<32x128xf32, #tpu.memory_space<vmem>>, vector<32x128xf32>
    %483 = vector.broadcast %8 : vector<1x128xf32> to vector<32x128xf32>
    %484 = arith.mulf %482, %483 : vector<32x128xf32>
    %485 = arith.truncf %484 : vector<32x128xf32> to vector<32x128xbf16>
    %c0_71 = arith.constant 0 : index
    %c0_72 = arith.constant 0 : index
    %486 = vector.load %arg13[%c0_71, %c0_72] : memref<1x128xf32, #tpu.memory_space<vmem>>, vector<1x128xf32>
    %c0_73 = arith.constant 0 : index
    %c0_74 = arith.constant 0 : index
    %487 = vector.load %arg14[%c0_73, %c0_74] : memref<64x1xf32, #tpu.memory_space<vmem>>, vector<32x1xf32>
    %c32_75 = arith.constant 32 : index
    %c0_76 = arith.constant 0 : index
    %488 = vector.load %arg14[%c32_75, %c0_76] : memref<64x1xf32, #tpu.memory_space<vmem>>, vector<32x1xf32>
    %c0_77 = arith.constant 0 : index
    %c0_78 = arith.constant 0 : index
    %489 = vector.load %arg2[%c0_77, %c0_78] : memref<192x4xf32, #tpu.memory_space<vmem>>, vector<192x4xf32>
    %490 = arith.truncf %489 : vector<192x4xf32> to vector<192x4xbf16>
    %cst_79 = arith.constant dense<0.000000e+00> : vector<192x128xf32>
    %491 = tpu.matmul %490, %481, %cst_79 {dimension_numbers = #tpu.dot_dimension_numbers<[1], [0], [0], [1], [0, 0, 1, 1], [], []>} : vector<192x4xbf16>, vector<4x128xbf16>, vector<192x128xf32> -> vector<192x128xf32>
    %492 = vector.broadcast %486 : vector<1x128xf32> to vector<192x128xf32>
    %493 = arith.addf %491, %492 : vector<192x128xf32>
    %494 = vector.broadcast %8 : vector<1x128xf32> to vector<192x128xf32>
    %495 = arith.mulf %493, %494 : vector<192x128xf32>
    %cst_80 = arith.constant 0.000000e+00 : f32
    %496 = vector.broadcast %cst_80 : f32 to vector<48x32xf32>
    %cst_81 = arith.constant 0.000000e+00 : f32
    %497 = vector.broadcast %cst_81 : f32 to vector<48x32xf32>
    %cst_82 = arith.constant 0.000000e+00 : f32
    %498 = vector.broadcast %cst_82 : f32 to vector<48x1xf32>
    %499 = vector.extract_strided_slice %495 {offsets = [0, 0], sizes = [48, 128], strides = [1, 1]} : vector<192x128xf32> to vector<48x128xf32>
    %500 = arith.truncf %496 : vector<48x32xf32> to vector<48x32xbf16>
    %cst_83 = arith.constant dense<0.000000e+00> : vector<48x128xf32>
    %501 = tpu.matmul %500, %485, %cst_83 {dimension_numbers = #tpu.dot_dimension_numbers<[1], [0], [0], [1], [0, 0, 1, 1], [], []>} : vector<48x32xbf16>, vector<32x128xbf16>, vector<48x128xf32> -> vector<48x128xf32>
    %502 = arith.addf %499, %501 : vector<48x128xf32>
    %503 = math.tanh %502 : vector<48x128xf32>
    %504 = vector.broadcast %8 : vector<1x128xf32> to vector<48x128xf32>
    %505 = arith.mulf %504, %503 : vector<48x128xf32>
    %506 = vector.broadcast %11 : vector<1x128xf32> to vector<48x128xf32>
    %507 = arith.addf %505, %506 : vector<48x128xf32>
    %508 = vector.extract_strided_slice %507 {offsets = [0, 0], sizes = [48, 32], strides = [1, 1]} : vector<48x128xf32> to vector<48x32xf32>
    %509 = vector.extract_strided_slice %507 {offsets = [0, 32], sizes = [48, 32], strides = [1, 1]} : vector<48x128xf32> to vector<48x32xf32>
    %510 = vector.extract_strided_slice %507 {offsets = [0, 64], sizes = [48, 32], strides = [1, 1]} : vector<48x128xf32> to vector<48x32xf32>
    %511 = vector.extract_strided_slice %507 {offsets = [0, 96], sizes = [48, 32], strides = [1, 1]} : vector<48x128xf32> to vector<48x32xf32>
    %512 = arith.mulf %509, %497 : vector<48x32xf32>
    %513 = arith.mulf %508, %510 : vector<48x32xf32>
    %514 = arith.addf %512, %513 : vector<48x32xf32>
    %515 = math.tanh %514 : vector<48x32xf32>
    %516 = arith.mulf %511, %515 : vector<48x32xf32>
    %517 = math.tanh %516 : vector<48x32xf32>
    %cst_84 = arith.constant dense<0.000000e+00> : vector<48x1xf32>
    %518 = tpu.matmul %517, %487, %cst_84 {dimension_numbers = #tpu.dot_dimension_numbers<[1], [0], [0], [1], [0, 0, 1, 1], [], []>} : vector<48x32xf32>, vector<32x1xf32>, vector<48x1xf32> -> vector<48x1xf32>
    %519 = arith.addf %518, %498 : vector<48x1xf32>
    %520 = vector.broadcast %519 : vector<48x1xf32> to vector<48x32xf32>
    %521 = arith.mulf %520, %496 : vector<48x32xf32>
    %522 = arith.addf %516, %521 : vector<48x32xf32>
    %523 = math.tanh %522 : vector<48x32xf32>
    %cst_85 = arith.constant dense<0.000000e+00> : vector<48x1xf32>
    %524 = tpu.matmul %523, %488, %cst_85 {dimension_numbers = #tpu.dot_dimension_numbers<[1], [0], [0], [1], [0, 0, 1, 1], [], []>} : vector<48x32xf32>, vector<32x1xf32>, vector<48x1xf32> -> vector<48x1xf32>
    %525 = vector.extract_strided_slice %495 {offsets = [48, 0], sizes = [48, 128], strides = [1, 1]} : vector<192x128xf32> to vector<48x128xf32>
    %526 = arith.truncf %522 : vector<48x32xf32> to vector<48x32xbf16>
    %cst_86 = arith.constant dense<0.000000e+00> : vector<48x128xf32>
    %527 = tpu.matmul %526, %485, %cst_86 {dimension_numbers = #tpu.dot_dimension_numbers<[1], [0], [0], [1], [0, 0, 1, 1], [], []>} : vector<48x32xbf16>, vector<32x128xbf16>, vector<48x128xf32> -> vector<48x128xf32>
    %528 = arith.addf %525, %527 : vector<48x128xf32>
    %529 = math.tanh %528 : vector<48x128xf32>
    %530 = vector.broadcast %8 : vector<1x128xf32> to vector<48x128xf32>
    %531 = arith.mulf %530, %529 : vector<48x128xf32>
    %532 = vector.broadcast %11 : vector<1x128xf32> to vector<48x128xf32>
    %533 = arith.addf %531, %532 : vector<48x128xf32>
    %534 = vector.extract_strided_slice %533 {offsets = [0, 0], sizes = [48, 32], strides = [1, 1]} : vector<48x128xf32> to vector<48x32xf32>
    %535 = vector.extract_strided_slice %533 {offsets = [0, 32], sizes = [48, 32], strides = [1, 1]} : vector<48x128xf32> to vector<48x32xf32>
    %536 = vector.extract_strided_slice %533 {offsets = [0, 64], sizes = [48, 32], strides = [1, 1]} : vector<48x128xf32> to vector<48x32xf32>
    %537 = vector.extract_strided_slice %533 {offsets = [0, 96], sizes = [48, 32], strides = [1, 1]} : vector<48x128xf32> to vector<48x32xf32>
    %538 = arith.mulf %535, %514 : vector<48x32xf32>
    %539 = arith.mulf %534, %536 : vector<48x32xf32>
    %540 = arith.addf %538, %539 : vector<48x32xf32>
    %541 = math.tanh %540 : vector<48x32xf32>
    %542 = arith.mulf %537, %541 : vector<48x32xf32>
    %543 = math.tanh %542 : vector<48x32xf32>
    %cst_87 = arith.constant dense<0.000000e+00> : vector<48x1xf32>
    %544 = tpu.matmul %543, %487, %cst_87 {dimension_numbers = #tpu.dot_dimension_numbers<[1], [0], [0], [1], [0, 0, 1, 1], [], []>} : vector<48x32xf32>, vector<32x1xf32>, vector<48x1xf32> -> vector<48x1xf32>
    %545 = arith.addf %544, %498 : vector<48x1xf32>
    %546 = arith.addf %544, %524 : vector<48x1xf32>
    %547 = tpu.concatenate %545, %546 in 1 : vector<48x1xf32>, vector<48x1xf32> -> vector<48x2xf32>
    %548 = vector.extract_strided_slice %547 {offsets = [0, 0], sizes = [48, 1], strides = [1, 1]} : vector<48x2xf32> to vector<48x1xf32>
    %549 = vector.broadcast %548 : vector<48x1xf32> to vector<48x32xf32>
    %550 = arith.mulf %549, %496 : vector<48x32xf32>
    %551 = vector.extract_strided_slice %547 {offsets = [0, 1], sizes = [48, 1], strides = [1, 1]} : vector<48x2xf32> to vector<48x1xf32>
    %552 = vector.broadcast %551 : vector<48x1xf32> to vector<48x32xf32>
    %553 = arith.mulf %552, %522 : vector<48x32xf32>
    %554 = arith.addf %550, %553 : vector<48x32xf32>
    %555 = arith.addf %542, %554 : vector<48x32xf32>
    %556 = math.tanh %555 : vector<48x32xf32>
    %cst_88 = arith.constant dense<0.000000e+00> : vector<48x1xf32>
    %557 = tpu.matmul %556, %488, %cst_88 {dimension_numbers = #tpu.dot_dimension_numbers<[1], [0], [0], [1], [0, 0, 1, 1], [], []>} : vector<48x32xf32>, vector<32x1xf32>, vector<48x1xf32> -> vector<48x1xf32>
    %558 = vector.extract_strided_slice %495 {offsets = [96, 0], sizes = [48, 128], strides = [1, 1]} : vector<192x128xf32> to vector<48x128xf32>
    %559 = arith.truncf %555 : vector<48x32xf32> to vector<48x32xbf16>
    %cst_89 = arith.constant dense<0.000000e+00> : vector<48x128xf32>
    %560 = tpu.matmul %559, %485, %cst_89 {dimension_numbers = #tpu.dot_dimension_numbers<[1], [0], [0], [1], [0, 0, 1, 1], [], []>} : vector<48x32xbf16>, vector<32x128xbf16>, vector<48x128xf32> -> vector<48x128xf32>
    %561 = arith.addf %558, %560 : vector<48x128xf32>
    %562 = math.tanh %561 : vector<48x128xf32>
    %563 = vector.broadcast %8 : vector<1x128xf32> to vector<48x128xf32>
    %564 = arith.mulf %563, %562 : vector<48x128xf32>
    %565 = vector.broadcast %11 : vector<1x128xf32> to vector<48x128xf32>
    %566 = arith.addf %564, %565 : vector<48x128xf32>
    %567 = vector.extract_strided_slice %566 {offsets = [0, 0], sizes = [48, 32], strides = [1, 1]} : vector<48x128xf32> to vector<48x32xf32>
    %568 = vector.extract_strided_slice %566 {offsets = [0, 32], sizes = [48, 32], strides = [1, 1]} : vector<48x128xf32> to vector<48x32xf32>
    %569 = vector.extract_strided_slice %566 {offsets = [0, 64], sizes = [48, 32], strides = [1, 1]} : vector<48x128xf32> to vector<48x32xf32>
    %570 = vector.extract_strided_slice %566 {offsets = [0, 96], sizes = [48, 32], strides = [1, 1]} : vector<48x128xf32> to vector<48x32xf32>
    %571 = arith.mulf %568, %540 : vector<48x32xf32>
    %572 = arith.mulf %567, %569 : vector<48x32xf32>
    %573 = arith.addf %571, %572 : vector<48x32xf32>
    %574 = math.tanh %573 : vector<48x32xf32>
    %575 = arith.mulf %570, %574 : vector<48x32xf32>
    %576 = math.tanh %575 : vector<48x32xf32>
    %cst_90 = arith.constant dense<0.000000e+00> : vector<48x1xf32>
    %577 = tpu.matmul %576, %487, %cst_90 {dimension_numbers = #tpu.dot_dimension_numbers<[1], [0], [0], [1], [0, 0, 1, 1], [], []>} : vector<48x32xf32>, vector<32x1xf32>, vector<48x1xf32> -> vector<48x1xf32>
    %578 = arith.addf %577, %498 : vector<48x1xf32>
    %579 = arith.addf %577, %524 : vector<48x1xf32>
    %580 = arith.addf %577, %557 : vector<48x1xf32>
    %581 = tpu.concatenate %578, %579, %580 in 1 : vector<48x1xf32>, vector<48x1xf32>, vector<48x1xf32> -> vector<48x3xf32>
    %582 = vector.extract_strided_slice %581 {offsets = [0, 0], sizes = [48, 1], strides = [1, 1]} : vector<48x3xf32> to vector<48x1xf32>
    %583 = vector.broadcast %582 : vector<48x1xf32> to vector<48x32xf32>
    %584 = arith.mulf %583, %496 : vector<48x32xf32>
    %585 = vector.extract_strided_slice %581 {offsets = [0, 1], sizes = [48, 1], strides = [1, 1]} : vector<48x3xf32> to vector<48x1xf32>
    %586 = vector.broadcast %585 : vector<48x1xf32> to vector<48x32xf32>
    %587 = arith.mulf %586, %522 : vector<48x32xf32>
    %588 = arith.addf %584, %587 : vector<48x32xf32>
    %589 = vector.extract_strided_slice %581 {offsets = [0, 2], sizes = [48, 1], strides = [1, 1]} : vector<48x3xf32> to vector<48x1xf32>
    %590 = vector.broadcast %589 : vector<48x1xf32> to vector<48x32xf32>
    %591 = arith.mulf %590, %555 : vector<48x32xf32>
    %592 = arith.addf %588, %591 : vector<48x32xf32>
    %593 = arith.addf %575, %592 : vector<48x32xf32>
    %594 = math.tanh %593 : vector<48x32xf32>
    %cst_91 = arith.constant dense<0.000000e+00> : vector<48x1xf32>
    %595 = tpu.matmul %594, %488, %cst_91 {dimension_numbers = #tpu.dot_dimension_numbers<[1], [0], [0], [1], [0, 0, 1, 1], [], []>} : vector<48x32xf32>, vector<32x1xf32>, vector<48x1xf32> -> vector<48x1xf32>
    %596 = vector.extract_strided_slice %495 {offsets = [144, 0], sizes = [48, 128], strides = [1, 1]} : vector<192x128xf32> to vector<48x128xf32>
    %597 = arith.truncf %593 : vector<48x32xf32> to vector<48x32xbf16>
    %cst_92 = arith.constant dense<0.000000e+00> : vector<48x128xf32>
    %598 = tpu.matmul %597, %485, %cst_92 {dimension_numbers = #tpu.dot_dimension_numbers<[1], [0], [0], [1], [0, 0, 1, 1], [], []>} : vector<48x32xbf16>, vector<32x128xbf16>, vector<48x128xf32> -> vector<48x128xf32>
    %599 = arith.addf %596, %598 : vector<48x128xf32>
    %600 = math.tanh %599 : vector<48x128xf32>
    %601 = vector.broadcast %8 : vector<1x128xf32> to vector<48x128xf32>
    %602 = arith.mulf %601, %600 : vector<48x128xf32>
    %603 = vector.broadcast %11 : vector<1x128xf32> to vector<48x128xf32>
    %604 = arith.addf %602, %603 : vector<48x128xf32>
    %605 = vector.extract_strided_slice %604 {offsets = [0, 0], sizes = [48, 32], strides = [1, 1]} : vector<48x128xf32> to vector<48x32xf32>
    %606 = vector.extract_strided_slice %604 {offsets = [0, 32], sizes = [48, 32], strides = [1, 1]} : vector<48x128xf32> to vector<48x32xf32>
    %607 = vector.extract_strided_slice %604 {offsets = [0, 64], sizes = [48, 32], strides = [1, 1]} : vector<48x128xf32> to vector<48x32xf32>
    %608 = vector.extract_strided_slice %604 {offsets = [0, 96], sizes = [48, 32], strides = [1, 1]} : vector<48x128xf32> to vector<48x32xf32>
    %609 = arith.mulf %606, %573 : vector<48x32xf32>
    %610 = arith.mulf %605, %607 : vector<48x32xf32>
    %611 = arith.addf %609, %610 : vector<48x32xf32>
    %612 = math.tanh %611 : vector<48x32xf32>
    %613 = arith.mulf %608, %612 : vector<48x32xf32>
    %614 = math.tanh %613 : vector<48x32xf32>
    %cst_93 = arith.constant dense<0.000000e+00> : vector<48x1xf32>
    %615 = tpu.matmul %614, %487, %cst_93 {dimension_numbers = #tpu.dot_dimension_numbers<[1], [0], [0], [1], [0, 0, 1, 1], [], []>} : vector<48x32xf32>, vector<32x1xf32>, vector<48x1xf32> -> vector<48x1xf32>
    %616 = arith.addf %615, %498 : vector<48x1xf32>
    %617 = arith.addf %615, %524 : vector<48x1xf32>
    %618 = arith.addf %615, %557 : vector<48x1xf32>
    %619 = arith.addf %615, %595 : vector<48x1xf32>
    %620 = tpu.concatenate %616, %617, %618, %619 in 1 : vector<48x1xf32>, vector<48x1xf32>, vector<48x1xf32>, vector<48x1xf32> -> vector<48x4xf32>
    %621 = vector.extract_strided_slice %620 {offsets = [0, 0], sizes = [48, 1], strides = [1, 1]} : vector<48x4xf32> to vector<48x1xf32>
    %622 = vector.broadcast %621 : vector<48x1xf32> to vector<48x32xf32>
    %623 = arith.mulf %622, %496 : vector<48x32xf32>
    %624 = vector.extract_strided_slice %620 {offsets = [0, 1], sizes = [48, 1], strides = [1, 1]} : vector<48x4xf32> to vector<48x1xf32>
    %625 = vector.broadcast %624 : vector<48x1xf32> to vector<48x32xf32>
    %626 = arith.mulf %625, %522 : vector<48x32xf32>
    %627 = arith.addf %623, %626 : vector<48x32xf32>
    %628 = vector.extract_strided_slice %620 {offsets = [0, 2], sizes = [48, 1], strides = [1, 1]} : vector<48x4xf32> to vector<48x1xf32>
    %629 = vector.broadcast %628 : vector<48x1xf32> to vector<48x32xf32>
    %630 = arith.mulf %629, %555 : vector<48x32xf32>
    %631 = arith.addf %627, %630 : vector<48x32xf32>
    %632 = vector.extract_strided_slice %620 {offsets = [0, 3], sizes = [48, 1], strides = [1, 1]} : vector<48x4xf32> to vector<48x1xf32>
    %633 = vector.broadcast %632 : vector<48x1xf32> to vector<48x32xf32>
    %634 = arith.mulf %633, %593 : vector<48x32xf32>
    %635 = arith.addf %631, %634 : vector<48x32xf32>
    %636 = arith.addf %613, %635 : vector<48x32xf32>
    %c0_94 = arith.constant 0 : index
    %c0_95 = arith.constant 0 : index
    %637 = vector.load %arg15[%c0_94, %c0_95] : memref<32x16xf32, #tpu.memory_space<vmem>>, vector<32x16xf32>
    %c0_96 = arith.constant 0 : index
    %c0_97 = arith.constant 0 : index
    %638 = vector.load %arg16[%c0_96, %c0_97] : memref<1x16xf32, #tpu.memory_space<vmem>>, vector<1x16xf32>
    %c0_98 = arith.constant 0 : index
    %c0_99 = arith.constant 0 : index
    %639 = vector.load %arg17[%c0_98, %c0_99] : memref<48x16xf32, #tpu.memory_space<vmem>>, vector<48x16xf32>
    %cst_100 = arith.constant dense<0.000000e+00> : vector<48x16xf32>
    %640 = tpu.matmul %245, %637, %cst_100 {dimension_numbers = #tpu.dot_dimension_numbers<[1], [0], [0], [1], [0, 0, 1, 1], [], []>} : vector<48x32xf32>, vector<32x16xf32>, vector<48x16xf32> -> vector<48x16xf32>
    %641 = vector.broadcast %638 : vector<1x16xf32> to vector<48x16xf32>
    %642 = arith.addf %640, %641 : vector<48x16xf32>
    %643 = math.tanh %642 : vector<48x16xf32>
    %644 = arith.mulf %639, %643 : vector<48x16xf32>
    %cst_101 = arith.constant dense<0.000000e+00> : vector<48xf32>
    %645 = vector.multi_reduction <add>, %644, %cst_101 [1] : vector<48x16xf32> to vector<48xf32>
    %646 = vector.shape_cast %645 : vector<48xf32> to vector<48x1xf32>
    %cst_102 = arith.constant dense<0.000000e+00> : vector<48x16xf32>
    %647 = tpu.matmul %479, %637, %cst_102 {dimension_numbers = #tpu.dot_dimension_numbers<[1], [0], [0], [1], [0, 0, 1, 1], [], []>} : vector<48x32xf32>, vector<32x16xf32>, vector<48x16xf32> -> vector<48x16xf32>
    %648 = vector.broadcast %638 : vector<1x16xf32> to vector<48x16xf32>
    %649 = arith.addf %647, %648 : vector<48x16xf32>
    %650 = math.tanh %649 : vector<48x16xf32>
    %651 = arith.mulf %639, %650 : vector<48x16xf32>
    %cst_103 = arith.constant dense<0.000000e+00> : vector<48xf32>
    %652 = vector.multi_reduction <add>, %651, %cst_103 [1] : vector<48x16xf32> to vector<48xf32>
    %653 = vector.shape_cast %652 : vector<48xf32> to vector<48x1xf32>
    %cst_104 = arith.constant dense<0.000000e+00> : vector<48x16xf32>
    %654 = tpu.matmul %636, %637, %cst_104 {dimension_numbers = #tpu.dot_dimension_numbers<[1], [0], [0], [1], [0, 0, 1, 1], [], []>} : vector<48x32xf32>, vector<32x16xf32>, vector<48x16xf32> -> vector<48x16xf32>
    %655 = vector.broadcast %638 : vector<1x16xf32> to vector<48x16xf32>
    %656 = arith.addf %654, %655 : vector<48x16xf32>
    %657 = math.tanh %656 : vector<48x16xf32>
    %658 = arith.mulf %639, %657 : vector<48x16xf32>
    %cst_105 = arith.constant dense<0.000000e+00> : vector<48xf32>
    %659 = vector.multi_reduction <add>, %658, %cst_105 [1] : vector<48x16xf32> to vector<48xf32>
    %660 = vector.shape_cast %659 : vector<48xf32> to vector<48x1xf32>
    %661 = tpu.concatenate %646, %653, %660 in 1 : vector<48x1xf32>, vector<48x1xf32>, vector<48x1xf32> -> vector<48x3xf32>
    %cst_106 = arith.constant dense<0xFF800000> : vector<48xf32>
    %662 = vector.multi_reduction <maximumf>, %661, %cst_106 [1] : vector<48x3xf32> to vector<48xf32>
    %663 = vector.shape_cast %662 : vector<48xf32> to vector<48x1xf32>
    %664 = vector.broadcast %663 : vector<48x1xf32> to vector<48x3xf32>
    %665 = arith.subf %661, %664 : vector<48x3xf32>
    %666 = math.exp %665 : vector<48x3xf32>
    %cst_107 = arith.constant dense<0.000000e+00> : vector<48xf32>
    %667 = vector.multi_reduction <add>, %666, %cst_107 [1] : vector<48x3xf32> to vector<48xf32>
    %668 = vector.shape_cast %667 : vector<48xf32> to vector<48x1xf32>
    %669 = tpu.reciprocal %668 {approx = true} : vector<48x1xf32> -> vector<48x1xf32>
    %670 = vector.broadcast %669 : vector<48x1xf32> to vector<48x3xf32>
    %671 = arith.mulf %666, %670 : vector<48x3xf32>
    %c0_108 = arith.constant 0 : index
    %c0_109 = arith.constant 0 : index
    %672 = vector.load %arg21[%c0_108, %c0_109] : memref<48x3xf32, #tpu.memory_space<vmem>>, vector<48x3xf32>
    tpu.vector_store %arg21[%c0_108, %c0_109], %671 {strides = array<i32>} : memref<48x3xf32, #tpu.memory_space<vmem>>, vector<48x3xf32>,
    %673 = vector.extract_strided_slice %671 {offsets = [0, 0], sizes = [48, 1], strides = [1, 1]} : vector<48x3xf32> to vector<48x1xf32>
    %674 = vector.broadcast %673 : vector<48x1xf32> to vector<48x32xf32>
    %675 = arith.mulf %674, %245 : vector<48x32xf32>
    %676 = vector.extract_strided_slice %671 {offsets = [0, 1], sizes = [48, 1], strides = [1, 1]} : vector<48x3xf32> to vector<48x1xf32>
    %677 = vector.broadcast %676 : vector<48x1xf32> to vector<48x32xf32>
    %678 = arith.mulf %677, %479 : vector<48x32xf32>
    %679 = arith.addf %675, %678 : vector<48x32xf32>
    %680 = vector.extract_strided_slice %671 {offsets = [0, 2], sizes = [48, 1], strides = [1, 1]} : vector<48x3xf32> to vector<48x1xf32>
    %681 = vector.broadcast %680 : vector<48x1xf32> to vector<48x32xf32>
    %682 = arith.mulf %681, %636 : vector<48x32xf32>
    %683 = arith.addf %679, %682 : vector<48x32xf32>
    %c0_110 = arith.constant 0 : index
    %c0_111 = arith.constant 0 : index
    %684 = vector.load %arg18[%c0_110, %c0_111] : memref<32x1xf32, #tpu.memory_space<vmem>>, vector<32x1xf32>
    %cst_112 = arith.constant dense<0.000000e+00> : vector<48x1xf32>
    %685 = tpu.matmul %683, %684, %cst_112 {dimension_numbers = #tpu.dot_dimension_numbers<[1], [0], [0], [1], [0, 0, 1, 1], [], []>} : vector<48x32xf32>, vector<32x1xf32>, vector<48x1xf32> -> vector<48x1xf32>
    %c0_113 = arith.constant 0 : index
    %c0_114 = arith.constant 0 : index
    %686 = vector.load %arg19[%c0_113, %c0_114] : memref<1x1xf32, #tpu.memory_space<vmem>>, vector<1x1xf32>
    %687 = vector.broadcast %686 : vector<1x1xf32> to vector<48x1xf32>
    %688 = arith.addf %685, %687 : vector<48x1xf32>
    %689 = math.tanh %688 : vector<48x1xf32>
    %c0_115 = arith.constant 0 : index
    %c0_116 = arith.constant 0 : index
    %690 = vector.load %arg20[%c0_115, %c0_116] : memref<48x1xf32, #tpu.memory_space<vmem>>, vector<48x1xf32>
    tpu.vector_store %arg20[%c0_115, %c0_116], %689 {strides = array<i32>} : memref<48x1xf32, #tpu.memory_space<vmem>>, vector<48x1xf32>,
    return
  }
}

</mosaic_0001>

<bundles_post_ra>
// kernel: _aist_forward_jit.1
= control target key start
LH: loop header
LB: loop body
LE: loop exit
PB: predicated region body
PF: predicated region fallthrough
CT: control target
= control target key end

     0   :  { %v70_v0 = vlaneseq  ;;  %v19171_v4 = vmov 0.0   ;;  %vm177_vm0 = vcmask 130048   ;;  %vm14009_vm1 = vmmov 0   ;;  %s19164_s28 = smov 64   ;;  %s14013_s29 = smov 32   ;;  %s19136_s3 = inlined_call_operand.vmem [shape: f32[16,128], index: 3, kind: input, shape index: {}]   ;;  %s19137_s0 = inlined_call_operand.vmem [shape: f32[384,16], index: 0, kind: input, shape index: {}]   ;;  %s19138_s4 = inlined_call_operand.vmem [shape: f32[32,128], index: 4, kind: input, shape index: {}]   ;;  %s19139_s5 = inlined_call_operand.vmem [shape: f32[1,128], index: 5, kind: input, shape index: {}]   ;;  %s19140_s6 = inlined_call_operand.vmem [shape: f32[64,1], index: 6, kind: input, shape index: {}]   ;;  %s19141_s8 = inlined_call_operand.vmem [shape: f32[32,128], index: 8, kind: input, shape index: {}]   ;;  %s19142_s7 = inlined_call_operand.vmem [shape: f32[4,128], index: 7, kind: input, shape index: {}]   ;;  %s19143_s1 = inlined_call_operand.vmem [shape: f32[384,4], index: 1, kind: input, shape index: {}]   ;;  %s19144_s9 = inlined_call_operand.vmem [shape: f32[1,128], index: 9, kind: input, shape index: {}]   ;;  %s19145_s10 = inlined_call_operand.vmem [shape: f32[64,1], index: 10, kind: input, shape index: {}]   ;;  %s19146_s12 = inlined_call_operand.vmem [shape: f32[32,128], index: 12, kind: input, shape index: {}]   ;;  %s19147_s11 = inlined_call_operand.vmem [shape: f32[4,128], index: 11, kind: input, shape index: {}]   ;;  %s19148_s2 = inlined_call_operand.vmem [shape: f32[192,4], index: 2, kind: input, shape index: {}]   ;;  %s19149_s13 = inlined_call_operand.vmem [shape: f32[1,128], index: 13, kind: input, shape index: {}]   ;;  %s19150_s14 = inlined_call_operand.vmem [shape: f32[64,1], index: 14, kind: input, shape index: {}]   ;;  %s19151_s15 = inlined_call_operand.vmem [shape: f32[32,16], index: 15, kind: input, shape index: {}]   ;;  %s19152_s16 = inlined_call_operand.vmem [shape: f32[1,16], index: 16, kind: input, shape index: {}]   ;;  %s19153_s17 = inlined_call_operand.vmem [shape: f32[48,16], index: 17, kind: input, shape index: {}]   ;;  %s19154_s21 = inlined_call_operand.vmem [shape: f32[48,3], index: 21, kind: output, shape index: {1}]   ;;  %s19155_s18 = inlined_call_operand.vmem [shape: f32[32,1], index: 18, kind: input, shape index: {}]   ;;  %s19156_s19 = inlined_call_operand.<no memory space> [shape: f32[1,1], index: 19, kind: input, shape index: {}]   ;;  %s19157_s20 = inlined_call_operand.vmem [shape: f32[48,1], index: 20, kind: output, shape index: {0}]  }
   0x1   :  { %19220 = sst [smem:[#allocation58_spill]] %s19136_s3  ;;  %11907 = vmatprep.subr.bf16.mxu1 %v19171_v4  ;;  %11911 = vmatprep.mubr.msk.bf16.mxu1 %vm14009_vm1, %v19171_v4  ;;  %v19166_v10 = vmov 0   ;;  %v14011_v21 = vmov 0.5   ;;  %vm523_vm5 = vcmask 261120   ;;  %vm2893_vm6 = vcmask 7168  }
   0x2   :  { %19221 = sst [smem:[#allocation59_spill]] %s19137_s0  ;;  %s19226_s26 = sld [smem:[#allocation58_spill]]  ;;  %v71_v9 = vand.u32 127, %v70_v0  ;;  %13047 = vset.pattern.permute.xlu1 %v19166_v10  ;;  %13046 = vset.pattern.permute.xlu0 %v19166_v10  ;;  %vm4060_vm7 = vcmask 1041408   ;;  %vm3987_vm8 = vcmask 31744   ;;  %vm9432_vm9 = vcmask 15360  }
   0x3   :  { %19222 = sst [smem:[#allocation60_spill]] %s19138_s4  ;;  %s19227_s3 = sld [smem:[#allocation59_spill]]  ;;  %vm10127_vm10 = vcmask 23552  }
   0x4   :  { %19223 = sst [smem:[#allocation61_spill]] %s19139_s5  ;;  %s19228_s25 = sld [smem:[#allocation60_spill]]  ;;  %vm72_vm2 = vcmp.ge.s32.totalorder %v71_v9, 64  ;;  %vm73_vm3 = vcmp.lt.s32.totalorder %v71_v9, 96 }
   0x5   :  { %19224 = sst [smem:[#allocation62_spill]] %s19140_s6  ;;  %vm14172_vm4 = vmand %vm72_vm2, %vm73_vm3  ;;  %s19231_s5 = sld [smem:[#allocation61_spill]] }
   0x6   :  { %19225 = sst [smem:[#allocation63_spill]] %s19141_s8  ;;  %v14178_v22 = vsel %vm14172_vm4, 1.0, %v14011_v21  ;;  %s19232_s8 = sld [smem:[#allocation62_spill]] }
   0x7   :  { %s19233_s0 = smov 64   ;;  %s19243_s24 = sld [smem:[#allocation63_spill]] }
   0x8   :  { %v77_v1 = vld [vmem:[%s19226_s26] sm:$0xff]  ;;  %v78_v2 = vld [vmem:[%s19226_s26 + $0x8] sm:$0xff] }
   0x9   :  { %v99_v3 = vld [vmem:[%s19227_s3] sm:$0xff]  ;;  %v79_v5 = vpack.c.bf16 %v78_v2, %v77_v1  ;;  %v100_v6 = vld [vmem:[%s19227_s3 + $0x8] sm:$0xff]  ;;  %v101_v7 = vld [vmem:[%s19227_s3 + $0x10] sm:$0xff]  ;;  %v14229_v1 = vsel %vm14172_vm4, 0.0, %v14011_v21 }
   0xa   :  { %v102_v8 = vld [vmem:[%s19227_s3 + $0x18] sm:$0xff]  ;;  %v147_v11 = vpack.c.bf16 %v100_v6, %v99_v3  ;;  %v80_v12 = vld [vmem:[%s19228_s25] sm:$0xff]  ;;  %v81_v13 = vld [vmem:[%s19228_s25 + $0x8] sm:$0xff] }
   0xb   :  { %v82_v14 = vld [vmem:[%s19228_s25 + $0x10] sm:$0xff]  ;;  %11857 = vmatprep.subr.bf16.mxu0 %v79_v5  ;;  %v148_v15 = vpack.c.bf16 %v102_v8, %v101_v7  ;;  %v83_v16 = vld [vmem:[%s19228_s25 + $0x18] sm:$0xff]  ;;  %v103_v17 = vld [vmem:[%s19227_s3 + $0x20] sm:$0xff]  ;;  %v84_v23 = vmul.f32 %v80_v12, %v14178_v22  ;;  %v85_v24 = vmul.f32 %v81_v13, %v14178_v22 }
   0xc   :  { %v104_v18 = vld [vmem:[%s19227_s3 + $0x28] sm:$0xff]  ;;  %11858 = vmatpush3.bf16.msra.mxu0 %v79_v5  ;;  %11859 = vmatprep.mubr.msk.bf16.mxu0 %vm177_vm0, %v147_v11  ;;  %v86_v25 = vmul.f32 %v82_v14, %v14178_v22  ;;  %v87_v26 = vmul.f32 %v83_v16, %v14178_v22  ;;  %v105_v28 = vld [vmem:[%s19227_s3 + $0x30] sm:$0xff]  ;;  %v106_v29 = vld [vmem:[%s19227_s3 + $0x38] sm:$0xff] }
   0xd   :  { %v149_v20 = vpack.c.bf16 %v104_v18, %v103_v17  ;;  %v14185_v27 = vpack.c.bf16 %v85_v24, %v84_v23  ;;  %v150_v31 = vpack.c.bf16 %v106_v29, %v105_v28  ;;  %v14210_v33 = vld [vmem:[%s19231_s5] ss:$0 sm:$0xff] }
   0xe   :  { %v14195_v30 = vpack.c.bf16 %v87_v26, %v86_v25 }
   0xf   :  { %11860 = vmatmul.mubr.msk.bf16.vlgmr.msra.gmra.mrb[0].mxu0 %vm177_vm0, %v148_v15  ;;  %11908 = vmatpush3.bf16.msra.mxu1 %v14185_v27 }
  0x10   :  { %11863 = vmatprep.mubr.msk.bf16.mxu0 %vm177_vm0, %v149_v20  ;;  %11909 = vmatprep.subr.bf16.mxu1 %v19171_v4 }
  0x13   :  { %11910 = vmatpush3.bf16.msra.mxu1 %v14195_v30 }
  0x16   :  { %11912 = vmatmul.mubr.bf16.vlgmr.msra.gmra.mrb[0].mxu1 %v19166_v10 }
  0x17   :  { %11864 = vmatmul.mubr.msk.bf16.gmra.mrb[4].mxu0 %vm177_vm0, %v150_v31  ;;  %11915 = vmatprep.mubr.msk.bf16.mxu1 %vm14009_vm1, %v19171_v4 }
  0x1e   :  { %11916 = vmatmul.mubr.bf16.gmra.mrb[4].mxu1 %v19166_v10 }
  0x1f   :  { %11919 = vmatprep.mubr.msk.bf16.mxu1 %vm14009_vm1, %v19171_v4 }
  0x26   :  { %11920 = vmatmul.mubr.bf16.gmra.mrb[8].mxu1 %v19166_v10 }
  0xe2   :  { %v11861_v32 = vpop.f32.mrb[0].mxu0 }
  0xe3   :  { %v284_v34 = vpop.f32.mrb[1].mxu0  ;;  %v293_v49 = vadd.f32 %v11861_v32, %v14210_v33 }
  0xe4   :  { %v11862_v35 = vpop.f32.mrb[2].mxu0  ;;  %v285_v36 = vadd.f32 %v14210_v33, %v284_v34 }
  0xe5   :  { %v287_v37 = vpop.f32.mrb[3].mxu0  ;;  %v296_v52 = vadd.f32 %v11862_v35, %v14210_v33  ;;  %v477_v53 = vmul.f32 %v293_v49, %v14178_v22 }
  0xe6   :  { %v288_v38 = vadd.f32 %v14210_v33, %v287_v37  ;;  %v475_v39 = vmul.f32 %v285_v36, %v14178_v22 }
  0xe7   :  { %v478_v57 = vmul.f32 %v296_v52, %v14178_v22 }
  0xe8   :  { %v476_v46 = vmul.f32 %v288_v38, %v14178_v22 }
  0xe9   :  { %v561_v42 = vpop.f32.mrb[0].mxu1 }
  0xea   :  { %v14215_v40 = vpop.f32.mrb[4].mxu0  ;;  %v584_v44 = vadd.f32 %v561_v42, %v475_v39  ;;  %v11913_v45 = vpop.f32.mrb[1].mxu1 }
  0xeb   :  { %v300_v41 = vpop.f32.mrb[5].mxu0  ;;  %v564_v48 = vpop.f32.mrb[2].mxu1 }
  0xec   :  { %v14217_v43 = vpop.f32.mrb[6].mxu0  ;;  %13151 = vtanh.f32 %v584_v44  ;;  %v585_v50 = vadd.f32 %v564_v48, %v476_v46  ;;  %v11914_v51 = vpop.f32.mrb[3].mxu1  ;;  %v301_v58 = vadd.f32 %v14210_v33, %v300_v41 }
  0xed   :  { %v303_v47 = vpop.f32.mrb[7].mxu0 }
  0xee   :  { %13153 = vtanh.f32 %v585_v50  ;;  %v304_v62 = vadd.f32 %v14210_v33, %v303_v47  ;;  %v479_v0 = vmul.f32 %v301_v58, %v14178_v22 }
  0xf0   :  { %v480_v5 = vmul.f32 %v304_v62, %v14178_v22 }
  0xf1   :  { %v569_v54 = vpop.f32.mrb[4].mxu1 }
  0xf2   :  { %v586_v55 = vadd.f32 %v569_v54, %v477_v53  ;;  %v11917_v56 = vpop.f32.mrb[5].mxu1 }
  0xf3   :  { %v572_v59 = vpop.f32.mrb[6].mxu1 }
  0xf4   :  { %13155 = vtanh.f32 %v586_v55  ;;  %v587_v60 = vadd.f32 %v572_v59, %v478_v57  ;;  %v11918_v61 = vpop.f32.mrb[7].mxu1 }
  0xf6   :  { %v13152_v63 = vpop.eup %13151  ;;  %13157 = vtanh.f32 %v587_v60 }
  0xf7   :  { %v596_v2 = vmul.f32 %v13152_v63, %v14178_v22 }
  0xf8   :  { %v13154_v3 = vpop.eup %13153 }
  0xf9   :  { %v577_v6 = vpop.f32.mrb[8].mxu1  ;;  %v14234_v7 = vadd.f32 %v596_v2, %v14229_v1  ;;  %v597_v8 = vmul.f32 %v13154_v3, %v14178_v22 }
  0xfa   :  { %v588_v9 = vadd.f32 %v577_v6, %v479_v0  ;;  %v11921_v11 = vpop.f32.mrb[9].mxu1 }
  0xfb   :  { %v580_v12 = vpop.f32.mrb[10].mxu1  ;;  %620 = vrot.lane.b32.xlu0 %v14234_v7, %s19164_s28  ;;  %v14240_v15 = vadd.f32 %v597_v8, %v14229_v1  ;;  %v608_v46 = vmul.f32 0.0, %v14234_v7  ;;  %v92_v11 = vld [vmem:[%s19232_s8 + $0x8] sm:$0xff] }
  0xfc   :  { %13159 = vtanh.f32 %v588_v9  ;;  %v589_v13 = vadd.f32 %v580_v12, %v480_v5  ;;  %v11922_v14 = vpop.f32.mrb[11].mxu1  ;;  %v91_v9 = vld [vmem:[%s19232_s8] sm:$0xff]  ;;  %v93_v12 = vld [vmem:[%s19232_s8 + $0x10] sm:$0xff] }
  0xfd   :  { %v609_v49 = vmul.f32 0.0, %v14240_v15  ;;  %v94_v14 = vld [vmem:[%s19232_s8 + $0x18] sm:$0xff] }
  0xfe   :  { %v13156_v16 = vpop.eup %13155  ;;  %13161 = vtanh.f32 %v589_v13  ;;  %v14319_v13 = vpack.c.bf16 %v92_v11, %v91_v9 }
  0xff   :  { %622 = vrot.lane.b32.xlu0 %v14240_v15, %s19164_s28  ;;  %v598_v17 = vmul.f32 %v13156_v16, %v14178_v22  ;;  %v14324_v16 = vpack.c.bf16 %v94_v14, %v93_v12 }
 0x100   :  { %v13158_v18 = vpop.eup %13157  ;;  %12797 = vmatprep.subr.bf16.mxu1 %v14319_v13  ;;  %12813 = vmatprep.subr.bf16.mxu0 %v14319_v13 }
 0x101   :  { %v14246_v19 = vadd.f32 %v598_v17, %v14229_v1  ;;  %v599_v20 = vmul.f32 %v13158_v18, %v14178_v22  ;;  %12799 = vmatpush3.bf16.msra.mxu1 %v14319_v13  ;;  %12815 = vmatpush3.bf16.msra.mxu0 %v14319_v13 }
 0x102   :  { %12801 = vmatprep.subr.bf16.mxu1 %v14324_v16  ;;  %12817 = vmatprep.subr.bf16.mxu0 %v14324_v16 }
 0x103   :  { %624 = vrot.lane.b32.xlu1 %v14246_v19, %s19164_s28  ;;  %v14252_v21 = vadd.f32 %v599_v20, %v14229_v1  ;;  %v610_v52 = vmul.f32 0.0, %v14246_v19 }
 0x105   :  { %v611_v55 = vmul.f32 0.0, %v14252_v21  ;;  %12803 = vmatpush3.bf16.msra.mxu1 %v14324_v16  ;;  %12819 = vmatpush3.bf16.msra.mxu0 %v14324_v16 }
 0x106   :  { %v13160_v23 = vpop.eup %13159  ;;  %11940 = vmatprep.subr.bf16.mxu1 %v19171_v4  ;;  %12821 = vmatprep.subr.bf16.mxu0 %v14319_v13 }
 0x107   :  { %626 = vrot.lane.b32.xlu1 %v14252_v21, %s19164_s28  ;;  %v600_v24 = vmul.f32 %v13160_v23, %v14178_v22 }
 0x108   :  { %v13162_v25 = vpop.eup %13161 }
 0x109   :  { %v14258_v26 = vadd.f32 %v600_v24, %v14229_v1  ;;  %v601_v28 = vmul.f32 %v13162_v25, %v14178_v22 }
 0x10b   :  { %628 = vrot.lane.b32.xlu0 %v14258_v26, %s19164_s28  ;;  %v14264_v29 = vadd.f32 %v601_v28, %v14229_v1  ;;  %v612_v59 = vmul.f32 0.0, %v14258_v26 }
 0x10d   :  { %630 = vrot.lane.b32.xlu1 %v14264_v29, %s19164_s28  ;;  %v613_v63 = vmul.f32 0.0, %v14264_v29 }
 0x16d   :  { %v621_v31 = vpop.permute.xlu0 %620 }
 0x16e   :  { %v638_v32 = vmul.f32 %v621_v31, %v14234_v7 }
 0x170   :  { %650 = vrot.lane.b32.xlu0 %v638_v32, %s14013_s29 }
 0x171   :  { %v623_v34 = vpop.permute.xlu0 %622 }
 0x172   :  { %v639_v35 = vmul.f32 %v623_v34, %v14240_v15 }
 0x174   :  { %652 = vrot.lane.b32.xlu1 %v639_v35, %s14013_s29 }
 0x175   :  { %v625_v36 = vpop.permute.xlu1 %624 }
 0x176   :  { %v640_v37 = vmul.f32 %v625_v36, %v14246_v19 }
 0x178   :  { %654 = vrot.lane.b32.xlu0 %v640_v37, %s14013_s29 }
 0x179   :  { %v627_v38 = vpop.permute.xlu1 %626 }
 0x17a   :  { %v641_v39 = vmul.f32 %v627_v38, %v14252_v21 }
 0x17c   :  { %656 = vrot.lane.b32.xlu1 %v641_v39, %s14013_s29 }
 0x17d   :  { %v629_v41 = vpop.permute.xlu0 %628 }
 0x17e   :  { %v642_v42 = vmul.f32 %v629_v41, %v14258_v26 }
 0x17f   :  { %v631_v44 = vpop.permute.xlu1 %630 }
 0x180   :  { %v643_v45 = vmul.f32 %v631_v44, %v14264_v29  ;;  %658 = vrot.lane.b32.xlu0 %v642_v42, %s14013_s29 }
 0x182   :  { %660 = vrot.lane.b32.xlu1 %v643_v45, %s14013_s29 }
 0x1e2   :  { %v651_v47 = vpop.permute.xlu0 %650 }
 0x1e3   :  { %v14281_v48 = vadd.f32 %v651_v47, %v608_v46 }
 0x1e5   :  { %13163 = vtanh.f32 %v14281_v48 }
 0x1e6   :  { %v653_v50 = vpop.permute.xlu1 %652 }
 0x1e7   :  { %v14285_v51 = vadd.f32 %v653_v50, %v609_v49 }
 0x1e9   :  { %13165 = vtanh.f32 %v14285_v51 }
 0x1ea   :  { %v655_v53 = vpop.permute.xlu0 %654 }
 0x1eb   :  { %v14289_v54 = vadd.f32 %v655_v53, %v610_v52  ;;  %v107_v53 = vld [vmem:[%s19227_s3 + $0x40] sm:$0xff] }
 0x1ed   :  { %13167 = vtanh.f32 %v14289_v54 }
 0x1ee   :  { %v657_v56 = vpop.permute.xlu1 %656 }
 0x1ef   :  { %v13164_v57 = vpop.eup %13163  ;;  %v14293_v58 = vadd.f32 %v657_v56, %v611_v55  ;;  %v108_v55 = vld [vmem:[%s19227_s3 + $0x48] sm:$0xff] }
 0x1f0   :  { %686 = vrot.lane.b32.xlu0 %v13164_v57, %s19164_s28  ;;  %v151_v56 = vpack.c.bf16 %v108_v55, %v107_v53  ;;  %v109_v57 = vld [vmem:[%s19227_s3 + $0x50] sm:$0xff] }
 0x1f1   :  { %13169 = vtanh.f32 %v14293_v58 }
 0x1f2   :  { %v659_v60 = vpop.permute.xlu0 %658  ;;  %11867 = vmatprep.mubr.msk.bf16.mxu0 %vm177_vm0, %v151_v56 }
 0x1f3   :  { %v13166_v61 = vpop.eup %13165  ;;  %v14298_v62 = vadd.f32 %v659_v60, %v612_v59  ;;  %v110_v59 = vld [vmem:[%s19227_s3 + $0x58] sm:$0xff] }
 0x1f4   :  { %688 = vrot.lane.b32.xlu1 %v13166_v61, %s19164_s28  ;;  %v661_v0 = vpop.permute.xlu1 %660  ;;  %v152_v60 = vpack.c.bf16 %v110_v59, %v109_v57 }
 0x1f5   :  { %13171 = vtanh.f32 %v14298_v62  ;;  %v14303_v2 = vadd.f32 %v661_v0, %v613_v63 }
 0x1f6   :  { %11868 = vmatmul.mubr.msk.bf16.gmra.mrb[8].mxu0 %vm177_vm0, %v152_v60 }
 0x1f7   :  { %v13168_v3 = vpop.eup %13167  ;;  %13173 = vtanh.f32 %v14303_v2 }
 0x1f8   :  { %690 = vrot.lane.b32.xlu0 %v13168_v3, %s19164_s28 }
 0x1fb   :  { %v13170_v5 = vpop.eup %13169 }
 0x1fc   :  { %692 = vrot.lane.b32.xlu1 %v13170_v5, %s19164_s28 }
 0x1ff   :  { %v13172_v6 = vpop.eup %13171 }
 0x200   :  { %694 = vrot.lane.b32.xlu0 %v13172_v6, %s19164_s28 }
 0x201   :  { %v13174_v8 = vpop.eup %13173 }
 0x202   :  { %696 = vrot.lane.b32.xlu1 %v13174_v8, %s19164_s28 }
 0x262   :  { %v687_v17 = vpop.permute.xlu0 %686 }
 0x263   :  { %v14337_v18 = vmul.f32 %v687_v17, %v14234_v7 }
 0x265   :  { %13175 = vtanh.f32 %v14337_v18 }
 0x266   :  { %v689_v20 = vpop.permute.xlu1 %688 }
 0x267   :  { %v14341_v23 = vmul.f32 %v689_v20, %v14240_v15 }
 0x269   :  { %13177 = vtanh.f32 %v14341_v23 }
 0x26a   :  { %v691_v24 = vpop.permute.xlu0 %690 }
 0x26b   :  { %v14345_v25 = vmul.f32 %v691_v24, %v14246_v19 }
 0x26d   :  { %13179 = vtanh.f32 %v14345_v25 }
 0x26e   :  { %v693_v28 = vpop.permute.xlu1 %692 }
 0x26f   :  { %v13176_v31 = vpop.eup %13175  ;;  %v14349_v32 = vmul.f32 %v693_v28, %v14252_v21 }
 0x270   :  { %722 = vrot.lane.b32.xlu0 %v13176_v31, %s14013_s29 }
 0x271   :  { %13181 = vtanh.f32 %v14349_v32 }
 0x272   :  { %v695_v7 = vpop.permute.xlu0 %694 }
 0x273   :  { %v13178_v15 = vpop.eup %13177  ;;  %v14354_v34 = vmul.f32 %v695_v7, %v14258_v26 }
 0x274   :  { %724 = vrot.lane.b32.xlu1 %v13178_v15, %s14013_s29  ;;  %v697_v19 = vpop.permute.xlu1 %696 }
 0x275   :  { %13183 = vtanh.f32 %v14354_v34  ;;  %v14359_v35 = vmul.f32 %v697_v19, %v14264_v29 }
 0x277   :  { %v13180_v36 = vpop.eup %13179  ;;  %13185 = vtanh.f32 %v14359_v35 }
 0x278   :  { %726 = vrot.lane.b32.xlu0 %v13180_v36, %s14013_s29 }
 0x27b   :  { %v13182_v21 = vpop.eup %13181 }
 0x27c   :  { %728 = vrot.lane.b32.xlu1 %v13182_v21, %s14013_s29 }
 0x27f   :  { %v13184_v37 = vpop.eup %13183 }
 0x280   :  { %730 = vrot.lane.b32.xlu0 %v13184_v37, %s14013_s29 }
 0x281   :  { %v13186_v26 = vpop.eup %13185 }
 0x282   :  { %732 = vrot.lane.b32.xlu1 %v13186_v26, %s14013_s29  ;;  %v309_v26 = vadd.f32 %v14215_v40, %v14210_v33 }
 0x2e2   :  { %v723_v38 = vpop.permute.xlu0 %722 }
 0x2e3   :  { %11931 = vmatprep.mubr.msk.f32.mxu1 %vm523_vm5, %v723_v38  ;;  %v312_v38 = vadd.f32 %v14217_v43, %v14210_v33 }
 0x2e6   :  { %v725_v29 = vpop.permute.xlu1 %724 }
 0x2e7   :  { %11932 = vmatmul.mubr.msk.f32.vlgmr.msra.gmra.mrb[12].mxu1 %vm523_vm5, %v725_v29  ;;  %v481_v29 = vmul.f32 %v309_v26, %v14178_v22 }
 0x2e8   :  { %11941 = vmatpush3.bf16.msra.mxu1 %v14185_v27 }
 0x2e9   :  { %11942 = vmatprep.subr.bf16.mxu1 %v19171_v4 }
 0x2ea   :  { %v727_v39 = vpop.permute.xlu0 %726 }
 0x2eb   :  { %11934 = vmatprep.mubr.msk.f32.mxu1 %vm523_vm5, %v727_v39 }
 0x2ec   :  { %11943 = vmatpush3.bf16.msra.mxu1 %v14195_v30 }
 0x2ed   :  { %12805 = vmatprep.subr.bf16.mxu1 %v14319_v13 }
 0x2ee   :  { %v729_v41 = vpop.permute.xlu1 %728 }
 0x2ef   :  { %11935 = vmatmul.mubr.msk.f32.gmra.mrb[14].mxu1 %vm523_vm5, %v729_v41 }
 0x2f2   :  { %v731_v42 = vpop.permute.xlu0 %730 }
 0x2f3   :  { %11937 = vmatprep.mubr.msk.f32.mxu1 %vm523_vm5, %v731_v42 }
 0x2f4   :  { %v733_v44 = vpop.permute.xlu1 %732 }
 0x2f5   :  { %11938 = vmatmul.mubr.msk.f32.gmra.mrb[16].mxu1 %vm523_vm5, %v733_v44 }
 0x2f6   :  { %11944 = vmatprep.mubr.msk.bf16.mxu1 %vm14009_vm1, %v19171_v4 }
 0x3ba   :  { %v11933_v45 = vpop.f32.mrb[12].mxu1 }
 0x3bb   :  { %848 = vperm.xlu1 %13047, %v11933_v45   ;;  %v812_v46 = vpop.f32.mrb[13].mxu1  ;;  %v482_v45 = vmul.f32 %v312_v38, %v14178_v22 }
 0x3bc   :  { %843 = vperm.xlu0 %13046, %v812_v46  }
 0x3c2   :  { %v11936_v47 = vpop.f32.mrb[14].mxu1 }
 0x3c3   :  { %858 = vperm.xlu0 %13046, %v11936_v47   ;;  %v822_v49 = vpop.f32.mrb[15].mxu1 }
 0x3c4   :  { %853 = vperm.xlu1 %13047, %v822_v49  }
 0x3c8   :  { %v11939_v50 = vpop.f32.mrb[16].mxu1 }
 0x3c9   :  { %868 = vperm.xlu0 %13046, %v11939_v50   ;;  %v832_v52 = vpop.f32.mrb[17].mxu1 }
 0x3ca   :  { %863 = vperm.xlu1 %13047, %v832_v52  }
 0x43a   :  { %v849_v61 = vpop.permute.xlu1 %848 }
 0x43b   :  { %v872_v63 = vmul.f32 0.0, %v849_v61  ;;  %v844_v0 = vpop.permute.xlu0 %843 }
 0x43c   :  { %v871_v3 = vmul.f32 0.0, %v844_v0 }
 0x43d   :  { %v878_v5 = vadd.f32 %v872_v63, %v14341_v23 }
 0x43e   :  { %v877_v6 = vadd.f32 %v871_v3, %v14337_v18 }
 0x440   :  { %v883_v8 = vpack.c.bf16 %v878_v5, %v877_v6 }
 0x442   :  { %889 = vrot.lane.b32.xlu1 %v883_v8, %s14013_s29  ;;  %v859_v9 = vpop.permute.xlu0 %858 }
 0x443   :  { %v874_v11 = vmul.f32 0.0, %v859_v9  ;;  %v854_v12 = vpop.permute.xlu1 %853 }
 0x444   :  { %v873_v14 = vmul.f32 0.0, %v854_v12 }
 0x445   :  { %v880_v17 = vadd.f32 %v874_v11, %v14349_v32 }
 0x446   :  { %v879_v20 = vadd.f32 %v873_v14, %v14345_v25 }
 0x448   :  { %v869_v24 = vpop.permute.xlu0 %868  ;;  %v884_v28 = vpack.c.bf16 %v880_v17, %v879_v20 }
 0x449   :  { %v876_v31 = vmul.f32 0.0, %v869_v24  ;;  %v864_v7 = vpop.permute.xlu1 %863 }
 0x44a   :  { %v875_v15 = vmul.f32 0.0, %v864_v7  ;;  %891 = vrot.lane.b32.xlu0 %v884_v28, %s14013_s29 }
 0x44b   :  { %v882_v18 = vadd.f32 %v876_v31, %v14359_v35 }
 0x44c   :  { %v881_v23 = vadd.f32 %v875_v15, %v14354_v34  ;;  %v11869_v34 = vpop.f32.mrb[8].mxu0 }
 0x44d   :  { %v316_v35 = vpop.f32.mrb[9].mxu0  ;;  %v325_v57 = vadd.f32 %v11869_v34, %v14210_v33 }
 0x44e   :  { %v885_v19 = vpack.c.bf16 %v882_v18, %v881_v23  ;;  %v11870_v21 = vpop.f32.mrb[10].mxu0  ;;  %v317_v44 = vadd.f32 %v14210_v33, %v316_v35 }
 0x44f   :  { %v319_v37 = vpop.f32.mrb[11].mxu0  ;;  %v328_v63 = vadd.f32 %v11870_v21, %v14210_v33  ;;  %v485_v5 = vmul.f32 %v325_v57, %v14178_v22 }
 0x450   :  { %893 = vrot.lane.b32.xlu1 %v885_v19, %s14013_s29  ;;  %v320_v50 = vadd.f32 %v14210_v33, %v319_v37  ;;  %v483_v40 = vmul.f32 %v317_v44, %v14178_v22 }
 0x451   :  { %v486_v14 = vmul.f32 %v328_v63, %v14178_v22 }
 0x452   :  { %v484_v55 = vmul.f32 %v320_v50, %v14178_v22 }
 0x4b4   :  { %v890_v36 = vpop.permute.xlu1 %889 }
 0x4b5   :  { %11945 = vmatmul.mubr.msk.bf16.vlgmr.msra.gmra.mrb[20].mxu1 %vm523_vm5, %v890_v36 }
 0x4b6   :  { %11948 = vmatprep.mubr.msk.bf16.mxu1 %vm14009_vm1, %v19171_v4  ;;  %12807 = vmatpush3.bf16.msra.mxu1 %v14319_v13 }
 0x4b7   :  { %12809 = vmatprep.subr.bf16.mxu1 %v14324_v16 }
 0x4ba   :  { %12811 = vmatpush3.bf16.msra.mxu1 %v14324_v16 }
 0x4bb   :  { %11973 = vmatprep.subr.bf16.mxu1 %v19171_v4 }
 0x4bc   :  { %v892_v25 = vpop.permute.xlu0 %891 }
 0x4bd   :  { %11949 = vmatmul.mubr.msk.bf16.gmra.mrb[24].mxu1 %vm523_vm5, %v892_v25 }
 0x4be   :  { %11952 = vmatprep.mubr.msk.bf16.mxu1 %vm14009_vm1, %v19171_v4 }
 0x4c2   :  { %v894_v32 = vpop.permute.xlu1 %893 }
 0x4c5   :  { %11953 = vmatmul.mubr.msk.bf16.gmra.mrb[28].mxu1 %vm523_vm5, %v894_v32 }
 0x588   :  { %v938_v39 = vpop.f32.mrb[20].mxu1 }
 0x589   :  { %v961_v41 = vadd.f32 %v938_v39, %v481_v29  ;;  %v11946_v42 = vpop.f32.mrb[21].mxu1 }
 0x58a   :  { %v941_v46 = vpop.f32.mrb[22].mxu1 }
 0x58b   :  { %13187 = vtanh.f32 %v961_v41  ;;  %v962_v47 = vadd.f32 %v941_v46, %v482_v45  ;;  %v11947_v49 = vpop.f32.mrb[23].mxu1 }
 0x58d   :  { %13189 = vtanh.f32 %v962_v47 }
 0x590   :  { %v946_v52 = vpop.f32.mrb[24].mxu1 }
 0x591   :  { %v963_v43 = vadd.f32 %v946_v52, %v483_v40  ;;  %v11950_v53 = vpop.f32.mrb[25].mxu1 }
 0x592   :  { %v949_v56 = vpop.f32.mrb[26].mxu1 }
 0x593   :  { %13191 = vtanh.f32 %v963_v43  ;;  %v964_v59 = vadd.f32 %v949_v56, %v484_v55  ;;  %v11951_v60 = vpop.f32.mrb[27].mxu1 }
 0x595   :  { %v13188_v61 = vpop.eup %13187  ;;  %13193 = vtanh.f32 %v964_v59 }
 0x596   :  { %v973_v0 = vmul.f32 %v13188_v61, %v14178_v22 }
 0x597   :  { %v13190_v3 = vpop.eup %13189 }
 0x598   :  { %v954_v6 = vpop.f32.mrb[28].mxu1  ;;  %v14427_v8 = vadd.f32 %v973_v0, %v14229_v1  ;;  %v974_v9 = vmul.f32 %v13190_v3, %v14178_v22 }
 0x599   :  { %v965_v11 = vadd.f32 %v954_v6, %v485_v5  ;;  %v11954_v12 = vpop.f32.mrb[29].mxu1 }
 0x59a   :  { %997 = vrot.lane.b32.xlu0 %v14427_v8, %s19164_s28  ;;  %v957_v17 = vpop.f32.mrb[30].mxu1  ;;  %v14434_v20 = vadd.f32 %v974_v9, %v14229_v1  ;;  %v985_v50 = vmul.f32 %v14427_v8, %v14281_v48 }
 0x59b   :  { %13195 = vtanh.f32 %v965_v11  ;;  %v966_v24 = vadd.f32 %v957_v17, %v486_v14  ;;  %v11955_v28 = vpop.f32.mrb[31].mxu1 }
 0x59c   :  { %999 = vrot.lane.b32.xlu1 %v14434_v20, %s19164_s28  ;;  %v986_v43 = vmul.f32 %v14434_v20, %v14285_v51 }
 0x59d   :  { %v13192_v31 = vpop.eup %13191  ;;  %13197 = vtanh.f32 %v966_v24 }
 0x59e   :  { %v975_v7 = vmul.f32 %v13192_v31, %v14178_v22 }
 0x59f   :  { %v13194_v15 = vpop.eup %13193 }
 0x5a0   :  { %v14440_v18 = vadd.f32 %v975_v7, %v14229_v1  ;;  %v976_v23 = vmul.f32 %v13194_v15, %v14178_v22 }
 0x5a2   :  { %1001 = vrot.lane.b32.xlu0 %v14440_v18, %s19164_s28  ;;  %v14446_v19 = vadd.f32 %v976_v23, %v14229_v1  ;;  %v987_v56 = vmul.f32 %v14440_v18, %v14289_v54 }
 0x5a4   :  { %1003 = vrot.lane.b32.xlu1 %v14446_v19, %s19164_s28  ;;  %v988_v48 = vmul.f32 %v14446_v19, %v14293_v58 }
 0x5a5   :  { %v13196_v36 = vpop.eup %13195 }
 0x5a6   :  { %v977_v25 = vmul.f32 %v13196_v36, %v14178_v22 }
 0x5a7   :  { %v13198_v32 = vpop.eup %13197 }
 0x5a8   :  { %v14452_v34 = vadd.f32 %v977_v25, %v14229_v1  ;;  %v978_v35 = vmul.f32 %v13198_v32, %v14178_v22 }
 0x5aa   :  { %1005 = vrot.lane.b32.xlu0 %v14452_v34, %s19164_s28  ;;  %v14458_v21 = vadd.f32 %v978_v35, %v14229_v1  ;;  %v989_v54 = vmul.f32 %v14452_v34, %v14298_v62 }
 0x5ac   :  { %1007 = vrot.lane.b32.xlu1 %v14458_v21, %s19164_s28  ;;  %v990_v58 = vmul.f32 %v14458_v21, %v14303_v2 }
 0x60c   :  { %v998_v37 = vpop.permute.xlu0 %997 }
 0x60d   :  { %v1015_v26 = vmul.f32 %v998_v37, %v14427_v8 }
 0x60e   :  { %v1000_v38 = vpop.permute.xlu1 %999 }
 0x60f   :  { %v1016_v29 = vmul.f32 %v1000_v38, %v14434_v20  ;;  %1027 = vrot.lane.b32.xlu0 %v1015_v26, %s14013_s29 }
 0x611   :  { %1029 = vrot.lane.b32.xlu1 %v1016_v29, %s14013_s29 }
 0x614   :  { %v1002_v39 = vpop.permute.xlu0 %1001 }
 0x615   :  { %v1017_v41 = vmul.f32 %v1002_v39, %v14440_v18 }
 0x616   :  { %v1004_v42 = vpop.permute.xlu1 %1003 }
 0x617   :  { %v1018_v44 = vmul.f32 %v1004_v42, %v14446_v19  ;;  %1031 = vrot.lane.b32.xlu0 %v1017_v41, %s14013_s29 }
 0x619   :  { %1033 = vrot.lane.b32.xlu1 %v1018_v44, %s14013_s29 }
 0x61c   :  { %v1006_v45 = vpop.permute.xlu0 %1005 }
 0x61d   :  { %v1019_v46 = vmul.f32 %v1006_v45, %v14452_v34 }
 0x61e   :  { %v1008_v47 = vpop.permute.xlu1 %1007 }
 0x61f   :  { %v1020_v49 = vmul.f32 %v1008_v47, %v14458_v21  ;;  %1035 = vrot.lane.b32.xlu0 %v1019_v46, %s14013_s29 }
 0x621   :  { %1037 = vrot.lane.b32.xlu1 %v1020_v49, %s14013_s29  ;;  %v111_v49 = vld [vmem:[%s19227_s3 + $0x60] sm:$0xff] }
 0x681   :  { %v1028_v40 = vpop.permute.xlu0 %1027 }
 0x682   :  { %v14476_v52 = vadd.f32 %v1028_v40, %v985_v50  ;;  %v112_v50 = vld [vmem:[%s19227_s3 + $0x68] sm:$0xff]  ;;  %v113_v40 = vld [vmem:[%s19227_s3 + $0x70] sm:$0xff] }
 0x683   :  { %v1030_v53 = vpop.permute.xlu1 %1029 }
 0x684   :  { %13199 = vtanh.f32 %v14476_v52  ;;  %v14481_v55 = vadd.f32 %v1030_v53, %v986_v43  ;;  %v153_v43 = vpack.c.bf16 %v112_v50, %v111_v49  ;;  %v114_v53 = vld [vmem:[%s19227_s3 + $0x78] sm:$0xff] }
 0x686   :  { %13201 = vtanh.f32 %v14481_v55  ;;  %11871 = vmatprep.mubr.msk.bf16.mxu0 %vm177_vm0, %v153_v43 }
 0x689   :  { %v1032_v57 = vpop.permute.xlu0 %1031 }
 0x68a   :  { %v14486_v59 = vadd.f32 %v1032_v57, %v987_v56  ;;  %v154_v56 = vpack.c.bf16 %v114_v53, %v113_v40 }
 0x68b   :  { %v1034_v60 = vpop.permute.xlu1 %1033 }
 0x68c   :  { %13203 = vtanh.f32 %v14486_v59  ;;  %v14491_v51 = vadd.f32 %v1034_v60, %v988_v48  ;;  %11872 = vmatmul.mubr.msk.bf16.gmra.mrb[12].mxu0 %vm177_vm0, %v154_v56 }
 0x68e   :  { %v13200_v61 = vpop.eup %13199  ;;  %13205 = vtanh.f32 %v14491_v51 }
 0x68f   :  { %1063 = vrot.lane.b32.xlu0 %v13200_v61, %s19164_s28 }
 0x690   :  { %v13202_v63 = vpop.eup %13201 }
 0x691   :  { %1065 = vrot.lane.b32.xlu1 %v13202_v63, %s19164_s28  ;;  %v1036_v0 = vpop.permute.xlu0 %1035  ;;  %v115_v63 = vld [vmem:[%s19227_s3 + $0x80] sm:$0xff] }
 0x692   :  { %v14498_v3 = vadd.f32 %v1036_v0, %v989_v54  ;;  %v116_v54 = vld [vmem:[%s19227_s3 + $0x88] sm:$0xff] }
 0x693   :  { %v1038_v5 = vpop.permute.xlu1 %1037 }
 0x694   :  { %13207 = vtanh.f32 %v14498_v3  ;;  %v14503_v6 = vadd.f32 %v1038_v5, %v990_v58  ;;  %v155_v58 = vpack.c.bf16 %v116_v54, %v115_v63  ;;  %v117_v5 = vld [vmem:[%s19227_s3 + $0x90] sm:$0xff] }
 0x696   :  { %v13204_v9 = vpop.eup %13203  ;;  %13209 = vtanh.f32 %v14503_v6  ;;  %11875 = vmatprep.mubr.msk.bf16.mxu0 %vm177_vm0, %v155_v58 }
 0x697   :  { %1067 = vrot.lane.b32.xlu0 %v13204_v9, %s19164_s28  ;;  %v118_v9 = vld [vmem:[%s19227_s3 + $0x98] sm:$0xff] }
 0x698   :  { %v13206_v11 = vpop.eup %13205 }
 0x699   :  { %1069 = vrot.lane.b32.xlu1 %v13206_v11, %s19164_s28 }
 0x69e   :  { %v13208_v62 = vpop.eup %13207 }
 0x69f   :  { %1071 = vrot.lane.b32.xlu0 %v13208_v62, %s19164_s28  ;;  %v156_v62 = vpack.c.bf16 %v118_v9, %v117_v5 }
 0x6a0   :  { %v13210_v12 = vpop.eup %13209 }
 0x6a1   :  { %1073 = vrot.lane.b32.xlu1 %v13210_v12, %s19164_s28  ;;  %11876 = vmatmul.mubr.msk.bf16.gmra.mrb[16].mxu0 %vm177_vm0, %v156_v62 }
 0x701   :  { %v1064_v2 = vpop.permute.xlu0 %1063 }
 0x702   :  { %v14511_v14 = vmul.f32 %v1064_v2, %v14427_v8 }
 0x703   :  { %v1066_v17 = vpop.permute.xlu1 %1065 }
 0x704   :  { %13211 = vtanh.f32 %v14511_v14  ;;  %v14515_v24 = vmul.f32 %v1066_v17, %v14434_v20 }
 0x706   :  { %13213 = vtanh.f32 %v14515_v24 }
 0x709   :  { %v1068_v28 = vpop.permute.xlu0 %1067 }
 0x70a   :  { %v14519_v31 = vmul.f32 %v1068_v28, %v14440_v18 }
 0x70b   :  { %v1070_v7 = vpop.permute.xlu1 %1069 }
 0x70c   :  { %13215 = vtanh.f32 %v14519_v31  ;;  %v14523_v15 = vmul.f32 %v1070_v7, %v14446_v19 }
 0x70e   :  { %v13212_v8 = vpop.eup %13211  ;;  %13217 = vtanh.f32 %v14523_v15 }
 0x70f   :  { %1099 = vrot.lane.b32.xlu0 %v13212_v8, %s14013_s29 }
 0x710   :  { %v13214_v23 = vpop.eup %13213 }
 0x711   :  { %1101 = vrot.lane.b32.xlu1 %v13214_v23, %s14013_s29  ;;  %v1072_v20 = vpop.permute.xlu0 %1071 }
 0x712   :  { %v14529_v36 = vmul.f32 %v1072_v20, %v14452_v34 }
 0x713   :  { %v1074_v18 = vpop.permute.xlu1 %1073 }
 0x714   :  { %13219 = vtanh.f32 %v14529_v36  ;;  %v14533_v25 = vmul.f32 %v1074_v18, %v14458_v21 }
 0x716   :  { %v13216_v19 = vpop.eup %13215  ;;  %13221 = vtanh.f32 %v14533_v25 }
 0x717   :  { %1103 = vrot.lane.b32.xlu0 %v13216_v19, %s14013_s29 }
 0x718   :  { %v13218_v32 = vpop.eup %13217 }
 0x719   :  { %1105 = vrot.lane.b32.xlu1 %v13218_v32, %s14013_s29 }
 0x71e   :  { %v13220_v35 = vpop.eup %13219 }
 0x71f   :  { %1107 = vrot.lane.b32.xlu0 %v13220_v35, %s14013_s29 }
 0x720   :  { %v13222_v37 = vpop.eup %13221 }
 0x721   :  { %1109 = vrot.lane.b32.xlu1 %v13222_v37, %s14013_s29 }
 0x781   :  { %v1100_v34 = vpop.permute.xlu0 %1099 }
 0x782   :  { %11964 = vmatprep.mubr.msk.f32.mxu1 %vm523_vm5, %v1100_v34  ;;  %v11873_v34 = vpop.f32.mrb[12].mxu0 }
 0x783   :  { %v1102_v26 = vpop.permute.xlu1 %1101  ;;  %v341_v43 = vadd.f32 %v11873_v34, %v14210_v33 }
 0x784   :  { %11965 = vmatmul.mubr.msk.f32.vlgmr.msra.gmra.mrb[18].mxu1 %vm523_vm5, %v1102_v26  ;;  %v332_v26 = vpop.f32.mrb[13].mxu0 }
 0x785   :  { %11974 = vmatpush3.bf16.msra.mxu1 %v14185_v27 }
 0x786   :  { %11975 = vmatprep.subr.bf16.mxu1 %v19171_v4 }
 0x789   :  { %v1104_v21 = vpop.permute.xlu0 %1103  ;;  %11976 = vmatpush3.bf16.msra.mxu1 %v14195_v30 }
 0x78a   :  { %11967 = vmatprep.mubr.msk.f32.mxu1 %vm523_vm5, %v1104_v21  ;;  %12006 = vmatprep.subr.bf16.mxu1 %v19171_v4  ;;  %v11874_v21 = vpop.f32.mrb[14].mxu0 }
 0x78b   :  { %v1106_v38 = vpop.permute.xlu1 %1105 }
 0x78c   :  { %11968 = vmatmul.mubr.msk.f32.gmra.mrb[32].mxu1 %vm523_vm5, %v1106_v38 }
 0x791   :  { %v1108_v29 = vpop.permute.xlu0 %1107 }
 0x792   :  { %11970 = vmatprep.mubr.msk.f32.mxu1 %vm523_vm5, %v1108_v29 }
 0x793   :  { %v1110_v39 = vpop.permute.xlu1 %1109 }
 0x794   :  { %11971 = vmatmul.mubr.msk.f32.gmra.mrb[34].mxu1 %vm523_vm5, %v1110_v39 }
 0x795   :  { %11977 = vmatprep.mubr.msk.bf16.mxu1 %vm14009_vm1, %v19171_v4 }
 0x857   :  { %v11966_v41 = vpop.f32.mrb[18].mxu1 }
 0x858   :  { %1225 = vperm.xlu1 %13047, %v11966_v41   ;;  %v1189_v42 = vpop.f32.mrb[19].mxu1 }
 0x859   :  { %1220 = vperm.xlu0 %13046, %v1189_v42   ;;  %v333_v42 = vadd.f32 %v14210_v33, %v332_v26 }
 0x85f   :  { %v11969_v44 = vpop.f32.mrb[32].mxu1 }
 0x860   :  { %1235 = vperm.xlu1 %13047, %v11969_v44   ;;  %v1199_v45 = vpop.f32.mrb[33].mxu1 }
 0x861   :  { %1230 = vperm.xlu0 %13046, %v1199_v45   ;;  %v487_v45 = vmul.f32 %v333_v42, %v14178_v22 }
 0x867   :  { %v11972_v46 = vpop.f32.mrb[34].mxu1 }
 0x868   :  { %1245 = vperm.xlu1 %13047, %v11972_v46   ;;  %v1209_v47 = vpop.f32.mrb[35].mxu1 }
 0x869   :  { %1240 = vperm.xlu0 %13046, %v1209_v47  }
 0x8d7   :  { %v1226_v57 = vpop.permute.xlu1 %1225 }
 0x8d8   :  { %v1249_v48 = vmul.f32 0.0, %v1226_v57  ;;  %v1221_v60 = vpop.permute.xlu0 %1220  ;;  %v344_v57 = vadd.f32 %v11874_v21, %v14210_v33 }
 0x8d9   :  { %v1248_v61 = vmul.f32 0.0, %v1221_v60 }
 0x8da   :  { %v1255_v0 = vadd.f32 %v1249_v48, %v14515_v24  ;;  %v489_v48 = vmul.f32 %v341_v43, %v14178_v22  ;;  %v490_v54 = vmul.f32 %v344_v57, %v14178_v22 }
 0x8db   :  { %v1254_v11 = vadd.f32 %v1248_v61, %v14511_v14 }
 0x8dd   :  { %v1260_v12 = vpack.c.bf16 %v1255_v0, %v1254_v11 }
 0x8df   :  { %v1236_v2 = vpop.permute.xlu1 %1235  ;;  %1266 = vrot.lane.b32.xlu0 %v1260_v12, %s14013_s29 }
 0x8e0   :  { %v1251_v17 = vmul.f32 0.0, %v1236_v2  ;;  %v1231_v24 = vpop.permute.xlu0 %1230 }
 0x8e1   :  { %v1250_v28 = vmul.f32 0.0, %v1231_v24 }
 0x8e2   :  { %v1257_v7 = vadd.f32 %v1251_v17, %v14523_v15  ;;  %v335_v15 = vpop.f32.mrb[15].mxu0 }
 0x8e3   :  { %v1256_v8 = vadd.f32 %v1250_v28, %v14519_v31  ;;  %v336_v44 = vadd.f32 %v14210_v33, %v335_v15 }
 0x8e5   :  { %v1261_v23 = vpack.c.bf16 %v1257_v7, %v1256_v8  ;;  %v488_v50 = vmul.f32 %v336_v44, %v14178_v22 }
 0x8e7   :  { %v1246_v20 = vpop.permute.xlu1 %1245  ;;  %1268 = vrot.lane.b32.xlu1 %v1261_v23, %s14013_s29 }
 0x8e8   :  { %v1253_v14 = vmul.f32 0.0, %v1246_v20  ;;  %v1241_v18 = vpop.permute.xlu0 %1240 }
 0x8e9   :  { %v1252_v19 = vmul.f32 0.0, %v1241_v18 }
 0x8ea   :  { %v1259_v32 = vadd.f32 %v1253_v14, %v14533_v25  ;;  %v14602_v25 = vpop.f32.mrb[16].mxu0 }
 0x8eb   :  { %v1258_v35 = vadd.f32 %v1252_v19, %v14529_v36  ;;  %v348_v29 = vpop.f32.mrb[17].mxu0 }
 0x8ec   :  { %v14604_v39 = vpop.f32.mrb[18].mxu0  ;;  %v349_v0 = vadd.f32 %v14210_v33, %v348_v29 }
 0x8ed   :  { %v1262_v37 = vpack.c.bf16 %v1259_v32, %v1258_v35  ;;  %v351_v41 = vpop.f32.mrb[19].mxu0 }
 0x8ee   :  { %v352_v11 = vadd.f32 %v14210_v33, %v351_v41  ;;  %v491_v12 = vmul.f32 %v349_v0, %v14178_v22 }
 0x8ef   :  { %1270 = vrot.lane.b32.xlu0 %v1262_v37, %s14013_s29 }
 0x8f0   :  { %v492_v24 = vmul.f32 %v352_v11, %v14178_v22 }
 0x951   :  { %v1267_v38 = vpop.permute.xlu0 %1266 }
 0x952   :  { %11978 = vmatmul.mubr.msk.bf16.vlgmr.msra.gmra.mrb[36].mxu1 %vm523_vm5, %v1267_v38 }
 0x953   :  { %11981 = vmatprep.mubr.msk.bf16.mxu1 %vm14009_vm1, %v19171_v4  ;;  %12007 = vmatpush3.bf16.msra.mxu1 %v14185_v27 }
 0x954   :  { %12008 = vmatprep.subr.bf16.mxu1 %v19171_v4 }
 0x957   :  { %12009 = vmatpush3.bf16.msra.mxu1 %v14195_v30 }
 0x958   :  { %12829 = vmatprep.subr.bf16.mxu1 %v14319_v13 }
 0x959   :  { %v1269_v31 = vpop.permute.xlu1 %1268 }
 0x95a   :  { %11982 = vmatmul.mubr.msk.bf16.gmra.mrb[40].mxu1 %vm523_vm5, %v1269_v31 }
 0x95b   :  { %11985 = vmatprep.mubr.msk.bf16.mxu1 %vm14009_vm1, %v19171_v4 }
 0x961   :  { %v1271_v36 = vpop.permute.xlu0 %1270 }
 0x962   :  { %11986 = vmatmul.mubr.msk.bf16.gmra.mrb[44].mxu1 %vm523_vm5, %v1271_v36 }
 0x963   :  { %12010 = vmatprep.mubr.msk.bf16.mxu1 %vm14009_vm1, %v19171_v4 }
 0xa25   :  { %v1315_v46 = vpop.f32.mrb[36].mxu1 }
 0xa26   :  { %v1338_v47 = vadd.f32 %v1315_v46, %v487_v45  ;;  %v11979_v49 = vpop.f32.mrb[37].mxu1 }
 0xa27   :  { %v1318_v40 = vpop.f32.mrb[38].mxu1 }
 0xa28   :  { %13223 = vtanh.f32 %v1338_v47  ;;  %v1339_v53 = vadd.f32 %v1318_v40, %v488_v50  ;;  %v11980_v56 = vpop.f32.mrb[39].mxu1 }
 0xa2a   :  { %13225 = vtanh.f32 %v1339_v53 }
 0xa2d   :  { %v1323_v60 = vpop.f32.mrb[40].mxu1 }
 0xa2e   :  { %v1340_v61 = vadd.f32 %v1323_v60, %v489_v48  ;;  %v11983_v63 = vpop.f32.mrb[41].mxu1 }
 0xa2f   :  { %v1326_v58 = vpop.f32.mrb[42].mxu1 }
 0xa30   :  { %13227 = vtanh.f32 %v1340_v61  ;;  %v1341_v5 = vadd.f32 %v1326_v58, %v490_v54  ;;  %v11984_v9 = vpop.f32.mrb[43].mxu1 }
 0xa32   :  { %v13224_v62 = vpop.eup %13223  ;;  %13229 = vtanh.f32 %v1341_v5 }
 0xa33   :  { %v1350_v2 = vmul.f32 %v13224_v62, %v14178_v22 }
 0xa34   :  { %v13226_v17 = vpop.eup %13225 }
 0xa35   :  { %v1331_v28 = vpop.f32.mrb[44].mxu1  ;;  %v14620_v7 = vadd.f32 %v1350_v2, %v14229_v1  ;;  %v1351_v8 = vmul.f32 %v13226_v17, %v14178_v22 }
 0xa36   :  { %v1342_v23 = vadd.f32 %v1331_v28, %v491_v12  ;;  %v11987_v20 = vpop.f32.mrb[45].mxu1 }
 0xa37   :  { %1374 = vrot.lane.b32.xlu1 %v14620_v7, %s19164_s28  ;;  %v1334_v33 = vpop.f32.mrb[46].mxu1  ;;  %v14626_v14 = vadd.f32 %v1351_v8, %v14229_v1  ;;  %v1362_v48 = vmul.f32 %v14620_v7, %v14476_v52 }
 0xa38   :  { %13231 = vtanh.f32 %v1342_v23  ;;  %v1343_v18 = vadd.f32 %v1334_v33, %v492_v24  ;;  %v11988_v19 = vpop.f32.mrb[47].mxu1  ;;  %v120_v33 = vld [vmem:[%s19227_s3 + $0xa8] sm:$0xff] }
 0xa39   :  { %1376 = vrot.lane.b32.xlu0 %v14626_v14, %s19164_s28  ;;  %v1363_v63 = vmul.f32 %v14626_v14, %v14481_v55 }
 0xa3a   :  { %v13228_v32 = vpop.eup %13227  ;;  %13233 = vtanh.f32 %v1343_v18  ;;  %v121_v18 = vld [vmem:[%s19227_s3 + $0xb0] sm:$0xff] }
 0xa3b   :  { %v1352_v35 = vmul.f32 %v13228_v32, %v14178_v22  ;;  %v122_v32 = vld [vmem:[%s19227_s3 + $0xb8] sm:$0xff] }
 0xa3c   :  { %v13230_v37 = vpop.eup %13229 }
 0xa3d   :  { %v14632_v34 = vadd.f32 %v1352_v35, %v14229_v1  ;;  %v1353_v26 = vmul.f32 %v13230_v37, %v14178_v22  ;;  %v123_v35 = vld [vmem:[%s19227_s3 + $0xc0] sm:$0xff]  ;;  %v124_v37 = vld [vmem:[%s19227_s3 + $0xc8] sm:$0xff] }
 0xa3f   :  { %1378 = vrot.lane.b32.xlu1 %v14632_v34, %s19164_s28  ;;  %v14638_v21 = vadd.f32 %v1353_v26, %v14229_v1  ;;  %v1364_v58 = vmul.f32 %v14632_v34, %v14486_v59  ;;  %v158_v26 = vpack.c.bf16 %v122_v32, %v121_v18 }
 0xa41   :  { %1380 = vrot.lane.b32.xlu0 %v14638_v21, %s19164_s28  ;;  %v1365_v52 = vmul.f32 %v14638_v21, %v14491_v51 }
 0xa42   :  { %v13232_v15 = vpop.eup %13231 }
 0xa43   :  { %v1354_v38 = vmul.f32 %v13232_v15, %v14178_v22  ;;  %v159_v15 = vpack.c.bf16 %v124_v37, %v123_v35 }
 0xa44   :  { %v13234_v31 = vpop.eup %13233 }
 0xa45   :  { %v14644_v36 = vadd.f32 %v1354_v38, %v14229_v1  ;;  %v1355_v29 = vmul.f32 %v13234_v31, %v14178_v22  ;;  %v125_v38 = vld [vmem:[%s19227_s3 + $0xd0] sm:$0xff]  ;;  %v126_v31 = vld [vmem:[%s19227_s3 + $0xd8] sm:$0xff] }
 0xa47   :  { %1382 = vrot.lane.b32.xlu1 %v14644_v36, %s19164_s28  ;;  %v14650_v41 = vadd.f32 %v1355_v29, %v14229_v1  ;;  %v1366_v59 = vmul.f32 %v14644_v36, %v14498_v3  ;;  %v127_v29 = vld [vmem:[%s19227_s3 + $0xe0] sm:$0xff] }
 0xa49   :  { %1384 = vrot.lane.b32.xlu0 %v14650_v41, %s19164_s28  ;;  %v1367_v51 = vmul.f32 %v14650_v41, %v14503_v6  ;;  %v119_v6 = vld [vmem:[%s19227_s3 + $0xa0] sm:$0xff] }
 0xa4a   :  { %v157_v19 = vpack.c.bf16 %v120_v33, %v119_v6 }
 0xa4c   :  { %11879 = vmatprep.mubr.msk.bf16.mxu0 %vm177_vm0, %v157_v19 }
 0xa4d   :  { %11880 = vmatmul.mubr.msk.bf16.gmra.mrb[20].mxu0 %vm177_vm0, %v158_v26 }
 0xa4e   :  { %11883 = vmatprep.mubr.msk.bf16.mxu0 %vm177_vm0, %v159_v15 }
 0xaa9   :  { %v1375_v42 = vpop.permute.xlu1 %1374 }
 0xaaa   :  { %v1392_v44 = vmul.f32 %v1375_v42, %v14620_v7  ;;  %v128_v42 = vld [vmem:[%s19227_s3 + $0xe8] sm:$0xff] }
 0xaab   :  { %v1377_v45 = vpop.permute.xlu0 %1376 }
 0xaac   :  { %v1393_v46 = vmul.f32 %v1377_v45, %v14626_v14  ;;  %1404 = vrot.lane.b32.xlu1 %v1392_v44, %s14013_s29  ;;  %v160_v44 = vpack.c.bf16 %v126_v31, %v125_v38  ;;  %v161_v45 = vpack.c.bf16 %v128_v42, %v127_v29 }
 0xaae   :  { %1406 = vrot.lane.b32.xlu0 %v1393_v46, %s14013_s29  ;;  %11884 = vmatmul.mubr.msk.bf16.gmra.mrb[24].mxu0 %vm177_vm0, %v160_v44  ;;  %v129_v46 = vld [vmem:[%s19227_s3 + $0xf0] sm:$0xff] }
 0xaaf   :  { %11887 = vmatprep.mubr.msk.bf16.mxu0 %vm177_vm0, %v161_v45 }
 0xab1   :  { %v1379_v47 = vpop.permute.xlu1 %1378 }
 0xab2   :  { %v1394_v49 = vmul.f32 %v1379_v47, %v14632_v34  ;;  %v130_v47 = vld [vmem:[%s19227_s3 + $0xf8] sm:$0xff] }
 0xab3   :  { %v1381_v50 = vpop.permute.xlu0 %1380 }
 0xab4   :  { %v1395_v40 = vmul.f32 %v1381_v50, %v14638_v21  ;;  %1408 = vrot.lane.b32.xlu1 %v1394_v49, %s14013_s29  ;;  %v131_v49 = vld [vmem:[%s19227_s3 + $0x100] sm:$0xff]  ;;  %v132_v50 = vld [vmem:[%s19227_s3 + $0x108] sm:$0xff] }
 0xab6   :  { %1410 = vrot.lane.b32.xlu0 %v1395_v40, %s14013_s29  ;;  %v162_v40 = vpack.c.bf16 %v130_v47, %v129_v46 }
 0xab8   :  { %11888 = vmatmul.mubr.msk.bf16.gmra.mrb[28].mxu0 %vm177_vm0, %v162_v40 }
 0xab9   :  { %v1383_v43 = vpop.permute.xlu1 %1382 }
 0xaba   :  { %v1396_v53 = vmul.f32 %v1383_v43, %v14644_v36  ;;  %v163_v43 = vpack.c.bf16 %v132_v50, %v131_v49 }
 0xabb   :  { %v1385_v56 = vpop.permute.xlu0 %1384 }
 0xabc   :  { %v1397_v57 = vmul.f32 %v1385_v56, %v14650_v41  ;;  %1412 = vrot.lane.b32.xlu1 %v1396_v53, %s14013_s29  ;;  %11891 = vmatprep.mubr.msk.bf16.mxu0 %vm177_vm0, %v163_v43  ;;  %v133_v53 = vld [vmem:[%s19227_s3 + $0x110] sm:$0xff]  ;;  %v134_v56 = vld [vmem:[%s19227_s3 + $0x118] sm:$0xff] }
 0xabe   :  { %1414 = vrot.lane.b32.xlu0 %v1397_v57, %s14013_s29  ;;  %v135_v57 = vld [vmem:[%s19227_s3 + $0x120] sm:$0xff] }
 0xb1e   :  { %v1405_v60 = vpop.permute.xlu1 %1404 }
 0xb1f   :  { %v14668_v61 = vadd.f32 %v1405_v60, %v1362_v48  ;;  %v136_v48 = vld [vmem:[%s19227_s3 + $0x128] sm:$0xff]  ;;  %v164_v60 = vpack.c.bf16 %v134_v56, %v133_v53 }
 0xb20   :  { %v1407_v54 = vpop.permute.xlu0 %1406 }
 0xb21   :  { %13235 = vtanh.f32 %v14668_v61  ;;  %v14673_v0 = vadd.f32 %v1407_v54, %v1363_v63  ;;  %v165_v63 = vpack.c.bf16 %v136_v48, %v135_v57  ;;  %11892 = vmatmul.mubr.msk.bf16.gmra.mrb[32].mxu0 %vm177_vm0, %v164_v60  ;;  %v137_v54 = vld [vmem:[%s19227_s3 + $0x130] sm:$0xff] }
 0xb23   :  { %13237 = vtanh.f32 %v14673_v0  ;;  %11895 = vmatprep.mubr.msk.bf16.mxu0 %vm177_vm0, %v165_v63 }
 0xb26   :  { %v1409_v5 = vpop.permute.xlu1 %1408 }
 0xb27   :  { %v14678_v9 = vadd.f32 %v1409_v5, %v1364_v58  ;;  %v138_v58 = vld [vmem:[%s19227_s3 + $0x138] sm:$0xff]  ;;  %v139_v5 = vld [vmem:[%s19227_s3 + $0x140] sm:$0xff] }
 0xb28   :  { %v1411_v11 = vpop.permute.xlu0 %1410 }
 0xb29   :  { %13239 = vtanh.f32 %v14678_v9  ;;  %v14683_v55 = vadd.f32 %v1411_v11, %v1365_v52  ;;  %v140_v52 = vld [vmem:[%s19227_s3 + $0x148] sm:$0xff]  ;;  %v166_v11 = vpack.c.bf16 %v138_v58, %v137_v54 }
 0xb2b   :  { %v13236_v62 = vpop.eup %13235  ;;  %13241 = vtanh.f32 %v14683_v55  ;;  %11896 = vmatmul.mubr.msk.bf16.gmra.mrb[36].mxu0 %vm177_vm0, %v166_v11 }
 0xb2c   :  { %1440 = vrot.lane.b32.xlu1 %v13236_v62, %s19164_s28  ;;  %v167_v62 = vpack.c.bf16 %v140_v52, %v139_v5 }
 0xb2d   :  { %v13238_v12 = vpop.eup %13237 }
 0xb2e   :  { %v1413_v2 = vpop.permute.xlu1 %1412  ;;  %1442 = vrot.lane.b32.xlu0 %v13238_v12, %s19164_s28  ;;  %11899 = vmatprep.mubr.msk.bf16.mxu0 %vm177_vm0, %v167_v62  ;;  %v141_v12 = vld [vmem:[%s19227_s3 + $0x150] sm:$0xff] }
 0xb2f   :  { %v14690_v17 = vadd.f32 %v1413_v2, %v1366_v59  ;;  %v142_v59 = vld [vmem:[%s19227_s3 + $0x158] sm:$0xff]  ;;  %v143_v2 = vld [vmem:[%s19227_s3 + $0x160] sm:$0xff] }
 0xb30   :  { %v1415_v24 = vpop.permute.xlu0 %1414 }
 0xb31   :  { %13243 = vtanh.f32 %v14690_v17  ;;  %v14695_v28 = vadd.f32 %v1415_v24, %v1367_v51  ;;  %v144_v51 = vld [vmem:[%s19227_s3 + $0x168] sm:$0xff]  ;;  %v168_v24 = vpack.c.bf16 %v142_v59, %v141_v12 }
 0xb33   :  { %v13240_v8 = vpop.eup %13239  ;;  %13245 = vtanh.f32 %v14695_v28  ;;  %11900 = vmatmul.mubr.msk.bf16.gmra.mrb[40].mxu0 %vm177_vm0, %v168_v24 }
 0xb34   :  { %1444 = vrot.lane.b32.xlu1 %v13240_v8, %s19164_s28  ;;  %v169_v8 = vpack.c.bf16 %v144_v51, %v143_v2 }
 0xb35   :  { %v13242_v23 = vpop.eup %13241 }
 0xb36   :  { %1446 = vrot.lane.b32.xlu0 %v13242_v23, %s19164_s28  ;;  %11903 = vmatprep.mubr.msk.bf16.mxu0 %vm177_vm0, %v169_v8  ;;  %v145_v23 = vld [vmem:[%s19227_s3 + $0x170] sm:$0xff] }
 0xb3b   :  { %v13244_v3 = vpop.eup %13243 }
 0xb3c   :  { %1448 = vrot.lane.b32.xlu1 %v13244_v3, %s19164_s28  ;;  %v146_v3 = vld [vmem:[%s19227_s3 + $0x178] sm:$0xff] }
 0xb3d   :  { %v13246_v20 = vpop.eup %13245 }
 0xb3e   :  { %1450 = vrot.lane.b32.xlu0 %v13246_v20, %s19164_s28  ;;  %v170_v20 = vpack.c.bf16 %v146_v3, %v145_v23 }
 0xb40   :  { %11904 = vmatmul.mubr.msk.bf16.gmra.mrb[44].mxu0 %vm177_vm0, %v170_v20 }
 0xb9e   :  { %v1441_v6 = vpop.permute.xlu1 %1440 }
 0xb9f   :  { %v14801_v33 = vmul.f32 %v1441_v6, %v14620_v7 }
 0xba0   :  { %v1443_v18 = vpop.permute.xlu0 %1442 }
 0xba1   :  { %13247 = vtanh.f32 %v14801_v33  ;;  %v14805_v19 = vmul.f32 %v1443_v18, %v14626_v14 }
 0xba3   :  { %13249 = vtanh.f32 %v14805_v19 }
 0xba6   :  { %v1445_v32 = vpop.permute.xlu1 %1444 }
 0xba7   :  { %v14809_v35 = vmul.f32 %v1445_v32, %v14632_v34 }
 0xba8   :  { %v1447_v37 = vpop.permute.xlu0 %1446 }
 0xba9   :  { %13251 = vtanh.f32 %v14809_v35  ;;  %v14813_v26 = vmul.f32 %v1447_v37, %v14638_v21 }
 0xbab   :  { %v13248_v7 = vpop.eup %13247  ;;  %13253 = vtanh.f32 %v14813_v26 }
 0xbac   :  { %1476 = vrot.lane.b32.xlu1 %v13248_v7, %s14013_s29 }
 0xbad   :  { %v13250_v15 = vpop.eup %13249 }
 0xbae   :  { %v1449_v14 = vpop.permute.xlu1 %1448  ;;  %1478 = vrot.lane.b32.xlu0 %v13250_v15, %s14013_s29 }
 0xbaf   :  { %v14819_v38 = vmul.f32 %v1449_v14, %v14644_v36  ;;  %v14830_v36 = vpop.f32.mrb[20].mxu0 }
 0xbb0   :  { %v1451_v34 = vpop.permute.xlu0 %1450  ;;  %v14832_v45 = vpop.f32.mrb[21].mxu0 }
 0xbb1   :  { %13255 = vtanh.f32 %v14819_v38  ;;  %v14823_v31 = vmul.f32 %v1451_v34, %v14650_v41  ;;  %v14834_v41 = vpop.f32.mrb[22].mxu0 }
 0xbb2   :  { %v14836_v46 = vpop.f32.mrb[23].mxu0 }
 0xbb3   :  { %v13252_v21 = vpop.eup %13251  ;;  %13257 = vtanh.f32 %v14823_v31  ;;  %v14838_v47 = vpop.f32.mrb[24].mxu0 }
 0xbb4   :  { %1480 = vrot.lane.b32.xlu1 %v13252_v21, %s14013_s29  ;;  %v14840_v50 = vpop.f32.mrb[25].mxu0 }
 0xbb5   :  { %v13254_v29 = vpop.eup %13253  ;;  %v14843_v40 = vpop.f32.mrb[26].mxu0 }
 0xbb6   :  { %1482 = vrot.lane.b32.xlu0 %v13254_v29, %s14013_s29  ;;  %v14845_v53 = vpop.f32.mrb[27].mxu0 }
 0xbb7   :  { %v14850_v56 = vpop.f32.mrb[28].mxu0 }
 0xbb8   :  { %v14852_v48 = vpop.f32.mrb[29].mxu0 }
 0xbb9   :  { %v14856_v60 = vpop.f32.mrb[30].mxu0 }
 0xbba   :  { %v14859_v54 = vpop.f32.mrb[31].mxu0 }
 0xbbb   :  { %v13256_v42 = vpop.eup %13255 }
 0xbbc   :  { %1484 = vrot.lane.b32.xlu1 %v13256_v42, %s14013_s29 }
 0xbbd   :  { %v13258_v44 = vpop.eup %13257 }
 0xbbe   :  { %1486 = vrot.lane.b32.xlu0 %v13258_v44, %s14013_s29 }
 0xbf4   :  { %v14862_v58 = vpop.f32.mrb[32].mxu0 }
 0xbf5   :  { %v14864_v52 = vpop.f32.mrb[33].mxu0 }
 0xbf6   :  { %v14867_v11 = vpop.f32.mrb[34].mxu0 }
 0xbf7   :  { %v14869_v12 = vpop.f32.mrb[35].mxu0 }
 0xbfe   :  { %v14872_v59 = vpop.f32.mrb[36].mxu0 }
 0xbff   :  { %v14874_v2 = vpop.f32.mrb[37].mxu0 }
 0xc00   :  { %v14876_v51 = vpop.f32.mrb[38].mxu0 }
 0xc01   :  { %v14878_v24 = vpop.f32.mrb[39].mxu0 }
 0xc06   :  { %v14880_v8 = vpop.f32.mrb[40].mxu0 }
 0xc07   :  { %v14882_v23 = vpop.f32.mrb[41].mxu0 }
 0xc08   :  { %v14884_v3 = vpop.f32.mrb[42].mxu0 }
 0xc09   :  { %v14886_v20 = vpop.f32.mrb[43].mxu0 }
 0xc13   :  { %v14888_v6 = vpop.f32.mrb[44].mxu0 }
 0xc14   :  { %v14890_v18 = vpop.f32.mrb[45].mxu0 }
 0xc15   :  { %v14892_v32 = vpop.f32.mrb[46].mxu0 }
 0xc16   :  { %v14894_v37 = vpop.f32.mrb[47].mxu0 }
 0xc1e   :  { %v1477_v49 = vpop.permute.xlu1 %1476 }
 0xc1f   :  { %11997 = vmatprep.mubr.msk.f32.mxu0 %vm523_vm5, %v1477_v49 }
 0xc20   :  { %v1479_v43 = vpop.permute.xlu0 %1478 }
 0xc21   :  { %11998 = vmatmul.mubr.msk.f32.vlgmr.msra.gmra.mrb[48].mxu0 %vm523_vm5, %v1479_v43 }
 0xc22   :  { %12823 = vmatpush3.bf16.msra.mxu0 %v14319_v13 }
 0xc23   :  { %12825 = vmatprep.subr.bf16.mxu0 %v14324_v16 }
 0xc26   :  { %v1481_v57 = vpop.permute.xlu1 %1480  ;;  %12827 = vmatpush3.bf16.msra.mxu0 %v14324_v16 }
 0xc27   :  { %12000 = vmatprep.mubr.msk.f32.mxu0 %vm523_vm5, %v1481_v57  ;;  %12039 = vmatprep.subr.bf16.mxu0 %v19171_v4 }
 0xc28   :  { %v1483_v63 = vpop.permute.xlu0 %1482 }
 0xc29   :  { %12001 = vmatmul.mubr.msk.f32.gmra.mrb[50].mxu0 %vm523_vm5, %v1483_v63 }
 0xc2e   :  { %v1485_v5 = vpop.permute.xlu1 %1484 }
 0xc2f   :  { %12003 = vmatprep.mubr.msk.f32.mxu0 %vm523_vm5, %v1485_v5 }
 0xc30   :  { %v1487_v62 = vpop.permute.xlu0 %1486 }
 0xc31   :  { %12004 = vmatmul.mubr.msk.f32.gmra.mrb[52].mxu0 %vm523_vm5, %v1487_v62 }
 0xcf4   :  { %v11999_v7 = vpop.f32.mrb[48].mxu0 }
 0xcf5   :  { %1602 = vperm.xlu0 %13046, %v11999_v7   ;;  %v1566_v15 = vpop.f32.mrb[49].mxu0 }
 0xcf6   :  { %1597 = vperm.xlu1 %13047, %v1566_v15  }
 0xcfc   :  { %v12002_v14 = vpop.f32.mrb[50].mxu0 }
 0xcfd   :  { %1612 = vperm.xlu0 %13046, %v12002_v14   ;;  %v1576_v34 = vpop.f32.mrb[51].mxu0 }
 0xcfe   :  { %1607 = vperm.xlu1 %13047, %v1576_v34  }
 0xd04   :  { %v12005_v21 = vpop.f32.mrb[52].mxu0 }
 0xd05   :  { %1622 = vperm.xlu0 %13046, %v12005_v21   ;;  %v1586_v29 = vpop.f32.mrb[53].mxu0 }
 0xd06   :  { %1617 = vperm.xlu1 %13047, %v1586_v29  }
 0xd74   :  { %v1603_v42 = vpop.permute.xlu0 %1602 }
 0xd75   :  { %v1626_v44 = vmul.f32 0.0, %v1603_v42  ;;  %v1598_v49 = vpop.permute.xlu1 %1597 }
 0xd76   :  { %v1625_v43 = vmul.f32 0.0, %v1598_v49 }
 0xd77   :  { %v1632_v57 = vadd.f32 %v1626_v44, %v14805_v19 }
 0xd78   :  { %v1631_v63 = vadd.f32 %v1625_v43, %v14801_v33 }
 0xd7a   :  { %v1637_v5 = vpack.c.bf16 %v1632_v57, %v1631_v63 }
 0xd7c   :  { %1643 = vrot.lane.b32.xlu1 %v1637_v5, %s14013_s29  ;;  %v1613_v62 = vpop.permute.xlu0 %1612 }
 0xd7d   :  { %v1628_v7 = vmul.f32 0.0, %v1613_v62  ;;  %v1608_v15 = vpop.permute.xlu1 %1607 }
 0xd7e   :  { %v1627_v14 = vmul.f32 0.0, %v1608_v15 }
 0xd7f   :  { %v1634_v34 = vadd.f32 %v1628_v7, %v14813_v26  ;;  %v14918_v26 = vld [vmem:[%s19231_s5] ss:$0 sm:$0xff] }
 0xd80   :  { %v1633_v21 = vadd.f32 %v1627_v14, %v14809_v35 }
 0xd82   :  { %v1638_v29 = vpack.c.bf16 %v1634_v34, %v1633_v21  ;;  %v365_v34 = vadd.f32 %v14918_v26, %v14832_v45 }
 0xd84   :  { %1645 = vrot.lane.b32.xlu0 %v1638_v29, %s14013_s29  ;;  %v1623_v42 = vpop.permute.xlu0 %1622 }
 0xd85   :  { %v1630_v49 = vmul.f32 0.0, %v1623_v42  ;;  %v1618_v10 = vpop.permute.xlu1 %1617 }
 0xd86   :  { %v1629_v19 = vmul.f32 0.0, %v1618_v10 }
 0xd87   :  { %v1636_v33 = vadd.f32 %v1630_v49, %v14823_v31  ;;  %v360_v31 = vadd.f32 %v14918_v26, %v14604_v39  ;;  %v495_v39 = vmul.f32 %v365_v34, %v14178_v22 }
 0xd88   :  { %v1635_v44 = vadd.f32 %v1629_v19, %v14819_v38  ;;  %v357_v38 = vadd.f32 %v14918_v26, %v14602_v25  ;;  %v368_v25 = vadd.f32 %v14918_v26, %v14836_v46 }
 0xd89   :  { %v494_v15 = vmul.f32 %v360_v31, %v14178_v22 }
 0xd8a   :  { %v1639_v43 = vpack.c.bf16 %v1636_v33, %v1635_v44  ;;  %v493_v63 = vmul.f32 %v357_v38, %v14178_v22  ;;  %v496_v33 = vmul.f32 %v368_v25, %v14178_v22 }
 0xd8c   :  { %1647 = vrot.lane.b32.xlu1 %v1639_v43, %s14013_s29  ;;  %v373_v43 = vadd.f32 %v14918_v26, %v14830_v36 }
 0xd8e   :  { %v497_v31 = vmul.f32 %v373_v43, %v14178_v22 }
 0xdee   :  { %v1644_v57 = vpop.permute.xlu1 %1643 }
 0xdef   :  { %12011 = vmatmul.mubr.msk.bf16.vlgmr.msra.gmra.mrb[48].mxu1 %vm523_vm5, %v1644_v57 }
 0xdf0   :  { %12014 = vmatprep.mubr.msk.bf16.mxu1 %vm14009_vm1, %v19171_v4  ;;  %12831 = vmatpush3.bf16.msra.mxu1 %v14319_v13 }
 0xdf1   :  { %12833 = vmatprep.subr.bf16.mxu1 %v14324_v16 }
 0xdf4   :  { %12835 = vmatpush3.bf16.msra.mxu1 %v14324_v16 }
 0xdf6   :  { %v1646_v10 = vpop.permute.xlu0 %1645 }
 0xdf7   :  { %12015 = vmatmul.mubr.msk.bf16.gmra.mrb[52].mxu1 %vm523_vm5, %v1646_v10 }
 0xdf8   :  { %12018 = vmatprep.mubr.msk.bf16.mxu1 %vm14009_vm1, %v19171_v4 }
 0xdfe   :  { %v1648_v35 = vpop.permute.xlu1 %1647 }
 0xdff   :  { %12019 = vmatmul.mubr.msk.bf16.gmra.mrb[56].mxu1 %vm523_vm5, %v1648_v35  ;;  %v376_v35 = vadd.f32 %v14918_v26, %v14834_v41 }
 0xec2   :  { %v1692_v5 = vpop.f32.mrb[48].mxu1 }
 0xec3   :  { %v1715_v62 = vadd.f32 %v1692_v5, %v493_v63  ;;  %v12012_v7 = vpop.f32.mrb[49].mxu1 }
 0xec4   :  { %v1695_v14 = vpop.f32.mrb[50].mxu1 }
 0xec5   :  { %13259 = vtanh.f32 %v1715_v62  ;;  %v1716_v21 = vadd.f32 %v1695_v14, %v494_v15  ;;  %v12013_v29 = vpop.f32.mrb[51].mxu1  ;;  %v498_v15 = vmul.f32 %v376_v35, %v14178_v22 }
 0xec7   :  { %13261 = vtanh.f32 %v1716_v21 }
 0xeca   :  { %v1700_v42 = vpop.f32.mrb[52].mxu1 }
 0xecb   :  { %v1717_v49 = vadd.f32 %v1700_v42, %v495_v39  ;;  %v12016_v19 = vpop.f32.mrb[53].mxu1 }
 0xecc   :  { %v1703_v44 = vpop.f32.mrb[54].mxu1 }
 0xecd   :  { %13263 = vtanh.f32 %v1717_v49  ;;  %v1718_v45 = vadd.f32 %v1703_v44, %v496_v33  ;;  %v12017_v57 = vpop.f32.mrb[55].mxu1 }
 0xecf   :  { %v13260_v10 = vpop.eup %13259  ;;  %13265 = vtanh.f32 %v1718_v45 }
 0xed0   :  { %v1727_v46 = vmul.f32 %v13260_v10, %v14178_v22 }
 0xed1   :  { %v13262_v38 = vpop.eup %13261 }
 0xed2   :  { %v1708_v63 = vpop.f32.mrb[56].mxu1  ;;  %v14939_v5 = vadd.f32 %v1727_v46, %v14229_v1  ;;  %v1728_v62 = vmul.f32 %v13262_v38, %v14178_v22 }
 0xed3   :  { %v1719_v36 = vadd.f32 %v1708_v63, %v497_v31  ;;  %v12020_v7 = vpop.f32.mrb[57].mxu1 }
 0xed4   :  { %1751 = vrot.lane.b32.xlu0 %v14939_v5, %s19233_s0  ;;  %v1711_v41 = vpop.f32.mrb[58].mxu1  ;;  %v14946_v14 = vadd.f32 %v1728_v62, %v14229_v1 }
 0xed5   :  { %13267 = vtanh.f32 %v1719_v36  ;;  %v1720_v34 = vadd.f32 %v1711_v41, %v498_v15  ;;  %v12021_v21 = vpop.f32.mrb[59].mxu1 }
 0xed6   :  { %1753 = vrot.lane.b32.xlu1 %v14946_v14, %s19233_s0 }
 0xed7   :  { %v13264_v29 = vpop.eup %13263  ;;  %13269 = vtanh.f32 %v1720_v34 }
 0xed8   :  { %v1729_v25 = vmul.f32 %v13264_v29, %v14178_v22  ;;  %v1739_v29 = vmul.f32 %v14939_v5, %v14668_v61 }
 0xed9   :  { %v13266_v39 = vpop.eup %13265 }
 0xeda   :  { %v14952_v42 = vadd.f32 %v1729_v25, %v14229_v1  ;;  %v1730_v49 = vmul.f32 %v13266_v39, %v14178_v22 }
 0xedc   :  { %1755 = vrot.lane.b32.xlu0 %v14952_v42, %s19233_s0  ;;  %v14958_v19 = vadd.f32 %v1730_v49, %v14229_v1  ;;  %v1740_v49 = vmul.f32 %v14946_v14, %v14673_v0 }
 0xede   :  { %1757 = vrot.lane.b32.xlu1 %v14958_v19, %s19233_s0  ;;  %v1742_v61 = vmul.f32 %v14958_v19, %v14683_v55 }
 0xedf   :  { %v13268_v33 = vpop.eup %13267 }
 0xee0   :  { %v1731_v44 = vmul.f32 %v13268_v33, %v14178_v22 }
 0xee1   :  { %v13270_v43 = vpop.eup %13269 }
 0xee2   :  { %v14964_v45 = vadd.f32 %v1731_v44, %v14229_v1  ;;  %v1732_v57 = vmul.f32 %v13270_v43, %v14178_v22  ;;  %v1741_v43 = vmul.f32 %v14952_v42, %v14678_v9 }
 0xee4   :  { %1759 = vrot.lane.b32.xlu0 %v14964_v45, %s19233_s0  ;;  %v14970_v10 = vadd.f32 %v1732_v57, %v14229_v1  ;;  %v1743_v9 = vmul.f32 %v14964_v45, %v14690_v17 }
 0xee6   :  { %1761 = vrot.lane.b32.xlu1 %v14970_v10, %s19233_s0  ;;  %v1744_v55 = vmul.f32 %v14970_v10, %v14695_v28 }
 0xf46   :  { %v1752_v35 = vpop.permute.xlu0 %1751 }
 0xf47   :  { %v1769_v46 = vmul.f32 %v1752_v35, %v14939_v5 }
 0xf48   :  { %v1754_v38 = vpop.permute.xlu1 %1753 }
 0xf49   :  { %v1770_v31 = vmul.f32 %v1754_v38, %v14946_v14  ;;  %1781 = vrot.lane.b32.xlu0 %v1769_v46, %s14013_s29 }
 0xf4b   :  { %1783 = vrot.lane.b32.xlu1 %v1770_v31, %s14013_s29 }
 0xf4e   :  { %v1756_v63 = vpop.permute.xlu0 %1755 }
 0xf4f   :  { %v1771_v62 = vmul.f32 %v1756_v63, %v14952_v42 }
 0xf50   :  { %v1758_v36 = vpop.permute.xlu1 %1757 }
 0xf51   :  { %v1772_v7 = vmul.f32 %v1758_v36, %v14958_v19  ;;  %1785 = vrot.lane.b32.xlu0 %v1771_v62, %s14013_s29 }
 0xf53   :  { %1787 = vrot.lane.b32.xlu1 %v1772_v7, %s14013_s29 }
 0xf56   :  { %v1760_v15 = vpop.permute.xlu0 %1759 }
 0xf57   :  { %v1773_v41 = vmul.f32 %v1760_v15, %v14964_v45 }
 0xf58   :  { %v1762_v34 = vpop.permute.xlu1 %1761 }
 0xf59   :  { %v1774_v21 = vmul.f32 %v1762_v34, %v14970_v10  ;;  %1789 = vrot.lane.b32.xlu0 %v1773_v41, %s14013_s29 }
 0xf5b   :  { %1791 = vrot.lane.b32.xlu1 %v1774_v21, %s14013_s29 }
 0xfbb   :  { %v1782_v25 = vpop.permute.xlu0 %1781 }
 0xfbc   :  { %v14988_v39 = vadd.f32 %v1782_v25, %v1739_v29 }
 0xfbd   :  { %v1784_v33 = vpop.permute.xlu1 %1783 }
 0xfbe   :  { %13271 = vtanh.f32 %v14988_v39  ;;  %v14993_v44 = vadd.f32 %v1784_v33, %v1740_v49 }
 0xfc0   :  { %13273 = vtanh.f32 %v14993_v44 }
 0xfc3   :  { %v1786_v57 = vpop.permute.xlu0 %1785 }
 0xfc4   :  { %v14998_v35 = vadd.f32 %v1786_v57, %v1741_v43 }
 0xfc5   :  { %v1788_v46 = vpop.permute.xlu1 %1787 }
 0xfc6   :  { %13275 = vtanh.f32 %v14998_v35  ;;  %v15003_v0 = vadd.f32 %v1788_v46, %v1742_v61 }
 0xfc8   :  { %v13272_v38 = vpop.eup %13271  ;;  %13277 = vtanh.f32 %v15003_v0 }
 0xfc9   :  { %1817 = vrot.lane.b32.xlu0 %v13272_v38, %s19233_s0 }
 0xfca   :  { %v13274_v31 = vpop.eup %13273 }
 0xfcb   :  { %1819 = vrot.lane.b32.xlu1 %v13274_v31, %s19233_s0  ;;  %v1790_v63 = vpop.permute.xlu0 %1789 }
 0xfcc   :  { %v15010_v62 = vadd.f32 %v1790_v63, %v1743_v9 }
 0xfcd   :  { %v1792_v36 = vpop.permute.xlu1 %1791 }
 0xfce   :  { %13279 = vtanh.f32 %v15010_v62  ;;  %v15015_v7 = vadd.f32 %v1792_v36, %v1744_v55 }
 0xfd0   :  { %v13276_v15 = vpop.eup %13275  ;;  %13281 = vtanh.f32 %v15015_v7 }
 0xfd1   :  { %1821 = vrot.lane.b32.xlu0 %v13276_v15, %s19233_s0 }
 0xfd2   :  { %v13278_v41 = vpop.eup %13277 }
 0xfd3   :  { %1823 = vrot.lane.b32.xlu1 %v13278_v41, %s19233_s0 }
 0xfd8   :  { %v13280_v17 = vpop.eup %13279 }
 0xfd9   :  { %1825 = vrot.lane.b32.xlu0 %v13280_v17, %s19233_s0 }
 0xfda   :  { %v13282_v34 = vpop.eup %13281 }
 0xfdb   :  { %1827 = vrot.lane.b32.xlu1 %v13282_v34, %s19233_s0 }
0x103b   :  { %v1818_v28 = vpop.permute.xlu0 %1817 }
0x103c   :  { %v15023_v21 = vmul.f32 %v1818_v28, %v14939_v5 }
0x103d   :  { %v1820_v29 = vpop.permute.xlu1 %1819 }
0x103e   :  { %13283 = vtanh.f32 %v15023_v21  ;;  %v1836_v25 = vmul.f32 %v1820_v29, %v14946_v14 }
0x1040   :  { %13285 = vtanh.f32 %v1836_v25 }
0x1043   :  { %v1822_v49 = vpop.permute.xlu0 %1821 }
0x1044   :  { %v15028_v33 = vmul.f32 %v1822_v49, %v14952_v42 }
0x1045   :  { %v1824_v43 = vpop.permute.xlu1 %1823 }
0x1046   :  { %13287 = vtanh.f32 %v15028_v33  ;;  %v1838_v57 = vmul.f32 %v1824_v43, %v14958_v19 }
0x1048   :  { %v13284_v61 = vpop.eup %13283  ;;  %13289 = vtanh.f32 %v1838_v57 }
0x1049   :  { %1853 = vrot.lane.b32.xlu0 %v13284_v61, %s14013_s29 }
0x104a   :  { %v13286_v5 = vpop.eup %13285 }
0x104b   :  { %1855 = vrot.lane.b32.xlu1 %v13286_v5, %s14013_s29  ;;  %v1826_v46 = vpop.permute.xlu0 %1825 }
0x104c   :  { %v15035_v14 = vmul.f32 %v1826_v46, %v14964_v45 }
0x104d   :  { %v1828_v38 = vpop.permute.xlu1 %1827 }
0x104e   :  { %13291 = vtanh.f32 %v15035_v14  ;;  %v1840_v42 = vmul.f32 %v1828_v38, %v14970_v10 }
0x1050   :  { %v13288_v31 = vpop.eup %13287  ;;  %13293 = vtanh.f32 %v1840_v42 }
0x1051   :  { %1857 = vrot.lane.b32.xlu0 %v13288_v31, %s14013_s29 }
0x1052   :  { %v13290_v19 = vpop.eup %13289 }
0x1053   :  { %1859 = vrot.lane.b32.xlu1 %v13290_v19, %s14013_s29 }
0x1058   :  { %v13292_v9 = vpop.eup %13291 }
0x1059   :  { %1861 = vrot.lane.b32.xlu0 %v13292_v9, %s14013_s29 }
0x105a   :  { %v13294_v63 = vpop.eup %13293 }
0x105b   :  { %1863 = vrot.lane.b32.xlu1 %v13294_v63, %s14013_s29 }
0x10bb   :  { %v1854_v45 = vpop.permute.xlu0 %1853 }
0x10bc   :  { %12030 = vmatprep.mubr.msk.f32.mxu0 %vm523_vm5, %v1854_v45 }
0x10bd   :  { %v1856_v55 = vpop.permute.xlu1 %1855 }
0x10be   :  { %12031 = vmatmul.mubr.msk.f32.vlgmr.msra.gmra.mrb[54].mxu0 %vm523_vm5, %v1856_v55 }
0x10bf   :  { %12040 = vmatpush3.bf16.msra.mxu0 %v14185_v27 }
0x10c0   :  { %12041 = vmatprep.subr.bf16.mxu0 %v19171_v4 }
0x10c3   :  { %v1858_v10 = vpop.permute.xlu0 %1857  ;;  %12042 = vmatpush3.bf16.msra.mxu0 %v14195_v30 }
0x10c4   :  { %12033 = vmatprep.mubr.msk.f32.mxu0 %vm523_vm5, %v1858_v10  ;;  %12089 = vmatprep.subr.bf16.mxu0 %v19171_v4 }
0x10c5   :  { %v1860_v36 = vpop.permute.xlu1 %1859 }
0x10c6   :  { %12034 = vmatmul.mubr.msk.f32.gmra.mrb[56].mxu0 %vm523_vm5, %v1860_v36 }
0x10cb   :  { %v1862_v15 = vpop.permute.xlu0 %1861 }
0x10cc   :  { %12036 = vmatprep.mubr.msk.f32.mxu0 %vm523_vm5, %v1862_v15 }
0x10cd   :  { %v1864_v41 = vpop.permute.xlu1 %1863 }
0x10ce   :  { %12037 = vmatmul.mubr.msk.f32.gmra.mrb[58].mxu0 %vm523_vm5, %v1864_v41 }
0x10cf   :  { %12043 = vmatprep.mubr.msk.bf16.mxu0 %vm14009_vm1, %v19171_v4 }
0x1191   :  { %v12032_v17 = vpop.f32.mrb[54].mxu0 }
0x1192   :  { %1979 = vperm.xlu1 %13047, %v12032_v17   ;;  %v1943_v34 = vpop.f32.mrb[55].mxu0 }
0x1193   :  { %1974 = vperm.xlu0 %13046, %v1943_v34  }
0x1199   :  { %v12035_v28 = vpop.f32.mrb[56].mxu0 }
0x119a   :  { %1989 = vperm.xlu1 %13047, %v12035_v28   ;;  %v1953_v29 = vpop.f32.mrb[57].mxu0 }
0x119b   :  { %1984 = vperm.xlu0 %13046, %v1953_v29  }
0x11a1   :  { %v12038_v49 = vpop.f32.mrb[58].mxu0 }
0x11a2   :  { %1999 = vperm.xlu1 %13047, %v12038_v49   ;;  %v1963_v43 = vpop.f32.mrb[59].mxu0 }
0x11a3   :  { %1994 = vperm.xlu0 %13046, %v1963_v43  }
0x1211   :  { %v1980_v61 = vpop.permute.xlu1 %1979 }
0x1212   :  { %v2003_v5 = vmul.f32 0.0, %v1980_v61  ;;  %v1975_v46 = vpop.permute.xlu0 %1974 }
0x1213   :  { %v2002_v38 = vmul.f32 0.0, %v1975_v46 }
0x1214   :  { %v2009_v31 = vadd.f32 %v2003_v5, %v1836_v25 }
0x1215   :  { %v2008_v19 = vadd.f32 %v2002_v38, %v15023_v21 }
0x1217   :  { %v2014_v9 = vpack.c.bf16 %v2009_v31, %v2008_v19 }
0x1219   :  { %v1990_v63 = vpop.permute.xlu1 %1989  ;;  %2020 = vrot.lane.b32.xlu0 %v2014_v9, %s14013_s29  ;;  %v389_v9 = vadd.f32 %v14918_v26, %v14838_v47 }
0x121a   :  { %v2005_v45 = vmul.f32 0.0, %v1990_v63  ;;  %v1985_v55 = vpop.permute.xlu0 %1984 }
0x121b   :  { %v2004_v10 = vmul.f32 0.0, %v1985_v55 }
0x121c   :  { %v2011_v36 = vadd.f32 %v2005_v45, %v1838_v57 }
0x121d   :  { %v2010_v15 = vadd.f32 %v2004_v10, %v15028_v33 }
0x121f   :  { %v2015_v41 = vpack.c.bf16 %v2011_v36, %v2010_v15 }
0x1221   :  { %v2000_v17 = vpop.permute.xlu1 %1999  ;;  %2022 = vrot.lane.b32.xlu1 %v2015_v41, %s14013_s29 }
0x1222   :  { %v2007_v34 = vmul.f32 0.0, %v2000_v17  ;;  %v1995_v28 = vpop.permute.xlu0 %1994  ;;  %v397_v17 = vadd.f32 %v14918_v26, %v14852_v48 }
0x1223   :  { %v2006_v29 = vmul.f32 0.0, %v1995_v28 }
0x1224   :  { %v2013_v25 = vadd.f32 %v2007_v34, %v1840_v42  ;;  %v384_v42 = vadd.f32 %v14918_v26, %v14845_v53  ;;  %v501_v53 = vmul.f32 %v389_v9, %v14178_v22 }
0x1225   :  { %v2012_v21 = vadd.f32 %v2006_v29, %v15035_v14  ;;  %v381_v14 = vadd.f32 %v14918_v26, %v14840_v50  ;;  %v392_v50 = vadd.f32 %v14918_v26, %v14843_v40  ;;  %v400_v29 = vadd.f32 %v14918_v26, %v14859_v54 }
0x1226   :  { %v500_v31 = vmul.f32 %v384_v42, %v14178_v22 }
0x1227   :  { %v2016_v49 = vpack.c.bf16 %v2013_v25, %v2012_v21  ;;  %v499_v61 = vmul.f32 %v381_v14, %v14178_v22  ;;  %v502_v15 = vmul.f32 %v392_v50, %v14178_v22  ;;  %v503_v21 = vmul.f32 %v397_v17, %v14178_v22 }
0x1228   :  { %v504_v14 = vmul.f32 %v400_v29, %v14178_v22 }
0x1229   :  { %2024 = vrot.lane.b32.xlu0 %v2016_v49, %s14013_s29 }
0x128b   :  { %v2021_v43 = vpop.permute.xlu0 %2020 }
0x128c   :  { %12044 = vmatmul.mubr.msk.bf16.vlgmr.msra.gmra.mrb[60].mxu0 %vm523_vm5, %v2021_v43 }
0x128d   :  { %12047 = vmatprep.mubr.msk.bf16.mxu0 %vm14009_vm1, %v19171_v4  ;;  %12090 = vmatpush3.bf16.msra.mxu0 %v14185_v27 }
0x128e   :  { %12091 = vmatprep.subr.bf16.mxu0 %v19171_v4 }
0x1291   :  { %12092 = vmatpush3.bf16.msra.mxu0 %v14195_v30 }
0x1292   :  { %12853 = vmatprep.subr.bf16.mxu0 %v14319_v13 }
0x1293   :  { %v2023_v33 = vpop.permute.xlu1 %2022 }
0x1294   :  { %12048 = vmatmul.mubr.msk.bf16.gmra.mrb[64].mxu0 %vm523_vm5, %v2023_v33 }
0x1295   :  { %12051 = vmatprep.mubr.msk.bf16.mxu0 %vm14009_vm1, %v19171_v4 }
0x129b   :  { %v2025_v57 = vpop.permute.xlu0 %2024 }
0x129c   :  { %12052 = vmatmul.mubr.msk.bf16.gmra.mrb[68].mxu0 %vm523_vm5, %v2025_v57 }
0x129d   :  { %12093 = vmatprep.mubr.msk.bf16.mxu0 %vm14009_vm1, %v19171_v4 }
0x135f   :  { %v2069_v5 = vpop.f32.mrb[60].mxu0 }
0x1360   :  { %v2092_v46 = vadd.f32 %v2069_v5, %v499_v61  ;;  %v12045_v38 = vpop.f32.mrb[61].mxu0 }
0x1361   :  { %v2072_v19 = vpop.f32.mrb[62].mxu0 }
0x1362   :  { %13295 = vtanh.f32 %v2092_v46  ;;  %v2093_v63 = vadd.f32 %v2072_v19, %v500_v31  ;;  %v12046_v45 = vpop.f32.mrb[63].mxu0 }
0x1364   :  { %13297 = vtanh.f32 %v2093_v63 }
0x1367   :  { %v2077_v55 = vpop.f32.mrb[64].mxu0 }
0x1368   :  { %v2094_v10 = vadd.f32 %v2077_v55, %v501_v53  ;;  %v12049_v36 = vpop.f32.mrb[65].mxu0 }
0x1369   :  { %v2080_v41 = vpop.f32.mrb[66].mxu0 }
0x136a   :  { %13299 = vtanh.f32 %v2094_v10  ;;  %v2095_v47 = vadd.f32 %v2080_v41, %v502_v15  ;;  %v12050_v34 = vpop.f32.mrb[67].mxu0 }
0x136c   :  { %v13296_v28 = vpop.eup %13295  ;;  %13301 = vtanh.f32 %v2095_v47 }
0x136d   :  { %v2104_v40 = vmul.f32 %v13296_v28, %v14178_v22 }
0x136e   :  { %v13298_v25 = vpop.eup %13297 }
0x136f   :  { %v2085_v49 = vpop.f32.mrb[68].mxu0  ;;  %v15093_v43 = vadd.f32 %v2104_v40, %v14229_v1  ;;  %v2105_v33 = vmul.f32 %v13298_v25, %v14178_v22 }
0x1370   :  { %v2096_v48 = vadd.f32 %v2085_v49, %v503_v21  ;;  %v12053_v57 = vpop.f32.mrb[69].mxu0 }
0x1371   :  { %2128 = vrot.lane.b32.xlu1 %v15093_v43, %s19233_s0  ;;  %v2088_v54 = vpop.f32.mrb[70].mxu0  ;;  %v15100_v42 = vadd.f32 %v2105_v33, %v14229_v1 }
0x1372   :  { %13303 = vtanh.f32 %v2096_v48  ;;  %v2097_v61 = vadd.f32 %v2088_v54, %v504_v14  ;;  %v12054_v5 = vpop.f32.mrb[71].mxu0  ;;  %v2116_v48 = vmul.f32 %v15093_v43, %v14988_v39 }
0x1373   :  { %2130 = vrot.lane.b32.xlu0 %v15100_v42, %s19233_s0  ;;  %v2117_v54 = vmul.f32 %v15100_v42, %v14993_v44 }
0x1374   :  { %v13300_v46 = vpop.eup %13299  ;;  %13305 = vtanh.f32 %v2097_v61 }
0x1375   :  { %v2106_v38 = vmul.f32 %v13300_v46, %v14178_v22 }
0x1376   :  { %v13302_v31 = vpop.eup %13301 }
0x1377   :  { %v15106_v19 = vadd.f32 %v2106_v38, %v14229_v1  ;;  %v2107_v9 = vmul.f32 %v13302_v31, %v14178_v22 }
0x1379   :  { %2132 = vrot.lane.b32.xlu1 %v15106_v19, %s19233_s0  ;;  %v15112_v63 = vadd.f32 %v2107_v9, %v14229_v1  ;;  %v2118_v46 = vmul.f32 %v15106_v19, %v14998_v35 }
0x137b   :  { %2134 = vrot.lane.b32.xlu0 %v15112_v63, %s19233_s0  ;;  %v2119_v39 = vmul.f32 %v15112_v63, %v15003_v0 }
0x137c   :  { %v13304_v45 = vpop.eup %13303 }
0x137d   :  { %v2108_v50 = vmul.f32 %v13304_v45, %v14178_v22 }
0x137e   :  { %v13306_v53 = vpop.eup %13305 }
0x137f   :  { %v15118_v55 = vadd.f32 %v2108_v50, %v14229_v1  ;;  %v2109_v10 = vmul.f32 %v13306_v53, %v14178_v22 }
0x1381   :  { %2136 = vrot.lane.b32.xlu1 %v15118_v55, %s19233_s0  ;;  %v15124_v36 = vadd.f32 %v2109_v10, %v14229_v1  ;;  %v2120_v35 = vmul.f32 %v15118_v55, %v15010_v62 }
0x1383   :  { %2138 = vrot.lane.b32.xlu0 %v15124_v36, %s19233_s0  ;;  %v2121_v0 = vmul.f32 %v15124_v36, %v15015_v7 }
0x13e3   :  { %v2129_v15 = vpop.permute.xlu1 %2128 }
0x13e4   :  { %v2146_v41 = vmul.f32 %v2129_v15, %v15093_v43 }
0x13e5   :  { %v2131_v17 = vpop.permute.xlu0 %2130 }
0x13e6   :  { %v2147_v47 = vmul.f32 %v2131_v17, %v15100_v42  ;;  %2158 = vrot.lane.b32.xlu1 %v2146_v41, %s14013_s29 }
0x13e8   :  { %2160 = vrot.lane.b32.xlu0 %v2147_v47, %s14013_s29 }
0x13eb   :  { %v2133_v34 = vpop.permute.xlu1 %2132 }
0x13ec   :  { %v2148_v28 = vmul.f32 %v2133_v34, %v15106_v19 }
0x13ed   :  { %v2135_v29 = vpop.permute.xlu0 %2134 }
0x13ee   :  { %v2149_v40 = vmul.f32 %v2135_v29, %v15112_v63  ;;  %2162 = vrot.lane.b32.xlu1 %v2148_v28, %s14013_s29 }
0x13f0   :  { %2164 = vrot.lane.b32.xlu0 %v2149_v40, %s14013_s29 }
0x13f3   :  { %v2137_v25 = vpop.permute.xlu1 %2136 }
0x13f4   :  { %v2150_v21 = vmul.f32 %v2137_v25, %v15118_v55 }
0x13f5   :  { %v2139_v49 = vpop.permute.xlu0 %2138 }
0x13f6   :  { %v2151_v33 = vmul.f32 %v2139_v49, %v15124_v36  ;;  %2166 = vrot.lane.b32.xlu1 %v2150_v21, %s14013_s29 }
0x13f8   :  { %2168 = vrot.lane.b32.xlu0 %v2151_v33, %s14013_s29 }
0x1458   :  { %v2159_v57 = vpop.permute.xlu1 %2158 }
0x1459   :  { %v15142_v14 = vadd.f32 %v2159_v57, %v2116_v48 }
0x145a   :  { %v2161_v61 = vpop.permute.xlu0 %2160 }
0x145b   :  { %13307 = vtanh.f32 %v15142_v14  ;;  %v15147_v5 = vadd.f32 %v2161_v61, %v2117_v54 }
0x145d   :  { %13309 = vtanh.f32 %v15147_v5 }
0x1460   :  { %v2163_v38 = vpop.permute.xlu1 %2162 }
0x1461   :  { %v15152_v31 = vadd.f32 %v2163_v38, %v2118_v46 }
0x1462   :  { %v2165_v9 = vpop.permute.xlu0 %2164 }
0x1463   :  { %13311 = vtanh.f32 %v15152_v31  ;;  %v15157_v44 = vadd.f32 %v2165_v9, %v2119_v39 }
0x1465   :  { %v13308_v45 = vpop.eup %13307  ;;  %13313 = vtanh.f32 %v15157_v44 }
0x1466   :  { %2194 = vrot.lane.b32.xlu1 %v13308_v45, %s19233_s0 }
0x1467   :  { %v13310_v50 = vpop.eup %13309 }
0x1468   :  { %v2167_v53 = vpop.permute.xlu1 %2166  ;;  %2196 = vrot.lane.b32.xlu0 %v13310_v50, %s19233_s0 }
0x1469   :  { %v15164_v10 = vadd.f32 %v2167_v53, %v2120_v35 }
0x146a   :  { %v2169_v15 = vpop.permute.xlu0 %2168 }
0x146b   :  { %13315 = vtanh.f32 %v15164_v10  ;;  %v15169_v41 = vadd.f32 %v2169_v15, %v2121_v0 }
0x146d   :  { %v13312_v17 = vpop.eup %13311  ;;  %13317 = vtanh.f32 %v15169_v41 }
0x146e   :  { %2198 = vrot.lane.b32.xlu1 %v13312_v17, %s19233_s0 }
0x146f   :  { %v13314_v47 = vpop.eup %13313 }
0x1470   :  { %2200 = vrot.lane.b32.xlu0 %v13314_v47, %s19233_s0 }
0x1475   :  { %v13316_v62 = vpop.eup %13315 }
0x1476   :  { %2202 = vrot.lane.b32.xlu1 %v13316_v62, %s19233_s0 }
0x1477   :  { %v13318_v34 = vpop.eup %13317 }
0x1478   :  { %2204 = vrot.lane.b32.xlu0 %v13318_v34, %s19233_s0 }
0x14d8   :  { %v2195_v7 = vpop.permute.xlu1 %2194 }
0x14d9   :  { %v2212_v28 = vmul.f32 %v2195_v7, %v15093_v43 }
0x14da   :  { %v2197_v29 = vpop.permute.xlu0 %2196 }
0x14db   :  { %13319 = vtanh.f32 %v2212_v28  ;;  %v2213_v40 = vmul.f32 %v2197_v29, %v15100_v42 }
0x14dd   :  { %13321 = vtanh.f32 %v2213_v40 }
0x14e0   :  { %v2199_v25 = vpop.permute.xlu1 %2198 }
0x14e1   :  { %v2214_v21 = vmul.f32 %v2199_v25, %v15106_v19 }
0x14e2   :  { %v2201_v49 = vpop.permute.xlu0 %2200 }
0x14e3   :  { %13323 = vtanh.f32 %v2214_v21  ;;  %v2215_v33 = vmul.f32 %v2201_v49, %v15112_v63 }
0x14e5   :  { %v13320_v48 = vpop.eup %13319  ;;  %13325 = vtanh.f32 %v2215_v33 }
0x14e6   :  { %2230 = vrot.lane.b32.xlu1 %v13320_v48, %s14013_s29 }
0x14e7   :  { %v13322_v57 = vpop.eup %13321 }
0x14e8   :  { %v2203_v54 = vpop.permute.xlu1 %2202  ;;  %2232 = vrot.lane.b32.xlu0 %v13322_v57, %s14013_s29 }
0x14e9   :  { %v2216_v43 = vmul.f32 %v2203_v54, %v15118_v55 }
0x14ea   :  { %v2205_v61 = vpop.permute.xlu0 %2204 }
0x14eb   :  { %13327 = vtanh.f32 %v2216_v43  ;;  %v2217_v42 = vmul.f32 %v2205_v61, %v15124_v36 }
0x14ed   :  { %v13324_v46 = vpop.eup %13323  ;;  %13329 = vtanh.f32 %v2217_v42 }
0x14ee   :  { %2234 = vrot.lane.b32.xlu1 %v13324_v46, %s14013_s29 }
0x14ef   :  { %v13326_v19 = vpop.eup %13325 }
0x14f0   :  { %2236 = vrot.lane.b32.xlu0 %v13326_v19, %s14013_s29 }
0x14f5   :  { %v13328_v63 = vpop.eup %13327 }
0x14f6   :  { %2238 = vrot.lane.b32.xlu1 %v13328_v63, %s14013_s29 }
0x14f7   :  { %v13330_v38 = vpop.eup %13329 }
0x14f8   :  { %2240 = vrot.lane.b32.xlu0 %v13330_v38, %s14013_s29 }
0x1558   :  { %v2231_v39 = vpop.permute.xlu1 %2230 }
0x1559   :  { %12063 = vmatprep.mubr.msk.f32.mxu1 %vm523_vm5, %v2231_v39 }
0x155a   :  { %v2233_v55 = vpop.permute.xlu0 %2232 }
0x155b   :  { %12064 = vmatmul.mubr.msk.f32.vlgmr.msra.gmra.mrb[60].mxu1 %vm523_vm5, %v2233_v55 }
0x1560   :  { %v2235_v36 = vpop.permute.xlu1 %2234 }
0x1561   :  { %12066 = vmatprep.mubr.msk.f32.mxu1 %vm523_vm5, %v2235_v36 }
0x1562   :  { %v2237_v9 = vpop.permute.xlu0 %2236 }
0x1563   :  { %12067 = vmatmul.mubr.msk.f32.gmra.mrb[62].mxu1 %vm523_vm5, %v2237_v9 }
0x1568   :  { %v2239_v45 = vpop.permute.xlu1 %2238 }
0x1569   :  { %12069 = vmatprep.mubr.msk.f32.mxu1 %vm523_vm5, %v2239_v45 }
0x156a   :  { %v2241_v50 = vpop.permute.xlu0 %2240 }
0x156b   :  { %12070 = vmatmul.mubr.msk.f32.gmra.mrb[64].mxu1 %vm523_vm5, %v2241_v50  ;;  %v408_v50 = vadd.f32 %v14918_v26, %v14856_v60 }
0x162e   :  { %v12065_v35 = vpop.f32.mrb[60].mxu1 }
0x162f   :  { %2356 = vperm.xlu0 %13046, %v12065_v35   ;;  %v2320_v53 = vpop.f32.mrb[61].mxu1 }
0x1630   :  { %2351 = vperm.xlu1 %13047, %v2320_v53  }
0x1636   :  { %v12068_v0 = vpop.f32.mrb[62].mxu1 }
0x1637   :  { %2366 = vperm.xlu0 %13046, %v12068_v0   ;;  %v2330_v15 = vpop.f32.mrb[63].mxu1 }
0x1638   :  { %2361 = vperm.xlu1 %13047, %v2330_v15  }
0x163e   :  { %v12071_v17 = vpop.f32.mrb[64].mxu1 }
0x163f   :  { %2376 = vperm.xlu0 %13046, %v12071_v17   ;;  %v2340_v47 = vpop.f32.mrb[65].mxu1  ;;  %v506_v17 = vmul.f32 %v408_v50, %v14178_v22 }
0x1640   :  { %2371 = vperm.xlu1 %13047, %v2340_v47  }
0x16ae   :  { %v2357_v62 = vpop.permute.xlu0 %2356 }
0x16af   :  { %v2380_v34 = vmul.f32 0.0, %v2357_v62  ;;  %v2352_v7 = vpop.permute.xlu1 %2351  ;;  %v413_v62 = vadd.f32 %v14918_v26, %v14864_v52 }
0x16b0   :  { %v2379_v29 = vmul.f32 0.0, %v2352_v7 }
0x16b1   :  { %v15194_v25 = vadd.f32 %v2380_v34, %v2213_v40  ;;  %v507_v60 = vmul.f32 %v413_v62, %v14178_v22 }
0x16b2   :  { %v15196_v49 = vadd.f32 %v2379_v29, %v2212_v28 }
0x16b3   :  { %19234 = vst [vmem:[#allocation3_spill] sm:$0xff] %v15194_v25 }
0x16b4   :  { %19235 = vst [vmem:[#allocation4_spill] sm:$0xff] %v15196_v49  ;;  %v2522_v48 = vpack.c.bf16 %v15194_v25, %v15196_v49 }
0x16b6   :  { %2528 = vrot.lane.b32.xlu1 %v2522_v48, %s14013_s29  ;;  %v2367_v57 = vpop.permute.xlu0 %2366 }
0x16b7   :  { %v2382_v54 = vmul.f32 0.0, %v2367_v57  ;;  %v2362_v61 = vpop.permute.xlu1 %2361 }
0x16b8   :  { %v2381_v46 = vmul.f32 0.0, %v2362_v61 }
0x16b9   :  { %v15201_v19 = vadd.f32 %v2382_v54, %v2215_v33 }
0x16ba   :  { %v15203_v63 = vadd.f32 %v2381_v46, %v2214_v21  ;;  %v421_v46 = vadd.f32 %v14918_v26, %v14862_v58 }
0x16bb   :  { %19236 = vst [vmem:[#allocation5_spill] sm:$0xff] %v15201_v19 }
0x16bc   :  { %19237 = vst [vmem:[#allocation6_spill] sm:$0xff] %v15203_v63  ;;  %v2523_v38 = vpack.c.bf16 %v15201_v19, %v15203_v63 }
0x16be   :  { %2530 = vrot.lane.b32.xlu0 %v2523_v38, %s14013_s29  ;;  %v2377_v28 = vpop.permute.xlu0 %2376 }
0x16bf   :  { %v2384_v40 = vmul.f32 0.0, %v2377_v28  ;;  %v2372_v39 = vpop.permute.xlu1 %2371 }
0x16c0   :  { %v2383_v55 = vmul.f32 0.0, %v2372_v39 }
0x16c1   :  { %v15208_v36 = vadd.f32 %v2384_v40, %v2217_v42  ;;  %v405_v42 = vadd.f32 %v14918_v26, %v14850_v56  ;;  %v416_v56 = vadd.f32 %v14918_v26, %v14869_v12  ;;  %v424_v40 = vadd.f32 %v14918_v26, %v14867_v11 }
0x16c2   :  { %v15210_v9 = vadd.f32 %v2383_v55, %v2216_v43  ;;  %v509_v55 = vmul.f32 %v421_v46, %v14178_v22 }
0x16c3   :  { %19238 = vst [vmem:[#allocation7_spill] sm:$0xff] %v15208_v36  ;;  %v505_v35 = vmul.f32 %v405_v42, %v14178_v22  ;;  %v508_v54 = vmul.f32 %v416_v56, %v14178_v22  ;;  %v510_v42 = vmul.f32 %v424_v40, %v14178_v22 }
0x16c4   :  { %19239 = vst [vmem:[#allocation8_spill] sm:$0xff] %v15210_v9  ;;  %v2524_v45 = vpack.c.bf16 %v15208_v36, %v15210_v9 }
0x16c6   :  { %2532 = vrot.lane.b32.xlu1 %v2524_v45, %s14013_s29 }
0x1728   :  { %v2529_v21 = vpop.permute.xlu1 %2528 }
0x1729   :  { %12094 = vmatmul.mubr.msk.bf16.vlgmr.msra.gmra.mrb[72].mxu0 %vm523_vm5, %v2529_v21 }
0x172a   :  { %12097 = vmatprep.mubr.msk.bf16.mxu0 %vm14009_vm1, %v19171_v4  ;;  %12855 = vmatpush3.bf16.msra.mxu0 %v14319_v13 }
0x172b   :  { %12857 = vmatprep.subr.bf16.mxu0 %v14324_v16 }
0x172e   :  { %12859 = vmatpush3.bf16.msra.mxu0 %v14324_v16 }
0x172f   :  { %12155 = vmatprep.subr.bf16.mxu0 %v19171_v4 }
0x1730   :  { %v2531_v33 = vpop.permute.xlu0 %2530 }
0x1731   :  { %12098 = vmatmul.mubr.msk.bf16.gmra.mrb[76].mxu0 %vm523_vm5, %v2531_v33 }
0x1732   :  { %12101 = vmatprep.mubr.msk.bf16.mxu0 %vm14009_vm1, %v19171_v4 }
0x1738   :  { %v2533_v43 = vpop.permute.xlu1 %2532 }
0x1739   :  { %12102 = vmatmul.mubr.msk.bf16.gmra.mrb[80].mxu0 %vm523_vm5, %v2533_v43 }
0x17fc   :  { %v2577_v53 = vpop.f32.mrb[72].mxu0 }
0x17fd   :  { %v2600_v0 = vadd.f32 %v2577_v53, %v505_v35  ;;  %v12095_v15 = vpop.f32.mrb[73].mxu0 }
0x17fe   :  { %v2580_v47 = vpop.f32.mrb[74].mxu0 }
0x17ff   :  { %13331 = vtanh.f32 %v2600_v0  ;;  %v2601_v34 = vadd.f32 %v2580_v47, %v506_v17  ;;  %v12096_v7 = vpop.f32.mrb[75].mxu0 }
0x1801   :  { %13333 = vtanh.f32 %v2601_v34 }
0x1804   :  { %v2585_v29 = vpop.f32.mrb[76].mxu0 }
0x1805   :  { %v2602_v48 = vadd.f32 %v2585_v29, %v507_v60  ;;  %v12099_v57 = vpop.f32.mrb[77].mxu0 }
0x1806   :  { %v2588_v61 = vpop.f32.mrb[78].mxu0 }
0x1807   :  { %13335 = vtanh.f32 %v2602_v48  ;;  %v2603_v52 = vadd.f32 %v2588_v61, %v508_v54  ;;  %v12100_v38 = vpop.f32.mrb[79].mxu0 }
0x1809   :  { %v13332_v28 = vpop.eup %13331  ;;  %13337 = vtanh.f32 %v2603_v52 }
0x180a   :  { %v2612_v12 = vmul.f32 %v13332_v28, %v14178_v22 }
0x180b   :  { %v13334_v39 = vpop.eup %13333 }
0x180c   :  { %v2593_v45 = vpop.f32.mrb[80].mxu0  ;;  %v15245_v21 = vadd.f32 %v2612_v12, %v14229_v1  ;;  %v2613_v33 = vmul.f32 %v13334_v39, %v14178_v22 }
0x180d   :  { %v2604_v58 = vadd.f32 %v2593_v45, %v509_v55  ;;  %v12103_v43 = vpop.f32.mrb[81].mxu0 }
0x180e   :  { %2636 = vrot.lane.b32.xlu0 %v15245_v21, %s19233_s0  ;;  %v2596_v11 = vpop.f32.mrb[82].mxu0  ;;  %v15252_v26 = vadd.f32 %v2613_v33, %v14229_v1  ;;  %v2624_v33 = vmul.f32 %v15245_v21, %v15142_v14 }
0x180f   :  { %13339 = vtanh.f32 %v2604_v58  ;;  %v2605_v50 = vadd.f32 %v2596_v11, %v510_v42  ;;  %v12104_v35 = vpop.f32.mrb[83].mxu0 }
0x1810   :  { %2638 = vrot.lane.b32.xlu1 %v15252_v26, %s19233_s0  ;;  %v2625_v42 = vmul.f32 %v15252_v26, %v15147_v5 }
0x1811   :  { %v13336_v53 = vpop.eup %13335  ;;  %13341 = vtanh.f32 %v2605_v50 }
0x1812   :  { %v2614_v0 = vmul.f32 %v13336_v53, %v14178_v22 }
0x1813   :  { %v13338_v15 = vpop.eup %13337 }
0x1814   :  { %v15258_v17 = vadd.f32 %v2614_v0, %v14229_v1  ;;  %v2615_v47 = vmul.f32 %v13338_v15, %v14178_v22 }
0x1816   :  { %2640 = vrot.lane.b32.xlu0 %v15258_v17, %s19233_s0  ;;  %v15264_v62 = vadd.f32 %v2615_v47, %v14229_v1  ;;  %v2626_v35 = vmul.f32 %v15258_v17, %v15152_v31  ;;  %v95_v47 = vld [vmem:[%s19232_s8 + $0x20] sm:$0xff] }
0x1818   :  { %2642 = vrot.lane.b32.xlu1 %v15264_v62, %s19233_s0  ;;  %v2627_v14 = vmul.f32 %v15264_v62, %v15157_v44 }
0x1819   :  { %v13340_v34 = vpop.eup %13339 }
0x181a   :  { %v2616_v7 = vmul.f32 %v13340_v34, %v14178_v22  ;;  %v96_v34 = vld [vmem:[%s19232_s8 + $0x28] sm:$0xff] }
0x181b   :  { %v13342_v56 = vpop.eup %13341 }
0x181c   :  { %v15270_v60 = vadd.f32 %v2616_v7, %v14229_v1  ;;  %v2617_v29 = vmul.f32 %v13342_v56, %v14178_v22  ;;  %v12836_v7 = vpack.c.bf16 %v96_v34, %v95_v47 }
0x181e   :  { %2644 = vrot.lane.b32.xlu0 %v15270_v60, %s19233_s0  ;;  %v15276_v48 = vadd.f32 %v2617_v29, %v14229_v1  ;;  %v2628_v56 = vmul.f32 %v15270_v60, %v15164_v10  ;;  %12837 = vmatprep.subr.bf16.mxu1 %v12836_v7 }
0x181f   :  { %12839 = vmatpush3.bf16.msra.mxu1 %v12836_v7 }
0x1820   :  { %2646 = vrot.lane.b32.xlu1 %v15276_v48, %s19233_s0 }
0x1880   :  { %v2637_v57 = vpop.permute.xlu0 %2636 }
0x1881   :  { %v2654_v54 = vmul.f32 %v2637_v57, %v15245_v21  ;;  %v97_v57 = vld [vmem:[%s19232_s8 + $0x30] sm:$0xff] }
0x1882   :  { %v2639_v61 = vpop.permute.xlu1 %2638 }
0x1883   :  { %v2655_v46 = vmul.f32 %v2639_v61, %v15252_v26  ;;  %2666 = vrot.lane.b32.xlu0 %v2654_v54, %s14013_s29  ;;  %v98_v54 = vld [vmem:[%s19232_s8 + $0x38] sm:$0xff]  ;;  %s14014_s8 = smov 1  }
0x1885   :  { %2668 = vrot.lane.b32.xlu1 %v2655_v46, %s14013_s29  ;;  %v2629_v46 = vmul.f32 %v15276_v48, %v15169_v41 }
0x1888   :  { %v2641_v52 = vpop.permute.xlu0 %2640 }
0x1889   :  { %v2656_v38 = vmul.f32 %v2641_v52, %v15258_v17  ;;  %v12840_v52 = vpack.c.bf16 %v98_v54, %v97_v57 }
0x188a   :  { %v2643_v28 = vpop.permute.xlu1 %2642 }
0x188b   :  { %v2657_v40 = vmul.f32 %v2643_v28, %v15264_v62  ;;  %2670 = vrot.lane.b32.xlu0 %v2656_v38, %s14013_s29  ;;  %12841 = vmatprep.subr.bf16.mxu1 %v12840_v52 }
0x188c   :  { %12843 = vmatpush3.bf16.msra.mxu1 %v12840_v52 }
0x188d   :  { %2672 = vrot.lane.b32.xlu1 %v2657_v40, %s14013_s29  ;;  %12845 = vmatprep.subr.bf16.mxu1 %v14319_v13 }
0x1890   :  { %v2645_v12 = vpop.permute.xlu0 %2644 }
0x1891   :  { %v2658_v39 = vmul.f32 %v2645_v12, %v15270_v60 }
0x1892   :  { %v2647_v55 = vpop.permute.xlu1 %2646 }
0x1893   :  { %v2659_v45 = vmul.f32 %v2647_v55, %v15276_v48  ;;  %2674 = vrot.lane.b32.xlu0 %v2658_v39, %s14013_s29 }
0x1895   :  { %2676 = vrot.lane.b32.xlu1 %v2659_v45, %s14013_s29 }
0x18f5   :  { %v2667_v58 = vpop.permute.xlu0 %2666 }
0x18f6   :  { %v15294_v43 = vadd.f32 %v2667_v58, %v2624_v33 }
0x18f7   :  { %v2669_v11 = vpop.permute.xlu1 %2668 }
0x18f8   :  { %13343 = vtanh.f32 %v15294_v43  ;;  %v15299_v50 = vadd.f32 %v2669_v11, %v2625_v42 }
0x18fa   :  { %13345 = vtanh.f32 %v15299_v50 }
0x18fd   :  { %v2671_v53 = vpop.permute.xlu0 %2670 }
0x18fe   :  { %v15304_v0 = vadd.f32 %v2671_v53, %v2626_v35 }
0x18ff   :  { %v2673_v15 = vpop.permute.xlu1 %2672 }
0x1900   :  { %13347 = vtanh.f32 %v15304_v0  ;;  %v15309_v5 = vadd.f32 %v2673_v15, %v2627_v14 }
0x1902   :  { %v13344_v31 = vpop.eup %13343  ;;  %13349 = vtanh.f32 %v15309_v5 }
0x1903   :  { %2702 = vrot.lane.b32.xlu0 %v13344_v31, %s19233_s0 }
0x1904   :  { %v13346_v44 = vpop.eup %13345 }
0x1905   :  { %2704 = vrot.lane.b32.xlu1 %v13346_v44, %s19233_s0  ;;  %v2675_v29 = vpop.permute.xlu0 %2674 }
0x1906   :  { %v15328_v61 = vadd.f32 %v2675_v29, %v2628_v56 }
0x1907   :  { %v2677_v10 = vpop.permute.xlu1 %2676 }
0x1908   :  { %13351 = vtanh.f32 %v15328_v61  ;;  %v15333_v38 = vadd.f32 %v2677_v10, %v2629_v46 }
0x190a   :  { %v13348_v28 = vpop.eup %13347  ;;  %13353 = vtanh.f32 %v15333_v38 }
0x190b   :  { %2706 = vrot.lane.b32.xlu0 %v13348_v28, %s19233_s0  ;;  %13355 = vtanh.f32 %v15196_v49 }
0x190c   :  { %v13350_v40 = vpop.eup %13349  ;;  %13357 = vtanh.f32 %v15194_v25 }
0x190d   :  { %2708 = vrot.lane.b32.xlu1 %v13350_v40, %s19233_s0  ;;  %13359 = vtanh.f32 %v15203_v63 }
0x190e   :  { %13361 = vtanh.f32 %v15201_v19 }
0x190f   :  { %13363 = vtanh.f32 %v15210_v9 }
0x1910   :  { %13365 = vtanh.f32 %v15208_v36 }
0x1912   :  { %v13352_v41 = vpop.eup %13351 }
0x1913   :  { %2710 = vrot.lane.b32.xlu0 %v13352_v41, %s19233_s0 }
0x1914   :  { %v13354_v12 = vpop.eup %13353 }
0x1915   :  { %2712 = vrot.lane.b32.xlu1 %v13354_v12, %s19233_s0  ;;  %v13356_v39 = vpop.eup %13355 }
0x1916   :  { %v13358_v55 = vpop.eup %13357 }
0x1917   :  { %2403 = vrot.lane.b32.xlu0 %v13356_v39, %s14013_s29  ;;  %v13360_v45 = vpop.eup %13359 }
0x1918   :  { %v13362_v33 = vpop.eup %13361 }
0x1919   :  { %2405 = vrot.lane.b32.xlu1 %v13358_v55, %s14013_s29  ;;  %v13364_v58 = vpop.eup %13363 }
0x191a   :  { %v13366_v42 = vpop.eup %13365 }
0x191b   :  { %2407 = vrot.lane.b32.xlu0 %v13360_v45, %s14013_s29 }
0x191d   :  { %2409 = vrot.lane.b32.xlu1 %v13362_v33, %s14013_s29 }
0x191f   :  { %2411 = vrot.lane.b32.xlu0 %v13364_v58, %s14013_s29 }
0x1921   :  { %2413 = vrot.lane.b32.xlu1 %v13366_v42, %s14013_s29 }
0x1975   :  { %v2703_v11 = vpop.permute.xlu0 %2702 }
0x1976   :  { %v15354_v35 = vmul.f32 %v2703_v11, %v15245_v21 }
0x1977   :  { %v2705_v53 = vpop.permute.xlu1 %2704 }
0x1978   :  { %13367 = vtanh.f32 %v15354_v35  ;;  %v15358_v14 = vmul.f32 %v2705_v53, %v15252_v26 }
0x197a   :  { %13369 = vtanh.f32 %v15358_v14 }
0x197d   :  { %v2707_v15 = vpop.permute.xlu0 %2706 }
0x197e   :  { %v15362_v47 = vmul.f32 %v2707_v15, %v15258_v17 }
0x197f   :  { %v2709_v34 = vpop.permute.xlu1 %2708 }
0x1980   :  { %13371 = vtanh.f32 %v15362_v47  ;;  %v15366_v31 = vmul.f32 %v2709_v34, %v15264_v62 }
0x1982   :  { %v13368_v21 = vpop.eup %13367  ;;  %13373 = vtanh.f32 %v15366_v31 }
0x1983   :  { %2738 = vrot.lane.b32.xlu0 %v13368_v21, %s14013_s29 }
0x1984   :  { %v13370_v7 = vpop.eup %13369 }
0x1985   :  { %2740 = vrot.lane.b32.xlu1 %v13370_v7, %s14013_s29  ;;  %v2711_v26 = vpop.permute.xlu0 %2710 }
0x1986   :  { %v15372_v44 = vmul.f32 %v2711_v26, %v15270_v60 }
0x1987   :  { %v2713_v17 = vpop.permute.xlu1 %2712 }
0x1988   :  { %13375 = vtanh.f32 %v15372_v44  ;;  %v15376_v56 = vmul.f32 %v2713_v17, %v15276_v48 }
0x1989   :  { %v2404_v62 = vpop.permute.xlu0 %2403 }
0x198a   :  { %v13372_v29 = vpop.eup %13371  ;;  %13377 = vtanh.f32 %v15376_v56  ;;  %12080 = vmatprep.mubr.msk.f32.mxu1 %vm523_vm5, %v2404_v62 }
0x198b   :  { %v2406_v57 = vpop.permute.xlu1 %2405  ;;  %2742 = vrot.lane.b32.xlu0 %v13372_v29, %s14013_s29 }
0x198c   :  { %v13374_v54 = vpop.eup %13373  ;;  %12081 = vmatmul.mubr.msk.f32.vlgmr.msra.gmra.mrb[66].mxu1 %vm523_vm5, %v2406_v57 }
0x198d   :  { %2744 = vrot.lane.b32.xlu1 %v13374_v54, %s14013_s29  ;;  %v2408_v60 = vpop.permute.xlu0 %2407  ;;  %12847 = vmatpush3.bf16.msra.mxu1 %v14319_v13 }
0x198e   :  { %12083 = vmatprep.mubr.msk.f32.mxu1 %vm523_vm5, %v2408_v60  ;;  %12849 = vmatprep.subr.bf16.mxu1 %v14324_v16 }
0x198f   :  { %v2410_v48 = vpop.permute.xlu1 %2409 }
0x1990   :  { %12084 = vmatmul.mubr.msk.f32.gmra.mrb[68].mxu1 %vm523_vm5, %v2410_v48 }
0x1991   :  { %v2412_v46 = vpop.permute.xlu0 %2411  ;;  %12851 = vmatpush3.bf16.msra.mxu1 %v14324_v16 }
0x1992   :  { %v13376_v52 = vpop.eup %13375  ;;  %12086 = vmatprep.mubr.msk.f32.mxu1 %vm523_vm5, %v2412_v46  ;;  %12122 = vmatprep.subr.bf16.mxu1 %v19171_v4 }
0x1993   :  { %v2414_v10 = vpop.permute.xlu1 %2413  ;;  %2746 = vrot.lane.b32.xlu0 %v13376_v52, %s14013_s29 }
0x1994   :  { %v13378_v28 = vpop.eup %13377  ;;  %12087 = vmatmul.mubr.msk.f32.gmra.mrb[70].mxu1 %vm523_vm5, %v2414_v10 }
0x1995   :  { %2748 = vrot.lane.b32.xlu1 %v13378_v28, %s14013_s29 }
0x19f5   :  { %v2739_v40 = vpop.permute.xlu0 %2738 }
0x19f6   :  { %12113 = vmatprep.mubr.msk.f32.mxu1 %vm523_vm5, %v2739_v40 }
0x19f7   :  { %v2741_v41 = vpop.permute.xlu1 %2740 }
0x19f8   :  { %12114 = vmatmul.mubr.msk.f32.vlgmr.msra.gmra.mrb[72].mxu1 %vm523_vm5, %v2741_v41  ;;  %v19168_v41 = vmov 1  }
0x19f9   :  { %12123 = vmatpush3.bf16.msra.mxu1 %v14185_v27 }
0x19fa   :  { %12124 = vmatprep.subr.bf16.mxu1 %v19171_v4 }
0x19fd   :  { %v2743_v12 = vpop.permute.xlu0 %2742  ;;  %12125 = vmatpush3.bf16.msra.mxu1 %v14195_v30 }
0x19fe   :  { %12116 = vmatprep.mubr.msk.f32.mxu1 %vm523_vm5, %v2743_v12  ;;  %12861 = vmatprep.subr.bf16.mxu1 %v14319_v13 }
0x19ff   :  { %v2745_v39 = vpop.permute.xlu1 %2744 }
0x1a00   :  { %12117 = vmatmul.mubr.msk.f32.gmra.mrb[74].mxu1 %vm523_vm5, %v2745_v39 }
0x1a05   :  { %v2747_v55 = vpop.permute.xlu0 %2746 }
0x1a06   :  { %12119 = vmatprep.mubr.msk.f32.mxu1 %vm523_vm5, %v2747_v55 }
0x1a07   :  { %v2749_v45 = vpop.permute.xlu1 %2748 }
0x1a08   :  { %12120 = vmatmul.mubr.msk.f32.gmra.mrb[76].mxu1 %vm523_vm5, %v2749_v45  ;;  %v19240_v45 = vmov 0  }
0x1a09   :  { %12126 = vmatprep.mubr.msk.bf16.mxu1 %vm14009_vm1, %v19171_v4 }
0x1a5f   :  { %v15405_v33 = vpop.f32.mrb[66].mxu1 }
0x1a60   :  { %v15407_v58 = vpop.f32.mrb[67].mxu1 }
0x1a63   :  { %v15409_v42 = vpop.f32.mrb[68].mxu1 }
0x1a64   :  { %v15411_v11 = vpop.f32.mrb[69].mxu1 }
0x1a67   :  { %v15413_v53 = vpop.f32.mrb[70].mxu1 }
0x1a68   :  { %v15415_v15 = vpop.f32.mrb[71].mxu1 }
0x1acb   :  { %v12115_v34 = vpop.f32.mrb[72].mxu1 }
0x1acc   :  { %v2864_v21 = vadd.f32 %v12115_v34, %v15405_v33  ;;  %v2828_v7 = vpop.f32.mrb[73].mxu1 }
0x1acd   :  { %v2863_v26 = vadd.f32 %v2828_v7, %v15407_v58 }
0x1ace   :  { %2877 = vrot.lane.b32.xlu1 %v2864_v21, %s14014_s8 }
0x1acf   :  { %2875 = vrot.lane.b32.xlu0 %v2863_v26, %s14014_s8 }
0x1ad3   :  { %v12118_v17 = vpop.f32.mrb[74].mxu1 }
0x1ad4   :  { %v2866_v62 = vadd.f32 %v12118_v17, %v15409_v42  ;;  %v2838_v29 = vpop.f32.mrb[75].mxu1 }
0x1ad5   :  { %v2865_v57 = vadd.f32 %v2838_v29, %v15411_v11 }
0x1ad6   :  { %2881 = vrot.lane.b32.xlu1 %v2866_v62, %s14014_s8 }
0x1ad7   :  { %2879 = vrot.lane.b32.xlu0 %v2865_v57, %s14014_s8 }
0x1adb   :  { %v12121_v54 = vpop.f32.mrb[76].mxu1 }
0x1adc   :  { %v2868_v60 = vadd.f32 %v12121_v54, %v15413_v53  ;;  %v2848_v48 = vpop.f32.mrb[77].mxu1 }
0x1add   :  { %v2867_v46 = vadd.f32 %v2848_v48, %v15415_v15 }
0x1ade   :  { %2885 = vrot.lane.b32.xlu1 %v2868_v60, %s14014_s8 }
0x1adf   :  { %2883 = vrot.lane.b32.xlu0 %v2867_v46, %s14014_s8 }
0x1b40   :  { %v2878_v52 = vpop.permute.xlu1 %2877 }
0x1b41   :  { %v2895_v10 = vsel %vm2893_vm6, %v12115_v34, %v2878_v52  ;;  %v2876_v28 = vpop.permute.xlu0 %2875 }
0x1b42   :  { %v2894_v40 = vsel %vm2893_vm6, %v2828_v7, %v2876_v28  ;;  %2907 = vperm.xlu1 %13047, %v2895_v10  }
0x1b43   :  { %2902 = vperm.xlu0 %13046, %v2894_v40  }
0x1b46   :  { %13048 = vset.pattern.permute.xlu1 %v19168_v41 }
0x1b47   :  { %2941 = vperm.xlu1 %13048, %v2895_v10   ;;  %13049 = vset.pattern.permute.xlu0 %v19168_v41 }
0x1b48   :  { %v2882_v12 = vpop.permute.xlu1 %2881  ;;  %2937 = vperm.xlu0 %13049, %v2894_v40  }
0x1b49   :  { %v2897_v39 = vsel %vm2893_vm6, %v12118_v17, %v2882_v12  ;;  %v2880_v55 = vpop.permute.xlu0 %2879 }
0x1b4a   :  { %v2896_v34 = vsel %vm2893_vm6, %v2838_v29, %v2880_v55 }
0x1b4b   :  { %2949 = vperm.xlu1 %13048, %v2897_v39  }
0x1b4c   :  { %13050 = vset.pattern.permute.xlu0 %v19240_v45 }
0x1b4d   :  { %2917 = vperm.xlu0 %13050, %v2897_v39  }
0x1b4f   :  { %13051 = vset.pattern.permute.xlu1 %v19240_v45 }
0x1b50   :  { %2912 = vperm.xlu1 %13051, %v2896_v34   ;;  %v2886_v26 = vpop.permute.xlu1 %2885 }
0x1b51   :  { %v2884_v21 = vpop.permute.xlu0 %2883  ;;  %v2899_v17 = vsel %vm2893_vm6, %v12121_v54, %v2886_v26 }
0x1b52   :  { %v2898_v7 = vsel %vm2893_vm6, %v2848_v48, %v2884_v21 }
0x1b53   :  { %2922 = vperm.xlu0 %13050, %v2898_v7  }
0x1b54   :  { %13052 = vset.pattern.permute.xlu1 %v19168_v41 }
0x1b55   :  { %2945 = vperm.xlu1 %13052, %v2896_v34  }
0x1b57   :  { %13054 = vset.pattern.permute.xlu0 %v19168_v41 }
0x1b58   :  { %2953 = vperm.xlu0 %13054, %v2898_v7  }
0x1b59   :  { %13053 = vset.pattern.permute.xlu1 %v19240_v45 }
0x1b5a   :  { %2927 = vperm.xlu1 %13053, %v2899_v17  }
0x1b5e   :  { %13055 = vset.pattern.permute.xlu1 %v19168_v41 }
0x1b5f   :  { %2957 = vperm.xlu1 %13055, %v2899_v17  }
0x1b63   :  { %13056 = vset.pattern.permute.xlu1 %v19240_v45 }
0x1bc1   :  { %v2908_v62 = vpop.permute.xlu1 %2907 }
0x1bc2   :  { %v2903_v29 = vpop.permute.xlu0 %2902  ;;  %v2931_v60 = vmul.f32 0.0, %v2908_v62 }
0x1bc3   :  { %v2930_v52 = vmul.f32 0.0, %v2903_v29 }
0x1bc6   :  { %v2942_v57 = vpop.permute.xlu1 %2941 }
0x1bc7   :  { %v2961_v48 = vmul.f32 %v2942_v57, %v15194_v25  ;;  %v2938_v46 = vpop.permute.xlu0 %2937 }
0x1bc8   :  { %v2960_v10 = vmul.f32 %v2938_v46, %v15196_v49 }
0x1bc9   :  { %v2967_v28 = vadd.f32 %v2961_v48, %v2931_v60 }
0x1bca   :  { %v2966_v54 = vadd.f32 %v2960_v10, %v2930_v52  ;;  %v2950_v40 = vpop.permute.xlu1 %2949 }
0x1bcb   :  { %v2973_v12 = vadd.f32 %v2967_v28, %v15358_v14  ;;  %v2963_v17 = vmul.f32 %v2950_v40, %v15201_v19 }
0x1bcc   :  { %v2972_v39 = vadd.f32 %v2966_v54, %v15354_v35  ;;  %v2918_v55 = vpop.permute.xlu0 %2917 }
0x1bcd   :  { %v2933_v7 = vmul.f32 0.0, %v2918_v55 }
0x1bce   :  { %v2978_v34 = vpack.c.bf16 %v2973_v12, %v2972_v39 }
0x1bcf   :  { %v2913_v21 = vpop.permute.xlu1 %2912  ;;  %v2969_v29 = vadd.f32 %v2963_v17, %v2933_v7 }
0x1bd0   :  { %2984 = vrot.lane.b32.xlu1 %v2978_v34, %s14013_s29  ;;  %v2932_v57 = vmul.f32 0.0, %v2913_v21 }
0x1bd1   :  { %v2975_v14 = vadd.f32 %v2969_v29, %v15366_v31 }
0x1bd2   :  { %v2923_v26 = vpop.permute.xlu0 %2922 }
0x1bd3   :  { %v2934_v54 = vmul.f32 0.0, %v2923_v26 }
0x1bd4   :  { %v2946_v62 = vpop.permute.xlu1 %2945 }
0x1bd5   :  { %v2962_v60 = vmul.f32 %v2946_v62, %v15203_v63 }
0x1bd7   :  { %v2968_v48 = vadd.f32 %v2962_v60, %v2932_v57  ;;  %v2954_v46 = vpop.permute.xlu0 %2953 }
0x1bd8   :  { %v2964_v10 = vmul.f32 %v2954_v46, %v15210_v9 }
0x1bd9   :  { %v2974_v35 = vadd.f32 %v2968_v48, %v15362_v47  ;;  %v2928_v52 = vpop.permute.xlu1 %2927 }
0x1bda   :  { %v2970_v40 = vadd.f32 %v2964_v10, %v2934_v54  ;;  %v2935_v39 = vmul.f32 0.0, %v2928_v52 }
0x1bdb   :  { %v2979_v28 = vpack.c.bf16 %v2975_v14, %v2974_v35 }
0x1bdc   :  { %v2976_v21 = vadd.f32 %v2970_v40, %v15372_v44 }
0x1bdd   :  { %2986 = vrot.lane.b32.xlu0 %v2979_v28, %s14013_s29 }
0x1bde   :  { %v2958_v12 = vpop.permute.xlu1 %2957 }
0x1bdf   :  { %v2965_v55 = vmul.f32 %v2958_v12, %v15208_v36 }
0x1be1   :  { %v2971_v34 = vadd.f32 %v2965_v55, %v2935_v39 }
0x1be3   :  { %v2977_v7 = vadd.f32 %v2971_v34, %v15376_v56  ;;  %v15472_v56 = vld [vmem:[%s19231_s5] ss:$0 sm:$0xff] }
0x1be4   :  { %v437_v35 = vadd.f32 %v15472_v56, %v14872_v59 }
0x1be5   :  { %v2980_v31 = vpack.c.bf16 %v2977_v7, %v2976_v21  ;;  %v445_v7 = vadd.f32 %v15472_v56, %v14882_v23 }
0x1be7   :  { %2988 = vrot.lane.b32.xlu1 %v2980_v31, %s14013_s29 }
0x1c42   :  { %v2985_v47 = vpop.permute.xlu1 %2984 }
0x1c43   :  { %12127 = vmatmul.mubr.msk.bf16.vlgmr.msra.gmra.mrb[80].mxu1 %vm523_vm5, %v2985_v47  ;;  %v448_v47 = vadd.f32 %v15472_v56, %v14886_v20 }
0x1c44   :  { %12130 = vmatprep.mubr.msk.bf16.mxu1 %vm14009_vm1, %v19171_v4  ;;  %12863 = vmatpush3.bf16.msra.mxu1 %v14319_v13  ;;  %v429_v13 = vadd.f32 %v15472_v56, %v14874_v2  ;;  %v440_v2 = vadd.f32 %v15472_v56, %v14876_v51 }
0x1c45   :  { %12865 = vmatprep.subr.bf16.mxu1 %v14324_v16  ;;  %v516_v23 = vmul.f32 %v448_v47, %v14178_v22 }
0x1c46   :  { %v511_v17 = vmul.f32 %v429_v13, %v14178_v22  ;;  %v514_v12 = vmul.f32 %v440_v2, %v14178_v22 }
0x1c48   :  { %12867 = vmatpush3.bf16.msra.mxu1 %v14324_v16  ;;  %v432_v16 = vadd.f32 %v15472_v56, %v14878_v24  ;;  %v513_v24 = vmul.f32 %v437_v35, %v14178_v22 }
0x1c4a   :  { %v512_v60 = vmul.f32 %v432_v16, %v14178_v22 }
0x1c4f   :  { %v2987_v26 = vpop.permute.xlu0 %2986 }
0x1c50   :  { %12131 = vmatmul.mubr.msk.bf16.gmra.mrb[84].mxu1 %vm523_vm5, %v2987_v26  ;;  %v515_v26 = vmul.f32 %v445_v7, %v14178_v22 }
0x1c51   :  { %12134 = vmatprep.mubr.msk.bf16.mxu1 %vm14009_vm1, %v19171_v4 }
0x1c59   :  { %v2989_v44 = vpop.permute.xlu1 %2988 }
0x1c5a   :  { %12135 = vmatmul.mubr.msk.bf16.gmra.mrb[88].mxu1 %vm523_vm5, %v2989_v44 }
0x1d16   :  { %v3033_v62 = vpop.f32.mrb[80].mxu1 }
0x1d17   :  { %v3056_v29 = vadd.f32 %v3033_v62, %v511_v17  ;;  %v12128_v57 = vpop.f32.mrb[81].mxu1 }
0x1d18   :  { %v3036_v48 = vpop.f32.mrb[82].mxu1 }
0x1d19   :  { %13379 = vtanh.f32 %v3056_v29  ;;  %v3057_v46 = vadd.f32 %v3036_v48, %v512_v60  ;;  %v12129_v14 = vpop.f32.mrb[83].mxu1 }
0x1d1b   :  { %13381 = vtanh.f32 %v3057_v46 }
0x1d23   :  { %v13380_v52 = vpop.eup %13379  ;;  %v3041_v10 = vpop.f32.mrb[84].mxu1 }
0x1d24   :  { %v3058_v28 = vadd.f32 %v3041_v10, %v513_v24  ;;  %v12132_v54 = vpop.f32.mrb[85].mxu1  ;;  %v3068_v40 = vmul.f32 %v13380_v52, %v14178_v22 }
0x1d25   :  { %v13382_v39 = vpop.eup %13381  ;;  %v3044_v55 = vpop.f32.mrb[86].mxu1 }
0x1d26   :  { %13383 = vtanh.f32 %v3058_v28  ;;  %v3059_v34 = vadd.f32 %v3044_v55, %v514_v12  ;;  %v12133_v21 = vpop.f32.mrb[87].mxu1  ;;  %v15488_v59 = vadd.f32 %v3068_v40, %v14229_v1  ;;  %v3069_v51 = vmul.f32 %v13382_v39, %v14178_v22 }
0x1d28   :  { %13385 = vtanh.f32 %v3059_v34  ;;  %3092 = vrot.lane.b32.xlu0 %v15488_v59, %s19233_s0  ;;  %v15496_v31 = vadd.f32 %v3069_v51, %v14229_v1 }
0x1d2a   :  { %3094 = vrot.lane.b32.xlu1 %v15496_v31, %s19233_s0 }
0x1d2d   :  { %v3049_v44 = vpop.f32.mrb[88].mxu1 }
0x1d2e   :  { %v3060_v13 = vadd.f32 %v3049_v44, %v515_v26  ;;  %v12136_v16 = vpop.f32.mrb[89].mxu1 }
0x1d2f   :  { %v3052_v17 = vpop.f32.mrb[90].mxu1 }
0x1d30   :  { %v13384_v62 = vpop.eup %13383  ;;  %13387 = vtanh.f32 %v3060_v13  ;;  %v3061_v29 = vadd.f32 %v3052_v17, %v516_v23  ;;  %v12137_v57 = vpop.f32.mrb[91].mxu1  ;;  %v3080_v13 = vmul.f32 %v15488_v59, %v15294_v43  ;;  %v3081_v17 = vmul.f32 %v15496_v31, %v15299_v50 }
0x1d31   :  { %v3070_v60 = vmul.f32 %v13384_v62, %v14178_v22 }
0x1d32   :  { %v13386_v48 = vpop.eup %13385  ;;  %13389 = vtanh.f32 %v3061_v29 }
0x1d33   :  { %v15506_v20 = vadd.f32 %v3070_v60, %v14229_v1  ;;  %v3071_v46 = vmul.f32 %v13386_v48, %v14178_v22 }
0x1d35   :  { %3096 = vrot.lane.b32.xlu0 %v15506_v20, %s19233_s0  ;;  %v15512_v14 = vadd.f32 %v3071_v46, %v14229_v1  ;;  %v3082_v57 = vmul.f32 %v15506_v20, %v15304_v0 }
0x1d37   :  { %3098 = vrot.lane.b32.xlu1 %v15512_v14, %s19233_s0  ;;  %v3083_v43 = vmul.f32 %v15512_v14, %v15309_v5 }
0x1d3a   :  { %v13388_v35 = vpop.eup %13387 }
0x1d3b   :  { %v3072_v2 = vmul.f32 %v13388_v35, %v14178_v22 }
0x1d3c   :  { %v13390_v24 = vpop.eup %13389 }
0x1d3d   :  { %v15518_v52 = vadd.f32 %v3072_v2, %v14229_v1  ;;  %v3073_v10 = vmul.f32 %v13390_v24, %v14178_v22 }
0x1d3f   :  { %3100 = vrot.lane.b32.xlu0 %v15518_v52, %s19233_s0  ;;  %v15524_v28 = vadd.f32 %v3073_v10, %v14229_v1  ;;  %v3084_v0 = vmul.f32 %v15518_v52, %v15328_v61 }
0x1d41   :  { %3102 = vrot.lane.b32.xlu1 %v15524_v28, %s19233_s0 }
0x1d9a   :  { %v3093_v54 = vpop.permute.xlu0 %3092 }
0x1d9b   :  { %v3110_v12 = vmul.f32 %v3093_v54, %v15488_v59  ;;  %v3085_v54 = vmul.f32 %v15524_v28, %v15333_v38 }
0x1d9c   :  { %v3095_v40 = vpop.permute.xlu1 %3094 }
0x1d9d   :  { %v3111_v39 = vmul.f32 %v3095_v40, %v15496_v31  ;;  %3122 = vrot.lane.b32.xlu0 %v3110_v12, %s14013_s29 }
0x1d9f   :  { %3124 = vrot.lane.b32.xlu1 %v3111_v39, %s14013_s29 }
0x1da7   :  { %v3097_v55 = vpop.permute.xlu0 %3096 }
0x1da8   :  { %v3112_v34 = vmul.f32 %v3097_v55, %v15506_v20 }
0x1da9   :  { %v3099_v21 = vpop.permute.xlu1 %3098 }
0x1daa   :  { %v3113_v51 = vmul.f32 %v3099_v21, %v15512_v14  ;;  %3126 = vrot.lane.b32.xlu0 %v3112_v34, %s14013_s29 }
0x1dac   :  { %3128 = vrot.lane.b32.xlu1 %v3113_v51, %s14013_s29 }
0x1db1   :  { %v3101_v7 = vpop.permute.xlu0 %3100 }
0x1db2   :  { %v3114_v47 = vmul.f32 %v3101_v7, %v15518_v52 }
0x1db3   :  { %v3103_v26 = vpop.permute.xlu1 %3102 }
0x1db4   :  { %v3115_v44 = vmul.f32 %v3103_v26, %v15524_v28  ;;  %3130 = vrot.lane.b32.xlu0 %v3114_v47, %s14013_s29 }
0x1db6   :  { %3132 = vrot.lane.b32.xlu1 %v3115_v44, %s14013_s29 }
0x1e0f   :  { %v3123_v16 = vpop.permute.xlu0 %3122 }
0x1e10   :  { %v15542_v23 = vadd.f32 %v3123_v16, %v3080_v13 }
0x1e11   :  { %v3125_v62 = vpop.permute.xlu1 %3124 }
0x1e12   :  { %13391 = vtanh.f32 %v15542_v23  ;;  %v15547_v29 = vadd.f32 %v3125_v62, %v3081_v17 }
0x1e14   :  { %13393 = vtanh.f32 %v15547_v29 }
0x1e1c   :  { %v13392_v60 = vpop.eup %13391  ;;  %v3127_v48 = vpop.permute.xlu0 %3126 }
0x1e1d   :  { %v15552_v46 = vadd.f32 %v3127_v48, %v3082_v57  ;;  %3158 = vrot.lane.b32.xlu0 %v13392_v60, %s19233_s0 }
0x1e1e   :  { %v13394_v50 = vpop.eup %13393  ;;  %v3129_v35 = vpop.permute.xlu1 %3128 }
0x1e1f   :  { %13395 = vtanh.f32 %v15552_v46  ;;  %v15558_v2 = vadd.f32 %v3129_v35, %v3083_v43  ;;  %3160 = vrot.lane.b32.xlu1 %v13394_v50, %s19233_s0 }
0x1e21   :  { %13397 = vtanh.f32 %v15558_v2 }
0x1e26   :  { %v3131_v24 = vpop.permute.xlu0 %3130 }
0x1e27   :  { %v15564_v10 = vadd.f32 %v3131_v24, %v3084_v0 }
0x1e28   :  { %v3133_v5 = vpop.permute.xlu1 %3132 }
0x1e29   :  { %v13396_v12 = vpop.eup %13395  ;;  %13399 = vtanh.f32 %v15564_v10  ;;  %v15569_v40 = vadd.f32 %v3133_v5, %v3085_v54 }
0x1e2a   :  { %3162 = vrot.lane.b32.xlu0 %v13396_v12, %s19233_s0 }
0x1e2b   :  { %v13398_v39 = vpop.eup %13397  ;;  %13401 = vtanh.f32 %v15569_v40 }
0x1e2c   :  { %3164 = vrot.lane.b32.xlu1 %v13398_v39, %s19233_s0 }
0x1e33   :  { %v13400_v61 = vpop.eup %13399 }
0x1e34   :  { %3166 = vrot.lane.b32.xlu0 %v13400_v61, %s19233_s0 }
0x1e35   :  { %v13402_v55 = vpop.eup %13401 }
0x1e36   :  { %3168 = vrot.lane.b32.xlu1 %v13402_v55, %s19233_s0 }
0x1e8f   :  { %v3159_v38 = vpop.permute.xlu0 %3158 }
0x1e90   :  { %v15577_v34 = vmul.f32 %v3159_v38, %v15488_v59 }
0x1e91   :  { %v3161_v21 = vpop.permute.xlu1 %3160 }
0x1e92   :  { %13403 = vtanh.f32 %v15577_v34  ;;  %v15581_v51 = vmul.f32 %v3161_v21, %v15496_v31 }
0x1e94   :  { %13405 = vtanh.f32 %v15581_v51 }
0x1e9c   :  { %v13404_v7 = vpop.eup %13403  ;;  %v3163_v47 = vpop.permute.xlu0 %3162 }
0x1e9d   :  { %v15585_v26 = vmul.f32 %v3163_v47, %v15506_v20  ;;  %3194 = vrot.lane.b32.xlu0 %v13404_v7, %s14013_s29 }
0x1e9e   :  { %v13406_v44 = vpop.eup %13405  ;;  %v3165_v13 = vpop.permute.xlu1 %3164 }
0x1e9f   :  { %13407 = vtanh.f32 %v15585_v26  ;;  %v15590_v59 = vmul.f32 %v3165_v13, %v15512_v14  ;;  %3196 = vrot.lane.b32.xlu1 %v13406_v44, %s14013_s29 }
0x1ea1   :  { %13409 = vtanh.f32 %v15590_v59 }
0x1ea6   :  { %v3167_v31 = vpop.permute.xlu0 %3166 }
0x1ea7   :  { %v15595_v16 = vmul.f32 %v3167_v31, %v15518_v52 }
0x1ea8   :  { %v3169_v17 = vpop.permute.xlu1 %3168 }
0x1ea9   :  { %v13408_v20 = vpop.eup %13407  ;;  %13411 = vtanh.f32 %v15595_v16  ;;  %v15599_v62 = vmul.f32 %v3169_v17, %v15524_v28 }
0x1eaa   :  { %3198 = vrot.lane.b32.xlu0 %v13408_v20, %s14013_s29 }
0x1eab   :  { %v13410_v57 = vpop.eup %13409  ;;  %13413 = vtanh.f32 %v15599_v62 }
0x1eac   :  { %3200 = vrot.lane.b32.xlu1 %v13410_v57, %s14013_s29 }
0x1eb3   :  { %v13412_v14 = vpop.eup %13411 }
0x1eb4   :  { %3202 = vrot.lane.b32.xlu0 %v13412_v14, %s14013_s29 }
0x1eb5   :  { %v13414_v60 = vpop.eup %13413 }
0x1eb6   :  { %3204 = vrot.lane.b32.xlu1 %v13414_v60, %s14013_s29 }
0x1f0f   :  { %v3195_v52 = vpop.permute.xlu0 %3194 }
0x1f10   :  { %12146 = vmatprep.mubr.msk.f32.mxu0 %vm523_vm5, %v3195_v52 }
0x1f11   :  { %v3197_v48 = vpop.permute.xlu1 %3196 }
0x1f12   :  { %12147 = vmatmul.mubr.msk.f32.vlgmr.msra.gmra.mrb[84].mxu0 %vm523_vm5, %v3197_v48 }
0x1f13   :  { %12156 = vmatpush3.bf16.msra.mxu0 %v14185_v27 }
0x1f14   :  { %12157 = vmatprep.subr.bf16.mxu0 %v19171_v4 }
0x1f17   :  { %12158 = vmatpush3.bf16.msra.mxu0 %v14195_v30 }
0x1f18   :  { %12238 = vmatprep.subr.bf16.mxu0 %v19171_v4 }
0x1f1c   :  { %v3199_v28 = vpop.permute.xlu0 %3198 }
0x1f1d   :  { %12149 = vmatprep.mubr.msk.f32.mxu0 %vm523_vm5, %v3199_v28 }
0x1f1e   :  { %v3201_v43 = vpop.permute.xlu1 %3200 }
0x1f1f   :  { %12150 = vmatmul.mubr.msk.f32.gmra.mrb[86].mxu0 %vm523_vm5, %v3201_v43 }
0x1f26   :  { %v3203_v50 = vpop.permute.xlu0 %3202 }
0x1f27   :  { %12152 = vmatprep.mubr.msk.f32.mxu0 %vm523_vm5, %v3203_v50 }
0x1f28   :  { %v3205_v35 = vpop.permute.xlu1 %3204 }
0x1f29   :  { %12153 = vmatmul.mubr.msk.f32.gmra.mrb[88].mxu0 %vm523_vm5, %v3205_v35 }
0x1f2a   :  { %12159 = vmatprep.mubr.msk.bf16.mxu0 %vm14009_vm1, %v19171_v4 }
0x1fe5   :  { %v12148_v27 = vpop.f32.mrb[84].mxu0 }
0x1fe6   :  { %v3320_v30 = vadd.f32 %v12148_v27, %v15405_v33  ;;  %v3284_v0 = vpop.f32.mrb[85].mxu0 }
0x1fe7   :  { %v3319_v24 = vadd.f32 %v3284_v0, %v15407_v58 }
0x1fe8   :  { %3333 = vrot.lane.b32.xlu1 %v3320_v30, %s14014_s8 }
0x1fe9   :  { %3331 = vrot.lane.b32.xlu0 %v3319_v24, %s14014_s8 }
0x1ff2   :  { %v12151_v54 = vpop.f32.mrb[86].mxu0 }
0x1ff3   :  { %v3322_v5 = vadd.f32 %v12151_v54, %v15409_v42  ;;  %v3294_v12 = vpop.f32.mrb[87].mxu0 }
0x1ff4   :  { %v3321_v39 = vadd.f32 %v3294_v12, %v15411_v11 }
0x1ff5   :  { %3337 = vrot.lane.b32.xlu1 %v3322_v5, %s14014_s8 }
0x1ff6   :  { %3335 = vrot.lane.b32.xlu0 %v3321_v39, %s14014_s8 }
0x1ffc   :  { %v12154_v61 = vpop.f32.mrb[88].mxu0 }
0x1ffd   :  { %v3324_v55 = vadd.f32 %v12154_v61, %v15413_v53  ;;  %v3304_v38 = vpop.f32.mrb[89].mxu0 }
0x1ffe   :  { %v3323_v21 = vadd.f32 %v3304_v38, %v15415_v15 }
0x1fff   :  { %3341 = vrot.lane.b32.xlu1 %v3324_v55, %s14014_s8 }
0x2000   :  { %3339 = vrot.lane.b32.xlu0 %v3323_v21, %s14014_s8 }
0x205a   :  { %v3334_v7 = vpop.permute.xlu1 %3333 }
0x205b   :  { %v3350_v47 = vsel %vm2893_vm6, %v12148_v27, %v3334_v7  ;;  %v3332_v44 = vpop.permute.xlu0 %3331 }
0x205c   :  { %3362 = vperm.xlu1 %13056, %v3350_v47   ;;  %3396 = vperm.xlu0 %13054, %v3350_v47   ;;  %v3349_v13 = vsel %vm2893_vm6, %v3284_v0, %v3332_v44 }
0x2060   :  { %13058 = vset.pattern.permute.xlu1 %v19168_v41  ;;  %13057 = vset.pattern.permute.xlu0 %v19240_v45 }
0x2061   :  { %3392 = vperm.xlu1 %13058, %v3349_v13   ;;  %3357 = vperm.xlu0 %13057, %v3349_v13  }
0x2065   :  { %13059 = vset.pattern.permute.xlu1 %v19240_v45  ;;  %13062 = vset.pattern.permute.xlu0 %v19168_v41 }
0x2067   :  { %v3338_v31 = vpop.permute.xlu1 %3337 }
0x2068   :  { %v3352_v17 = vsel %vm2893_vm6, %v12151_v54, %v3338_v31  ;;  %v3336_v20 = vpop.permute.xlu0 %3335 }
0x2069   :  { %v3351_v57 = vsel %vm2893_vm6, %v3294_v12, %v3336_v20  ;;  %3372 = vperm.xlu1 %13059, %v3352_v17  }
0x206a   :  { %3400 = vperm.xlu0 %13062, %v3351_v57  }
0x206d   :  { %13060 = vset.pattern.permute.xlu1 %v19168_v41 }
0x206e   :  { %3404 = vperm.xlu1 %13060, %v3352_v17   ;;  %13063 = vset.pattern.permute.xlu0 %v19240_v45 }
0x2071   :  { %v3342_v60 = vpop.permute.xlu1 %3341 }
0x2072   :  { %13061 = vset.pattern.permute.xlu1 %v19240_v45  ;;  %v3340_v14 = vpop.permute.xlu0 %3339  ;;  %v3354_v48 = vsel %vm2893_vm6, %v12154_v61, %v3342_v60 }
0x2073   :  { %v3353_v52 = vsel %vm2893_vm6, %v3304_v38, %v3340_v14  ;;  %3367 = vperm.xlu1 %13061, %v3351_v57  }
0x2074   :  { %3377 = vperm.xlu0 %13063, %v3353_v52  }
0x2077   :  { %3382 = vperm.xlu1 %13061, %v3354_v48  }
0x2078   :  { %13065 = vset.pattern.permute.xlu0 %v19168_v41 }
0x2079   :  { %3412 = vperm.xlu0 %13065, %v3354_v48  }
0x207b   :  { %13064 = vset.pattern.permute.xlu1 %v19168_v41 }
0x207c   :  { %3408 = vperm.xlu1 %13064, %v3353_v52  }
0x207d   :  { %13066 = vset.pattern.permute.xlu0 %v19240_v45 }
0x2080   :  { %13067 = vset.pattern.permute.xlu1 %v19240_v45 }
0x20db   :  { %v3363_v28 = vpop.permute.xlu1 %3362  ;;  %v3397_v43 = vpop.permute.xlu0 %3396 }
0x20dc   :  { %v3386_v50 = vmul.f32 0.0, %v3363_v28  ;;  %v3416_v35 = vmul.f32 %v3397_v43, %v15194_v25 }
0x20de   :  { %v3422_v0 = vadd.f32 %v3416_v35, %v3386_v50 }
0x20e0   :  { %v3393_v27 = vpop.permute.xlu1 %3392  ;;  %v3358_v30 = vpop.permute.xlu0 %3357  ;;  %v3428_v12 = vadd.f32 %v3422_v0, %v15581_v51 }
0x20e1   :  { %v3415_v24 = vmul.f32 %v3393_v27, %v15196_v49  ;;  %v3385_v54 = vmul.f32 0.0, %v3358_v30 }
0x20e3   :  { %v3421_v5 = vadd.f32 %v3415_v24, %v3385_v54 }
0x20e5   :  { %v3427_v39 = vadd.f32 %v3421_v5, %v15577_v34 }
0x20e7   :  { %v3433_v61 = vpack.c.bf16 %v3428_v12, %v3427_v39 }
0x20e8   :  { %v3373_v55 = vpop.permute.xlu1 %3372 }
0x20e9   :  { %3439 = vrot.lane.b32.xlu1 %v3433_v61, %s14013_s29  ;;  %v3401_v21 = vpop.permute.xlu0 %3400  ;;  %v3388_v47 = vmul.f32 0.0, %v3373_v55 }
0x20ea   :  { %v3417_v13 = vmul.f32 %v3401_v21, %v15203_v63 }
0x20ed   :  { %v3405_v38 = vpop.permute.xlu1 %3404 }
0x20ee   :  { %v3418_v7 = vmul.f32 %v3405_v38, %v15201_v19 }
0x20f0   :  { %v3424_v31 = vadd.f32 %v3418_v7, %v3388_v47 }
0x20f2   :  { %v3368_v44 = vpop.permute.xlu1 %3367  ;;  %v3430_v51 = vadd.f32 %v3424_v31, %v15590_v59 }
0x20f3   :  { %v3387_v17 = vmul.f32 0.0, %v3368_v44  ;;  %v3378_v20 = vpop.permute.xlu0 %3377 }
0x20f4   :  { %v3389_v50 = vmul.f32 0.0, %v3378_v20 }
0x20f5   :  { %v3423_v57 = vadd.f32 %v3417_v13, %v3387_v17  ;;  %v461_v13 = vadd.f32 %v15472_v56, %v14890_v18 }
0x20f6   :  { %v3383_v14 = vpop.permute.xlu1 %3382 }
0x20f7   :  { %v3429_v34 = vadd.f32 %v3423_v57, %v15585_v26  ;;  %v3390_v28 = vmul.f32 0.0, %v3383_v14  ;;  %v519_v57 = vmul.f32 %v461_v13, %v14178_v22 }
0x20f8   :  { %v3413_v60 = vpop.permute.xlu0 %3412 }
0x20f9   :  { %v3420_v52 = vmul.f32 %v3413_v60, %v15208_v36  ;;  %v3434_v48 = vpack.c.bf16 %v3430_v51, %v3429_v34 }
0x20fb   :  { %v3409_v43 = vpop.permute.xlu1 %3408  ;;  %3441 = vrot.lane.b32.xlu1 %v3434_v48, %s14013_s29  ;;  %v3426_v35 = vadd.f32 %v3420_v52, %v3390_v28  ;;  %v469_v28 = vadd.f32 %v15472_v56, %v14888_v6 }
0x20fc   :  { %v3419_v27 = vmul.f32 %v3409_v43, %v15210_v9  ;;  %v472_v43 = vadd.f32 %v15472_v56, %v14892_v32 }
0x20fd   :  { %v3432_v0 = vadd.f32 %v3426_v35, %v15599_v62  ;;  %v456_v62 = vadd.f32 %v15472_v56, %v14884_v3  ;;  %v464_v3 = vadd.f32 %v15472_v56, %v14894_v37 }
0x20fe   :  { %v3425_v30 = vadd.f32 %v3419_v27, %v3389_v50  ;;  %v521_v50 = vmul.f32 %v469_v28, %v14178_v22 }
0x20ff   :  { %v518_v38 = vmul.f32 %v456_v62, %v14178_v22  ;;  %v520_v60 = vmul.f32 %v464_v3, %v14178_v22 }
0x2100   :  { %v3431_v24 = vadd.f32 %v3425_v30, %v15595_v16  ;;  %v453_v16 = vadd.f32 %v15472_v56, %v14880_v8 }
0x2102   :  { %v3435_v59 = vpack.c.bf16 %v3432_v0, %v3431_v24  ;;  %v517_v12 = vmul.f32 %v453_v16, %v14178_v22  ;;  %v522_v0 = vmul.f32 %v472_v43, %v14178_v22 }
0x2104   :  { %3443 = vrot.lane.b32.xlu0 %v3435_v59, %s14013_s29 }
0x215b   :  { %v3440_v26 = vpop.permute.xlu1 %3439 }
0x215c   :  { %12160 = vmatmul.mubr.msk.bf16.vlgmr.msra.gmra.mrb[92].mxu0 %vm523_vm5, %v3440_v26 }
0x215d   :  { %12163 = vmatprep.mubr.msk.bf16.mxu0 %vm14009_vm1, %v19171_v4 }
0x216d   :  { %v3442_v54 = vpop.permute.xlu1 %3441 }
0x216e   :  { %12164 = vmatmul.mubr.msk.bf16.gmra.mrb[96].mxu0 %vm523_vm5, %v3442_v54 }
0x216f   :  { %12167 = vmatprep.mubr.msk.bf16.mxu0 %vm14009_vm1, %v19171_v4 }
0x2176   :  { %v3444_v5 = vpop.permute.xlu0 %3443 }
0x2177   :  { %12168 = vmatmul.mubr.msk.bf16.gmra.mrb[100].mxu0 %vm523_vm5, %v3444_v5 }
0x2178   :  { %12242 = vmatprep.mubr.msk.bf16.mxu0 %vm14009_vm1, %v19171_v4 }
0x222f   :  { %v3488_v39 = vpop.f32.mrb[92].mxu0 }
0x2230   :  { %v3511_v61 = vadd.f32 %v3488_v39, %v517_v12  ;;  %v12161_v55 = vpop.f32.mrb[93].mxu0 }
0x2231   :  { %v3491_v21 = vpop.f32.mrb[94].mxu0 }
0x2232   :  { %13415 = vtanh.f32 %v3511_v61  ;;  %v3512_v7 = vadd.f32 %v3491_v21, %v518_v38  ;;  %v12162_v47 = vpop.f32.mrb[95].mxu0 }
0x2234   :  { %13417 = vtanh.f32 %v3512_v7 }
0x223c   :  { %v13416_v44 = vpop.eup %13415 }
0x223d   :  { %v3523_v8 = vmul.f32 %v13416_v44, %v14178_v22 }
0x223e   :  { %v13418_v31 = vpop.eup %13417 }
0x223f   :  { %v15683_v17 = vadd.f32 %v3523_v8, %v14229_v1  ;;  %v3524_v20 = vmul.f32 %v13418_v31, %v14178_v22 }
0x2241   :  { %3547 = vrot.lane.b32.xlu1 %v15683_v17, %s19233_s0  ;;  %v3496_v14 = vpop.f32.mrb[96].mxu0  ;;  %v15690_v51 = vadd.f32 %v3524_v20, %v14229_v1 }
0x2242   :  { %v3513_v18 = vadd.f32 %v3496_v14, %v519_v57  ;;  %v12165_v34 = vpop.f32.mrb[97].mxu0 }
0x2243   :  { %v3499_v52 = vpop.f32.mrb[98].mxu0  ;;  %3549 = vrot.lane.b32.xlu0 %v15690_v51, %s19233_s0  ;;  %v3535_v34 = vmul.f32 %v15683_v17, %v15542_v23 }
0x2244   :  { %13419 = vtanh.f32 %v3513_v18  ;;  %v3514_v37 = vadd.f32 %v3499_v52, %v520_v60  ;;  %v12166_v48 = vpop.f32.mrb[99].mxu0 }
0x2246   :  { %13421 = vtanh.f32 %v3514_v37  ;;  %v3536_v37 = vmul.f32 %v15690_v51, %v15547_v29 }
0x224a   :  { %v3504_v35 = vpop.f32.mrb[100].mxu0 }
0x224b   :  { %v3515_v27 = vadd.f32 %v3504_v35, %v521_v50  ;;  %v12169_v30 = vpop.f32.mrb[101].mxu0 }
0x224c   :  { %v3507_v24 = vpop.f32.mrb[102].mxu0 }
0x224d   :  { %13423 = vtanh.f32 %v3515_v27  ;;  %v3516_v59 = vadd.f32 %v3507_v24, %v522_v0  ;;  %v12170_v26 = vpop.f32.mrb[103].mxu0 }
0x224e   :  { %v13420_v54 = vpop.eup %13419 }
0x224f   :  { %13425 = vtanh.f32 %v3516_v59  ;;  %v3525_v5 = vmul.f32 %v13420_v54, %v14178_v22 }
0x2250   :  { %v13422_v6 = vpop.eup %13421 }
0x2251   :  { %v15703_v16 = vadd.f32 %v3525_v5, %v14229_v1  ;;  %v3526_v32 = vmul.f32 %v13422_v6, %v14178_v22 }
0x2253   :  { %3551 = vrot.lane.b32.xlu1 %v15703_v16, %s19233_s0  ;;  %v15709_v56 = vadd.f32 %v3526_v32, %v14229_v1  ;;  %v3537_v35 = vmul.f32 %v15703_v16, %v15552_v46 }
0x2255   :  { %3553 = vrot.lane.b32.xlu0 %v15709_v56, %s19233_s0  ;;  %v3538_v30 = vmul.f32 %v15709_v56, %v15558_v2 }
0x2257   :  { %v13424_v62 = vpop.eup %13423 }
0x2258   :  { %v3527_v12 = vmul.f32 %v13424_v62, %v14178_v22 }
0x2259   :  { %v13426_v39 = vpop.eup %13425 }
0x225a   :  { %v15715_v61 = vadd.f32 %v3527_v12, %v14229_v1  ;;  %v3528_v55 = vmul.f32 %v13426_v39, %v14178_v22 }
0x225c   :  { %3555 = vrot.lane.b32.xlu1 %v15715_v61, %s19233_s0  ;;  %v15721_v38 = vadd.f32 %v3528_v55, %v14229_v1  ;;  %v3539_v24 = vmul.f32 %v15715_v61, %v15564_v10  ;;  %v3890_v55 = vld [vmem:[%s19243_s24] sm:$0xff] }
0x225e   :  { %3557 = vrot.lane.b32.xlu0 %v15721_v38, %s19233_s0  ;;  %v3540_v54 = vmul.f32 %v15721_v38, %v15569_v40 }
0x22b3   :  { %v3548_v21 = vpop.permute.xlu1 %3547 }
0x22b4   :  { %v3565_v7 = vmul.f32 %v3548_v21, %v15683_v17  ;;  %v3891_v21 = vld [vmem:[%s19243_s24 + $0x8] sm:$0xff] }
0x22b5   :  { %v3550_v47 = vpop.permute.xlu0 %3549 }
0x22b6   :  { %v3566_v44 = vmul.f32 %v3550_v47, %v15690_v51  ;;  %3577 = vrot.lane.b32.xlu1 %v3565_v7, %s14013_s29  ;;  %v3894_v7 = vmul.f32 %v3890_v55, %v14178_v22 }
0x22b8   :  { %3579 = vrot.lane.b32.xlu0 %v3566_v44, %s14013_s29 }
0x22c5   :  { %v3552_v13 = vpop.permute.xlu1 %3551 }
0x22c6   :  { %v3567_v8 = vmul.f32 %v3552_v13, %v15703_v16 }
0x22c7   :  { %v3554_v31 = vpop.permute.xlu0 %3553 }
0x22c8   :  { %v3568_v3 = vmul.f32 %v3554_v31, %v15709_v56  ;;  %3581 = vrot.lane.b32.xlu1 %v3567_v8, %s14013_s29 }
0x22ca   :  { %3583 = vrot.lane.b32.xlu0 %v3568_v3, %s14013_s29 }
0x22ce   :  { %v3556_v20 = vpop.permute.xlu1 %3555 }
0x22cf   :  { %v3569_v57 = vmul.f32 %v3556_v20, %v15715_v61  ;;  %v3892_v20 = vld [vmem:[%s19243_s24 + $0x10] sm:$0xff] }
0x22d0   :  { %v3558_v14 = vpop.permute.xlu0 %3557 }
0x22d1   :  { %v3570_v18 = vmul.f32 %v3558_v14, %v15721_v38  ;;  %3585 = vrot.lane.b32.xlu1 %v3569_v57, %s14013_s29  ;;  %v3893_v57 = vld [vmem:[%s19243_s24 + $0x18] sm:$0xff]  ;;  %v3888_v14 = vld [vmem:[%s19142_s7] sm:$0xf] }
0x22d3   :  { %3587 = vrot.lane.b32.xlu0 %v3570_v18, %s14013_s29  ;;  %v3897_v18 = vmul.f32 %v3893_v57, %v14178_v22 }
0x2328   :  { %v3578_v60 = vpop.permute.xlu1 %3577 }
0x2329   :  { %v3595_v52 = vadd.f32 %v3578_v60, %v3535_v34 }
0x232a   :  { %v3580_v48 = vpop.permute.xlu0 %3579 }
0x232b   :  { %13427 = vtanh.f32 %v3595_v52  ;;  %v3596_v28 = vadd.f32 %v3580_v48, %v3536_v37 }
0x232d   :  { %13429 = vtanh.f32 %v3596_v28 }
0x2335   :  { %v13428_v43 = vpop.eup %13427 }
0x2336   :  { %3613 = vrot.lane.b32.xlu1 %v13428_v43, %s19233_s0 }
0x2337   :  { %v13430_v50 = vpop.eup %13429 }
0x2338   :  { %3615 = vrot.lane.b32.xlu0 %v13430_v50, %s19233_s0 }
0x233a   :  { %v3582_v27 = vpop.permute.xlu1 %3581 }
0x233b   :  { %v3597_v23 = vadd.f32 %v3582_v27, %v3537_v35 }
0x233c   :  { %v3584_v0 = vpop.permute.xlu0 %3583 }
0x233d   :  { %13431 = vtanh.f32 %v3597_v23  ;;  %v3598_v29 = vadd.f32 %v3584_v0, %v3538_v30  ;;  %v3909_v0 = vld [vmem:[%s19143_s1] sm:$0xff] }
0x233f   :  { %13433 = vtanh.f32 %v3598_v29  ;;  %v3910_v29 = vld [vmem:[%s19143_s1 + $0x8] sm:$0xff] }
0x2343   :  { %v3586_v59 = vpop.permute.xlu1 %3585 }
0x2344   :  { %v3599_v26 = vadd.f32 %v3586_v59, %v3539_v24  ;;  %v3957_v59 = vpack.c.bf16 %v3910_v29, %v3909_v0 }
0x2345   :  { %v3588_v5 = vpop.permute.xlu0 %3587 }
0x2346   :  { %13435 = vtanh.f32 %v3599_v26  ;;  %v3600_v46 = vadd.f32 %v3588_v5, %v3540_v54  ;;  %v3911_v26 = vld [vmem:[%s19143_s1 + $0x10] sm:$0xff]  ;;  %v3912_v54 = vld [vmem:[%s19143_s1 + $0x18] sm:$0xff]  ;;  %v3913_v5 = vld [vmem:[%s19143_s1 + $0x20] sm:$0xff] }
0x2347   :  { %v13432_v6 = vpop.eup %13431 }
0x2348   :  { %13437 = vtanh.f32 %v3600_v46  ;;  %3617 = vrot.lane.b32.xlu1 %v13432_v6, %s19233_s0  ;;  %v3914_v46 = vld [vmem:[%s19143_s1 + $0x28] sm:$0xff] }
0x2349   :  { %v13434_v2 = vpop.eup %13433 }
0x234a   :  { %3619 = vrot.lane.b32.xlu0 %v13434_v2, %s19233_s0  ;;  %v3958_v2 = vpack.c.bf16 %v3912_v54, %v3911_v26 }
0x2350   :  { %v13436_v32 = vpop.eup %13435 }
0x2351   :  { %3621 = vrot.lane.b32.xlu1 %v13436_v32, %s19233_s0  ;;  %v3959_v32 = vpack.c.bf16 %v3914_v46, %v3913_v5 }
0x2352   :  { %v13438_v62 = vpop.eup %13437 }
0x2353   :  { %3623 = vrot.lane.b32.xlu0 %v13438_v62, %s19233_s0  ;;  %v3915_v62 = vld [vmem:[%s19143_s1 + $0x30] sm:$0xff] }
0x23a8   :  { %v3614_v10 = vpop.permute.xlu1 %3613 }
0x23a9   :  { %v15756_v12 = vmul.f32 %v3614_v10, %v15683_v17  ;;  %v3895_v17 = vmul.f32 %v3891_v21, %v14178_v22  ;;  %v3916_v10 = vld [vmem:[%s19143_s1 + $0x38] sm:$0xff] }
0x23aa   :  { %v3616_v40 = vpop.permute.xlu0 %3615 }
0x23ab   :  { %19241 = vst [vmem:[#allocation9_spill] sm:$0xff] %v15756_v12  ;;  %13439 = vtanh.f32 %v15756_v12  ;;  %v15760_v39 = vmul.f32 %v3616_v40, %v15690_v51  ;;  %v15771_v47 = vpack.c.bf16 %v3895_v17, %v3894_v7  ;;  %v3960_v40 = vpack.c.bf16 %v3916_v10, %v3915_v62 }
0x23ad   :  { %19242 = vst [vmem:[#allocation10_spill] sm:$0xff] %v15760_v39  ;;  %13441 = vtanh.f32 %v15760_v39  ;;  %12239 = vmatpush3.bf16.msra.mxu0 %v15771_v47 }
0x23ae   :  { %12240 = vmatprep.subr.bf16.mxu0 %v19171_v4 }
0x23b5   :  { %v13440_v51 = vpop.eup %13439 }
0x23b6   :  { %3649 = vrot.lane.b32.xlu1 %v13440_v51, %s14013_s29 }
0x23b7   :  { %v13442_v44 = vpop.eup %13441 }
0x23b8   :  { %3651 = vrot.lane.b32.xlu0 %v13442_v44, %s14013_s29 }
0x23ba   :  { %v3618_v13 = vpop.permute.xlu1 %3617 }
0x23bb   :  { %v15778_v8 = vmul.f32 %v3618_v13, %v15703_v16  ;;  %v3896_v16 = vmul.f32 %v3892_v20, %v14178_v22 }
0x23bc   :  { %v3620_v31 = vpop.permute.xlu0 %3619 }
0x23bd   :  { %19244 = vst [vmem:[#allocation11_spill] sm:$0xff] %v15778_v8  ;;  %13443 = vtanh.f32 %v15778_v8  ;;  %v15782_v3 = vmul.f32 %v3620_v31, %v15709_v56  ;;  %v3889_v56 = vpack.c.bf16 %v3888_v14, %v3888_v14  ;;  %v15796_v34 = vpack.c.bf16 %v3897_v18, %v3896_v16 }
0x23bf   :  { %19245 = vst [vmem:[#allocation12_spill] sm:$0xff] %v15782_v3  ;;  %13445 = vtanh.f32 %v15782_v3  ;;  %13032 = vmatprep.subr.msk.bf16.mxu1 %vm4060_vm7, %v3889_v56  ;;  %12241 = vmatpush3.bf16.msra.mxu0 %v15796_v34  ;;  %v4062_v35 = vsel %vm4060_vm7, %v3889_v56, 0 }
0x23c2   :  { %12243 = vmatmul.mubr.bf16.vlgmr.msra.gmra.mrb[104].mxu0 %v19240_v45 }
0x23c3   :  { %v3622_v60 = vpop.permute.xlu1 %3621  ;;  %12246 = vmatprep.mubr.msk.bf16.mxu0 %vm14009_vm1, %v19171_v4 }
0x23c4   :  { %v15801_v52 = vmul.f32 %v3622_v60, %v15715_v61 }
0x23c5   :  { %v3624_v37 = vpop.permute.xlu0 %3623 }
0x23c6   :  { %19246 = vst [vmem:[#allocation13_spill] sm:$0xff] %v15801_v52  ;;  %13447 = vtanh.f32 %v15801_v52  ;;  %v15806_v48 = vmul.f32 %v3624_v37, %v15721_v38 }
0x23c7   :  { %v13444_v28 = vpop.eup %13443 }
0x23c8   :  { %19247 = vst [vmem:[#allocation14_spill] sm:$0xff] %v15806_v48  ;;  %13449 = vtanh.f32 %v15806_v48  ;;  %3653 = vrot.lane.b32.xlu1 %v13444_v28, %s14013_s29 }
0x23c9   :  { %v13446_v43 = vpop.eup %13445 }
0x23ca   :  { %3655 = vrot.lane.b32.xlu0 %v13446_v43, %s14013_s29  ;;  %12247 = vmatmul.mubr.bf16.gmra.mrb[108].mxu0 %v19240_v45 }
0x23cb   :  { %12250 = vmatprep.mubr.msk.bf16.mxu0 %vm14009_vm1, %v19171_v4 }
0x23d0   :  { %v13448_v61 = vpop.eup %13447 }
0x23d1   :  { %3657 = vrot.lane.b32.xlu1 %v13448_v61, %s14013_s29 }
0x23d2   :  { %v13450_v38 = vpop.eup %13449  ;;  %12251 = vmatmul.mubr.bf16.gmra.mrb[112].mxu0 %v19240_v45 }
0x23d3   :  { %3659 = vrot.lane.b32.xlu0 %v13450_v38, %s14013_s29 }
0x2428   :  { %v3650_v50 = vpop.permute.xlu1 %3649 }
0x2429   :  { %12179 = vmatprep.mubr.msk.f32.mxu1 %vm523_vm5, %v3650_v50 }
0x242a   :  { %v3652_v27 = vpop.permute.xlu0 %3651 }
0x242b   :  { %12180 = vmatmul.mubr.msk.f32.vlgmr.msra.gmra.mrb[78].mxu1 %vm523_vm5, %v3652_v27 }
0x242c   :  { %12189 = vmatpush3.bf16.msra.mxu1 %v4062_v35 }
0x243a   :  { %v3654_v23 = vpop.permute.xlu1 %3653 }
0x243b   :  { %12182 = vmatprep.mubr.msk.f32.mxu1 %vm523_vm5, %v3654_v23 }
0x243c   :  { %v3656_v30 = vpop.permute.xlu0 %3655 }
0x243d   :  { %12183 = vmatmul.mubr.msk.f32.gmra.mrb[92].mxu1 %vm523_vm5, %v3656_v30 }
0x2443   :  { %v3658_v24 = vpop.permute.xlu1 %3657 }
0x2444   :  { %12185 = vmatprep.mubr.msk.f32.mxu1 %vm523_vm5, %v3658_v24 }
0x2445   :  { %v3660_v6 = vpop.permute.xlu0 %3659 }
0x2446   :  { %12186 = vmatmul.mubr.msk.f32.gmra.mrb[94].mxu1 %vm523_vm5, %v3660_v6 }
0x2447   :  { %12190 = vmatprep.mubr.msk.bf16.mxu1 %vm3987_vm8, %v3957_v59 }
0x244a   :  { %12191 = vmatmul.mubr.msk.bf16.vlgmr.msra.gmra.mrb[96].mxu1 %vm3987_vm8, %v3958_v2 }
0x244b   :  { %12194 = vmatprep.mubr.msk.bf16.mxu1 %vm3987_vm8, %v3959_v32 }
0x2452   :  { %12195 = vmatmul.mubr.msk.bf16.gmra.mrb[100].mxu1 %vm3987_vm8, %v3960_v40 }
0x2495   :  { %v4371_v55 = vpop.f32.mrb[104].mxu0 }
0x2496   :  { %v12244_v21 = vpop.f32.mrb[105].mxu0 }
0x2497   :  { %v4374_v7 = vpop.f32.mrb[106].mxu0 }
0x2498   :  { %v12245_v17 = vpop.f32.mrb[107].mxu0 }
0x249d   :  { %v4379_v51 = vpop.f32.mrb[108].mxu0 }
0x249e   :  { %v12248_v44 = vpop.f32.mrb[109].mxu0 }
0x249f   :  { %v4382_v13 = vpop.f32.mrb[110].mxu0 }
0x24a0   :  { %v12249_v31 = vpop.f32.mrb[111].mxu0 }
0x24a5   :  { %v4387_v20 = vpop.f32.mrb[112].mxu0 }
0x24a6   :  { %v12252_v57 = vpop.f32.mrb[113].mxu0 }
0x24a7   :  { %v4390_v14 = vpop.f32.mrb[114].mxu0 }
0x24a8   :  { %v12253_v16 = vpop.f32.mrb[115].mxu0 }
0x24fe   :  { %v15854_v18 = vpop.f32.mrb[78].mxu1 }
0x24ff   :  { %19248 = vst [vmem:[#allocation15_spill] sm:$0xff] %v15854_v18  ;;  %v15858_v56 = vadd.f32 %v15854_v18, %v15405_v33  ;;  %v15860_v60 = vpop.f32.mrb[79].mxu1 }
0x2500   :  { %19250 = vst [vmem:[#allocation17_spill] sm:$0xff] %v15860_v60  ;;  %v15864_v37 = vadd.f32 %v15860_v60, %v15407_v58 }
0x2501   :  { %19249 = vst [vmem:[#allocation16_spill] sm:$0xff] %v15858_v56 }
0x2502   :  { %19251 = vst [vmem:[#allocation18_spill] sm:$0xff] %v15864_v37 }
0x2510   :  { %v15866_v28 = vpop.f32.mrb[92].mxu1 }
0x2511   :  { %19252 = vst [vmem:[#allocation19_spill] sm:$0xff] %v15866_v28  ;;  %v15870_v43 = vadd.f32 %v15866_v28, %v15409_v42  ;;  %v15872_v61 = vpop.f32.mrb[93].mxu1  ;;  %v15893_v42 = vld [vmem:[%s19144_s9] ss:$0 sm:$0xff] }
0x2512   :  { %19254 = vst [vmem:[#allocation21_spill] sm:$0xff] %v15872_v61  ;;  %v15876_v38 = vadd.f32 %v15872_v61, %v15411_v11 }
0x2513   :  { %19253 = vst [vmem:[#allocation20_spill] sm:$0xff] %v15870_v43 }
0x2514   :  { %19255 = vst [vmem:[#allocation22_spill] sm:$0xff] %v15876_v38 }
0x2519   :  { %v15878_v33 = vpop.f32.mrb[94].mxu1 }
0x251a   :  { %19256 = vst [vmem:[#allocation23_spill] sm:$0xff] %v15878_v33  ;;  %v15882_v50 = vadd.f32 %v15878_v33, %v15413_v53  ;;  %v15884_v58 = vpop.f32.mrb[95].mxu1 }
0x251b   :  { %19258 = vst [vmem:[#allocation25_spill] sm:$0xff] %v15884_v58  ;;  %v15888_v35 = vadd.f32 %v15884_v58, %v15415_v15 }
0x251c   :  { %19257 = vst [vmem:[#allocation24_spill] sm:$0xff] %v15882_v50 }
0x251d   :  { %19259 = vst [vmem:[#allocation26_spill] sm:$0xff] %v15888_v35  ;;  %v12192_v27 = vpop.f32.mrb[96].mxu1 }
0x251e   :  { %v4107_v11 = vadd.f32 %v12192_v27, %v15893_v42  ;;  %v4098_v23 = vpop.f32.mrb[97].mxu1 }
0x251f   :  { %v4099_v30 = vadd.f32 %v15893_v42, %v4098_v23  ;;  %v12193_v0 = vpop.f32.mrb[98].mxu1 }
0x2520   :  { %v4110_v53 = vadd.f32 %v12193_v0, %v15893_v42  ;;  %v4101_v29 = vpop.f32.mrb[99].mxu1  ;;  %v4291_v24 = vmul.f32 %v4107_v11, %v14178_v22 }
0x2521   :  { %v4289_v15 = vmul.f32 %v4099_v30, %v14178_v22  ;;  %v4102_v59 = vadd.f32 %v15893_v42, %v4101_v29 }
0x2522   :  { %v4396_v26 = vadd.f32 %v4379_v51, %v4291_v24  ;;  %v4292_v54 = vmul.f32 %v4110_v53, %v14178_v22 }
0x2523   :  { %v4394_v5 = vadd.f32 %v4371_v55, %v4289_v15  ;;  %v4290_v46 = vmul.f32 %v4102_v59, %v14178_v22 }
0x2524   :  { %13451 = vtanh.f32 %v4396_v26  ;;  %v4397_v6 = vadd.f32 %v4382_v13, %v4292_v54 }
0x2525   :  { %13453 = vtanh.f32 %v4394_v5  ;;  %v4395_v2 = vadd.f32 %v4374_v7, %v4290_v46  ;;  %v15903_v32 = vpop.f32.mrb[100].mxu1 }
0x2526   :  { %13455 = vtanh.f32 %v4397_v6  ;;  %v4114_v62 = vpop.f32.mrb[101].mxu1 }
0x2527   :  { %13457 = vtanh.f32 %v4395_v2  ;;  %v4115_v10 = vadd.f32 %v15893_v42, %v4114_v62  ;;  %v15906_v40 = vpop.f32.mrb[102].mxu1 }
0x2528   :  { %v4117_v21 = vpop.f32.mrb[103].mxu1 }
0x2529   :  { %v4118_v17 = vadd.f32 %v15893_v42, %v4117_v21  ;;  %v4293_v55 = vmul.f32 %v4115_v10, %v14178_v22 }
0x252b   :  { %v4398_v51 = vadd.f32 %v4387_v20, %v4293_v55  ;;  %v4294_v44 = vmul.f32 %v4118_v17, %v14178_v22 }
0x252d   :  { %13459 = vtanh.f32 %v4398_v51  ;;  %v4399_v13 = vadd.f32 %v4390_v14, %v4294_v44 }
0x252e   :  { %v13452_v7 = vpop.eup %13451 }
0x252f   :  { %v13454_v31 = vpop.eup %13453  ;;  %13461 = vtanh.f32 %v4399_v13  ;;  %v4408_v30 = vmul.f32 %v13452_v7, %v14178_v22 }
0x2530   :  { %v13456_v57 = vpop.eup %13455  ;;  %v4406_v16 = vmul.f32 %v13454_v31, %v14178_v22 }
0x2531   :  { %v13458_v27 = vpop.eup %13457  ;;  %v4409_v14 = vmul.f32 %v13456_v57, %v14178_v22  ;;  %v15926_v0 = vadd.f32 %v4408_v30, %v14229_v1 }
0x2532   :  { %v15913_v11 = vadd.f32 %v4406_v16, %v14229_v1  ;;  %v4407_v23 = vmul.f32 %v13458_v27, %v14178_v22 }
0x2533   :  { %v15931_v29 = vadd.f32 %v4409_v14, %v14229_v1  ;;  %v4420_v30 = vmul.f32 0.0, %v15926_v0 }
0x2534   :  { %4430 = vrot.lane.b32.xlu1 %v15913_v11, %s19233_s0  ;;  %v15920_v20 = vadd.f32 %v4407_v23, %v14229_v1  ;;  %v4418_v7 = vmul.f32 0.0, %v15913_v11 }
0x2536   :  { %4432 = vrot.lane.b32.xlu0 %v15920_v20, %s19233_s0  ;;  %v4419_v16 = vmul.f32 0.0, %v15920_v20 }
0x2537   :  { %v13460_v53 = vpop.eup %13459 }
0x2538   :  { %4434 = vrot.lane.b32.xlu1 %v15926_v0, %s19233_s0  ;;  %v4410_v24 = vmul.f32 %v13460_v53, %v14178_v22 }
0x2539   :  { %v13462_v15 = vpop.eup %13461 }
0x253a   :  { %4436 = vrot.lane.b32.xlu0 %v15931_v29, %s19233_s0  ;;  %v15937_v59 = vadd.f32 %v4410_v24, %v14229_v1  ;;  %v4411_v26 = vmul.f32 %v13462_v15, %v14178_v22  ;;  %v4421_v24 = vmul.f32 0.0, %v15931_v29 }
0x253c   :  { %4438 = vrot.lane.b32.xlu1 %v15937_v59, %s19233_s0  ;;  %v15943_v54 = vadd.f32 %v4411_v26, %v14229_v1 }
0x253e   :  { %4440 = vrot.lane.b32.xlu0 %v15943_v54, %s19233_s0 }
0x25a6   :  { %v4431_v5 = vpop.permute.xlu1 %4430 }
0x25a7   :  { %v4448_v46 = vmul.f32 %v4431_v5, %v15913_v11  ;;  %v4422_v5 = vmul.f32 0.0, %v15937_v59 }
0x25a8   :  { %v4433_v6 = vpop.permute.xlu0 %4432 }
0x25a9   :  { %v4449_v2 = vmul.f32 %v4433_v6, %v15920_v20  ;;  %4460 = vrot.lane.b32.xlu1 %v4448_v46, %s14013_s29 }
0x25aa   :  { %v4435_v62 = vpop.permute.xlu1 %4434 }
0x25ab   :  { %v4450_v10 = vmul.f32 %v4435_v62, %v15926_v0  ;;  %4462 = vrot.lane.b32.xlu0 %v4449_v2, %s14013_s29  ;;  %v4423_v2 = vmul.f32 0.0, %v15943_v54 }
0x25ac   :  { %v4437_v21 = vpop.permute.xlu0 %4436 }
0x25ad   :  { %v4451_v17 = vmul.f32 %v4437_v21, %v15931_v29  ;;  %4464 = vrot.lane.b32.xlu1 %v4450_v10, %s14013_s29 }
0x25ae   :  { %v4439_v55 = vpop.permute.xlu1 %4438 }
0x25af   :  { %v4452_v51 = vmul.f32 %v4439_v55, %v15937_v59  ;;  %4466 = vrot.lane.b32.xlu0 %v4451_v17, %s14013_s29 }
0x25b0   :  { %v4441_v44 = vpop.permute.xlu0 %4440 }
0x25b1   :  { %v4453_v13 = vmul.f32 %v4441_v44, %v15943_v54  ;;  %4468 = vrot.lane.b32.xlu1 %v4452_v51, %s14013_s29 }
0x25b3   :  { %4470 = vrot.lane.b32.xlu0 %v4453_v13, %s14013_s29 }
0x261b   :  { %v4461_v31 = vpop.permute.xlu1 %4460 }
0x261c   :  { %v15960_v57 = vadd.f32 %v4461_v31, %v4418_v7  ;;  %v3901_v7 = vld [vmem:[%s19145_s10] sm:$0xff]  ;;  %v3902_v31 = vld [vmem:[%s19145_s10 + $0x8] sm:$0xff] }
0x261d   :  { %v4463_v27 = vpop.permute.xlu0 %4462 }
0x261e   :  { %13463 = vtanh.f32 %v15960_v57  ;;  %v15964_v23 = vadd.f32 %v4463_v27, %v4419_v16  ;;  %v3903_v16 = vld [vmem:[%s19145_s10 + $0x10] sm:$0xff]  ;;  %v15998_v27 = vpack.c.bf16 %v3902_v31, %v3901_v7 }
0x261f   :  { %v4465_v14 = vpop.permute.xlu1 %4464 }
0x2620   :  { %13465 = vtanh.f32 %v15964_v23  ;;  %v15968_v53 = vadd.f32 %v4465_v14, %v4420_v30  ;;  %v3904_v30 = vld [vmem:[%s19145_s10 + $0x18] sm:$0xff]  ;;  %12869 = vmatprep.subr.bf16.mxu0 %v15998_v27  ;;  %12885 = vmatprep.subr.bf16.mxu1 %v15998_v27 }
0x2621   :  { %v4467_v15 = vpop.permute.xlu0 %4466  ;;  %v16003_v14 = vpack.c.bf16 %v3904_v30, %v3903_v16  ;;  %12871 = vmatpush3.bf16.msra.mxu0 %v15998_v27  ;;  %12887 = vmatpush3.bf16.msra.mxu1 %v15998_v27 }
0x2622   :  { %13467 = vtanh.f32 %v15968_v53  ;;  %v15972_v26 = vadd.f32 %v4467_v15, %v4421_v24 }
0x2623   :  { %v4469_v46 = vpop.permute.xlu1 %4468  ;;  %12873 = vmatprep.subr.bf16.mxu0 %v16003_v14  ;;  %12889 = vmatprep.subr.bf16.mxu1 %v16003_v14 }
0x2624   :  { %13469 = vtanh.f32 %v15972_v26  ;;  %v15976_v6 = vadd.f32 %v4469_v46, %v4422_v5 }
0x2625   :  { %v4471_v62 = vpop.permute.xlu0 %4470  ;;  %12875 = vmatpush3.bf16.msra.mxu0 %v16003_v14  ;;  %12891 = vmatpush3.bf16.msra.mxu1 %v16003_v14 }
0x2626   :  { %13471 = vtanh.f32 %v15976_v6  ;;  %v15980_v10 = vadd.f32 %v4471_v62, %v4423_v2  ;;  %12271 = vmatprep.subr.bf16.mxu0 %v19171_v4  ;;  %12893 = vmatprep.subr.bf16.mxu1 %v15998_v27 }
0x2628   :  { %v13464_v21 = vpop.eup %13463  ;;  %13473 = vtanh.f32 %v15980_v10 }
0x2629   :  { %4496 = vrot.lane.b32.xlu1 %v13464_v21, %s19233_s0 }
0x262a   :  { %v13466_v17 = vpop.eup %13465 }
0x262b   :  { %4498 = vrot.lane.b32.xlu0 %v13466_v17, %s19233_s0 }
0x262c   :  { %v13468_v55 = vpop.eup %13467 }
0x262d   :  { %4500 = vrot.lane.b32.xlu1 %v13468_v55, %s19233_s0 }
0x262e   :  { %v13470_v51 = vpop.eup %13469 }
0x262f   :  { %4502 = vrot.lane.b32.xlu0 %v13470_v51, %s19233_s0 }
0x2630   :  { %v13472_v44 = vpop.eup %13471 }
0x2631   :  { %4504 = vrot.lane.b32.xlu1 %v13472_v44, %s19233_s0 }
0x2632   :  { %v13474_v13 = vpop.eup %13473 }
0x2633   :  { %4506 = vrot.lane.b32.xlu0 %v13474_v13, %s19233_s0 }
0x269b   :  { %v4497_v24 = vpop.permute.xlu1 %4496 }
0x269c   :  { %v16016_v15 = vmul.f32 %v4497_v24, %v15913_v11 }
0x269d   :  { %v4499_v5 = vpop.permute.xlu0 %4498 }
0x269e   :  { %13475 = vtanh.f32 %v16016_v15  ;;  %v16020_v46 = vmul.f32 %v4499_v5, %v15920_v20 }
0x269f   :  { %v4501_v2 = vpop.permute.xlu1 %4500 }
0x26a0   :  { %13477 = vtanh.f32 %v16020_v46  ;;  %v16024_v62 = vmul.f32 %v4501_v2, %v15926_v0 }
0x26a1   :  { %v4503_v21 = vpop.permute.xlu0 %4502 }
0x26a2   :  { %13479 = vtanh.f32 %v16024_v62  ;;  %v16028_v17 = vmul.f32 %v4503_v21, %v15931_v29 }
0x26a3   :  { %v4505_v11 = vpop.permute.xlu1 %4504 }
0x26a4   :  { %13481 = vtanh.f32 %v16028_v17  ;;  %v16032_v55 = vmul.f32 %v4505_v11, %v15937_v59 }
0x26a5   :  { %v4507_v20 = vpop.permute.xlu0 %4506 }
0x26a6   :  { %13483 = vtanh.f32 %v16032_v55  ;;  %v16036_v51 = vmul.f32 %v4507_v20, %v15943_v54 }
0x26a8   :  { %v13476_v0 = vpop.eup %13475  ;;  %13485 = vtanh.f32 %v16036_v51 }
0x26a9   :  { %4532 = vrot.lane.b32.xlu1 %v13476_v0, %s14013_s29 }
0x26aa   :  { %v13478_v44 = vpop.eup %13477 }
0x26ab   :  { %4534 = vrot.lane.b32.xlu0 %v13478_v44, %s14013_s29 }
0x26ac   :  { %v13480_v29 = vpop.eup %13479 }
0x26ad   :  { %4536 = vrot.lane.b32.xlu1 %v13480_v29, %s14013_s29  ;;  %v3917_v29 = vld [vmem:[%s19143_s1 + $0x40] sm:$0xff] }
0x26ae   :  { %v13482_v13 = vpop.eup %13481 }
0x26af   :  { %4538 = vrot.lane.b32.xlu0 %v13482_v13, %s14013_s29  ;;  %v3918_v13 = vld [vmem:[%s19143_s1 + $0x48] sm:$0xff] }
0x26b0   :  { %v13484_v59 = vpop.eup %13483 }
0x26b1   :  { %4540 = vrot.lane.b32.xlu1 %v13484_v59, %s14013_s29  ;;  %v3961_v59 = vpack.c.bf16 %v3918_v13, %v3917_v29 }
0x26b2   :  { %v13486_v7 = vpop.eup %13485 }
0x26b3   :  { %4542 = vrot.lane.b32.xlu0 %v13486_v7, %s14013_s29  ;;  %v3919_v7 = vld [vmem:[%s19143_s1 + $0x50] sm:$0xff]  ;;  %12198 = vmatprep.mubr.msk.bf16.mxu1 %vm3987_vm8, %v3961_v59 }
0x271b   :  { %v4533_v54 = vpop.permute.xlu1 %4532 }
0x271c   :  { %12262 = vmatprep.mubr.msk.f32.mxu0 %vm523_vm5, %v4533_v54  ;;  %v3920_v54 = vld [vmem:[%s19143_s1 + $0x58] sm:$0xff] }
0x271d   :  { %v4535_v31 = vpop.permute.xlu0 %4534 }
0x271e   :  { %12263 = vmatmul.mubr.msk.f32.vlgmr.msra.gmra.mrb[90].mxu0 %vm523_vm5, %v4535_v31  ;;  %v3962_v31 = vpack.c.bf16 %v3920_v54, %v3919_v7 }
0x271f   :  { %v4537_v16 = vpop.permute.xlu1 %4536  ;;  %12272 = vmatpush3.bf16.msra.mxu0 %v15771_v47 }
0x2720   :  { %12265 = vmatprep.mubr.msk.f32.mxu0 %vm523_vm5, %v4537_v16  ;;  %12273 = vmatprep.subr.bf16.mxu0 %v19171_v4 }
0x2721   :  { %v4539_v30 = vpop.permute.xlu0 %4538  ;;  %12199 = vmatmul.mubr.msk.bf16.gmra.mrb[104].mxu1 %vm3987_vm8, %v3962_v31 }
0x2722   :  { %12266 = vmatmul.mubr.msk.f32.gmra.mrb[116].mxu0 %vm523_vm5, %v4539_v30 }
0x2723   :  { %v4541_v24 = vpop.permute.xlu1 %4540  ;;  %12274 = vmatpush3.bf16.msra.mxu0 %v15796_v34 }
0x2724   :  { %12268 = vmatprep.mubr.msk.f32.mxu0 %vm523_vm5, %v4541_v24  ;;  %12877 = vmatprep.subr.bf16.mxu0 %v15998_v27 }
0x2725   :  { %v4543_v5 = vpop.permute.xlu0 %4542 }
0x2726   :  { %12269 = vmatmul.mubr.msk.f32.gmra.mrb[118].mxu0 %vm523_vm5, %v4543_v5 }
0x2727   :  { %12275 = vmatprep.mubr.msk.bf16.mxu0 %vm14009_vm1, %v19171_v4 }
0x27f1   :  { %v12264_v2 = vpop.f32.mrb[90].mxu0 }
0x27f2   :  { %4658 = vperm.xlu0 %13066, %v12264_v2   ;;  %v4622_v21 = vpop.f32.mrb[91].mxu0 }
0x27f3   :  { %4653 = vperm.xlu1 %13067, %v4622_v21  }
0x27f5   :  { %v12267_v11 = vpop.f32.mrb[116].mxu0 }
0x27f6   :  { %v4632_v20 = vpop.f32.mrb[117].mxu0 }
0x27f7   :  { %4663 = vperm.xlu1 %13067, %v4632_v20  }
0x27f9   :  { %v12270_v0 = vpop.f32.mrb[118].mxu0 }
0x27fa   :  { %v4642_v44 = vpop.f32.mrb[119].mxu0 }
0x27fb   :  { %4668 = vperm.xlu1 %13067, %v12267_v11   ;;  %4673 = vperm.xlu0 %13066, %v4642_v44  }
0x27ff   :  { %4678 = vperm.xlu1 %13067, %v12270_v0  }
0x2871   :  { %v4659_v16 = vpop.permute.xlu0 %4658 }
0x2872   :  { %v4682_v30 = vmul.f32 0.0, %v4659_v16  ;;  %v4654_v24 = vpop.permute.xlu1 %4653 }
0x2873   :  { %v4681_v5 = vmul.f32 0.0, %v4654_v24 }
0x2874   :  { %v4688_v2 = vadd.f32 %v4682_v30, %v16020_v46 }
0x2875   :  { %v4687_v21 = vadd.f32 %v4681_v5, %v16016_v15 }
0x2876   :  { %v4664_v11 = vpop.permute.xlu1 %4663 }
0x2877   :  { %v4693_v20 = vpack.c.bf16 %v4688_v2, %v4687_v21  ;;  %v4683_v0 = vmul.f32 0.0, %v4664_v11  ;;  %v4123_v11 = vadd.f32 %v15903_v32, %v15893_v42 }
0x2879   :  { %4699 = vrot.lane.b32.xlu0 %v4693_v20, %s14013_s29  ;;  %v4689_v59 = vadd.f32 %v4683_v0, %v16024_v62  ;;  %v4126_v20 = vadd.f32 %v15906_v40, %v15893_v42  ;;  %v4295_v0 = vmul.f32 %v4123_v11, %v14178_v22 }
0x287a   :  { %v4674_v44 = vpop.permute.xlu0 %4673  ;;  %v4669_v29 = vpop.permute.xlu1 %4668 }
0x287b   :  { %v4684_v13 = vmul.f32 0.0, %v4669_v29  ;;  %v4685_v7 = vmul.f32 0.0, %v4674_v44 }
0x287d   :  { %v4690_v54 = vadd.f32 %v4684_v13, %v16028_v17  ;;  %v4691_v46 = vadd.f32 %v4685_v7, %v16032_v55  ;;  %v12200_v55 = vpop.f32.mrb[104].mxu1 }
0x287e   :  { %v4679_v31 = vpop.permute.xlu1 %4678 }
0x287f   :  { %v4694_v16 = vpack.c.bf16 %v4690_v54, %v4689_v59  ;;  %v4686_v24 = vmul.f32 0.0, %v4679_v31  ;;  %v4296_v59 = vmul.f32 %v4126_v20, %v14178_v22 }
0x2881   :  { %v4692_v15 = vadd.f32 %v4686_v24, %v16036_v51  ;;  %4701 = vrot.lane.b32.xlu1 %v4694_v16, %s14013_s29  ;;  %v4130_v51 = vpop.f32.mrb[105].mxu1 }
0x2882   :  { %v12201_v2 = vpop.f32.mrb[106].mxu1  ;;  %v4131_v7 = vadd.f32 %v15893_v42, %v4130_v51 }
0x2883   :  { %v4695_v30 = vpack.c.bf16 %v4692_v15, %v4691_v46  ;;  %v4133_v21 = vpop.f32.mrb[107].mxu1  ;;  %v4142_v20 = vadd.f32 %v12201_v2, %v15893_v42 }
0x2884   :  { %v4134_v24 = vadd.f32 %v15893_v42, %v4133_v21  ;;  %v4297_v32 = vmul.f32 %v4131_v7, %v14178_v22 }
0x2885   :  { %4703 = vrot.lane.b32.xlu0 %v4695_v30, %s14013_s29 }
0x2886   :  { %v4298_v40 = vmul.f32 %v4134_v24, %v14178_v22 }
0x28eb   :  { %v4700_v5 = vpop.permute.xlu0 %4699 }
0x28ec   :  { %12276 = vmatmul.mubr.msk.bf16.vlgmr.msra.gmra.mrb[120].mxu0 %vm523_vm5, %v4700_v5 }
0x28ed   :  { %12279 = vmatprep.mubr.msk.bf16.mxu0 %vm14009_vm1, %v19171_v4  ;;  %12879 = vmatpush3.bf16.msra.mxu0 %v15998_v27 }
0x28ee   :  { %12881 = vmatprep.subr.bf16.mxu0 %v16003_v14 }
0x28f1   :  { %12883 = vmatpush3.bf16.msra.mxu0 %v16003_v14 }
0x28f2   :  { %12304 = vmatprep.subr.bf16.mxu0 %v19171_v4 }
0x28f3   :  { %v4702_v62 = vpop.permute.xlu1 %4701 }
0x28f4   :  { %12280 = vmatmul.mubr.msk.bf16.gmra.mrb[124].mxu0 %vm523_vm5, %v4702_v62  ;;  %v4139_v62 = vadd.f32 %v12200_v55, %v15893_v42 }
0x28f5   :  { %12283 = vmatprep.mubr.msk.bf16.mxu0 %vm14009_vm1, %v19171_v4 }
0x28f7   :  { %v4704_v17 = vpop.permute.xlu0 %4703 }
0x28fc   :  { %12284 = vmatmul.mubr.msk.bf16.gmra.mrb[128].mxu0 %vm523_vm5, %v4704_v17 }
0x29bf   :  { %v4748_v44 = vpop.f32.mrb[120].mxu0 }
0x29c0   :  { %v4771_v29 = vadd.f32 %v4748_v44, %v4295_v0  ;;  %v12277_v13 = vpop.f32.mrb[121].mxu0  ;;  %v4299_v44 = vmul.f32 %v4139_v62, %v14178_v22 }
0x29c1   :  { %v4751_v54 = vpop.f32.mrb[122].mxu0 }
0x29c2   :  { %13487 = vtanh.f32 %v4771_v29  ;;  %v4772_v31 = vadd.f32 %v4751_v54, %v4296_v59  ;;  %v12278_v16 = vpop.f32.mrb[123].mxu0  ;;  %v4300_v54 = vmul.f32 %v4142_v20, %v14178_v22 }
0x29c4   :  { %13489 = vtanh.f32 %v4772_v31 }
0x29c7   :  { %v4756_v46 = vpop.f32.mrb[124].mxu0 }
0x29c8   :  { %v4773_v15 = vadd.f32 %v4756_v46, %v4297_v32  ;;  %v12281_v30 = vpop.f32.mrb[125].mxu0 }
0x29c9   :  { %v4759_v5 = vpop.f32.mrb[126].mxu0 }
0x29ca   :  { %13491 = vtanh.f32 %v4773_v15  ;;  %v4774_v17 = vadd.f32 %v4759_v5, %v4298_v40  ;;  %v12282_v51 = vpop.f32.mrb[127].mxu0 }
0x29cc   :  { %v13488_v11 = vpop.eup %13487  ;;  %13493 = vtanh.f32 %v4774_v17 }
0x29cd   :  { %v4783_v21 = vmul.f32 %v13488_v11, %v14178_v22 }
0x29ce   :  { %v13490_v0 = vpop.eup %13489 }
0x29cf   :  { %v4764_v29 = vpop.f32.mrb[128].mxu0  ;;  %v16106_v13 = vadd.f32 %v4783_v21, %v14229_v1  ;;  %v4784_v59 = vmul.f32 %v13490_v0, %v14178_v22 }
0x29d0   :  { %v4775_v7 = vadd.f32 %v4764_v29, %v4299_v44  ;;  %v12285_v55 = vpop.f32.mrb[129].mxu0 }
0x29d1   :  { %4807 = vrot.lane.b32.xlu1 %v16106_v13, %s19233_s0  ;;  %v4767_v2 = vpop.f32.mrb[130].mxu0  ;;  %v16113_v31 = vadd.f32 %v4784_v59, %v14229_v1 }
0x29d2   :  { %13495 = vtanh.f32 %v4775_v7  ;;  %v4776_v16 = vadd.f32 %v4767_v2, %v4300_v54  ;;  %v12286_v24 = vpop.f32.mrb[131].mxu0 }
0x29d3   :  { %4809 = vrot.lane.b32.xlu0 %v16113_v31, %s19233_s0 }
0x29d4   :  { %v13492_v32 = vpop.eup %13491  ;;  %13497 = vtanh.f32 %v4776_v16 }
0x29d5   :  { %v4785_v40 = vmul.f32 %v13492_v32, %v14178_v22 }
0x29d6   :  { %v13494_v46 = vpop.eup %13493 }
0x29d7   :  { %v16119_v15 = vadd.f32 %v4785_v40, %v14229_v1  ;;  %v4786_v30 = vmul.f32 %v13494_v46, %v14178_v22  ;;  %v4795_v46 = vmul.f32 %v16106_v13, %v15960_v57 }
0x29d9   :  { %4811 = vrot.lane.b32.xlu1 %v16119_v15, %s19233_s0  ;;  %v16125_v5 = vadd.f32 %v4786_v30, %v14229_v1 }
0x29db   :  { %4813 = vrot.lane.b32.xlu0 %v16125_v5, %s19233_s0  ;;  %v4798_v57 = vmul.f32 %v16125_v5, %v15972_v26 }
0x29dc   :  { %v13496_v62 = vpop.eup %13495 }
0x29dd   :  { %v4787_v17 = vmul.f32 %v13496_v62, %v14178_v22 }
0x29de   :  { %v13498_v51 = vpop.eup %13497 }
0x29df   :  { %v16131_v11 = vadd.f32 %v4787_v17, %v14229_v1  ;;  %v4788_v20 = vmul.f32 %v13498_v51, %v14178_v22  ;;  %v4796_v17 = vmul.f32 %v16113_v31, %v15964_v23 }
0x29e1   :  { %4815 = vrot.lane.b32.xlu1 %v16131_v11, %s19233_s0  ;;  %v16137_v21 = vadd.f32 %v4788_v20, %v14229_v1 }
0x29e3   :  { %4817 = vrot.lane.b32.xlu0 %v16137_v21, %s19233_s0  ;;  %v4800_v26 = vmul.f32 %v16137_v21, %v15980_v10 }
0x2a43   :  { %v4808_v0 = vpop.permute.xlu1 %4807 }
0x2a44   :  { %v4825_v44 = vmul.f32 %v4808_v0, %v16106_v13  ;;  %v4797_v0 = vmul.f32 %v16119_v15, %v15968_v53  ;;  %v4799_v53 = vmul.f32 %v16131_v11, %v15976_v6 }
0x2a45   :  { %v4810_v29 = vpop.permute.xlu0 %4809 }
0x2a46   :  { %v4826_v59 = vmul.f32 %v4810_v29, %v16113_v31  ;;  %4837 = vrot.lane.b32.xlu1 %v4825_v44, %s14013_s29 }
0x2a48   :  { %4839 = vrot.lane.b32.xlu0 %v4826_v59, %s14013_s29 }
0x2a4b   :  { %v4812_v7 = vpop.permute.xlu1 %4811 }
0x2a4c   :  { %v4827_v55 = vmul.f32 %v4812_v7, %v16119_v15 }
0x2a4d   :  { %v4814_v54 = vpop.permute.xlu0 %4813 }
0x2a4e   :  { %v4828_v2 = vmul.f32 %v4814_v54, %v16125_v5  ;;  %4841 = vrot.lane.b32.xlu1 %v4827_v55, %s14013_s29 }
0x2a50   :  { %4843 = vrot.lane.b32.xlu0 %v4828_v2, %s14013_s29 }
0x2a53   :  { %v4816_v16 = vpop.permute.xlu1 %4815 }
0x2a54   :  { %v4829_v24 = vmul.f32 %v4816_v16, %v16131_v11 }
0x2a55   :  { %v4818_v32 = vpop.permute.xlu0 %4817 }
0x2a56   :  { %v4830_v40 = vmul.f32 %v4818_v32, %v16137_v21  ;;  %4845 = vrot.lane.b32.xlu1 %v4829_v24, %s14013_s29 }
0x2a58   :  { %4847 = vrot.lane.b32.xlu0 %v4830_v40, %s14013_s29 }
0x2ab8   :  { %v4838_v30 = vpop.permute.xlu1 %4837 }
0x2ab9   :  { %v16155_v62 = vadd.f32 %v4838_v30, %v4795_v46 }
0x2aba   :  { %v4840_v51 = vpop.permute.xlu0 %4839 }
0x2abb   :  { %13499 = vtanh.f32 %v16155_v62  ;;  %v16160_v20 = vadd.f32 %v4840_v51, %v4796_v17 }
0x2abd   :  { %13501 = vtanh.f32 %v16160_v20 }
0x2ac0   :  { %v4842_v44 = vpop.permute.xlu1 %4841 }
0x2ac1   :  { %v16165_v29 = vadd.f32 %v4842_v44, %v4797_v0 }
0x2ac2   :  { %v4844_v59 = vpop.permute.xlu0 %4843 }
0x2ac3   :  { %13503 = vtanh.f32 %v16165_v29  ;;  %v16170_v23 = vadd.f32 %v4844_v59, %v4798_v57 }
0x2ac5   :  { %v13500_v7 = vpop.eup %13499  ;;  %13505 = vtanh.f32 %v16170_v23 }
0x2ac6   :  { %4873 = vrot.lane.b32.xlu1 %v13500_v7, %s19233_s0 }
0x2ac7   :  { %v13502_v55 = vpop.eup %13501 }
0x2ac8   :  { %4875 = vrot.lane.b32.xlu0 %v13502_v55, %s19233_s0  ;;  %v4846_v54 = vpop.permute.xlu1 %4845 }
0x2ac9   :  { %v16177_v2 = vadd.f32 %v4846_v54, %v4799_v53 }
0x2aca   :  { %v4848_v16 = vpop.permute.xlu0 %4847 }
0x2acb   :  { %13507 = vtanh.f32 %v16177_v2  ;;  %v16182_v24 = vadd.f32 %v4848_v16, %v4800_v26 }
0x2acd   :  { %v13504_v32 = vpop.eup %13503  ;;  %13509 = vtanh.f32 %v16182_v24 }
0x2ace   :  { %4877 = vrot.lane.b32.xlu1 %v13504_v32, %s19233_s0 }
0x2acf   :  { %v13506_v40 = vpop.eup %13505 }
0x2ad0   :  { %4879 = vrot.lane.b32.xlu0 %v13506_v40, %s19233_s0 }
0x2ad5   :  { %v13508_v6 = vpop.eup %13507 }
0x2ad6   :  { %4881 = vrot.lane.b32.xlu1 %v13508_v6, %s19233_s0 }
0x2ad7   :  { %v13510_v46 = vpop.eup %13509 }
0x2ad8   :  { %4883 = vrot.lane.b32.xlu0 %v13510_v46, %s19233_s0 }
0x2b38   :  { %v4874_v10 = vpop.permute.xlu1 %4873 }
0x2b39   :  { %v16190_v30 = vmul.f32 %v4874_v10, %v16106_v13 }
0x2b3a   :  { %v4876_v17 = vpop.permute.xlu0 %4875 }
0x2b3b   :  { %13511 = vtanh.f32 %v16190_v30  ;;  %v16194_v51 = vmul.f32 %v4876_v17, %v16113_v31 }
0x2b3d   :  { %13513 = vtanh.f32 %v16194_v51 }
0x2b40   :  { %v4878_v0 = vpop.permute.xlu1 %4877 }
0x2b41   :  { %v16198_v44 = vmul.f32 %v4878_v0, %v16119_v15 }
0x2b42   :  { %v4880_v57 = vpop.permute.xlu0 %4879 }
0x2b43   :  { %13515 = vtanh.f32 %v16198_v44  ;;  %v16202_v59 = vmul.f32 %v4880_v57, %v16125_v5 }
0x2b45   :  { %v13512_v13 = vpop.eup %13511  ;;  %13517 = vtanh.f32 %v16202_v59 }
0x2b46   :  { %4909 = vrot.lane.b32.xlu1 %v13512_v13, %s14013_s29 }
0x2b47   :  { %v13514_v7 = vpop.eup %13513 }
0x2b48   :  { %4911 = vrot.lane.b32.xlu0 %v13514_v7, %s14013_s29  ;;  %v4882_v31 = vpop.permute.xlu1 %4881 }
0x2b49   :  { %v16208_v55 = vmul.f32 %v4882_v31, %v16131_v11  ;;  %v3921_v31 = vld [vmem:[%s19143_s1 + $0x60] sm:$0xff] }
0x2b4a   :  { %v4884_v15 = vpop.permute.xlu0 %4883 }
0x2b4b   :  { %13519 = vtanh.f32 %v16208_v55  ;;  %v16212_v53 = vmul.f32 %v4884_v15, %v16137_v21  ;;  %v3922_v15 = vld [vmem:[%s19143_s1 + $0x68] sm:$0xff] }
0x2b4d   :  { %v13516_v5 = vpop.eup %13515  ;;  %13521 = vtanh.f32 %v16212_v53 }
0x2b4e   :  { %4913 = vrot.lane.b32.xlu1 %v13516_v5, %s14013_s29  ;;  %v3923_v5 = vld [vmem:[%s19143_s1 + $0x70] sm:$0xff] }
0x2b4f   :  { %v13518_v54 = vpop.eup %13517 }
0x2b50   :  { %4915 = vrot.lane.b32.xlu0 %v13518_v54, %s14013_s29  ;;  %v3963_v54 = vpack.c.bf16 %v3922_v15, %v3921_v31 }
0x2b52   :  { %12202 = vmatprep.mubr.msk.bf16.mxu1 %vm3987_vm8, %v3963_v54 }
0x2b55   :  { %v13520_v26 = vpop.eup %13519 }
0x2b56   :  { %4917 = vrot.lane.b32.xlu1 %v13520_v26, %s14013_s29  ;;  %v3924_v26 = vld [vmem:[%s19143_s1 + $0x78] sm:$0xff] }
0x2b57   :  { %v13522_v16 = vpop.eup %13521 }
0x2b58   :  { %4919 = vrot.lane.b32.xlu0 %v13522_v16, %s14013_s29  ;;  %v3964_v16 = vpack.c.bf16 %v3924_v26, %v3923_v5 }
0x2b5a   :  { %12203 = vmatmul.mubr.msk.bf16.gmra.mrb[108].mxu1 %vm3987_vm8, %v3964_v16 }
0x2bb8   :  { %v4910_v11 = vpop.permute.xlu1 %4909 }
0x2bb9   :  { %12295 = vmatprep.mubr.msk.f32.mxu0 %vm523_vm5, %v4910_v11 }
0x2bba   :  { %v4912_v32 = vpop.permute.xlu0 %4911 }
0x2bbb   :  { %12296 = vmatmul.mubr.msk.f32.vlgmr.msra.gmra.mrb[132].mxu0 %vm523_vm5, %v4912_v32 }
0x2bbc   :  { %12305 = vmatpush3.bf16.msra.mxu0 %v15771_v47 }
0x2bbd   :  { %12306 = vmatprep.subr.bf16.mxu0 %v19171_v4 }
0x2bc0   :  { %v4914_v21 = vpop.permute.xlu1 %4913  ;;  %12307 = vmatpush3.bf16.msra.mxu0 %v15796_v34 }
0x2bc1   :  { %12298 = vmatprep.mubr.msk.f32.mxu0 %vm523_vm5, %v4914_v21  ;;  %12337 = vmatprep.subr.bf16.mxu0 %v19171_v4 }
0x2bc2   :  { %v4916_v40 = vpop.permute.xlu0 %4915 }
0x2bc3   :  { %12299 = vmatmul.mubr.msk.f32.gmra.mrb[134].mxu0 %vm523_vm5, %v4916_v40 }
0x2bc8   :  { %v4918_v6 = vpop.permute.xlu1 %4917 }
0x2bc9   :  { %12301 = vmatprep.mubr.msk.f32.mxu0 %vm523_vm5, %v4918_v6  ;;  %v3925_v6 = vld [vmem:[%s19143_s1 + $0x80] sm:$0xff] }
0x2bca   :  { %v4920_v46 = vpop.permute.xlu0 %4919 }
0x2bcb   :  { %12302 = vmatmul.mubr.msk.f32.gmra.mrb[136].mxu0 %vm523_vm5, %v4920_v46  ;;  %v3926_v46 = vld [vmem:[%s19143_s1 + $0x88] sm:$0xff] }
0x2bcc   :  { %12308 = vmatprep.mubr.msk.bf16.mxu0 %vm14009_vm1, %v19171_v4 }
0x2c8e   :  { %v12297_v10 = vpop.f32.mrb[132].mxu0 }
0x2c8f   :  { %5035 = vperm.xlu0 %13066, %v12297_v10   ;;  %v4999_v17 = vpop.f32.mrb[133].mxu0 }
0x2c90   :  { %5030 = vperm.xlu1 %13067, %v4999_v17   ;;  %v3965_v17 = vpack.c.bf16 %v3926_v46, %v3925_v6 }
0x2c92   :  { %12206 = vmatprep.mubr.msk.bf16.mxu1 %vm3987_vm8, %v3965_v17  ;;  %v12204_v17 = vpop.f32.mrb[108].mxu1 }
0x2c96   :  { %v12300_v0 = vpop.f32.mrb[134].mxu0 }
0x2c97   :  { %5045 = vperm.xlu0 %13066, %v12300_v0   ;;  %v5009_v57 = vpop.f32.mrb[135].mxu0  ;;  %v3927_v0 = vld [vmem:[%s19143_s1 + $0x90] sm:$0xff] }
0x2c98   :  { %5040 = vperm.xlu1 %13067, %v5009_v57   ;;  %v3928_v57 = vld [vmem:[%s19143_s1 + $0x98] sm:$0xff] }
0x2c9e   :  { %v12303_v13 = vpop.f32.mrb[136].mxu0 }
0x2c9f   :  { %5055 = vperm.xlu0 %13066, %v12303_v13   ;;  %v5019_v7 = vpop.f32.mrb[137].mxu0 }
0x2ca0   :  { %5050 = vperm.xlu1 %13067, %v5019_v7   ;;  %v3966_v7 = vpack.c.bf16 %v3928_v57, %v3927_v0  ;;  %v4146_v0 = vpop.f32.mrb[109].mxu1 }
0x2ca1   :  { %v12205_v57 = vpop.f32.mrb[110].mxu1 }
0x2ca2   :  { %12207 = vmatmul.mubr.msk.bf16.gmra.mrb[112].mxu1 %vm3987_vm8, %v3966_v7 }
0x2d0e   :  { %v5036_v11 = vpop.permute.xlu0 %5035 }
0x2d0f   :  { %v5059_v32 = vmul.f32 0.0, %v5036_v11  ;;  %v5031_v21 = vpop.permute.xlu1 %5030 }
0x2d10   :  { %v5058_v40 = vmul.f32 0.0, %v5031_v21 }
0x2d11   :  { %v5065_v10 = vadd.f32 %v5059_v32, %v16194_v51 }
0x2d12   :  { %v5064_v13 = vadd.f32 %v5058_v40, %v16190_v30 }
0x2d14   :  { %v5070_v31 = vpack.c.bf16 %v5065_v10, %v5064_v13 }
0x2d16   :  { %v5046_v15 = vpop.permute.xlu0 %5045  ;;  %5076 = vrot.lane.b32.xlu1 %v5070_v31, %s14013_s29 }
0x2d17   :  { %v5061_v51 = vmul.f32 0.0, %v5046_v15  ;;  %v5041_v5 = vpop.permute.xlu1 %5040 }
0x2d18   :  { %v5060_v54 = vmul.f32 0.0, %v5041_v5 }
0x2d19   :  { %v5067_v26 = vadd.f32 %v5061_v51, %v16202_v59  ;;  %v4149_v59 = vpop.f32.mrb[111].mxu1  ;;  %v4147_v51 = vadd.f32 %v15893_v42, %v4146_v0 }
0x2d1a   :  { %v5066_v16 = vadd.f32 %v5060_v54, %v16198_v44  ;;  %v4150_v5 = vadd.f32 %v15893_v42, %v4149_v59 }
0x2d1b   :  { %v4301_v54 = vmul.f32 %v4147_v51, %v14178_v22 }
0x2d1c   :  { %v5071_v11 = vpack.c.bf16 %v5067_v26, %v5066_v16 }
0x2d1e   :  { %v5056_v32 = vpop.permute.xlu0 %5055  ;;  %5078 = vrot.lane.b32.xlu0 %v5071_v11, %s14013_s29 }
0x2d1f   :  { %v5063_v30 = vmul.f32 0.0, %v5056_v32  ;;  %v5051_v21 = vpop.permute.xlu1 %5050  ;;  %v4302_v32 = vmul.f32 %v4150_v5, %v14178_v22 }
0x2d20   :  { %v5062_v40 = vmul.f32 0.0, %v5051_v21  ;;  %v4155_v21 = vadd.f32 %v12204_v17, %v15893_v42 }
0x2d21   :  { %v5069_v6 = vadd.f32 %v5063_v30, %v16212_v53 }
0x2d22   :  { %v5068_v46 = vadd.f32 %v5062_v40, %v16208_v55 }
0x2d24   :  { %v5072_v10 = vpack.c.bf16 %v5069_v6, %v5068_v46  ;;  %v4158_v46 = vadd.f32 %v12205_v57, %v15893_v42 }
0x2d26   :  { %5080 = vrot.lane.b32.xlu1 %v5072_v10, %s14013_s29  ;;  %v4303_v10 = vmul.f32 %v4155_v21, %v14178_v22 }
0x2d75   :  { %v16281_v53 = vpop.f32.mrb[112].mxu1 }
0x2d76   :  { %v4162_v7 = vpop.f32.mrb[113].mxu1 }
0x2d77   :  { %v16283_v31 = vpop.f32.mrb[114].mxu1 }
0x2d78   :  { %v4165_v15 = vpop.f32.mrb[115].mxu1 }
0x2d79   :  { %v4166_v17 = vadd.f32 %v15893_v42, %v4165_v15 }
0x2d88   :  { %v5077_v13 = vpop.permute.xlu1 %5076 }
0x2d89   :  { %12309 = vmatmul.mubr.msk.bf16.vlgmr.msra.gmra.mrb[140].mxu0 %vm523_vm5, %v5077_v13 }
0x2d8a   :  { %12312 = vmatprep.mubr.msk.bf16.mxu0 %vm14009_vm1, %v19171_v4  ;;  %12338 = vmatpush3.bf16.msra.mxu0 %v15771_v47 }
0x2d8b   :  { %12339 = vmatprep.subr.bf16.mxu0 %v19171_v4 }
0x2d8e   :  { %12340 = vmatpush3.bf16.msra.mxu0 %v15796_v34 }
0x2d8f   :  { %12901 = vmatprep.subr.bf16.mxu0 %v15998_v27 }
0x2d90   :  { %v5079_v44 = vpop.permute.xlu0 %5078 }
0x2d91   :  { %12313 = vmatmul.mubr.msk.bf16.gmra.mrb[144].mxu0 %vm523_vm5, %v5079_v44  ;;  %v4304_v44 = vmul.f32 %v4158_v46, %v14178_v22 }
0x2d92   :  { %12316 = vmatprep.mubr.msk.bf16.mxu0 %vm14009_vm1, %v19171_v4 }
0x2d98   :  { %v5081_v55 = vpop.permute.xlu1 %5080 }
0x2d99   :  { %12317 = vmatmul.mubr.msk.bf16.gmra.mrb[148].mxu0 %vm523_vm5, %v5081_v55  ;;  %v4163_v55 = vadd.f32 %v15893_v42, %v4162_v7 }
0x2d9a   :  { %12341 = vmatprep.mubr.msk.bf16.mxu0 %vm14009_vm1, %v19171_v4 }
0x2d9b   :  { %v4305_v57 = vmul.f32 %v4163_v55, %v14178_v22 }
0x2e5c   :  { %v5125_v26 = vpop.f32.mrb[140].mxu0 }
0x2e5d   :  { %v5148_v16 = vadd.f32 %v5125_v26, %v4301_v54  ;;  %v12310_v11 = vpop.f32.mrb[141].mxu0 }
0x2e5e   :  { %v5128_v30 = vpop.f32.mrb[142].mxu0 }
0x2e5f   :  { %13523 = vtanh.f32 %v5148_v16  ;;  %v5149_v40 = vadd.f32 %v5128_v30, %v4302_v32  ;;  %v12311_v6 = vpop.f32.mrb[143].mxu0  ;;  %v4306_v32 = vmul.f32 %v4166_v17, %v14178_v22 }
0x2e61   :  { %13525 = vtanh.f32 %v5149_v40 }
0x2e64   :  { %v5133_v0 = vpop.f32.mrb[144].mxu0 }
0x2e65   :  { %v5150_v59 = vadd.f32 %v5133_v0, %v4303_v10  ;;  %v12314_v13 = vpop.f32.mrb[145].mxu0 }
0x2e66   :  { %v5136_v51 = vpop.f32.mrb[146].mxu0 }
0x2e67   :  { %13527 = vtanh.f32 %v5150_v59  ;;  %v5151_v5 = vadd.f32 %v5136_v51, %v4304_v44  ;;  %v12315_v54 = vpop.f32.mrb[147].mxu0 }
0x2e69   :  { %v13524_v26 = vpop.eup %13523  ;;  %13529 = vtanh.f32 %v5151_v5 }
0x2e6a   :  { %v5160_v16 = vmul.f32 %v13524_v26, %v14178_v22 }
0x2e6b   :  { %v13526_v11 = vpop.eup %13525 }
0x2e6c   :  { %v5141_v30 = vpop.f32.mrb[148].mxu0  ;;  %v16299_v21 = vadd.f32 %v5160_v16, %v14229_v1  ;;  %v5161_v7 = vmul.f32 %v13526_v11, %v14178_v22 }
0x2e6d   :  { %v5152_v40 = vadd.f32 %v5141_v30, %v4305_v57  ;;  %v12318_v6 = vpop.f32.mrb[149].mxu0 }
0x2e6e   :  { %5184 = vrot.lane.b32.xlu0 %v16299_v21, %s19233_s0  ;;  %v5144_v42 = vpop.f32.mrb[150].mxu0  ;;  %v16305_v15 = vadd.f32 %v5161_v7, %v14229_v1 }
0x2e6f   :  { %13531 = vtanh.f32 %v5152_v40  ;;  %v5153_v46 = vadd.f32 %v5144_v42, %v4306_v32  ;;  %v12319_v10 = vpop.f32.mrb[151].mxu0 }
0x2e70   :  { %5186 = vrot.lane.b32.xlu1 %v16305_v15, %s19233_s0 }
0x2e71   :  { %v13528_v0 = vpop.eup %13527  ;;  %13533 = vtanh.f32 %v5153_v46 }
0x2e72   :  { %v5162_v59 = vmul.f32 %v13528_v0, %v14178_v22 }
0x2e73   :  { %v13530_v13 = vpop.eup %13529 }
0x2e74   :  { %v16311_v44 = vadd.f32 %v5162_v59, %v14229_v1  ;;  %v5163_v55 = vmul.f32 %v13530_v13, %v14178_v22 }
0x2e76   :  { %5188 = vrot.lane.b32.xlu0 %v16311_v44, %s19233_s0  ;;  %v16317_v51 = vadd.f32 %v5163_v55, %v14229_v1  ;;  %v5172_v55 = vmul.f32 %v16299_v21, %v16155_v62 }
0x2e78   :  { %5190 = vrot.lane.b32.xlu1 %v16317_v51, %s19233_s0  ;;  %v5175_v62 = vmul.f32 %v16317_v51, %v16170_v23 }
0x2e79   :  { %v13532_v5 = vpop.eup %13531 }
0x2e7a   :  { %v5164_v54 = vmul.f32 %v13532_v5, %v14178_v22 }
0x2e7b   :  { %v13534_v17 = vpop.eup %13533 }
0x2e7c   :  { %v16323_v26 = vadd.f32 %v5164_v54, %v14229_v1  ;;  %v5165_v57 = vmul.f32 %v13534_v17, %v14178_v22  ;;  %v5173_v17 = vmul.f32 %v16305_v15, %v16160_v20 }
0x2e7e   :  { %5192 = vrot.lane.b32.xlu0 %v16323_v26, %s19233_s0  ;;  %v16329_v16 = vadd.f32 %v5165_v57, %v14229_v1 }
0x2e80   :  { %5194 = vrot.lane.b32.xlu1 %v16329_v16, %s19233_s0  ;;  %v5177_v23 = vmul.f32 %v16329_v16, %v16182_v24  ;;  %v3929_v24 = vld [vmem:[%s19143_s1 + $0xa0] sm:$0xff] }
0x2ee0   :  { %v5185_v11 = vpop.permute.xlu0 %5184 }
0x2ee1   :  { %v5202_v32 = vmul.f32 %v5185_v11, %v16299_v21 }
0x2ee2   :  { %v5187_v30 = vpop.permute.xlu1 %5186 }
0x2ee3   :  { %v5203_v7 = vmul.f32 %v5187_v30, %v16305_v15  ;;  %5214 = vrot.lane.b32.xlu0 %v5202_v32, %s14013_s29  ;;  %v5174_v32 = vmul.f32 %v16311_v44, %v16165_v29  ;;  %v5176_v29 = vmul.f32 %v16323_v26, %v16177_v2 }
0x2ee5   :  { %5216 = vrot.lane.b32.xlu1 %v5203_v7, %s14013_s29 }
0x2ee8   :  { %v5189_v40 = vpop.permute.xlu0 %5188 }
0x2ee9   :  { %v5204_v6 = vmul.f32 %v5189_v40, %v16311_v44 }
0x2eea   :  { %v5191_v42 = vpop.permute.xlu1 %5190 }
0x2eeb   :  { %v5205_v46 = vmul.f32 %v5191_v42, %v16317_v51  ;;  %5218 = vrot.lane.b32.xlu0 %v5204_v6, %s14013_s29 }
0x2eed   :  { %5220 = vrot.lane.b32.xlu1 %v5205_v46, %s14013_s29 }
0x2ef0   :  { %v5193_v10 = vpop.permute.xlu0 %5192 }
0x2ef1   :  { %v5206_v0 = vmul.f32 %v5193_v10, %v16323_v26 }
0x2ef2   :  { %v5195_v59 = vpop.permute.xlu1 %5194 }
0x2ef3   :  { %v5207_v13 = vmul.f32 %v5195_v59, %v16329_v16  ;;  %5222 = vrot.lane.b32.xlu0 %v5206_v0, %s14013_s29 }
0x2ef5   :  { %5224 = vrot.lane.b32.xlu1 %v5207_v13, %s14013_s29 }
0x2f55   :  { %v5215_v5 = vpop.permute.xlu0 %5214 }
0x2f56   :  { %v16347_v54 = vadd.f32 %v5215_v5, %v5172_v55 }
0x2f57   :  { %v5217_v57 = vpop.permute.xlu1 %5216 }
0x2f58   :  { %13535 = vtanh.f32 %v16347_v54  ;;  %v16352_v11 = vadd.f32 %v5217_v57, %v5173_v17  ;;  %v3930_v17 = vld [vmem:[%s19143_s1 + $0xa8] sm:$0xff]  ;;  %v3931_v57 = vld [vmem:[%s19143_s1 + $0xb0] sm:$0xff] }
0x2f5a   :  { %13537 = vtanh.f32 %v16352_v11 }
0x2f5d   :  { %v5219_v30 = vpop.permute.xlu0 %5218 }
0x2f5e   :  { %v16357_v7 = vadd.f32 %v5219_v30, %v5174_v32  ;;  %v3967_v32 = vpack.c.bf16 %v3930_v17, %v3929_v24  ;;  %v3932_v30 = vld [vmem:[%s19143_s1 + $0xb8] sm:$0xff]  ;;  %v3941_v24 = vld [vmem:[%s19143_s1 + $0x100] sm:$0xff]  ;;  %v3942_v17 = vld [vmem:[%s19143_s1 + $0x108] sm:$0xff] }
0x2f5f   :  { %v5221_v40 = vpop.permute.xlu1 %5220 }
0x2f60   :  { %13539 = vtanh.f32 %v16357_v7  ;;  %v16362_v20 = vadd.f32 %v5221_v40, %v5175_v62  ;;  %v3933_v62 = vld [vmem:[%s19143_s1 + $0xc0] sm:$0xff]  ;;  %v3934_v40 = vld [vmem:[%s19143_s1 + $0xc8] sm:$0xff]  ;;  %12210 = vmatprep.mubr.msk.bf16.mxu1 %vm3987_vm8, %v3967_v32  ;;  %v3973_v32 = vpack.c.bf16 %v3942_v17, %v3941_v24  ;;  %v3952_v24 = vld [vmem:[%s19143_s1 + $0x158] sm:$0xff] }
0x2f61   :  { %v3953_v17 = vld [vmem:[%s19143_s1 + $0x160] sm:$0xff] }
0x2f62   :  { %v13536_v6 = vpop.eup %13535  ;;  %13541 = vtanh.f32 %v16362_v20 }
0x2f63   :  { %5250 = vrot.lane.b32.xlu0 %v13536_v6, %s19233_s0  ;;  %v3968_v6 = vpack.c.bf16 %v3932_v30, %v3931_v57  ;;  %v3943_v30 = vld [vmem:[%s19143_s1 + $0x110] sm:$0xff] }
0x2f64   :  { %v13538_v42 = vpop.eup %13537 }
0x2f65   :  { %v5223_v46 = vpop.permute.xlu0 %5222  ;;  %5252 = vrot.lane.b32.xlu1 %v13538_v42, %s19233_s0  ;;  %v3969_v42 = vpack.c.bf16 %v3934_v40, %v3933_v62  ;;  %12211 = vmatmul.mubr.msk.bf16.gmra.mrb[116].mxu1 %vm3987_vm8, %v3968_v6  ;;  %v3944_v62 = vld [vmem:[%s19143_s1 + $0x118] sm:$0xff]  ;;  %v3945_v40 = vld [vmem:[%s19143_s1 + $0x120] sm:$0xff]  ;;  %v3946_v6 = vld [vmem:[%s19143_s1 + $0x128] sm:$0xff] }
0x2f66   :  { %v16369_v10 = vadd.f32 %v5223_v46, %v5176_v29  ;;  %v3935_v29 = vld [vmem:[%s19143_s1 + $0xd0] sm:$0xff]  ;;  %v3936_v46 = vld [vmem:[%s19143_s1 + $0xd8] sm:$0xff] }
0x2f67   :  { %v5225_v0 = vpop.permute.xlu1 %5224  ;;  %12214 = vmatprep.mubr.msk.bf16.mxu1 %vm3987_vm8, %v3969_v42  ;;  %v3974_v42 = vpack.c.bf16 %v3944_v62, %v3943_v30  ;;  %v3955_v62 = vld [vmem:[%s19143_s1 + $0x170] sm:$0xff] }
0x2f68   :  { %13543 = vtanh.f32 %v16369_v10  ;;  %v16374_v59 = vadd.f32 %v5225_v0, %v5177_v23  ;;  %v3937_v23 = vld [vmem:[%s19143_s1 + $0xe0] sm:$0xff]  ;;  %v3938_v0 = vld [vmem:[%s19143_s1 + $0xe8] sm:$0xff] }
0x2f6a   :  { %v13540_v13 = vpop.eup %13539  ;;  %13545 = vtanh.f32 %v16374_v59 }
0x2f6b   :  { %5254 = vrot.lane.b32.xlu0 %v13540_v13, %s19233_s0  ;;  %v3970_v13 = vpack.c.bf16 %v3936_v46, %v3935_v29  ;;  %v3975_v29 = vpack.c.bf16 %v3946_v6, %v3945_v40  ;;  %v3947_v46 = vld [vmem:[%s19143_s1 + $0x130] sm:$0xff]  ;;  %v3956_v40 = vld [vmem:[%s19143_s1 + $0x178] sm:$0xff] }
0x2f6c   :  { %v13542_v55 = vpop.eup %13541  ;;  %v3980_v6 = vpack.c.bf16 %v3956_v40, %v3955_v62 }
0x2f6d   :  { %5256 = vrot.lane.b32.xlu1 %v13542_v55, %s19233_s0  ;;  %v3971_v55 = vpack.c.bf16 %v3938_v0, %v3937_v23  ;;  %12215 = vmatmul.mubr.msk.bf16.gmra.mrb[120].mxu1 %vm3987_vm8, %v3970_v13  ;;  %v3948_v23 = vld [vmem:[%s19143_s1 + $0x138] sm:$0xff]  ;;  %v3949_v0 = vld [vmem:[%s19143_s1 + $0x140] sm:$0xff]  ;;  %v3950_v13 = vld [vmem:[%s19143_s1 + $0x148] sm:$0xff] }
0x2f6f   :  { %12218 = vmatprep.mubr.msk.bf16.mxu1 %vm3987_vm8, %v3971_v55  ;;  %v3976_v55 = vpack.c.bf16 %v3948_v23, %v3947_v46 }
0x2f72   :  { %v13544_v2 = vpop.eup %13543 }
0x2f73   :  { %5258 = vrot.lane.b32.xlu0 %v13544_v2, %s19233_s0  ;;  %v3939_v2 = vld [vmem:[%s19143_s1 + $0xf0] sm:$0xff] }
0x2f74   :  { %v13546_v5 = vpop.eup %13545 }
0x2f75   :  { %5260 = vrot.lane.b32.xlu1 %v13546_v5, %s19233_s0  ;;  %v3940_v5 = vld [vmem:[%s19143_s1 + $0xf8] sm:$0xff] }
0x2f76   :  { %v3972_v57 = vpack.c.bf16 %v3940_v5, %v3939_v2  ;;  %v3977_v2 = vpack.c.bf16 %v3950_v13, %v3949_v0  ;;  %v3951_v5 = vld [vmem:[%s19143_s1 + $0x150] sm:$0xff] }
0x2f78   :  { %12219 = vmatmul.mubr.msk.bf16.gmra.mrb[124].mxu1 %vm3987_vm8, %v3972_v57  ;;  %v3954_v57 = vld [vmem:[%s19143_s1 + $0x168] sm:$0xff] }
0x2f79   :  { %12222 = vmatprep.mubr.msk.bf16.mxu1 %vm3987_vm8, %v3973_v32  ;;  %v3978_v32 = vpack.c.bf16 %v3952_v24, %v3951_v5  ;;  %v3979_v30 = vpack.c.bf16 %v3954_v57, %v3953_v17 }
0x2f80   :  { %12223 = vmatmul.mubr.msk.bf16.gmra.mrb[128].mxu1 %vm3987_vm8, %v3974_v42 }
0x2f81   :  { %12226 = vmatprep.mubr.msk.bf16.mxu1 %vm3987_vm8, %v3975_v29 }
0x2f88   :  { %12227 = vmatmul.mubr.msk.bf16.gmra.mrb[132].mxu1 %vm3987_vm8, %v3976_v55 }
0x2f89   :  { %12230 = vmatprep.mubr.msk.bf16.mxu1 %vm3987_vm8, %v3977_v2 }
0x2f90   :  { %12231 = vmatmul.mubr.msk.bf16.gmra.mrb[136].mxu1 %vm3987_vm8, %v3978_v32 }
0x2f91   :  { %12234 = vmatprep.mubr.msk.bf16.mxu1 %vm3987_vm8, %v3979_v30 }
0x2f98   :  { %12235 = vmatmul.mubr.msk.bf16.gmra.mrb[140].mxu1 %vm3987_vm8, %v3980_v6 }
0x2fd5   :  { %v5251_v42 = vpop.permute.xlu0 %5250 }
0x2fd6   :  { %v16480_v29 = vmul.f32 %v5251_v42, %v16299_v21 }
0x2fd7   :  { %v5253_v46 = vpop.permute.xlu1 %5252 }
0x2fd8   :  { %13547 = vtanh.f32 %v16480_v29  ;;  %v16484_v23 = vmul.f32 %v5253_v46, %v16305_v15 }
0x2fda   :  { %13549 = vtanh.f32 %v16484_v23 }
0x2fdd   :  { %v5255_v0 = vpop.permute.xlu0 %5254 }
0x2fde   :  { %v16488_v13 = vmul.f32 %v5255_v0, %v16311_v44 }
0x2fdf   :  { %v5257_v55 = vpop.permute.xlu1 %5256 }
0x2fe0   :  { %13551 = vtanh.f32 %v16488_v13  ;;  %v16492_v2 = vmul.f32 %v5257_v55, %v16317_v51 }
0x2fe2   :  { %v13548_v21 = vpop.eup %13547  ;;  %13553 = vtanh.f32 %v16492_v2 }
0x2fe3   :  { %5286 = vrot.lane.b32.xlu0 %v13548_v21, %s14013_s29 }
0x2fe4   :  { %v13550_v5 = vpop.eup %13549 }
0x2fe5   :  { %v5259_v15 = vpop.permute.xlu0 %5258  ;;  %5288 = vrot.lane.b32.xlu1 %v13550_v5, %s14013_s29 }
0x2fe6   :  { %v16498_v24 = vmul.f32 %v5259_v15, %v16323_v26 }
0x2fe7   :  { %v5261_v44 = vpop.permute.xlu1 %5260 }
0x2fe8   :  { %13555 = vtanh.f32 %v16498_v24  ;;  %v16502_v17 = vmul.f32 %v5261_v44, %v16329_v16 }
0x2fea   :  { %v13552_v51 = vpop.eup %13551  ;;  %13557 = vtanh.f32 %v16502_v17 }
0x2feb   :  { %5290 = vrot.lane.b32.xlu0 %v13552_v51, %s14013_s29 }
0x2fec   :  { %v13554_v57 = vpop.eup %13553 }
0x2fed   :  { %5292 = vrot.lane.b32.xlu1 %v13554_v57, %s14013_s29 }
0x2ff2   :  { %v13556_v32 = vpop.eup %13555 }
0x2ff3   :  { %5294 = vrot.lane.b32.xlu0 %v13556_v32, %s14013_s29 }
0x2ff4   :  { %v13558_v30 = vpop.eup %13557 }
0x2ff5   :  { %5296 = vrot.lane.b32.xlu1 %v13558_v30, %s14013_s29 }
0x3038   :  { %v16509_v26 = vpop.f32.mrb[116].mxu1 }
0x3039   :  { %v16511_v62 = vpop.f32.mrb[117].mxu1 }
0x303a   :  { %v16513_v16 = vpop.f32.mrb[118].mxu1 }
0x303b   :  { %v16515_v40 = vpop.f32.mrb[119].mxu1 }
0x3040   :  { %v16517_v6 = vpop.f32.mrb[120].mxu1 }
0x3041   :  { %v16519_v46 = vpop.f32.mrb[121].mxu1 }
0x3042   :  { %v16522_v0 = vpop.f32.mrb[122].mxu1 }
0x3043   :  { %v16524_v21 = vpop.f32.mrb[123].mxu1 }
0x304b   :  { %v16529_v5 = vpop.f32.mrb[124].mxu1 }
0x304c   :  { %v16531_v44 = vpop.f32.mrb[125].mxu1 }
0x304d   :  { %v16535_v51 = vpop.f32.mrb[126].mxu1 }
0x304e   :  { %v16538_v32 = vpop.f32.mrb[127].mxu1 }
0x3053   :  { %v16541_v30 = vpop.f32.mrb[128].mxu1 }
0x3055   :  { %v5287_v42 = vpop.permute.xlu0 %5286 }
0x3056   :  { %12328 = vmatprep.mubr.msk.f32.mxu1 %vm523_vm5, %v5287_v42 }
0x3057   :  { %v5289_v55 = vpop.permute.xlu1 %5288 }
0x3058   :  { %12329 = vmatmul.mubr.msk.f32.vlgmr.msra.gmra.mrb[144].mxu1 %vm523_vm5, %v5289_v55  ;;  %v16543_v55 = vpop.f32.mrb[129].mxu1 }
0x3059   :  { %12895 = vmatpush3.bf16.msra.mxu1 %v15998_v27  ;;  %v16546_v41 = vpop.f32.mrb[130].mxu1 }
0x305a   :  { %12897 = vmatprep.subr.bf16.mxu1 %v16003_v14 }
0x305d   :  { %v5291_v15 = vpop.permute.xlu0 %5290  ;;  %12899 = vmatpush3.bf16.msra.mxu1 %v16003_v14 }
0x305e   :  { %12331 = vmatprep.mubr.msk.f32.mxu1 %vm523_vm5, %v5291_v15  ;;  %12370 = vmatprep.subr.bf16.mxu1 %v19171_v4  ;;  %v16548_v15 = vpop.f32.mrb[131].mxu1 }
0x305f   :  { %v5293_v57 = vpop.permute.xlu1 %5292  ;;  %v16551_v4 = vpop.f32.mrb[132].mxu1 }
0x3060   :  { %12332 = vmatmul.mubr.msk.f32.gmra.mrb[146].mxu1 %vm523_vm5, %v5293_v57  ;;  %v16553_v8 = vpop.f32.mrb[133].mxu1 }
0x3061   :  { %v16555_v9 = vpop.f32.mrb[134].mxu1 }
0x3062   :  { %v16557_v57 = vpop.f32.mrb[135].mxu1 }
0x3063   :  { %v16559_v12 = vpop.f32.mrb[136].mxu1 }
0x3064   :  { %v16561_v63 = vpop.f32.mrb[137].mxu1 }
0x3065   :  { %v5295_v42 = vpop.permute.xlu0 %5294 }
0x3066   :  { %12334 = vmatprep.mubr.msk.f32.mxu1 %vm523_vm5, %v5295_v42  ;;  %v16563_v42 = vpop.f32.mrb[138].mxu1 }
0x3067   :  { %v5297_v52 = vpop.permute.xlu1 %5296  ;;  %v16565_v49 = vpop.f32.mrb[139].mxu1 }
0x3068   :  { %12335 = vmatmul.mubr.msk.f32.gmra.mrb[148].mxu1 %vm523_vm5, %v5297_v52 }
0x306b   :  { %v16567_v48 = vpop.f32.mrb[140].mxu1 }
0x306c   :  { %v16569_v3 = vpop.f32.mrb[141].mxu1 }
0x306d   :  { %v16571_v52 = vpop.f32.mrb[142].mxu1 }
0x306e   :  { %v16573_v36 = vpop.f32.mrb[143].mxu1 }
0x312b   :  { %v12330_v39 = vpop.f32.mrb[144].mxu1 }
0x312c   :  { %5412 = vperm.xlu1 %13067, %v12330_v39   ;;  %v5376_v19 = vpop.f32.mrb[145].mxu1 }
0x312d   :  { %5407 = vperm.xlu0 %13066, %v5376_v19  }
0x3133   :  { %v12333_v25 = vpop.f32.mrb[146].mxu1 }
0x3134   :  { %5422 = vperm.xlu1 %13067, %v12333_v25   ;;  %v5386_v33 = vpop.f32.mrb[147].mxu1 }
0x3135   :  { %5417 = vperm.xlu0 %13066, %v5386_v33  }
0x313b   :  { %v12336_v58 = vpop.f32.mrb[148].mxu1 }
0x313c   :  { %5432 = vperm.xlu1 %13067, %v12336_v58   ;;  %v5396_v28 = vpop.f32.mrb[149].mxu1 }
0x313d   :  { %5427 = vperm.xlu0 %13066, %v5396_v28  }
0x31ab   :  { %v5413_v61 = vpop.permute.xlu1 %5412 }
0x31ac   :  { %v5436_v18 = vmul.f32 0.0, %v5413_v61  ;;  %v5408_v60 = vpop.permute.xlu0 %5407 }
0x31ad   :  { %v5435_v35 = vmul.f32 0.0, %v5408_v60 }
0x31ae   :  { %v5442_v50 = vadd.f32 %v5436_v18, %v16484_v23  ;;  %v16597_v23 = vld [vmem:[%s19144_s9] ss:$0 sm:$0xff] }
0x31af   :  { %v5441_v43 = vadd.f32 %v5435_v35, %v16480_v29  ;;  %v19260_v29 = vmov 0.0  }
0x31b1   :  { %v5447_v38 = vpack.c.bf16 %v5442_v50, %v5441_v43 }
0x31b3   :  { %5453 = vrot.lane.b32.xlu0 %v5447_v38, %s14013_s29  ;;  %v5423_v19 = vpop.permute.xlu1 %5422 }
0x31b4   :  { %v5438_v39 = vmul.f32 0.0, %v5423_v19  ;;  %v5418_v25 = vpop.permute.xlu0 %5417 }
0x31b5   :  { %v5437_v56 = vmul.f32 0.0, %v5418_v25 }
0x31b6   :  { %v5444_v33 = vadd.f32 %v5438_v39, %v16492_v2  ;;  %v4174_v2 = vadd.f32 %v16597_v23, %v16283_v31 }
0x31b7   :  { %v5443_v58 = vadd.f32 %v5437_v56, %v16488_v13  ;;  %v4171_v13 = vadd.f32 %v16597_v23, %v16281_v53  ;;  %v4182_v53 = vadd.f32 %v16597_v23, %v16515_v40 }
0x31b8   :  { %v4308_v25 = vmul.f32 %v4174_v2, %v14178_v22 }
0x31b9   :  { %v5448_v28 = vpack.c.bf16 %v5444_v33, %v5443_v58  ;;  %v4179_v58 = vadd.f32 %v16597_v23, %v16511_v62 }
0x31bb   :  { %5455 = vrot.lane.b32.xlu1 %v5448_v28, %s14013_s29  ;;  %v5433_v61 = vpop.permute.xlu1 %5432  ;;  %v4309_v31 = vmul.f32 %v4179_v58, %v14178_v22 }
0x31bc   :  { %v5440_v60 = vmul.f32 0.0, %v5433_v61  ;;  %v5428_v37 = vpop.permute.xlu0 %5427 }
0x31bd   :  { %v5439_v18 = vmul.f32 0.0, %v5428_v37 }
0x31be   :  { %v5446_v35 = vadd.f32 %v5440_v60, %v16502_v17 }
0x31bf   :  { %v5445_v43 = vadd.f32 %v5439_v18, %v16498_v24  ;;  %v4307_v24 = vmul.f32 %v4171_v13, %v14178_v22  ;;  %v4190_v13 = vadd.f32 %v16597_v23, %v16513_v16 }
0x31c1   :  { %v5449_v38 = vpack.c.bf16 %v5446_v35, %v5445_v43  ;;  %v4310_v43 = vmul.f32 %v4182_v53, %v14178_v22 }
0x31c3   :  { %5457 = vrot.lane.b32.xlu0 %v5449_v38, %s14013_s29 }
0x3225   :  { %v5454_v50 = vpop.permute.xlu0 %5453 }
0x3226   :  { %12342 = vmatmul.mubr.msk.bf16.vlgmr.msra.gmra.mrb[152].mxu0 %vm523_vm5, %v5454_v50  ;;  %v4187_v50 = vadd.f32 %v16597_v23, %v16509_v26 }
0x3227   :  { %12345 = vmatprep.mubr.msk.bf16.mxu0 %vm14009_vm1, %v19260_v29  ;;  %12903 = vmatpush3.bf16.msra.mxu0 %v15998_v27 }
0x3228   :  { %12905 = vmatprep.subr.bf16.mxu0 %v16003_v14 }
0x322b   :  { %12907 = vmatpush3.bf16.msra.mxu0 %v16003_v14 }
0x322d   :  { %v5456_v56 = vpop.permute.xlu1 %5455 }
0x322e   :  { %12346 = vmatmul.mubr.msk.bf16.gmra.mrb[156].mxu0 %vm523_vm5, %v5456_v56 }
0x322f   :  { %12349 = vmatprep.mubr.msk.bf16.mxu0 %vm14009_vm1, %v19260_v29 }
0x3235   :  { %v5458_v37 = vpop.permute.xlu0 %5457 }
0x3236   :  { %12350 = vmatmul.mubr.msk.bf16.gmra.mrb[160].mxu0 %vm523_vm5, %v5458_v37 }
0x32f9   :  { %v5502_v17 = vpop.f32.mrb[152].mxu0 }
0x32fa   :  { %v5525_v19 = vadd.f32 %v5502_v17, %v4307_v24  ;;  %v12343_v39 = vpop.f32.mrb[153].mxu0  ;;  %v4311_v24 = vmul.f32 %v4187_v50, %v14178_v22 }
0x32fb   :  { %v5505_v33 = vpop.f32.mrb[154].mxu0 }
0x32fc   :  { %13559 = vtanh.f32 %v5525_v19  ;;  %v5526_v28 = vadd.f32 %v5505_v33, %v4308_v25  ;;  %v12344_v61 = vpop.f32.mrb[155].mxu0  ;;  %v4312_v33 = vmul.f32 %v4190_v13, %v14178_v22 }
0x32fe   :  { %13561 = vtanh.f32 %v5526_v28 }
0x3301   :  { %v5510_v60 = vpop.f32.mrb[156].mxu0 }
0x3302   :  { %v5527_v18 = vadd.f32 %v5510_v60, %v4309_v31  ;;  %v12347_v35 = vpop.f32.mrb[157].mxu0 }
0x3303   :  { %v5513_v38 = vpop.f32.mrb[158].mxu0 }
0x3304   :  { %13563 = vtanh.f32 %v5527_v18  ;;  %v5528_v62 = vadd.f32 %v5513_v38, %v4310_v43  ;;  %v12348_v56 = vpop.f32.mrb[159].mxu0 }
0x3306   :  { %v13560_v37 = vpop.eup %13559  ;;  %13565 = vtanh.f32 %v5528_v62 }
0x3307   :  { %v5537_v40 = vmul.f32 %v13560_v37, %v14178_v22 }
0x3308   :  { %v13562_v2 = vpop.eup %13561 }
0x3309   :  { %v5518_v17 = vpop.f32.mrb[160].mxu0  ;;  %v16618_v19 = vadd.f32 %v5537_v40, %v14229_v1  ;;  %v5538_v39 = vmul.f32 %v13562_v2, %v14178_v22 }
0x330a   :  { %v5529_v26 = vadd.f32 %v5518_v17, %v4311_v24  ;;  %v12351_v25 = vpop.f32.mrb[161].mxu0 }
0x330b   :  { %5561 = vrot.lane.b32.xlu1 %v16618_v19, %s19233_s0  ;;  %v5521_v16 = vpop.f32.mrb[162].mxu0  ;;  %v16625_v58 = vadd.f32 %v5538_v39, %v14229_v1 }
0x330c   :  { %13567 = vtanh.f32 %v5529_v26  ;;  %v5530_v28 = vadd.f32 %v5521_v16, %v4312_v33  ;;  %v12352_v61 = vpop.f32.mrb[163].mxu0 }
0x330d   :  { %5563 = vrot.lane.b32.xlu0 %v16625_v58, %s19233_s0 }
0x330e   :  { %v13564_v53 = vpop.eup %13563  ;;  %13569 = vtanh.f32 %v5530_v28 }
0x330f   :  { %v5539_v31 = vmul.f32 %v13564_v53, %v14178_v22 }
0x3310   :  { %v13566_v60 = vpop.eup %13565 }
0x3311   :  { %v16631_v18 = vadd.f32 %v5539_v31, %v14229_v1  ;;  %v5540_v35 = vmul.f32 %v13566_v60, %v14178_v22  ;;  %v5549_v31 = vmul.f32 %v16618_v19, %v16347_v54 }
0x3313   :  { %5565 = vrot.lane.b32.xlu1 %v16631_v18, %s19233_s0  ;;  %v16637_v43 = vadd.f32 %v5540_v35, %v14229_v1 }
0x3315   :  { %5567 = vrot.lane.b32.xlu0 %v16637_v43, %s19233_s0  ;;  %v5552_v54 = vmul.f32 %v16637_v43, %v16362_v20 }
0x3316   :  { %v13568_v38 = vpop.eup %13567 }
0x3317   :  { %v5541_v50 = vmul.f32 %v13568_v38, %v14178_v22  ;;  %v5550_v38 = vmul.f32 %v16625_v58, %v16352_v11 }
0x3318   :  { %v13570_v62 = vpop.eup %13569 }
0x3319   :  { %v16643_v56 = vadd.f32 %v5541_v50, %v14229_v1  ;;  %v5542_v37 = vmul.f32 %v13570_v62, %v14178_v22 }
0x331b   :  { %5569 = vrot.lane.b32.xlu1 %v16643_v56, %s19233_s0  ;;  %v16649_v13 = vadd.f32 %v5542_v37, %v14229_v1  ;;  %v5551_v37 = vmul.f32 %v16631_v18, %v16357_v7  ;;  %v5553_v7 = vmul.f32 %v16643_v56, %v16369_v10 }
0x331d   :  { %5571 = vrot.lane.b32.xlu0 %v16649_v13, %s19233_s0  ;;  %v5554_v20 = vmul.f32 %v16649_v13, %v16374_v59 }
0x337d   :  { %v5562_v40 = vpop.permute.xlu1 %5561 }
0x337e   :  { %v5579_v2 = vmul.f32 %v5562_v40, %v16618_v19 }
0x337f   :  { %v5564_v24 = vpop.permute.xlu0 %5563 }
0x3380   :  { %v5580_v17 = vmul.f32 %v5564_v24, %v16625_v58  ;;  %5591 = vrot.lane.b32.xlu1 %v5579_v2, %s14013_s29 }
0x3382   :  { %5593 = vrot.lane.b32.xlu0 %v5580_v17, %s14013_s29 }
0x3385   :  { %v5566_v39 = vpop.permute.xlu1 %5565 }
0x3386   :  { %v5581_v26 = vmul.f32 %v5566_v39, %v16631_v18 }
0x3387   :  { %v5568_v25 = vpop.permute.xlu0 %5567 }
0x3388   :  { %v5582_v33 = vmul.f32 %v5568_v25, %v16637_v43  ;;  %5595 = vrot.lane.b32.xlu1 %v5581_v26, %s14013_s29 }
0x338a   :  { %5597 = vrot.lane.b32.xlu0 %v5582_v33, %s14013_s29 }
0x338d   :  { %v5570_v16 = vpop.permute.xlu1 %5569 }
0x338e   :  { %v5583_v28 = vmul.f32 %v5570_v16, %v16643_v56 }
0x338f   :  { %v5572_v61 = vpop.permute.xlu0 %5571 }
0x3390   :  { %v5584_v53 = vmul.f32 %v5572_v61, %v16649_v13  ;;  %5599 = vrot.lane.b32.xlu1 %v5583_v28, %s14013_s29 }
0x3392   :  { %5601 = vrot.lane.b32.xlu0 %v5584_v53, %s14013_s29 }
0x33f2   :  { %v5592_v60 = vpop.permute.xlu1 %5591 }
0x33f3   :  { %v16667_v35 = vadd.f32 %v5592_v60, %v5549_v31 }
0x33f4   :  { %v5594_v50 = vpop.permute.xlu0 %5593 }
0x33f5   :  { %13571 = vtanh.f32 %v16667_v35  ;;  %v16672_v62 = vadd.f32 %v5594_v50, %v5550_v38 }
0x33f7   :  { %13573 = vtanh.f32 %v16672_v62 }
0x33fa   :  { %v5596_v40 = vpop.permute.xlu1 %5595 }
0x33fb   :  { %v16677_v2 = vadd.f32 %v5596_v40, %v5551_v37 }
0x33fc   :  { %v5598_v24 = vpop.permute.xlu0 %5597 }
0x33fd   :  { %13575 = vtanh.f32 %v16677_v2  ;;  %v16682_v11 = vadd.f32 %v5598_v24, %v5552_v54 }
0x33ff   :  { %v13572_v17 = vpop.eup %13571  ;;  %13577 = vtanh.f32 %v16682_v11 }
0x3400   :  { %5627 = vrot.lane.b32.xlu1 %v13572_v17, %s19233_s0 }
0x3401   :  { %v13574_v39 = vpop.eup %13573 }
0x3402   :  { %5629 = vrot.lane.b32.xlu0 %v13574_v39, %s19233_s0  ;;  %v5600_v26 = vpop.permute.xlu1 %5599 }
0x3403   :  { %v16689_v25 = vadd.f32 %v5600_v26, %v5553_v7 }
0x3404   :  { %v5602_v33 = vpop.permute.xlu0 %5601 }
0x3405   :  { %13579 = vtanh.f32 %v16689_v25  ;;  %v16694_v16 = vadd.f32 %v5602_v33, %v5554_v20 }
0x3407   :  { %v13576_v28 = vpop.eup %13575  ;;  %13581 = vtanh.f32 %v16694_v16 }
0x3408   :  { %5631 = vrot.lane.b32.xlu1 %v13576_v28, %s19233_s0 }
0x3409   :  { %v13578_v61 = vpop.eup %13577 }
0x340a   :  { %5633 = vrot.lane.b32.xlu0 %v13578_v61, %s19233_s0 }
0x340f   :  { %v13580_v10 = vpop.eup %13579 }
0x3410   :  { %5635 = vrot.lane.b32.xlu1 %v13580_v10, %s19233_s0 }
0x3411   :  { %v13582_v53 = vpop.eup %13581 }
0x3412   :  { %5637 = vrot.lane.b32.xlu0 %v13582_v53, %s19233_s0 }
0x3472   :  { %v5628_v59 = vpop.permute.xlu1 %5627 }
0x3473   :  { %v16702_v31 = vmul.f32 %v5628_v59, %v16618_v19 }
0x3474   :  { %v5630_v60 = vpop.permute.xlu0 %5629 }
0x3475   :  { %13583 = vtanh.f32 %v16702_v31  ;;  %v5646_v38 = vmul.f32 %v5630_v60, %v16625_v58 }
0x3477   :  { %13585 = vtanh.f32 %v5646_v38 }
0x347a   :  { %v5632_v50 = vpop.permute.xlu1 %5631 }
0x347b   :  { %v16707_v37 = vmul.f32 %v5632_v50, %v16631_v18 }
0x347c   :  { %v5634_v40 = vpop.permute.xlu0 %5633 }
0x347d   :  { %13587 = vtanh.f32 %v16707_v37  ;;  %v5648_v54 = vmul.f32 %v5634_v40, %v16637_v43 }
0x347f   :  { %v13584_v24 = vpop.eup %13583  ;;  %13589 = vtanh.f32 %v5648_v54 }
0x3480   :  { %5663 = vrot.lane.b32.xlu1 %v13584_v24, %s14013_s29 }
0x3481   :  { %v13586_v19 = vpop.eup %13585 }
0x3482   :  { %5665 = vrot.lane.b32.xlu0 %v13586_v19, %s14013_s29  ;;  %v5636_v17 = vpop.permute.xlu1 %5635 }
0x3483   :  { %v16714_v58 = vmul.f32 %v5636_v17, %v16643_v56 }
0x3484   :  { %v5638_v39 = vpop.permute.xlu0 %5637 }
0x3485   :  { %13591 = vtanh.f32 %v16714_v58  ;;  %v5650_v18 = vmul.f32 %v5638_v39, %v16649_v13 }
0x3487   :  { %v13588_v7 = vpop.eup %13587  ;;  %13593 = vtanh.f32 %v5650_v18 }
0x3488   :  { %5667 = vrot.lane.b32.xlu1 %v13588_v7, %s14013_s29 }
0x3489   :  { %v13590_v43 = vpop.eup %13589 }
0x348a   :  { %5669 = vrot.lane.b32.xlu0 %v13590_v43, %s14013_s29 }
0x348f   :  { %v13592_v26 = vpop.eup %13591 }
0x3490   :  { %5671 = vrot.lane.b32.xlu1 %v13592_v26, %s14013_s29 }
0x3491   :  { %v13594_v20 = vpop.eup %13593 }
0x3492   :  { %5673 = vrot.lane.b32.xlu0 %v13594_v20, %s14013_s29 }
0x34f2   :  { %v5664_v56 = vpop.permute.xlu1 %5663 }
0x34f3   :  { %12361 = vmatprep.mubr.msk.f32.mxu1 %vm523_vm5, %v5664_v56 }
0x34f4   :  { %v5666_v33 = vpop.permute.xlu0 %5665 }
0x34f5   :  { %12362 = vmatmul.mubr.msk.f32.vlgmr.msra.gmra.mrb[150].mxu1 %vm523_vm5, %v5666_v33 }
0x34f6   :  { %12371 = vmatpush3.bf16.msra.mxu1 %v15771_v47 }
0x34f7   :  { %12372 = vmatprep.subr.bf16.mxu1 %v19260_v29 }
0x34fa   :  { %v5668_v13 = vpop.permute.xlu1 %5667  ;;  %12373 = vmatpush3.bf16.msra.mxu1 %v15796_v34 }
0x34fb   :  { %12364 = vmatprep.mubr.msk.f32.mxu1 %vm523_vm5, %v5668_v13  ;;  %12420 = vmatprep.subr.bf16.mxu1 %v19260_v29 }
0x34fc   :  { %v5670_v28 = vpop.permute.xlu0 %5669 }
0x34fd   :  { %12365 = vmatmul.mubr.msk.f32.gmra.mrb[152].mxu1 %vm523_vm5, %v5670_v28 }
0x3502   :  { %v5672_v61 = vpop.permute.xlu1 %5671 }
0x3503   :  { %12367 = vmatprep.mubr.msk.f32.mxu1 %vm523_vm5, %v5672_v61 }
0x3504   :  { %v5674_v10 = vpop.permute.xlu0 %5673 }
0x3505   :  { %12368 = vmatmul.mubr.msk.f32.gmra.mrb[154].mxu1 %vm523_vm5, %v5674_v10 }
0x3506   :  { %12374 = vmatprep.mubr.msk.bf16.mxu1 %vm14009_vm1, %v19260_v29 }
0x35c8   :  { %v12363_v53 = vpop.f32.mrb[150].mxu1 }
0x35c9   :  { %5789 = vperm.xlu0 %13066, %v12363_v53   ;;  %v5753_v59 = vpop.f32.mrb[151].mxu1 }
0x35ca   :  { %5784 = vperm.xlu1 %13067, %v5753_v59  }
0x35d0   :  { %v12366_v60 = vpop.f32.mrb[152].mxu1 }
0x35d1   :  { %5799 = vperm.xlu0 %13066, %v12366_v60   ;;  %v5763_v50 = vpop.f32.mrb[153].mxu1 }
0x35d2   :  { %5794 = vperm.xlu1 %13067, %v5763_v50  }
0x35d8   :  { %v12369_v40 = vpop.f32.mrb[154].mxu1 }
0x35d9   :  { %5809 = vperm.xlu0 %13066, %v12369_v40   ;;  %v5773_v24 = vpop.f32.mrb[155].mxu1 }
0x35da   :  { %5804 = vperm.xlu1 %13067, %v5773_v24  }
0x3648   :  { %v5790_v19 = vpop.permute.xlu0 %5789 }
0x3649   :  { %v5813_v17 = vmul.f32 0.0, %v5790_v19  ;;  %v5785_v39 = vpop.permute.xlu1 %5784 }
0x364a   :  { %v5812_v7 = vmul.f32 0.0, %v5785_v39 }
0x364b   :  { %v5819_v43 = vadd.f32 %v5813_v17, %v5646_v38 }
0x364c   :  { %v5818_v26 = vadd.f32 %v5812_v7, %v16702_v31 }
0x364e   :  { %v5824_v20 = vpack.c.bf16 %v5819_v43, %v5818_v26 }
0x3650   :  { %v5800_v56 = vpop.permute.xlu0 %5799  ;;  %5830 = vrot.lane.b32.xlu1 %v5824_v20, %s14013_s29 }
0x3651   :  { %v5815_v33 = vmul.f32 0.0, %v5800_v56  ;;  %v5795_v13 = vpop.permute.xlu1 %5794  ;;  %v4203_v56 = vadd.f32 %v16597_v23, %v16517_v6 }
0x3652   :  { %v5814_v28 = vmul.f32 0.0, %v5795_v13 }
0x3653   :  { %v5821_v61 = vadd.f32 %v5815_v33, %v5648_v54 }
0x3654   :  { %v5820_v10 = vadd.f32 %v5814_v28, %v16707_v37 }
0x3656   :  { %v5825_v53 = vpack.c.bf16 %v5821_v61, %v5820_v10 }
0x3658   :  { %v5810_v59 = vpop.permute.xlu0 %5809  ;;  %5832 = vrot.lane.b32.xlu0 %v5825_v53, %s14013_s29 }
0x3659   :  { %v5817_v60 = vmul.f32 0.0, %v5810_v59  ;;  %v5805_v50 = vpop.permute.xlu1 %5804 }
0x365a   :  { %v5816_v40 = vmul.f32 0.0, %v5805_v50 }
0x365b   :  { %v5823_v38 = vadd.f32 %v5817_v60, %v5650_v18  ;;  %v4198_v18 = vadd.f32 %v16597_v23, %v16524_v21  ;;  %v4315_v21 = vmul.f32 %v4203_v56, %v14178_v22  ;;  %v4211_v60 = vadd.f32 %v16597_v23, %v16531_v44 }
0x365c   :  { %v5822_v31 = vadd.f32 %v5816_v40, %v16714_v58  ;;  %v4195_v58 = vadd.f32 %v16597_v23, %v16519_v46  ;;  %v4206_v46 = vadd.f32 %v16597_v23, %v16522_v0 }
0x365d   :  { %v4314_v26 = vmul.f32 %v4198_v18, %v14178_v22 }
0x365e   :  { %v5826_v24 = vpack.c.bf16 %v5823_v38, %v5822_v31  ;;  %v4313_v17 = vmul.f32 %v4195_v58, %v14178_v22  ;;  %v4316_v53 = vmul.f32 %v4206_v46, %v14178_v22  ;;  %v4214_v38 = vadd.f32 %v16597_v23, %v16538_v32 }
0x3660   :  { %5834 = vrot.lane.b32.xlu1 %v5826_v24, %s14013_s29  ;;  %v4317_v24 = vmul.f32 %v4211_v60, %v14178_v22  ;;  %v4318_v18 = vmul.f32 %v4214_v38, %v14178_v22 }
0x36c2   :  { %v5831_v19 = vpop.permute.xlu1 %5830 }
0x36c3   :  { %12375 = vmatmul.mubr.msk.bf16.vlgmr.msra.gmra.mrb[156].mxu1 %vm523_vm5, %v5831_v19 }
0x36c4   :  { %12378 = vmatprep.mubr.msk.bf16.mxu1 %vm14009_vm1, %v19260_v29  ;;  %12421 = vmatpush3.bf16.msra.mxu1 %v15771_v47 }
0x36c5   :  { %12422 = vmatprep.subr.bf16.mxu1 %v19260_v29 }
0x36c8   :  { %12423 = vmatpush3.bf16.msra.mxu1 %v15796_v34 }
0x36c9   :  { %12925 = vmatprep.subr.bf16.mxu1 %v15998_v27 }
0x36ca   :  { %v5833_v37 = vpop.permute.xlu0 %5832 }
0x36cb   :  { %12379 = vmatmul.mubr.msk.bf16.gmra.mrb[160].mxu1 %vm523_vm5, %v5833_v37 }
0x36cc   :  { %12382 = vmatprep.mubr.msk.bf16.mxu1 %vm14009_vm1, %v19260_v29 }
0x36d2   :  { %v5835_v54 = vpop.permute.xlu1 %5834 }
0x36d3   :  { %12383 = vmatmul.mubr.msk.bf16.gmra.mrb[164].mxu1 %vm523_vm5, %v5835_v54 }
0x36d4   :  { %12424 = vmatprep.mubr.msk.bf16.mxu1 %vm14009_vm1, %v19260_v29 }
0x3796   :  { %v5879_v39 = vpop.f32.mrb[156].mxu1 }
0x3797   :  { %v5902_v7 = vadd.f32 %v5879_v39, %v4313_v17  ;;  %v12376_v43 = vpop.f32.mrb[157].mxu1 }
0x3798   :  { %v5882_v20 = vpop.f32.mrb[158].mxu1 }
0x3799   :  { %13595 = vtanh.f32 %v5902_v7  ;;  %v5903_v33 = vadd.f32 %v5882_v20, %v4314_v26  ;;  %v12377_v13 = vpop.f32.mrb[159].mxu1 }
0x379b   :  { %13597 = vtanh.f32 %v5903_v33 }
0x379e   :  { %v5887_v28 = vpop.f32.mrb[160].mxu1 }
0x379f   :  { %v5904_v61 = vadd.f32 %v5887_v28, %v4315_v21  ;;  %v12380_v10 = vpop.f32.mrb[161].mxu1 }
0x37a0   :  { %v5890_v59 = vpop.f32.mrb[162].mxu1 }
0x37a1   :  { %13599 = vtanh.f32 %v5904_v61  ;;  %v5905_v6 = vadd.f32 %v5890_v59, %v4316_v53  ;;  %v12381_v50 = vpop.f32.mrb[163].mxu1 }
0x37a3   :  { %v13596_v40 = vpop.eup %13595  ;;  %13601 = vtanh.f32 %v5905_v6 }
0x37a4   :  { %v5914_v0 = vmul.f32 %v13596_v40, %v14178_v22 }
0x37a5   :  { %v13598_v31 = vpop.eup %13597 }
0x37a6   :  { %v5895_v19 = vpop.f32.mrb[164].mxu1  ;;  %v16772_v37 = vadd.f32 %v5914_v0, %v14229_v1  ;;  %v5915_v54 = vmul.f32 %v13598_v31, %v14178_v22 }
0x37a7   :  { %v5906_v44 = vadd.f32 %v5895_v19, %v4317_v24  ;;  %v12384_v58 = vpop.f32.mrb[165].mxu1 }
0x37a8   :  { %5938 = vrot.lane.b32.xlu0 %v16772_v37, %s19233_s0  ;;  %v5898_v32 = vpop.f32.mrb[166].mxu1  ;;  %v16779_v17 = vadd.f32 %v5915_v54, %v14229_v1  ;;  %v5926_v58 = vmul.f32 %v16772_v37, %v16667_v35 }
0x37a9   :  { %13603 = vtanh.f32 %v5906_v44  ;;  %v5907_v39 = vadd.f32 %v5898_v32, %v4318_v18  ;;  %v12385_v7 = vpop.f32.mrb[167].mxu1 }
0x37aa   :  { %5940 = vrot.lane.b32.xlu1 %v16779_v17, %s19233_s0 }
0x37ab   :  { %v13600_v43 = vpop.eup %13599  ;;  %13605 = vtanh.f32 %v5907_v39  ;;  %v5927_v39 = vmul.f32 %v16779_v17, %v16672_v62 }
0x37ac   :  { %v5916_v26 = vmul.f32 %v13600_v43, %v14178_v22 }
0x37ad   :  { %v13602_v20 = vpop.eup %13601 }
0x37ae   :  { %v16785_v56 = vadd.f32 %v5916_v26, %v14229_v1  ;;  %v5917_v33 = vmul.f32 %v13602_v20, %v14178_v22 }
0x37b0   :  { %5942 = vrot.lane.b32.xlu0 %v16785_v56, %s19233_s0  ;;  %v16791_v13 = vadd.f32 %v5917_v33, %v14229_v1  ;;  %v5928_v26 = vmul.f32 %v16785_v56, %v16677_v2 }
0x37b2   :  { %5944 = vrot.lane.b32.xlu1 %v16791_v13, %s19233_s0  ;;  %v5929_v35 = vmul.f32 %v16791_v13, %v16682_v11 }
0x37b3   :  { %v13604_v46 = vpop.eup %13603 }
0x37b4   :  { %v5918_v21 = vmul.f32 %v13604_v46, %v14178_v22 }
0x37b5   :  { %v13606_v28 = vpop.eup %13605 }
0x37b6   :  { %v16797_v61 = vadd.f32 %v5918_v21, %v14229_v1  ;;  %v5919_v10 = vmul.f32 %v13606_v28, %v14178_v22 }
0x37b8   :  { %5946 = vrot.lane.b32.xlu0 %v16797_v61, %s19233_s0  ;;  %v16803_v53 = vadd.f32 %v5919_v10, %v14229_v1  ;;  %v5930_v2 = vmul.f32 %v16797_v61, %v16689_v25 }
0x37ba   :  { %5948 = vrot.lane.b32.xlu1 %v16803_v53, %s19233_s0  ;;  %v5931_v11 = vmul.f32 %v16803_v53, %v16694_v16 }
0x381a   :  { %v5939_v59 = vpop.permute.xlu0 %5938 }
0x381b   :  { %v5956_v60 = vmul.f32 %v5939_v59, %v16772_v37 }
0x381c   :  { %v5941_v6 = vpop.permute.xlu1 %5940 }
0x381d   :  { %v5957_v50 = vmul.f32 %v5941_v6, %v16779_v17  ;;  %5968 = vrot.lane.b32.xlu0 %v5956_v60, %s14013_s29 }
0x381f   :  { %5970 = vrot.lane.b32.xlu1 %v5957_v50, %s14013_s29 }
0x3822   :  { %v5943_v40 = vpop.permute.xlu0 %5942 }
0x3823   :  { %v5958_v38 = vmul.f32 %v5943_v40, %v16785_v56 }
0x3824   :  { %v5945_v0 = vpop.permute.xlu1 %5944 }
0x3825   :  { %v5959_v31 = vmul.f32 %v5945_v0, %v16791_v13  ;;  %5972 = vrot.lane.b32.xlu0 %v5958_v38, %s14013_s29 }
0x3827   :  { %5974 = vrot.lane.b32.xlu1 %v5959_v31, %s14013_s29 }
0x382a   :  { %v5947_v24 = vpop.permute.xlu0 %5946 }
0x382b   :  { %v5960_v19 = vmul.f32 %v5947_v24, %v16797_v61 }
0x382c   :  { %v5949_v54 = vpop.permute.xlu1 %5948 }
0x382d   :  { %v5961_v44 = vmul.f32 %v5949_v54, %v16803_v53  ;;  %5976 = vrot.lane.b32.xlu0 %v5960_v19, %s14013_s29 }
0x382f   :  { %5978 = vrot.lane.b32.xlu1 %v5961_v44, %s14013_s29 }
0x388f   :  { %v5969_v18 = vpop.permute.xlu0 %5968 }
0x3890   :  { %v16821_v32 = vadd.f32 %v5969_v18, %v5926_v58 }
0x3891   :  { %v5971_v7 = vpop.permute.xlu1 %5970 }
0x3892   :  { %13607 = vtanh.f32 %v16821_v32  ;;  %v16826_v43 = vadd.f32 %v5971_v7, %v5927_v39 }
0x3894   :  { %13609 = vtanh.f32 %v16826_v43 }
0x3897   :  { %v5973_v20 = vpop.permute.xlu0 %5972 }
0x3898   :  { %v16831_v33 = vadd.f32 %v5973_v20, %v5928_v26 }
0x3899   :  { %v5975_v46 = vpop.permute.xlu1 %5974 }
0x389a   :  { %13611 = vtanh.f32 %v16831_v33  ;;  %v16836_v62 = vadd.f32 %v5975_v46, %v5929_v35 }
0x389c   :  { %v13608_v21 = vpop.eup %13607  ;;  %13613 = vtanh.f32 %v16836_v62 }
0x389d   :  { %6004 = vrot.lane.b32.xlu0 %v13608_v21, %s19233_s0 }
0x389e   :  { %v13610_v28 = vpop.eup %13609 }
0x389f   :  { %v5977_v10 = vpop.permute.xlu0 %5976  ;;  %6006 = vrot.lane.b32.xlu1 %v13610_v28, %s19233_s0 }
0x38a0   :  { %v16843_v59 = vadd.f32 %v5977_v10, %v5930_v2 }
0x38a1   :  { %v5979_v60 = vpop.permute.xlu1 %5978 }
0x38a2   :  { %13615 = vtanh.f32 %v16843_v59  ;;  %v16848_v6 = vadd.f32 %v5979_v60, %v5931_v11 }
0x38a4   :  { %v13612_v50 = vpop.eup %13611  ;;  %13617 = vtanh.f32 %v16848_v6 }
0x38a5   :  { %6008 = vrot.lane.b32.xlu0 %v13612_v50, %s19233_s0 }
0x38a6   :  { %v13614_v40 = vpop.eup %13613 }
0x38a7   :  { %6010 = vrot.lane.b32.xlu1 %v13614_v40, %s19233_s0 }
0x38ac   :  { %v13616_v25 = vpop.eup %13615 }
0x38ad   :  { %6012 = vrot.lane.b32.xlu0 %v13616_v25, %s19233_s0 }
0x38ae   :  { %v13618_v38 = vpop.eup %13617 }
0x38af   :  { %6014 = vrot.lane.b32.xlu1 %v13618_v38, %s19233_s0 }
0x390f   :  { %v6005_v16 = vpop.permute.xlu0 %6004 }
0x3910   :  { %v6022_v0 = vmul.f32 %v6005_v16, %v16772_v37 }
0x3911   :  { %v6007_v31 = vpop.permute.xlu1 %6006 }
0x3912   :  { %13619 = vtanh.f32 %v6022_v0  ;;  %v6023_v24 = vmul.f32 %v6007_v31, %v16779_v17 }
0x3914   :  { %13621 = vtanh.f32 %v6023_v24 }
0x3917   :  { %v6009_v19 = vpop.permute.xlu0 %6008 }
0x3918   :  { %v6024_v54 = vmul.f32 %v6009_v19, %v16785_v56 }
0x3919   :  { %v6011_v44 = vpop.permute.xlu1 %6010 }
0x391a   :  { %13623 = vtanh.f32 %v6024_v54  ;;  %v6025_v58 = vmul.f32 %v6011_v44, %v16791_v13 }
0x391c   :  { %v13620_v18 = vpop.eup %13619  ;;  %13625 = vtanh.f32 %v6025_v58 }
0x391d   :  { %6040 = vrot.lane.b32.xlu0 %v13620_v18, %s14013_s29 }
0x391e   :  { %v13622_v39 = vpop.eup %13621 }
0x391f   :  { %v6013_v7 = vpop.permute.xlu0 %6012  ;;  %6042 = vrot.lane.b32.xlu1 %v13622_v39, %s14013_s29 }
0x3920   :  { %v6026_v37 = vmul.f32 %v6013_v7, %v16797_v61 }
0x3921   :  { %v6015_v26 = vpop.permute.xlu1 %6014 }
0x3922   :  { %13627 = vtanh.f32 %v6026_v37  ;;  %v6027_v17 = vmul.f32 %v6015_v26, %v16803_v53 }
0x3924   :  { %v13624_v20 = vpop.eup %13623  ;;  %13629 = vtanh.f32 %v6027_v17 }
0x3925   :  { %6044 = vrot.lane.b32.xlu0 %v13624_v20, %s14013_s29 }
0x3926   :  { %v13626_v56 = vpop.eup %13625 }
0x3927   :  { %6046 = vrot.lane.b32.xlu1 %v13626_v56, %s14013_s29 }
0x392c   :  { %v13628_v13 = vpop.eup %13627 }
0x392d   :  { %6048 = vrot.lane.b32.xlu0 %v13628_v13, %s14013_s29 }
0x392e   :  { %v13630_v35 = vpop.eup %13629 }
0x392f   :  { %6050 = vrot.lane.b32.xlu1 %v13630_v35, %s14013_s29 }
0x398f   :  { %v6041_v46 = vpop.permute.xlu0 %6040 }
0x3990   :  { %12394 = vmatprep.mubr.msk.f32.mxu0 %vm523_vm5, %v6041_v46 }
0x3991   :  { %v6043_v61 = vpop.permute.xlu1 %6042 }
0x3992   :  { %12395 = vmatmul.mubr.msk.f32.vlgmr.msra.gmra.mrb[138].mxu0 %vm523_vm5, %v6043_v61 }
0x3997   :  { %v6045_v53 = vpop.permute.xlu0 %6044 }
0x3998   :  { %12397 = vmatprep.mubr.msk.f32.mxu0 %vm523_vm5, %v6045_v53 }
0x3999   :  { %v6047_v21 = vpop.permute.xlu1 %6046 }
0x399a   :  { %12398 = vmatmul.mubr.msk.f32.gmra.mrb[164].mxu0 %vm523_vm5, %v6047_v21 }
0x399f   :  { %v6049_v28 = vpop.permute.xlu0 %6048 }
0x39a0   :  { %12400 = vmatprep.mubr.msk.f32.mxu0 %vm523_vm5, %v6049_v28 }
0x39a1   :  { %v6051_v2 = vpop.permute.xlu1 %6050 }
0x39a2   :  { %12401 = vmatmul.mubr.msk.f32.gmra.mrb[166].mxu0 %vm523_vm5, %v6051_v2 }
0x3a65   :  { %v12396_v10 = vpop.f32.mrb[138].mxu0 }
0x3a66   :  { %6166 = vperm.xlu1 %13067, %v12396_v10   ;;  %v6130_v11 = vpop.f32.mrb[139].mxu0  ;;  %v4222_v10 = vadd.f32 %v16597_v23, %v16535_v51 }
0x3a67   :  { %6161 = vperm.xlu0 %13066, %v6130_v11  }
0x3a6d   :  { %v12399_v60 = vpop.f32.mrb[164].mxu0 }
0x3a6e   :  { %6176 = vperm.xlu1 %13067, %v12399_v60   ;;  %v6140_v50 = vpop.f32.mrb[165].mxu0 }
0x3a6f   :  { %6171 = vperm.xlu0 %13066, %v6140_v50  }
0x3a75   :  { %v12402_v40 = vpop.f32.mrb[166].mxu0 }
0x3a76   :  { %6186 = vperm.xlu1 %13067, %v12402_v40   ;;  %v6150_v25 = vpop.f32.mrb[167].mxu0 }
0x3a77   :  { %6181 = vperm.xlu0 %13066, %v6150_v25   ;;  %v4320_v25 = vmul.f32 %v4222_v10, %v14178_v22 }
0x3ae5   :  { %v6167_v38 = vpop.permute.xlu1 %6166 }
0x3ae6   :  { %v6190_v16 = vmul.f32 0.0, %v6167_v38  ;;  %v6162_v31 = vpop.permute.xlu0 %6161 }
0x3ae7   :  { %v6189_v19 = vmul.f32 0.0, %v6162_v31 }
0x3ae8   :  { %v16873_v44 = vadd.f32 %v6190_v16, %v6023_v24  ;;  %v4227_v16 = vadd.f32 %v16597_v23, %v16543_v55 }
0x3ae9   :  { %v16875_v18 = vadd.f32 %v6189_v19, %v6022_v0 }
0x3aea   :  { %19261 = vst [vmem:[#allocation27_spill] sm:$0xff] %v16873_v44  ;;  %v4321_v51 = vmul.f32 %v4227_v16, %v14178_v22 }
0x3aeb   :  { %19262 = vst [vmem:[#allocation28_spill] sm:$0xff] %v16875_v18  ;;  %v6332_v39 = vpack.c.bf16 %v16873_v44, %v16875_v18 }
0x3aed   :  { %6338 = vrot.lane.b32.xlu0 %v6332_v39, %s14013_s29  ;;  %v6177_v7 = vpop.permute.xlu1 %6176 }
0x3aee   :  { %v6192_v26 = vmul.f32 0.0, %v6177_v7  ;;  %v6172_v20 = vpop.permute.xlu0 %6171 }
0x3aef   :  { %v6191_v56 = vmul.f32 0.0, %v6172_v20 }
0x3af0   :  { %v16880_v13 = vadd.f32 %v6192_v26, %v6025_v58 }
0x3af1   :  { %v16882_v35 = vadd.f32 %v6191_v56, %v6024_v54 }
0x3af2   :  { %19263 = vst [vmem:[#allocation29_spill] sm:$0xff] %v16880_v13 }
0x3af3   :  { %19264 = vst [vmem:[#allocation30_spill] sm:$0xff] %v16882_v35  ;;  %v6333_v46 = vpack.c.bf16 %v16880_v13, %v16882_v35 }
0x3af5   :  { %6340 = vrot.lane.b32.xlu1 %v6333_v46, %s14013_s29  ;;  %v6187_v0 = vpop.permute.xlu1 %6186  ;;  %v4235_v46 = vadd.f32 %v16597_v23, %v16541_v30 }
0x3af6   :  { %v6194_v24 = vmul.f32 0.0, %v6187_v0  ;;  %v6182_v61 = vpop.permute.xlu0 %6181 }
0x3af7   :  { %v6193_v53 = vmul.f32 0.0, %v6182_v61  ;;  %v4238_v61 = vadd.f32 %v16597_v23, %v16546_v41 }
0x3af8   :  { %v16887_v21 = vadd.f32 %v6194_v24, %v6027_v17  ;;  %v4219_v17 = vadd.f32 %v16597_v23, %v16529_v5  ;;  %v4230_v5 = vadd.f32 %v16597_v23, %v16548_v15 }
0x3af9   :  { %v16889_v28 = vadd.f32 %v6193_v53, %v6026_v37  ;;  %v4324_v10 = vmul.f32 %v4238_v61, %v14178_v22 }
0x3afa   :  { %19265 = vst [vmem:[#allocation31_spill] sm:$0xff] %v16887_v21  ;;  %v4319_v11 = vmul.f32 %v4219_v17, %v14178_v22  ;;  %v4322_v20 = vmul.f32 %v4230_v5, %v14178_v22 }
0x3afb   :  { %19266 = vst [vmem:[#allocation32_spill] sm:$0xff] %v16889_v28  ;;  %v6334_v2 = vpack.c.bf16 %v16887_v21, %v16889_v28 }
0x3afd   :  { %6342 = vrot.lane.b32.xlu0 %v6334_v2, %s14013_s29  ;;  %v4323_v2 = vmul.f32 %v4235_v46, %v14178_v22 }
0x3b5f   :  { %v6339_v54 = vpop.permute.xlu0 %6338 }
0x3b60   :  { %12425 = vmatmul.mubr.msk.bf16.vlgmr.msra.gmra.mrb[168].mxu1 %vm523_vm5, %v6339_v54 }
0x3b61   :  { %12428 = vmatprep.mubr.msk.bf16.mxu1 %vm14009_vm1, %v19260_v29  ;;  %12927 = vmatpush3.bf16.msra.mxu1 %v15998_v27 }
0x3b62   :  { %12929 = vmatprep.subr.bf16.mxu1 %v16003_v14 }
0x3b65   :  { %12931 = vmatpush3.bf16.msra.mxu1 %v16003_v14 }
0x3b66   :  { %12486 = vmatprep.subr.bf16.mxu1 %v19260_v29 }
0x3b67   :  { %v6341_v58 = vpop.permute.xlu1 %6340 }
0x3b68   :  { %12429 = vmatmul.mubr.msk.bf16.gmra.mrb[172].mxu1 %vm523_vm5, %v6341_v58 }
0x3b69   :  { %12432 = vmatprep.mubr.msk.bf16.mxu1 %vm14009_vm1, %v19260_v29 }
0x3b6f   :  { %v6343_v37 = vpop.permute.xlu0 %6342 }
0x3b70   :  { %12433 = vmatmul.mubr.msk.bf16.gmra.mrb[176].mxu1 %vm523_vm5, %v6343_v37 }
0x3c33   :  { %v6387_v60 = vpop.f32.mrb[168].mxu1 }
0x3c34   :  { %v6410_v50 = vadd.f32 %v6387_v60, %v4319_v11  ;;  %v12426_v40 = vpop.f32.mrb[169].mxu1 }
0x3c35   :  { %v6390_v38 = vpop.f32.mrb[170].mxu1 }
0x3c36   :  { %13631 = vtanh.f32 %v6410_v50  ;;  %v6411_v31 = vadd.f32 %v6390_v38, %v4320_v25  ;;  %v12427_v19 = vpop.f32.mrb[171].mxu1 }
0x3c38   :  { %13633 = vtanh.f32 %v6411_v31 }
0x3c3b   :  { %v6395_v39 = vpop.f32.mrb[172].mxu1 }
0x3c3c   :  { %v6412_v7 = vadd.f32 %v6395_v39, %v4321_v51  ;;  %v12430_v26 = vpop.f32.mrb[173].mxu1 }
0x3c3d   :  { %v6398_v56 = vpop.f32.mrb[174].mxu1 }
0x3c3e   :  { %13635 = vtanh.f32 %v6412_v7  ;;  %v6413_v55 = vadd.f32 %v6398_v56, %v4322_v20  ;;  %v12431_v0 = vpop.f32.mrb[175].mxu1 }
0x3c40   :  { %v13632_v24 = vpop.eup %13631  ;;  %13637 = vtanh.f32 %v6413_v55 }
0x3c41   :  { %v6422_v15 = vmul.f32 %v13632_v24, %v14178_v22 }
0x3c42   :  { %v13634_v53 = vpop.eup %13633 }
0x3c43   :  { %v6403_v54 = vpop.f32.mrb[176].mxu1  ;;  %v16924_v58 = vadd.f32 %v6422_v15, %v14229_v1  ;;  %v6423_v37 = vmul.f32 %v13634_v53, %v14178_v22 }
0x3c44   :  { %v6414_v30 = vadd.f32 %v6403_v54, %v4323_v2  ;;  %v12434_v17 = vpop.f32.mrb[177].mxu1 }
0x3c45   :  { %6446 = vrot.lane.b32.xlu1 %v16924_v58, %s19233_s0  ;;  %v6406_v41 = vpop.f32.mrb[178].mxu1  ;;  %v16931_v23 = vadd.f32 %v6423_v37, %v14229_v1 }
0x3c46   :  { %13639 = vtanh.f32 %v6414_v30  ;;  %v6415_v11 = vadd.f32 %v6406_v41, %v4324_v10  ;;  %v12435_v60 = vpop.f32.mrb[179].mxu1  ;;  %v6434_v30 = vmul.f32 %v16924_v58, %v16821_v32 }
0x3c47   :  { %6448 = vrot.lane.b32.xlu0 %v16931_v23, %s19233_s0  ;;  %v6435_v41 = vmul.f32 %v16931_v23, %v16826_v43 }
0x3c48   :  { %v13636_v50 = vpop.eup %13635  ;;  %13641 = vtanh.f32 %v6415_v11 }
0x3c49   :  { %v6424_v40 = vmul.f32 %v13636_v50, %v14178_v22 }
0x3c4a   :  { %v13638_v25 = vpop.eup %13637 }
0x3c4b   :  { %v16937_v38 = vadd.f32 %v6424_v40, %v14229_v1  ;;  %v6425_v16 = vmul.f32 %v13638_v25, %v14178_v22 }
0x3c4d   :  { %6450 = vrot.lane.b32.xlu1 %v16937_v38, %s19233_s0  ;;  %v16943_v31 = vadd.f32 %v6425_v16, %v14229_v1  ;;  %v6436_v50 = vmul.f32 %v16937_v38, %v16831_v33 }
0x3c4f   :  { %6452 = vrot.lane.b32.xlu0 %v16943_v31, %s19233_s0  ;;  %v6437_v32 = vmul.f32 %v16943_v31, %v16836_v62 }
0x3c50   :  { %v13640_v19 = vpop.eup %13639 }
0x3c51   :  { %v6426_v5 = vmul.f32 %v13640_v19, %v14178_v22  ;;  %v3905_v19 = vld [vmem:[%s19145_s10 + $0x20] sm:$0xff] }
0x3c52   :  { %v13642_v51 = vpop.eup %13641 }
0x3c53   :  { %v16949_v39 = vadd.f32 %v6426_v5, %v14229_v1  ;;  %v6427_v7 = vmul.f32 %v13642_v51, %v14178_v22  ;;  %v3906_v5 = vld [vmem:[%s19145_s10 + $0x28] sm:$0xff] }
0x3c54   :  { %v12908_v51 = vpack.c.bf16 %v3906_v5, %v3905_v19 }
0x3c55   :  { %6454 = vrot.lane.b32.xlu1 %v16949_v39, %s19233_s0  ;;  %v16955_v26 = vadd.f32 %v6427_v7, %v14229_v1  ;;  %v6438_v7 = vmul.f32 %v16949_v39, %v16843_v59 }
0x3c56   :  { %12909 = vmatprep.subr.bf16.mxu0 %v12908_v51 }
0x3c57   :  { %6456 = vrot.lane.b32.xlu0 %v16955_v26, %s19233_s0  ;;  %12911 = vmatpush3.bf16.msra.mxu0 %v12908_v51 }
0x3cb7   :  { %v6447_v20 = vpop.permute.xlu1 %6446 }
0x3cb8   :  { %v6464_v56 = vmul.f32 %v6447_v20, %v16924_v58 }
0x3cb9   :  { %v6449_v46 = vpop.permute.xlu0 %6448 }
0x3cba   :  { %v6465_v55 = vmul.f32 %v6449_v46, %v16931_v23  ;;  %6476 = vrot.lane.b32.xlu1 %v6464_v56, %s14013_s29  ;;  %v3907_v56 = vld [vmem:[%s19145_s10 + $0x30] sm:$0xff]  ;;  %v3908_v46 = vld [vmem:[%s19145_s10 + $0x38] sm:$0xff] }
0x3cbc   :  { %6478 = vrot.lane.b32.xlu0 %v6465_v55, %s14013_s29 }
0x3cbf   :  { %v6451_v0 = vpop.permute.xlu1 %6450 }
0x3cc0   :  { %v6466_v24 = vmul.f32 %v6451_v0, %v16937_v38  ;;  %v6439_v0 = vmul.f32 %v16955_v26, %v16848_v6 }
0x3cc1   :  { %v6453_v61 = vpop.permute.xlu0 %6452 }
0x3cc2   :  { %v6467_v15 = vmul.f32 %v6453_v61, %v16943_v31  ;;  %6480 = vrot.lane.b32.xlu1 %v6466_v24, %s14013_s29  ;;  %v12912_v24 = vpack.c.bf16 %v3908_v46, %v3907_v56 }
0x3cc4   :  { %6482 = vrot.lane.b32.xlu0 %v6467_v15, %s14013_s29  ;;  %12913 = vmatprep.subr.bf16.mxu0 %v12912_v24 }
0x3cc5   :  { %12915 = vmatpush3.bf16.msra.mxu0 %v12912_v24 }
0x3cc6   :  { %12917 = vmatprep.subr.bf16.mxu0 %v15998_v27 }
0x3cc7   :  { %v6455_v53 = vpop.permute.xlu1 %6454 }
0x3cc8   :  { %v6468_v2 = vmul.f32 %v6455_v53, %v16949_v39 }
0x3cc9   :  { %v6457_v54 = vpop.permute.xlu0 %6456 }
0x3cca   :  { %v6469_v37 = vmul.f32 %v6457_v54, %v16955_v26  ;;  %6484 = vrot.lane.b32.xlu1 %v6468_v2, %s14013_s29 }
0x3ccc   :  { %6486 = vrot.lane.b32.xlu0 %v6469_v37, %s14013_s29 }
0x3d2c   :  { %v6477_v17 = vpop.permute.xlu1 %6476 }
0x3d2d   :  { %v16973_v10 = vadd.f32 %v6477_v17, %v6434_v30 }
0x3d2e   :  { %v6479_v11 = vpop.permute.xlu0 %6478 }
0x3d2f   :  { %13643 = vtanh.f32 %v16973_v10  ;;  %v16978_v60 = vadd.f32 %v6479_v11, %v6435_v41 }
0x3d31   :  { %13645 = vtanh.f32 %v16978_v60 }
0x3d34   :  { %v6481_v40 = vpop.permute.xlu1 %6480 }
0x3d35   :  { %v16983_v25 = vadd.f32 %v6481_v40, %v6436_v50 }
0x3d36   :  { %v6483_v16 = vpop.permute.xlu0 %6482 }
0x3d37   :  { %13647 = vtanh.f32 %v16983_v25  ;;  %v16988_v43 = vadd.f32 %v6483_v16, %v6437_v32 }
0x3d39   :  { %v13644_v33 = vpop.eup %13643  ;;  %13649 = vtanh.f32 %v16988_v43 }
0x3d3a   :  { %6512 = vrot.lane.b32.xlu1 %v13644_v33, %s19233_s0 }
0x3d3b   :  { %v13646_v62 = vpop.eup %13645 }
0x3d3c   :  { %6514 = vrot.lane.b32.xlu0 %v13646_v62, %s19233_s0  ;;  %v6485_v20 = vpop.permute.xlu1 %6484 }
0x3d3d   :  { %v17007_v55 = vadd.f32 %v6485_v20, %v6438_v7 }
0x3d3e   :  { %v6487_v59 = vpop.permute.xlu0 %6486 }
0x3d3f   :  { %13651 = vtanh.f32 %v17007_v55  ;;  %v17012_v61 = vadd.f32 %v6487_v59, %v6439_v0 }
0x3d41   :  { %v13648_v15 = vpop.eup %13647  ;;  %13653 = vtanh.f32 %v17012_v61 }
0x3d42   :  { %6516 = vrot.lane.b32.xlu1 %v13648_v15, %s19233_s0  ;;  %13655 = vtanh.f32 %v16875_v18 }
0x3d43   :  { %v13650_v53 = vpop.eup %13649  ;;  %13657 = vtanh.f32 %v16873_v44 }
0x3d44   :  { %6518 = vrot.lane.b32.xlu0 %v13650_v53, %s19233_s0  ;;  %13659 = vtanh.f32 %v16882_v35 }
0x3d45   :  { %13661 = vtanh.f32 %v16880_v13 }
0x3d46   :  { %13663 = vtanh.f32 %v16889_v28 }
0x3d47   :  { %13665 = vtanh.f32 %v16887_v21 }
0x3d49   :  { %v13652_v6 = vpop.eup %13651 }
0x3d4a   :  { %6520 = vrot.lane.b32.xlu1 %v13652_v6, %s19233_s0 }
0x3d4b   :  { %v13654_v2 = vpop.eup %13653 }
0x3d4c   :  { %6522 = vrot.lane.b32.xlu0 %v13654_v2, %s19233_s0  ;;  %v13656_v54 = vpop.eup %13655 }
0x3d4d   :  { %v13658_v37 = vpop.eup %13657 }
0x3d4e   :  { %6213 = vrot.lane.b32.xlu1 %v13656_v54, %s14013_s29  ;;  %v13660_v30 = vpop.eup %13659 }
0x3d4f   :  { %v13662_v17 = vpop.eup %13661 }
0x3d50   :  { %6215 = vrot.lane.b32.xlu0 %v13658_v37, %s14013_s29  ;;  %v13664_v41 = vpop.eup %13663 }
0x3d51   :  { %v13666_v11 = vpop.eup %13665 }
0x3d52   :  { %6217 = vrot.lane.b32.xlu1 %v13660_v30, %s14013_s29 }
0x3d54   :  { %6219 = vrot.lane.b32.xlu0 %v13662_v17, %s14013_s29 }
0x3d56   :  { %6221 = vrot.lane.b32.xlu1 %v13664_v41, %s14013_s29 }
0x3d58   :  { %6223 = vrot.lane.b32.xlu0 %v13666_v11, %s14013_s29 }
0x3dac   :  { %v6513_v50 = vpop.permute.xlu1 %6512 }
0x3dad   :  { %v17033_v40 = vmul.f32 %v6513_v50, %v16924_v58 }
0x3dae   :  { %v6515_v32 = vpop.permute.xlu0 %6514 }
0x3daf   :  { %13667 = vtanh.f32 %v17033_v40  ;;  %v17037_v16 = vmul.f32 %v6515_v32, %v16931_v23 }
0x3db1   :  { %13669 = vtanh.f32 %v17037_v16 }
0x3db4   :  { %v6517_v19 = vpop.permute.xlu1 %6516 }
0x3db5   :  { %v17041_v5 = vmul.f32 %v6517_v19, %v16937_v38 }
0x3db6   :  { %v6519_v33 = vpop.permute.xlu0 %6518 }
0x3db7   :  { %13671 = vtanh.f32 %v17041_v5  ;;  %v17045_v51 = vmul.f32 %v6519_v33, %v16943_v31 }
0x3db9   :  { %v13668_v58 = vpop.eup %13667  ;;  %13673 = vtanh.f32 %v17045_v51 }
0x3dba   :  { %6548 = vrot.lane.b32.xlu1 %v13668_v58, %s14013_s29 }
0x3dbb   :  { %v13670_v62 = vpop.eup %13669 }
0x3dbc   :  { %6550 = vrot.lane.b32.xlu0 %v13670_v62, %s14013_s29  ;;  %v6521_v23 = vpop.permute.xlu1 %6520 }
0x3dbd   :  { %v17051_v7 = vmul.f32 %v6521_v23, %v16949_v39 }
0x3dbe   :  { %v6523_v38 = vpop.permute.xlu0 %6522 }
0x3dbf   :  { %13675 = vtanh.f32 %v17051_v7  ;;  %v17055_v20 = vmul.f32 %v6523_v38, %v16955_v26 }
0x3dc0   :  { %v6214_v31 = vpop.permute.xlu1 %6213 }
0x3dc1   :  { %v13672_v56 = vpop.eup %13671  ;;  %13677 = vtanh.f32 %v17055_v20  ;;  %12411 = vmatprep.mubr.msk.f32.mxu0 %vm523_vm5, %v6214_v31 }
0x3dc2   :  { %v6216_v46 = vpop.permute.xlu0 %6215  ;;  %6552 = vrot.lane.b32.xlu1 %v13672_v56, %s14013_s29 }
0x3dc3   :  { %v13674_v0 = vpop.eup %13673  ;;  %12412 = vmatmul.mubr.msk.f32.vlgmr.msra.gmra.mrb[168].mxu0 %vm523_vm5, %v6216_v46 }
0x3dc4   :  { %6554 = vrot.lane.b32.xlu0 %v13674_v0, %s14013_s29  ;;  %v6218_v39 = vpop.permute.xlu1 %6217  ;;  %12919 = vmatpush3.bf16.msra.mxu0 %v15998_v27 }
0x3dc5   :  { %12414 = vmatprep.mubr.msk.f32.mxu0 %vm523_vm5, %v6218_v39  ;;  %12921 = vmatprep.subr.bf16.mxu0 %v16003_v14 }
0x3dc6   :  { %v6220_v26 = vpop.permute.xlu0 %6219 }
0x3dc7   :  { %12415 = vmatmul.mubr.msk.f32.gmra.mrb[170].mxu0 %vm523_vm5, %v6220_v26 }
0x3dc8   :  { %v6222_v24 = vpop.permute.xlu1 %6221  ;;  %12923 = vmatpush3.bf16.msra.mxu0 %v16003_v14 }
0x3dc9   :  { %v13676_v59 = vpop.eup %13675  ;;  %12417 = vmatprep.mubr.msk.f32.mxu0 %vm523_vm5, %v6222_v24  ;;  %12453 = vmatprep.subr.bf16.mxu0 %v19260_v29 }
0x3dca   :  { %v6224_v15 = vpop.permute.xlu0 %6223  ;;  %6556 = vrot.lane.b32.xlu1 %v13676_v59, %s14013_s29 }
0x3dcb   :  { %v13678_v53 = vpop.eup %13677  ;;  %12418 = vmatmul.mubr.msk.f32.gmra.mrb[172].mxu0 %vm523_vm5, %v6224_v15 }
0x3dcc   :  { %6558 = vrot.lane.b32.xlu0 %v13678_v53, %s14013_s29 }
0x3e2c   :  { %v6549_v6 = vpop.permute.xlu1 %6548 }
0x3e2d   :  { %12444 = vmatprep.mubr.msk.f32.mxu0 %vm523_vm5, %v6549_v6 }
0x3e2e   :  { %v6551_v2 = vpop.permute.xlu0 %6550 }
0x3e2f   :  { %12445 = vmatmul.mubr.msk.f32.vlgmr.msra.gmra.mrb[174].mxu0 %vm523_vm5, %v6551_v2 }
0x3e30   :  { %12454 = vmatpush3.bf16.msra.mxu0 %v15771_v47 }
0x3e31   :  { %12455 = vmatprep.subr.bf16.mxu0 %v19260_v29 }
0x3e34   :  { %v6553_v54 = vpop.permute.xlu1 %6552  ;;  %12456 = vmatpush3.bf16.msra.mxu0 %v15796_v34 }
0x3e35   :  { %12447 = vmatprep.mubr.msk.f32.mxu0 %vm523_vm5, %v6553_v54  ;;  %12933 = vmatprep.subr.bf16.mxu0 %v15998_v27  ;;  %v19267_v54 = vmov 1  }
0x3e36   :  { %v6555_v37 = vpop.permute.xlu0 %6554 }
0x3e37   :  { %12448 = vmatmul.mubr.msk.f32.gmra.mrb[176].mxu0 %vm523_vm5, %v6555_v37 }
0x3e3c   :  { %v6557_v30 = vpop.permute.xlu1 %6556 }
0x3e3d   :  { %12450 = vmatprep.mubr.msk.f32.mxu0 %vm523_vm5, %v6557_v30 }
0x3e3e   :  { %v6559_v17 = vpop.permute.xlu0 %6558 }
0x3e3f   :  { %12451 = vmatmul.mubr.msk.f32.gmra.mrb[178].mxu0 %vm523_vm5, %v6559_v17 }
0x3e40   :  { %12457 = vmatprep.mubr.msk.bf16.mxu0 %vm14009_vm1, %v19260_v29 }
0x3e96   :  { %v17084_v41 = vpop.f32.mrb[168].mxu0 }
0x3e97   :  { %v17086_v11 = vpop.f32.mrb[169].mxu0 }
0x3e9a   :  { %v17088_v50 = vpop.f32.mrb[170].mxu0 }
0x3e9b   :  { %v17090_v32 = vpop.f32.mrb[171].mxu0 }
0x3e9e   :  { %v17092_v19 = vpop.f32.mrb[172].mxu0 }
0x3e9f   :  { %v17094_v33 = vpop.f32.mrb[173].mxu0 }
0x3f02   :  { %v12446_v58 = vpop.f32.mrb[174].mxu0 }
0x3f03   :  { %v6674_v62 = vadd.f32 %v12446_v58, %v17084_v41  ;;  %v6638_v23 = vpop.f32.mrb[175].mxu0 }
0x3f04   :  { %v6673_v38 = vadd.f32 %v6638_v23, %v17086_v11 }
0x3f05   :  { %6687 = vrot.lane.b32.xlu0 %v6674_v62, %s14014_s8 }
0x3f06   :  { %6685 = vrot.lane.b32.xlu1 %v6673_v38, %s14014_s8 }
0x3f0a   :  { %v12449_v31 = vpop.f32.mrb[176].mxu0 }
0x3f0b   :  { %v6676_v56 = vadd.f32 %v12449_v31, %v17088_v50  ;;  %v6648_v46 = vpop.f32.mrb[177].mxu0 }
0x3f0c   :  { %v6675_v0 = vadd.f32 %v6648_v46, %v17090_v32 }
0x3f0d   :  { %6691 = vrot.lane.b32.xlu0 %v6676_v56, %s14014_s8 }
0x3f0e   :  { %6689 = vrot.lane.b32.xlu1 %v6675_v0, %s14014_s8 }
0x3f12   :  { %v12452_v39 = vpop.f32.mrb[178].mxu0 }
0x3f13   :  { %v6678_v26 = vadd.f32 %v12452_v39, %v17092_v19  ;;  %v6658_v24 = vpop.f32.mrb[179].mxu0 }
0x3f14   :  { %v6677_v59 = vadd.f32 %v6658_v24, %v17094_v33 }
0x3f15   :  { %6695 = vrot.lane.b32.xlu0 %v6678_v26, %s14014_s8 }
0x3f16   :  { %6693 = vrot.lane.b32.xlu1 %v6677_v59, %s14014_s8 }
0x3f77   :  { %v6688_v15 = vpop.permute.xlu0 %6687 }
0x3f78   :  { %v6704_v53 = vsel %vm2893_vm6, %v12446_v58, %v6688_v15  ;;  %v6686_v6 = vpop.permute.xlu1 %6685 }
0x3f79   :  { %v6703_v2 = vsel %vm2893_vm6, %v6638_v23, %v6686_v6  ;;  %6716 = vperm.xlu0 %13066, %v6704_v53  }
0x3f7a   :  { %6711 = vperm.xlu1 %13067, %v6703_v2  }
0x3f7d   :  { %13068 = vset.pattern.permute.xlu0 %v19267_v54 }
0x3f7e   :  { %6750 = vperm.xlu0 %13068, %v6704_v53   ;;  %13069 = vset.pattern.permute.xlu1 %v19267_v54 }
0x3f7f   :  { %6746 = vperm.xlu1 %13069, %v6703_v2   ;;  %v6692_v37 = vpop.permute.xlu0 %6691 }
0x3f80   :  { %v6690_v30 = vpop.permute.xlu1 %6689  ;;  %v6706_v62 = vsel %vm2893_vm6, %v12449_v31, %v6692_v37 }
0x3f81   :  { %v6705_v17 = vsel %vm2893_vm6, %v6648_v46, %v6690_v30 }
0x3f82   :  { %6754 = vperm.xlu0 %13068, %v6705_v17  }
0x3f83   :  { %13070 = vset.pattern.permute.xlu1 %v19240_v45 }
0x3f84   :  { %6726 = vperm.xlu1 %13070, %v6706_v62  }
0x3f86   :  { %13073 = vset.pattern.permute.xlu0 %v19240_v45 }
0x3f87   :  { %v6696_v38 = vpop.permute.xlu0 %6695 }
0x3f88   :  { %13071 = vset.pattern.permute.xlu1 %v19267_v54  ;;  %v6694_v58 = vpop.permute.xlu1 %6693  ;;  %v6708_v56 = vsel %vm2893_vm6, %v12452_v39, %v6696_v38 }
0x3f89   :  { %v6707_v23 = vsel %vm2893_vm6, %v6658_v24, %v6694_v58  ;;  %6758 = vperm.xlu1 %13071, %v6706_v62  }
0x3f8a   :  { %6731 = vperm.xlu0 %13073, %v6707_v23  }
0x3f8d   :  { %13072 = vset.pattern.permute.xlu1 %v19240_v45 }
0x3f8e   :  { %6721 = vperm.xlu1 %13072, %v6705_v17   ;;  %13075 = vset.pattern.permute.xlu0 %v19267_v54 }
0x3f8f   :  { %6766 = vperm.xlu0 %13075, %v6708_v56  }
0x3f92   :  { %6736 = vperm.xlu1 %13072, %v6708_v56  }
0x3f93   :  { %13076 = vset.pattern.permute.xlu0 %v19240_v45 }
0x3f96   :  { %13074 = vset.pattern.permute.xlu1 %v19267_v54 }
0x3f97   :  { %6762 = vperm.xlu1 %13074, %v6707_v23  }
0x3ff8   :  { %v6717_v31 = vpop.permute.xlu0 %6716 }
0x3ff9   :  { %v6712_v46 = vpop.permute.xlu1 %6711  ;;  %v6740_v26 = vmul.f32 0.0, %v6717_v31 }
0x3ffa   :  { %v6739_v15 = vmul.f32 0.0, %v6712_v46 }
0x3ffd   :  { %v6751_v0 = vpop.permute.xlu0 %6750 }
0x3ffe   :  { %v6770_v24 = vmul.f32 %v6751_v0, %v16873_v44  ;;  %v6747_v59 = vpop.permute.xlu1 %6746 }
0x3fff   :  { %v6769_v39 = vmul.f32 %v6747_v59, %v16875_v18 }
0x4000   :  { %v6776_v53 = vadd.f32 %v6770_v24, %v6740_v26 }
0x4001   :  { %v6775_v6 = vadd.f32 %v6769_v39, %v6739_v15  ;;  %v6755_v62 = vpop.permute.xlu0 %6754 }
0x4002   :  { %v6782_v2 = vadd.f32 %v6776_v53, %v17037_v16  ;;  %v6771_v46 = vmul.f32 %v6755_v62, %v16882_v35 }
0x4003   :  { %v6781_v37 = vadd.f32 %v6775_v6, %v17033_v40  ;;  %v6727_v30 = vpop.permute.xlu1 %6726 }
0x4004   :  { %v6742_v38 = vmul.f32 0.0, %v6727_v30 }
0x4005   :  { %v6787_v17 = vpack.c.bf16 %v6782_v2, %v6781_v37 }
0x4007   :  { %6793 = vrot.lane.b32.xlu1 %v6787_v17, %s14013_s29 }
0x4008   :  { %v6759_v58 = vpop.permute.xlu1 %6758 }
0x4009   :  { %v6772_v23 = vmul.f32 %v6759_v58, %v16880_v13  ;;  %v6732_v56 = vpop.permute.xlu0 %6731 }
0x400a   :  { %v6743_v37 = vmul.f32 0.0, %v6732_v56 }
0x400b   :  { %v6778_v0 = vadd.f32 %v6772_v23, %v6742_v38 }
0x400d   :  { %v6722_v31 = vpop.permute.xlu1 %6721  ;;  %v6784_v16 = vadd.f32 %v6778_v0, %v17045_v51 }
0x400e   :  { %v6741_v26 = vmul.f32 0.0, %v6722_v31  ;;  %v6767_v15 = vpop.permute.xlu0 %6766 }
0x400f   :  { %v6774_v6 = vmul.f32 %v6767_v15, %v16887_v21 }
0x4010   :  { %v6777_v24 = vadd.f32 %v6771_v46, %v6741_v26 }
0x4011   :  { %v6737_v59 = vpop.permute.xlu1 %6736 }
0x4012   :  { %v6783_v40 = vadd.f32 %v6777_v24, %v17041_v5  ;;  %v6744_v39 = vmul.f32 0.0, %v6737_v59 }
0x4014   :  { %v6788_v53 = vpack.c.bf16 %v6784_v16, %v6783_v40  ;;  %v6780_v30 = vadd.f32 %v6774_v6, %v6744_v39 }
0x4016   :  { %6795 = vrot.lane.b32.xlu1 %v6788_v53, %s14013_s29  ;;  %v6763_v2 = vpop.permute.xlu1 %6762  ;;  %v6786_v58 = vadd.f32 %v6780_v30, %v17055_v20  ;;  %v17151_v20 = vld [vmem:[%s19144_s9] ss:$0 sm:$0xff] }
0x4017   :  { %v6773_v17 = vmul.f32 %v6763_v2, %v16889_v28  ;;  %v4251_v40 = vadd.f32 %v17151_v20, %v16551_v4 }
0x4019   :  { %v6779_v62 = vadd.f32 %v6773_v17, %v6743_v37 }
0x401b   :  { %v6785_v23 = vadd.f32 %v6779_v62, %v17051_v7 }
0x401d   :  { %v6789_v51 = vpack.c.bf16 %v6786_v58, %v6785_v23 }
0x401f   :  { %6797 = vrot.lane.b32.xlu0 %v6789_v51, %s14013_s29  ;;  %v4259_v51 = vadd.f32 %v17151_v20, %v16561_v63 }
0x4079   :  { %v6794_v5 = vpop.permute.xlu1 %6793 }
0x407a   :  { %12458 = vmatmul.mubr.msk.bf16.vlgmr.msra.gmra.mrb[180].mxu0 %vm523_vm5, %v6794_v5  ;;  %v4262_v5 = vadd.f32 %v17151_v20, %v16565_v49 }
0x407b   :  { %12461 = vmatprep.mubr.msk.bf16.mxu0 %vm14009_vm1, %v19260_v29  ;;  %12935 = vmatpush3.bf16.msra.mxu0 %v15998_v27  ;;  %v4243_v27 = vadd.f32 %v17151_v20, %v16553_v8  ;;  %v4254_v8 = vadd.f32 %v17151_v20, %v16555_v9 }
0x407c   :  { %12937 = vmatprep.subr.bf16.mxu0 %v16003_v14 }
0x407d   :  { %v4325_v56 = vmul.f32 %v4243_v27, %v14178_v22  ;;  %v4328_v30 = vmul.f32 %v4254_v8, %v14178_v22 }
0x407f   :  { %12939 = vmatpush3.bf16.msra.mxu0 %v16003_v14  ;;  %v4246_v14 = vadd.f32 %v17151_v20, %v16557_v57  ;;  %v4327_v57 = vmul.f32 %v4251_v40, %v14178_v22 }
0x4081   :  { %v4326_v26 = vmul.f32 %v4246_v14, %v14178_v22 }
0x4088   :  { %v6796_v38 = vpop.permute.xlu1 %6795 }
0x4089   :  { %12462 = vmatmul.mubr.msk.bf16.gmra.mrb[184].mxu0 %vm523_vm5, %v6796_v38  ;;  %v4329_v38 = vmul.f32 %v4259_v51, %v14178_v22 }
0x408a   :  { %12465 = vmatprep.mubr.msk.bf16.mxu0 %vm14009_vm1, %v19260_v29 }
0x4091   :  { %v6798_v7 = vpop.permute.xlu0 %6797 }
0x4092   :  { %12466 = vmatmul.mubr.msk.bf16.gmra.mrb[188].mxu0 %vm523_vm5, %v6798_v7 }
0x414d   :  { %v6842_v31 = vpop.f32.mrb[180].mxu0 }
0x414e   :  { %v6865_v46 = vadd.f32 %v6842_v31, %v4325_v56  ;;  %v12459_v0 = vpop.f32.mrb[181].mxu0  ;;  %v4330_v56 = vmul.f32 %v4262_v5, %v14178_v22 }
0x414f   :  { %v6845_v24 = vpop.f32.mrb[182].mxu0 }
0x4150   :  { %13679 = vtanh.f32 %v6865_v46  ;;  %v6866_v59 = vadd.f32 %v6845_v24, %v4326_v26  ;;  %v12460_v16 = vpop.f32.mrb[183].mxu0 }
0x4152   :  { %13681 = vtanh.f32 %v6866_v59 }
0x415a   :  { %v13680_v15 = vpop.eup %13679 }
0x415b   :  { %v6877_v39 = vmul.f32 %v13680_v15, %v14178_v22 }
0x415c   :  { %v13682_v53 = vpop.eup %13681  ;;  %v6850_v6 = vpop.f32.mrb[184].mxu0 }
0x415d   :  { %v6867_v2 = vadd.f32 %v6850_v6, %v4327_v57  ;;  %v12463_v37 = vpop.f32.mrb[185].mxu0  ;;  %v17167_v17 = vadd.f32 %v6877_v39, %v14229_v1  ;;  %v6878_v62 = vmul.f32 %v13682_v53, %v14178_v22 }
0x415e   :  { %v6853_v4 = vpop.f32.mrb[186].mxu0 }
0x415f   :  { %13683 = vtanh.f32 %v6867_v2  ;;  %v6868_v58 = vadd.f32 %v6853_v4, %v4328_v30  ;;  %6901 = vrot.lane.b32.xlu1 %v17167_v17, %s19233_s0  ;;  %v12464_v9 = vpop.f32.mrb[187].mxu0  ;;  %v17173_v23 = vadd.f32 %v6878_v62, %v14229_v1 }
0x4161   :  { %13685 = vtanh.f32 %v6868_v58  ;;  %6903 = vrot.lane.b32.xlu0 %v17173_v23, %s19233_s0 }
0x4165   :  { %v6858_v7 = vpop.f32.mrb[188].mxu0 }
0x4166   :  { %v6869_v27 = vadd.f32 %v6858_v7, %v4329_v38  ;;  %v12467_v14 = vpop.f32.mrb[189].mxu0 }
0x4167   :  { %v6861_v31 = vpop.f32.mrb[190].mxu0 }
0x4168   :  { %13687 = vtanh.f32 %v6869_v27  ;;  %v6870_v46 = vadd.f32 %v6861_v31, %v4330_v56  ;;  %v12468_v0 = vpop.f32.mrb[191].mxu0  ;;  %v6889_v27 = vmul.f32 %v17167_v17, %v16973_v10  ;;  %v6890_v31 = vmul.f32 %v17173_v23, %v16978_v60 }
0x4169   :  { %v13684_v26 = vpop.eup %13683 }
0x416a   :  { %13689 = vtanh.f32 %v6870_v46  ;;  %v6879_v63 = vmul.f32 %v13684_v26, %v14178_v22 }
0x416b   :  { %v13686_v24 = vpop.eup %13685 }
0x416c   :  { %v17185_v59 = vadd.f32 %v6879_v63, %v14229_v1  ;;  %v6880_v49 = vmul.f32 %v13686_v24, %v14178_v22 }
0x416e   :  { %6905 = vrot.lane.b32.xlu1 %v17185_v59, %s19233_s0  ;;  %v17191_v16 = vadd.f32 %v6880_v49, %v14229_v1  ;;  %v6891_v63 = vmul.f32 %v17185_v59, %v16983_v25 }
0x4170   :  { %6907 = vrot.lane.b32.xlu0 %v17191_v16, %s19233_s0  ;;  %v6892_v60 = vmul.f32 %v17191_v16, %v16988_v43 }
0x4172   :  { %v13688_v40 = vpop.eup %13687 }
0x4173   :  { %v6881_v8 = vmul.f32 %v13688_v40, %v14178_v22 }
0x4174   :  { %v13690_v15 = vpop.eup %13689 }
0x4175   :  { %v17197_v57 = vadd.f32 %v6881_v8, %v14229_v1  ;;  %v6882_v39 = vmul.f32 %v13690_v15, %v14178_v22 }
0x4177   :  { %6909 = vrot.lane.b32.xlu1 %v17197_v57, %s19233_s0  ;;  %v17203_v53 = vadd.f32 %v6882_v39, %v14229_v1  ;;  %v6893_v15 = vmul.f32 %v17197_v57, %v17007_v55 }
0x4179   :  { %6911 = vrot.lane.b32.xlu0 %v17203_v53, %s19233_s0 }
0x41d1   :  { %v6902_v6 = vpop.permute.xlu1 %6901 }
0x41d2   :  { %v6919_v2 = vmul.f32 %v6902_v6, %v17167_v17  ;;  %v6894_v6 = vmul.f32 %v17203_v53, %v17012_v61 }
0x41d3   :  { %v6904_v37 = vpop.permute.xlu0 %6903 }
0x41d4   :  { %v6920_v30 = vmul.f32 %v6904_v37, %v17173_v23  ;;  %6931 = vrot.lane.b32.xlu1 %v6919_v2, %s14013_s29 }
0x41d6   :  { %6933 = vrot.lane.b32.xlu0 %v6920_v30, %s14013_s29 }
0x41e0   :  { %v6906_v62 = vpop.permute.xlu1 %6905 }
0x41e1   :  { %v6921_v4 = vmul.f32 %v6906_v62, %v17185_v59 }
0x41e2   :  { %v6908_v58 = vpop.permute.xlu0 %6907 }
0x41e3   :  { %v6922_v9 = vmul.f32 %v6908_v58, %v17191_v16  ;;  %6935 = vrot.lane.b32.xlu1 %v6921_v4, %s14013_s29 }
0x41e5   :  { %6937 = vrot.lane.b32.xlu0 %v6922_v9, %s14013_s29 }
0x41e9   :  { %v6910_v51 = vpop.permute.xlu1 %6909 }
0x41ea   :  { %v6923_v5 = vmul.f32 %v6910_v51, %v17197_v57 }
0x41eb   :  { %v6912_v38 = vpop.permute.xlu0 %6911 }
0x41ec   :  { %v6924_v7 = vmul.f32 %v6912_v38, %v17203_v53  ;;  %6939 = vrot.lane.b32.xlu1 %v6923_v5, %s14013_s29 }
0x41ee   :  { %6941 = vrot.lane.b32.xlu0 %v6924_v7, %s14013_s29 }
0x4246   :  { %v6932_v14 = vpop.permute.xlu1 %6931 }
0x4247   :  { %v17221_v56 = vadd.f32 %v6932_v14, %v6889_v27 }
0x4248   :  { %v6934_v46 = vpop.permute.xlu0 %6933 }
0x4249   :  { %13691 = vtanh.f32 %v17221_v56  ;;  %v17226_v0 = vadd.f32 %v6934_v46, %v6890_v31 }
0x424b   :  { %13693 = vtanh.f32 %v17226_v0 }
0x4253   :  { %v13692_v26 = vpop.eup %13691 }
0x4254   :  { %6967 = vrot.lane.b32.xlu1 %v13692_v26, %s19233_s0 }
0x4255   :  { %v13694_v10 = vpop.eup %13693  ;;  %v6936_v24 = vpop.permute.xlu1 %6935 }
0x4256   :  { %v17232_v49 = vadd.f32 %v6936_v24, %v6891_v63  ;;  %6969 = vrot.lane.b32.xlu0 %v13694_v10, %s19233_s0 }
0x4257   :  { %v6938_v40 = vpop.permute.xlu0 %6937 }
0x4258   :  { %13695 = vtanh.f32 %v17232_v49  ;;  %v17238_v8 = vadd.f32 %v6938_v40, %v6892_v60 }
0x425a   :  { %13697 = vtanh.f32 %v17238_v8 }
0x425e   :  { %v6940_v25 = vpop.permute.xlu1 %6939 }
0x425f   :  { %v17243_v39 = vadd.f32 %v6940_v25, %v6893_v15 }
0x4260   :  { %v6942_v2 = vpop.permute.xlu0 %6941 }
0x4261   :  { %13699 = vtanh.f32 %v17243_v39  ;;  %v17248_v43 = vadd.f32 %v6942_v2, %v6894_v6 }
0x4262   :  { %v13696_v37 = vpop.eup %13695 }
0x4263   :  { %13701 = vtanh.f32 %v17248_v43  ;;  %6971 = vrot.lane.b32.xlu1 %v13696_v37, %s19233_s0 }
0x4264   :  { %v13698_v30 = vpop.eup %13697 }
0x4265   :  { %6973 = vrot.lane.b32.xlu0 %v13698_v30, %s19233_s0 }
0x426b   :  { %v13700_v55 = vpop.eup %13699 }
0x426c   :  { %6975 = vrot.lane.b32.xlu1 %v13700_v55, %s19233_s0 }
0x426d   :  { %v13702_v62 = vpop.eup %13701 }
0x426e   :  { %6977 = vrot.lane.b32.xlu0 %v13702_v62, %s19233_s0 }
0x42c6   :  { %v6968_v61 = vpop.permute.xlu1 %6967 }
0x42c7   :  { %v17256_v4 = vmul.f32 %v6968_v61, %v17167_v17 }
0x42c8   :  { %v6970_v58 = vpop.permute.xlu0 %6969 }
0x42c9   :  { %13703 = vtanh.f32 %v17256_v4  ;;  %v17260_v9 = vmul.f32 %v6970_v58, %v17173_v23 }
0x42cb   :  { %13705 = vtanh.f32 %v17260_v9 }
0x42d3   :  { %v13704_v51 = vpop.eup %13703 }
0x42d4   :  { %7003 = vrot.lane.b32.xlu1 %v13704_v51, %s14013_s29 }
0x42d5   :  { %v13706_v5 = vpop.eup %13705  ;;  %v6972_v38 = vpop.permute.xlu1 %6971 }
0x42d6   :  { %v17265_v7 = vmul.f32 %v6972_v38, %v17185_v59  ;;  %7005 = vrot.lane.b32.xlu0 %v13706_v5, %s14013_s29 }
0x42d7   :  { %v6974_v17 = vpop.permute.xlu0 %6973 }
0x42d8   :  { %13707 = vtanh.f32 %v17265_v7  ;;  %v17270_v27 = vmul.f32 %v6974_v17, %v17191_v16 }
0x42da   :  { %13709 = vtanh.f32 %v17270_v27 }
0x42de   :  { %v6976_v23 = vpop.permute.xlu1 %6975 }
0x42df   :  { %v17274_v14 = vmul.f32 %v6976_v23, %v17197_v57 }
0x42e0   :  { %v6978_v31 = vpop.permute.xlu0 %6977 }
0x42e1   :  { %13711 = vtanh.f32 %v17274_v14  ;;  %v17278_v59 = vmul.f32 %v6978_v31, %v17203_v53 }
0x42e2   :  { %v13708_v46 = vpop.eup %13707 }
0x42e3   :  { %13713 = vtanh.f32 %v17278_v59  ;;  %7007 = vrot.lane.b32.xlu1 %v13708_v46, %s14013_s29 }
0x42e4   :  { %v13710_v26 = vpop.eup %13709 }
0x42e5   :  { %7009 = vrot.lane.b32.xlu0 %v13710_v26, %s14013_s29 }
0x42eb   :  { %v13712_v16 = vpop.eup %13711 }
0x42ec   :  { %7011 = vrot.lane.b32.xlu1 %v13712_v16, %s14013_s29 }
0x42ed   :  { %v13714_v63 = vpop.eup %13713 }
0x42ee   :  { %7013 = vrot.lane.b32.xlu0 %v13714_v63, %s14013_s29 }
0x4346   :  { %v7004_v57 = vpop.permute.xlu1 %7003 }
0x4347   :  { %12477 = vmatprep.mubr.msk.f32.mxu1 %vm523_vm5, %v7004_v57 }
0x4348   :  { %v7006_v10 = vpop.permute.xlu0 %7005 }
0x4349   :  { %12478 = vmatmul.mubr.msk.f32.vlgmr.msra.gmra.mrb[180].mxu1 %vm523_vm5, %v7006_v10 }
0x434a   :  { %12487 = vmatpush3.bf16.msra.mxu1 %v15771_v47 }
0x434b   :  { %12488 = vmatprep.subr.bf16.mxu1 %v19260_v29 }
0x434e   :  { %12489 = vmatpush3.bf16.msra.mxu1 %v15796_v34 }
0x434f   :  { %12545 = vmatprep.subr.bf16.mxu1 %v19260_v29 }
0x4355   :  { %v7008_v53 = vpop.permute.xlu1 %7007 }
0x4356   :  { %12480 = vmatprep.mubr.msk.f32.mxu1 %vm523_vm5, %v7008_v53 }
0x4357   :  { %v7010_v24 = vpop.permute.xlu0 %7009 }
0x4358   :  { %12481 = vmatmul.mubr.msk.f32.gmra.mrb[182].mxu1 %vm523_vm5, %v7010_v24 }
0x435e   :  { %v7012_v60 = vpop.permute.xlu1 %7011 }
0x435f   :  { %12483 = vmatprep.mubr.msk.f32.mxu1 %vm523_vm5, %v7012_v60 }
0x4360   :  { %v7014_v40 = vpop.permute.xlu0 %7013 }
0x4361   :  { %12484 = vmatmul.mubr.msk.f32.gmra.mrb[184].mxu1 %vm523_vm5, %v7014_v40 }
0x4362   :  { %12490 = vmatprep.mubr.msk.bf16.mxu1 %vm14009_vm1, %v19260_v29 }
0x441c   :  { %v12479_v47 = vpop.f32.mrb[180].mxu1 }
0x441d   :  { %v7129_v34 = vadd.f32 %v12479_v47, %v17084_v41  ;;  %v7093_v15 = vpop.f32.mrb[181].mxu1 }
0x441e   :  { %v7128_v25 = vadd.f32 %v7093_v15, %v17086_v11 }
0x441f   :  { %7142 = vrot.lane.b32.xlu0 %v7129_v34, %s14014_s8 }
0x4420   :  { %7140 = vrot.lane.b32.xlu1 %v7128_v25, %s14014_s8 }
0x442b   :  { %v12482_v6 = vpop.f32.mrb[182].mxu1 }
0x442c   :  { %v7131_v2 = vadd.f32 %v12482_v6, %v17088_v50  ;;  %v7103_v37 = vpop.f32.mrb[183].mxu1 }
0x442d   :  { %v7130_v30 = vadd.f32 %v7103_v37, %v17090_v32 }
0x442e   :  { %7146 = vrot.lane.b32.xlu0 %v7131_v2, %s14014_s8 }
0x442f   :  { %7144 = vrot.lane.b32.xlu1 %v7130_v30, %s14014_s8 }
0x4434   :  { %v12485_v55 = vpop.f32.mrb[184].mxu1 }
0x4435   :  { %v7133_v62 = vadd.f32 %v12485_v55, %v17092_v19  ;;  %v7113_v61 = vpop.f32.mrb[185].mxu1 }
0x4436   :  { %v7132_v58 = vadd.f32 %v7113_v61, %v17094_v33 }
0x4437   :  { %7150 = vrot.lane.b32.xlu0 %v7133_v62, %s14014_s8 }
0x4438   :  { %7148 = vrot.lane.b32.xlu1 %v7132_v58, %s14014_s8 }
0x4491   :  { %v7143_v51 = vpop.permute.xlu0 %7142 }
0x4492   :  { %v7159_v5 = vsel %vm2893_vm6, %v12479_v47, %v7143_v51  ;;  %v7141_v38 = vpop.permute.xlu1 %7140 }
0x4493   :  { %7171 = vperm.xlu0 %13076, %v7159_v5   ;;  %7205 = vperm.xlu1 %13074, %v7159_v5   ;;  %v7158_v17 = vsel %vm2893_vm6, %v7093_v15, %v7141_v38 }
0x4497   :  { %13077 = vset.pattern.permute.xlu1 %v19240_v45 }
0x4498   :  { %7166 = vperm.xlu1 %13077, %v7158_v17  }
0x449c   :  { %13078 = vset.pattern.permute.xlu1 %v19267_v54 }
0x449d   :  { %7201 = vperm.xlu1 %13078, %v7158_v17  }
0x44a0   :  { %v7147_v23 = vpop.permute.xlu0 %7146 }
0x44a1   :  { %v7161_v31 = vsel %vm2893_vm6, %v12482_v6, %v7147_v23  ;;  %13079 = vset.pattern.permute.xlu1 %v19240_v45  ;;  %v7145_v46 = vpop.permute.xlu1 %7144 }
0x44a2   :  { %v7160_v26 = vsel %vm2893_vm6, %v7103_v37, %v7145_v46  ;;  %7181 = vperm.xlu1 %13079, %v7161_v31  }
0x44a3   :  { %7176 = vperm.xlu0 %13076, %v7160_v26  }
0x44a6   :  { %13080 = vset.pattern.permute.xlu1 %v19267_v54 }
0x44a7   :  { %7213 = vperm.xlu1 %13080, %v7161_v31   ;;  %13081 = vset.pattern.permute.xlu0 %v19267_v54 }
0x44a8   :  { %7209 = vperm.xlu0 %13081, %v7160_v26  }
0x44a9   :  { %v7151_v16 = vpop.permute.xlu0 %7150 }
0x44aa   :  { %v7149_v63 = vpop.permute.xlu1 %7148  ;;  %v7163_v10 = vsel %vm2893_vm6, %v12485_v55, %v7151_v16 }
0x44ab   :  { %v7162_v57 = vsel %vm2893_vm6, %v7113_v61, %v7149_v63  ;;  %13083 = vset.pattern.permute.xlu1 %v19240_v45 }
0x44ac   :  { %13082 = vset.pattern.permute.xlu0 %v19240_v45  ;;  %7186 = vperm.xlu1 %13083, %v7162_v57  }
0x44ad   :  { %7191 = vperm.xlu0 %13082, %v7163_v10  }
0x44b0   :  { %13084 = vset.pattern.permute.xlu1 %v19267_v54 }
0x44b1   :  { %7217 = vperm.xlu1 %13084, %v7162_v57  }
0x44b5   :  { %7221 = vperm.xlu1 %13084, %v7163_v10  }
0x44b9   :  { %13085 = vset.pattern.permute.xlu1 %v19240_v45 }
0x4512   :  { %v7206_v53 = vpop.permute.xlu1 %7205  ;;  %v7172_v24 = vpop.permute.xlu0 %7171 }
0x4513   :  { %v7195_v40 = vmul.f32 0.0, %v7172_v24  ;;  %v7225_v47 = vmul.f32 %v7206_v53, %v16873_v44 }
0x4515   :  { %v7231_v15 = vadd.f32 %v7225_v47, %v7195_v40 }
0x4517   :  { %v7167_v60 = vpop.permute.xlu1 %7166  ;;  %v7237_v37 = vadd.f32 %v7231_v15, %v17260_v9 }
0x4518   :  { %v7194_v25 = vmul.f32 0.0, %v7167_v60 }
0x451c   :  { %v7202_v34 = vpop.permute.xlu1 %7201 }
0x451d   :  { %v7224_v6 = vmul.f32 %v7202_v34, %v16875_v18 }
0x451f   :  { %v7230_v2 = vadd.f32 %v7224_v6, %v7194_v25 }
0x4521   :  { %v7236_v30 = vadd.f32 %v7230_v2, %v17256_v4  ;;  %v7182_v55 = vpop.permute.xlu1 %7181 }
0x4522   :  { %v7177_v62 = vpop.permute.xlu0 %7176  ;;  %v7197_v51 = vmul.f32 0.0, %v7182_v55 }
0x4523   :  { %v7242_v61 = vpack.c.bf16 %v7237_v37, %v7236_v30  ;;  %v7196_v17 = vmul.f32 0.0, %v7177_v62 }
0x4525   :  { %7248 = vrot.lane.b32.xlu0 %v7242_v61, %s14013_s29 }
0x4526   :  { %v7214_v58 = vpop.permute.xlu1 %7213 }
0x4527   :  { %v7227_v5 = vmul.f32 %v7214_v58, %v16880_v13  ;;  %v7210_v38 = vpop.permute.xlu0 %7209 }
0x4528   :  { %v7226_v23 = vmul.f32 %v7210_v38, %v16882_v35  ;;  %v4275_v38 = vadd.f32 %v17151_v20, %v16569_v3 }
0x4529   :  { %v7233_v31 = vadd.f32 %v7227_v5, %v7197_v51 }
0x452a   :  { %v7232_v46 = vadd.f32 %v7226_v23, %v7196_v17 }
0x452b   :  { %v7239_v26 = vadd.f32 %v7233_v31, %v17270_v27  ;;  %v7187_v9 = vpop.permute.xlu1 %7186 }
0x452c   :  { %v7238_v4 = vadd.f32 %v7232_v46, %v17265_v7  ;;  %v7192_v10 = vpop.permute.xlu0 %7191  ;;  %v7198_v53 = vmul.f32 0.0, %v7187_v9 }
0x452d   :  { %v7199_v60 = vmul.f32 0.0, %v7192_v10 }
0x452e   :  { %v7243_v16 = vpack.c.bf16 %v7239_v26, %v7238_v4 }
0x4530   :  { %7250 = vrot.lane.b32.xlu1 %v7243_v16, %s14013_s29  ;;  %v7218_v63 = vpop.permute.xlu1 %7217 }
0x4531   :  { %v7228_v57 = vmul.f32 %v7218_v63, %v16889_v28 }
0x4533   :  { %v7234_v40 = vadd.f32 %v7228_v57, %v7198_v53  ;;  %v4283_v53 = vadd.f32 %v17151_v20, %v16567_v48 }
0x4534   :  { %v7222_v24 = vpop.permute.xlu1 %7221 }
0x4535   :  { %v7229_v47 = vmul.f32 %v7222_v24, %v16887_v21  ;;  %v7240_v15 = vadd.f32 %v7234_v40, %v17274_v14  ;;  %v4267_v14 = vadd.f32 %v17151_v20, %v16559_v12  ;;  %v4278_v12 = vadd.f32 %v17151_v20, %v16573_v36 }
0x4536   :  { %v4286_v24 = vadd.f32 %v17151_v20, %v16571_v52 }
0x4537   :  { %v7235_v34 = vadd.f32 %v7229_v47, %v7199_v60  ;;  %v4331_v37 = vmul.f32 %v4267_v14, %v14178_v22  ;;  %v4334_v46 = vmul.f32 %v4278_v12, %v14178_v22  ;;  %v4335_v60 = vmul.f32 %v4283_v53, %v14178_v22 }
0x4539   :  { %v7241_v27 = vadd.f32 %v7235_v34, %v17278_v59  ;;  %v4270_v59 = vadd.f32 %v17151_v20, %v16563_v42  ;;  %v4333_v42 = vmul.f32 %v4275_v38, %v14178_v22 }
0x453b   :  { %v7244_v25 = vpack.c.bf16 %v7241_v27, %v7240_v15  ;;  %v4332_v61 = vmul.f32 %v4270_v59, %v14178_v22  ;;  %v4336_v27 = vmul.f32 %v4286_v24, %v14178_v22 }
0x453d   :  { %7252 = vrot.lane.b32.xlu0 %v7244_v25, %s14013_s29 }
0x4597   :  { %v7249_v7 = vpop.permute.xlu0 %7248 }
0x4598   :  { %12491 = vmatmul.mubr.msk.bf16.vlgmr.msra.gmra.mrb[188].mxu1 %vm523_vm5, %v7249_v7 }
0x4599   :  { %12494 = vmatprep.mubr.msk.bf16.mxu1 %vm14009_vm1, %v19260_v29 }
0x45a2   :  { %v7251_v6 = vpop.permute.xlu1 %7250 }
0x45a3   :  { %12495 = vmatmul.mubr.msk.bf16.gmra.mrb[192].mxu1 %vm523_vm5, %v7251_v6 }
0x45a4   :  { %12498 = vmatprep.mubr.msk.bf16.mxu1 %vm14009_vm1, %v19260_v29 }
0x45af   :  { %v7253_v2 = vpop.permute.xlu0 %7252 }
0x45b0   :  { %12499 = vmatmul.mubr.msk.bf16.gmra.mrb[196].mxu1 %vm523_vm5, %v7253_v2 }
0x45b1   :  { %12549 = vmatprep.mubr.msk.bf16.mxu1 %vm14009_vm1, %v19260_v29 }
0x466b   :  { %v7297_v30 = vpop.f32.mrb[188].mxu1 }
0x466c   :  { %v7320_v55 = vadd.f32 %v7297_v30, %v4331_v37  ;;  %v12492_v62 = vpop.f32.mrb[189].mxu1 }
0x466d   :  { %v7300_v58 = vpop.f32.mrb[190].mxu1 }
0x466e   :  { %13715 = vtanh.f32 %v7320_v55  ;;  %v7321_v51 = vadd.f32 %v7300_v58, %v4332_v61  ;;  %v12493_v5 = vpop.f32.mrb[191].mxu1 }
0x4670   :  { %13717 = vtanh.f32 %v7321_v51 }
0x4676   :  { %v7305_v17 = vpop.f32.mrb[192].mxu1 }
0x4677   :  { %v7322_v23 = vadd.f32 %v7305_v17, %v4333_v42  ;;  %v12496_v31 = vpop.f32.mrb[193].mxu1 }
0x4678   :  { %v13716_v26 = vpop.eup %13715  ;;  %v7308_v9 = vpop.f32.mrb[194].mxu1 }
0x4679   :  { %13719 = vtanh.f32 %v7322_v23  ;;  %v7323_v4 = vadd.f32 %v7308_v9, %v4334_v46  ;;  %v12497_v16 = vpop.f32.mrb[195].mxu1  ;;  %v7332_v63 = vmul.f32 %v13716_v26, %v14178_v22 }
0x467a   :  { %v13718_v57 = vpop.eup %13717 }
0x467b   :  { %13721 = vtanh.f32 %v7323_v4  ;;  %v17362_v3 = vadd.f32 %v7332_v63, %v14229_v1  ;;  %v7333_v36 = vmul.f32 %v13718_v57, %v14178_v22 }
0x467d   :  { %7356 = vrot.lane.b32.xlu1 %v17362_v3, %s19233_s0  ;;  %v17368_v10 = vadd.f32 %v7333_v36, %v14229_v1  ;;  %v7344_v4 = vmul.f32 %v17362_v3, %v17221_v56 }
0x467f   :  { %7358 = vrot.lane.b32.xlu0 %v17368_v10, %s19233_s0  ;;  %v7345_v57 = vmul.f32 %v17368_v10, %v17226_v0 }
0x4683   :  { %v13720_v40 = vpop.eup %13719  ;;  %v7313_v47 = vpop.f32.mrb[196].mxu1 }
0x4684   :  { %v7324_v34 = vadd.f32 %v7313_v47, %v4335_v60  ;;  %v12500_v15 = vpop.f32.mrb[197].mxu1  ;;  %v7334_v25 = vmul.f32 %v13720_v40, %v14178_v22 }
0x4685   :  { %v13722_v7 = vpop.eup %13721  ;;  %v7316_v6 = vpop.f32.mrb[198].mxu1 }
0x4686   :  { %13723 = vtanh.f32 %v7324_v34  ;;  %v7325_v48 = vadd.f32 %v7316_v6, %v4336_v27  ;;  %v12501_v2 = vpop.f32.mrb[199].mxu1  ;;  %v17380_v14 = vadd.f32 %v7334_v25, %v14229_v1  ;;  %v7335_v52 = vmul.f32 %v13722_v7, %v14178_v22 }
0x4688   :  { %13725 = vtanh.f32 %v7325_v48  ;;  %7360 = vrot.lane.b32.xlu1 %v17380_v14, %s19233_s0  ;;  %v17386_v20 = vadd.f32 %v7335_v52, %v14229_v1  ;;  %v7346_v24 = vmul.f32 %v17380_v14, %v17232_v49 }
0x468a   :  { %7362 = vrot.lane.b32.xlu0 %v17386_v20, %s19233_s0  ;;  %v7347_v47 = vmul.f32 %v17386_v20, %v17238_v8 }
0x4690   :  { %v13724_v59 = vpop.eup %13723 }
0x4691   :  { %v7336_v37 = vmul.f32 %v13724_v59, %v14178_v22 }
0x4692   :  { %v13726_v30 = vpop.eup %13725 }
0x4693   :  { %v17392_v55 = vadd.f32 %v7336_v37, %v14229_v1  ;;  %v7337_v62 = vmul.f32 %v13726_v30, %v14178_v22 }
0x4695   :  { %7364 = vrot.lane.b32.xlu1 %v17392_v55, %s19233_s0  ;;  %v17398_v61 = vadd.f32 %v7337_v62, %v14229_v1  ;;  %v7348_v0 = vmul.f32 %v17392_v55, %v17243_v39 }
0x4697   :  { %7366 = vrot.lane.b32.xlu0 %v17398_v61, %s19233_s0  ;;  %v7349_v8 = vmul.f32 %v17398_v61, %v17248_v43 }
0x46ef   :  { %v7357_v58 = vpop.permute.xlu1 %7356 }
0x46f0   :  { %v7374_v51 = vmul.f32 %v7357_v58, %v17362_v3 }
0x46f1   :  { %v7359_v5 = vpop.permute.xlu0 %7358 }
0x46f2   :  { %v7375_v38 = vmul.f32 %v7359_v5, %v17368_v10  ;;  %7386 = vrot.lane.b32.xlu1 %v7374_v51, %s14013_s29 }
0x46f4   :  { %7388 = vrot.lane.b32.xlu0 %v7375_v38, %s14013_s29  ;;  %v7699_v38 = vld [vmem:[%s19146_s12] sm:$0xff] }
0x46fa   :  { %v7361_v12 = vpop.permute.xlu1 %7360 }
0x46fb   :  { %v7376_v42 = vmul.f32 %v7361_v12, %v17380_v14 }
0x46fc   :  { %v7363_v17 = vpop.permute.xlu0 %7362 }
0x46fd   :  { %v7377_v23 = vmul.f32 %v7363_v17, %v17386_v20  ;;  %7390 = vrot.lane.b32.xlu1 %v7376_v42, %s14013_s29  ;;  %v7701_v42 = vld [vmem:[%s19146_s12 + $0x10] sm:$0xff]  ;;  %v7702_v17 = vld [vmem:[%s19146_s12 + $0x18] sm:$0xff] }
0x46ff   :  { %7392 = vrot.lane.b32.xlu0 %v7377_v23, %s14013_s29 }
0x4707   :  { %v7365_v31 = vpop.permute.xlu1 %7364 }
0x4708   :  { %v7378_v46 = vmul.f32 %v7365_v31, %v17392_v55  ;;  %v7705_v31 = vmul.f32 %v7701_v42, %v14178_v22 }
0x4709   :  { %v7367_v26 = vpop.permute.xlu0 %7366 }
0x470a   :  { %v7379_v9 = vmul.f32 %v7367_v26, %v17398_v61  ;;  %7394 = vrot.lane.b32.xlu1 %v7378_v46, %s14013_s29  ;;  %v7706_v46 = vmul.f32 %v7702_v17, %v14178_v22 }
0x470c   :  { %7396 = vrot.lane.b32.xlu0 %v7379_v9, %s14013_s29 }
0x4764   :  { %v7387_v16 = vpop.permute.xlu1 %7386 }
0x4765   :  { %v7404_v63 = vadd.f32 %v7387_v16, %v7344_v4  ;;  %v17473_v4 = vpack.c.bf16 %v7706_v46, %v7705_v31 }
0x4766   :  { %v7389_v36 = vpop.permute.xlu0 %7388 }
0x4767   :  { %13727 = vtanh.f32 %v7404_v63  ;;  %v7405_v53 = vadd.f32 %v7389_v36, %v7345_v57 }
0x4769   :  { %13729 = vtanh.f32 %v7405_v53 }
0x476f   :  { %v7391_v60 = vpop.permute.xlu1 %7390 }
0x4770   :  { %v7406_v40 = vadd.f32 %v7391_v60, %v7346_v24 }
0x4771   :  { %v13728_v34 = vpop.eup %13727  ;;  %v7393_v15 = vpop.permute.xlu0 %7392 }
0x4772   :  { %13731 = vtanh.f32 %v7406_v40  ;;  %v7407_v56 = vadd.f32 %v7393_v15, %v7347_v47  ;;  %7422 = vrot.lane.b32.xlu1 %v13728_v34, %s19233_s0 }
0x4773   :  { %v13730_v27 = vpop.eup %13729 }
0x4774   :  { %13733 = vtanh.f32 %v7407_v56  ;;  %7424 = vrot.lane.b32.xlu0 %v13730_v27, %s19233_s0  ;;  %v7718_v56 = vld [vmem:[%s19148_s2] sm:$0xff]  ;;  %v7719_v27 = vld [vmem:[%s19148_s2 + $0x8] sm:$0xff] }
0x477c   :  { %v13732_v25 = vpop.eup %13731  ;;  %v7395_v49 = vpop.permute.xlu1 %7394 }
0x477d   :  { %v7408_v7 = vadd.f32 %v7395_v49, %v7348_v0  ;;  %7426 = vrot.lane.b32.xlu1 %v13732_v25, %s19233_s0  ;;  %v7742_v25 = vpack.c.bf16 %v7719_v27, %v7718_v56  ;;  %v7720_v49 = vld [vmem:[%s19148_s2 + $0x10] sm:$0xff] }
0x477e   :  { %v13734_v6 = vpop.eup %13733  ;;  %v7397_v48 = vpop.permute.xlu0 %7396 }
0x477f   :  { %13735 = vtanh.f32 %v7408_v7  ;;  %v7409_v2 = vadd.f32 %v7397_v48, %v7349_v8  ;;  %7428 = vrot.lane.b32.xlu0 %v13734_v6, %s19233_s0  ;;  %v7721_v7 = vld [vmem:[%s19148_s2 + $0x18] sm:$0xff]  ;;  %v7722_v8 = vld [vmem:[%s19148_s2 + $0x20] sm:$0xff]  ;;  %v7723_v6 = vld [vmem:[%s19148_s2 + $0x28] sm:$0xff] }
0x4781   :  { %13737 = vtanh.f32 %v7409_v2  ;;  %v7743_v2 = vpack.c.bf16 %v7721_v7, %v7720_v49 }
0x4789   :  { %v13736_v52 = vpop.eup %13735 }
0x478a   :  { %7430 = vrot.lane.b32.xlu1 %v13736_v52, %s19233_s0  ;;  %v7744_v52 = vpack.c.bf16 %v7723_v6, %v7722_v8 }
0x478b   :  { %v13738_v59 = vpop.eup %13737 }
0x478c   :  { %7432 = vrot.lane.b32.xlu0 %v13738_v59, %s19233_s0  ;;  %v7724_v59 = vld [vmem:[%s19148_s2 + $0x30] sm:$0xff] }
0x47e4   :  { %v7423_v39 = vpop.permute.xlu1 %7422 }
0x47e5   :  { %v17433_v37 = vmul.f32 %v7423_v39, %v17362_v3  ;;  %v7700_v3 = vld [vmem:[%s19146_s12 + $0x8] sm:$0xff]  ;;  %v7725_v39 = vld [vmem:[%s19148_s2 + $0x38] sm:$0xff] }
0x47e6   :  { %v7425_v30 = vpop.permute.xlu0 %7424  ;;  %v7704_v12 = vmul.f32 %v7700_v3, %v14178_v22 }
0x47e7   :  { %19268 = vst [vmem:[#allocation33_spill] sm:$0xff] %v17433_v37  ;;  %13739 = vtanh.f32 %v17433_v37  ;;  %v17437_v43 = vmul.f32 %v7425_v30, %v17368_v10  ;;  %v7745_v30 = vpack.c.bf16 %v7725_v39, %v7724_v59 }
0x47e9   :  { %19269 = vst [vmem:[#allocation34_spill] sm:$0xff] %v17437_v43  ;;  %13741 = vtanh.f32 %v17437_v43 }
0x47ef   :  { %v7427_v62 = vpop.permute.xlu1 %7426 }
0x47f0   :  { %v17441_v58 = vmul.f32 %v7427_v62, %v17380_v14  ;;  %v7703_v14 = vmul.f32 %v7699_v38, %v14178_v22 }
0x47f1   :  { %v13740_v51 = vpop.eup %13739  ;;  %v7429_v5 = vpop.permute.xlu0 %7428 }
0x47f2   :  { %19270 = vst [vmem:[#allocation35_spill] sm:$0xff] %v17441_v58  ;;  %13743 = vtanh.f32 %v17441_v58  ;;  %v17451_v10 = vmul.f32 %v7429_v5, %v17386_v20  ;;  %7458 = vrot.lane.b32.xlu1 %v13740_v51, %s14013_s29  ;;  %v7697_v20 = vld [vmem:[%s19147_s11] sm:$0xf]  ;;  %v17469_v26 = vpack.c.bf16 %v7704_v12, %v7703_v14 }
0x47f3   :  { %v13742_v23 = vpop.eup %13741  ;;  %v7698_v9 = vpack.c.bf16 %v7697_v20, %v7697_v20 }
0x47f4   :  { %19271 = vst [vmem:[#allocation36_spill] sm:$0xff] %v17451_v10  ;;  %13745 = vtanh.f32 %v17451_v10  ;;  %7460 = vrot.lane.b32.xlu0 %v13742_v23, %s14013_s29  ;;  %12546 = vmatpush3.bf16.msra.mxu1 %v17469_v26 }
0x47f5   :  { %13033 = vmatprep.subr.msk.bf16.mxu0 %vm4060_vm7, %v7698_v9  ;;  %12547 = vmatprep.subr.bf16.mxu1 %v19260_v29 }
0x47f8   :  { %12548 = vmatpush3.bf16.msra.mxu1 %v17473_v4 }
0x47fb   :  { %12550 = vmatmul.mubr.bf16.vlgmr.msra.gmra.mrb[200].mxu1 %v19240_v45 }
0x47fc   :  { %v13744_v16 = vpop.eup %13743  ;;  %v7431_v63 = vpop.permute.xlu1 %7430  ;;  %12553 = vmatprep.mubr.msk.bf16.mxu1 %vm14009_vm1, %v19260_v29 }
0x47fd   :  { %v17478_v57 = vmul.f32 %v7431_v63, %v17392_v55  ;;  %7462 = vrot.lane.b32.xlu1 %v13744_v16, %s14013_s29 }
0x47fe   :  { %v13746_v36 = vpop.eup %13745  ;;  %v7433_v53 = vpop.permute.xlu0 %7432 }
0x47ff   :  { %19272 = vst [vmem:[#allocation37_spill] sm:$0xff] %v17478_v57  ;;  %13747 = vtanh.f32 %v17478_v57  ;;  %v17486_v24 = vmul.f32 %v7433_v53, %v17398_v61  ;;  %7464 = vrot.lane.b32.xlu0 %v13746_v36, %s14013_s29  ;;  %v7797_v61 = vsel %vm4060_vm7, %v7698_v9, 0 }
0x4801   :  { %19273 = vst [vmem:[#allocation38_spill] sm:$0xff] %v17486_v24  ;;  %13749 = vtanh.f32 %v17486_v24 }
0x4803   :  { %12554 = vmatmul.mubr.bf16.gmra.mrb[204].mxu1 %v19240_v45 }
0x4804   :  { %12557 = vmatprep.mubr.msk.bf16.mxu1 %vm14009_vm1, %v19260_v29 }
0x4809   :  { %v13748_v55 = vpop.eup %13747 }
0x480a   :  { %7466 = vrot.lane.b32.xlu1 %v13748_v55, %s14013_s29 }
0x480b   :  { %v13750_v60 = vpop.eup %13749  ;;  %12558 = vmatmul.mubr.bf16.gmra.mrb[208].mxu1 %v19240_v45 }
0x480c   :  { %7468 = vrot.lane.b32.xlu0 %v13750_v60, %s14013_s29 }
0x4864   :  { %v7459_v40 = vpop.permute.xlu1 %7458 }
0x4865   :  { %12510 = vmatprep.mubr.msk.f32.mxu0 %vm523_vm5, %v7459_v40 }
0x4866   :  { %v7461_v47 = vpop.permute.xlu0 %7460 }
0x4867   :  { %12511 = vmatmul.mubr.msk.f32.vlgmr.msra.gmra.mrb[192].mxu0 %vm523_vm5, %v7461_v47 }
0x4868   :  { %12520 = vmatpush3.bf16.msra.mxu0 %v7797_v61 }
0x4869   :  { %12595 = vmatprep.subr.bf16.mxu0 %v19260_v29 }
0x486f   :  { %v7463_v34 = vpop.permute.xlu1 %7462 }
0x4870   :  { %12513 = vmatprep.mubr.msk.f32.mxu0 %vm523_vm5, %v7463_v34 }
0x4871   :  { %v7465_v15 = vpop.permute.xlu0 %7464 }
0x4872   :  { %12514 = vmatmul.mubr.msk.f32.gmra.mrb[194].mxu0 %vm523_vm5, %v7465_v15 }
0x487c   :  { %v7467_v0 = vpop.permute.xlu1 %7466 }
0x487d   :  { %12516 = vmatprep.mubr.msk.f32.mxu0 %vm523_vm5, %v7467_v0 }
0x487e   :  { %v7469_v48 = vpop.permute.xlu0 %7468 }
0x487f   :  { %12517 = vmatmul.mubr.msk.f32.gmra.mrb[196].mxu0 %vm523_vm5, %v7469_v48 }
0x4880   :  { %12521 = vmatprep.mubr.msk.bf16.mxu0 %vm3987_vm8, %v7742_v25 }
0x4883   :  { %12522 = vmatmul.mubr.msk.bf16.vlgmr.msra.gmra.mrb[200].mxu0 %vm3987_vm8, %v7743_v2 }
0x4884   :  { %12525 = vmatprep.mubr.msk.bf16.mxu0 %vm3987_vm8, %v7744_v52  ;;  %12596 = vmatpush3.bf16.msra.mxu0 %v17469_v26 }
0x4885   :  { %12597 = vmatprep.subr.bf16.mxu0 %v19260_v29 }
0x4888   :  { %12598 = vmatpush3.bf16.msra.mxu0 %v17473_v4 }
0x4889   :  { %12645 = vmatprep.subr.bf16.mxu0 %v19260_v29 }
0x488b   :  { %12526 = vmatmul.mubr.msk.bf16.gmra.mrb[204].mxu0 %vm3987_vm8, %v7745_v30 }
0x48ce   :  { %v7986_v62 = vpop.f32.mrb[200].mxu1 }
0x48cf   :  { %v12551_v51 = vpop.f32.mrb[201].mxu1 }
0x48d0   :  { %v7989_v5 = vpop.f32.mrb[202].mxu1 }
0x48d1   :  { %v12552_v38 = vpop.f32.mrb[203].mxu1 }
0x48d6   :  { %v7994_v3 = vpop.f32.mrb[204].mxu1 }
0x48d7   :  { %v12555_v14 = vpop.f32.mrb[205].mxu1 }
0x48d8   :  { %v7997_v12 = vpop.f32.mrb[206].mxu1 }
0x48d9   :  { %v12556_v42 = vpop.f32.mrb[207].mxu1 }
0x48de   :  { %v8002_v17 = vpop.f32.mrb[208].mxu1 }
0x48df   :  { %v12559_v23 = vpop.f32.mrb[209].mxu1 }
0x48e0   :  { %v8005_v20 = vpop.f32.mrb[210].mxu1 }
0x48e1   :  { %v12560_v31 = vpop.f32.mrb[211].mxu1 }
0x493a   :  { %v17536_v46 = vpop.f32.mrb[192].mxu0 }
0x493b   :  { %19274 = vst [vmem:[#allocation39_spill] sm:$0xff] %v17536_v46  ;;  %v17540_v9 = vadd.f32 %v17536_v46, %v17084_v41  ;;  %v17542_v16 = vpop.f32.mrb[193].mxu0 }
0x493c   :  { %19275 = vst [vmem:[#allocation40_spill] sm:$0xff] %v17542_v16  ;;  %v17546_v63 = vadd.f32 %v17542_v16, %v17086_v11 }
0x493e   :  { %19276 = vst [vmem:[#allocation41_spill] sm:$0xff] %v17546_v63 }
0x4945   :  { %v17548_v36 = vpop.f32.mrb[194].mxu0 }
0x4946   :  { %19277 = vst [vmem:[#allocation42_spill] sm:$0xff] %v17548_v36  ;;  %v17552_v53 = vadd.f32 %v17548_v36, %v17088_v50  ;;  %v17554_v55 = vpop.f32.mrb[195].mxu0  ;;  %v17575_v50 = vld [vmem:[%s19149_s13] ss:$0 sm:$0xff] }
0x4947   :  { %19279 = vst [vmem:[#allocation44_spill] sm:$0xff] %v17554_v55  ;;  %v17558_v60 = vadd.f32 %v17554_v55, %v17090_v32 }
0x4948   :  { %19278 = vst [vmem:[#allocation43_spill] sm:$0xff] %v17552_v53 }
0x4949   :  { %19280 = vst [vmem:[#allocation45_spill] sm:$0xff] %v17558_v60 }
0x4952   :  { %v17560_v41 = vpop.f32.mrb[196].mxu0 }
0x4953   :  { %19281 = vst [vmem:[#allocation46_spill] sm:$0xff] %v17560_v41  ;;  %v17564_v40 = vadd.f32 %v17560_v41, %v17092_v19  ;;  %v17566_v11 = vpop.f32.mrb[197].mxu0 }
0x4954   :  { %19283 = vst [vmem:[#allocation48_spill] sm:$0xff] %v17566_v11  ;;  %v17570_v61 = vadd.f32 %v17566_v11, %v17094_v33 }
0x4955   :  { %19282 = vst [vmem:[#allocation47_spill] sm:$0xff] %v17564_v40 }
0x4956   :  { %19284 = vst [vmem:[#allocation49_spill] sm:$0xff] %v17570_v61  ;;  %v12523_v47 = vpop.f32.mrb[200].mxu0 }
0x4957   :  { %v7842_v32 = vadd.f32 %v12523_v47, %v17575_v50  ;;  %v7833_v34 = vpop.f32.mrb[201].mxu0 }
0x4958   :  { %v7834_v15 = vadd.f32 %v17575_v50, %v7833_v34  ;;  %v12524_v56 = vpop.f32.mrb[202].mxu0 }
0x4959   :  { %v7845_v19 = vadd.f32 %v12524_v56, %v17575_v50  ;;  %v7836_v27 = vpop.f32.mrb[203].mxu0  ;;  %v7930_v0 = vmul.f32 %v7842_v32, %v14178_v22 }
0x495a   :  { %v7928_v33 = vmul.f32 %v7834_v15, %v14178_v22  ;;  %v7837_v25 = vadd.f32 %v17575_v50, %v7836_v27 }
0x495b   :  { %v8011_v49 = vadd.f32 %v7994_v3, %v7930_v0  ;;  %v7931_v7 = vmul.f32 %v7845_v19, %v14178_v22 }
0x495c   :  { %v8009_v8 = vadd.f32 %v7986_v62, %v7928_v33  ;;  %v7929_v6 = vmul.f32 %v7837_v25, %v14178_v22 }
0x495d   :  { %13751 = vtanh.f32 %v8011_v49  ;;  %v8012_v48 = vadd.f32 %v7997_v12, %v7931_v7 }
0x495e   :  { %13753 = vtanh.f32 %v8009_v8  ;;  %v8010_v2 = vadd.f32 %v7989_v5, %v7929_v6  ;;  %v17585_v52 = vpop.f32.mrb[204].mxu0 }
0x495f   :  { %13755 = vtanh.f32 %v8012_v48  ;;  %v7849_v59 = vpop.f32.mrb[205].mxu0  ;;  %v7858_v28 = vadd.f32 %v17585_v52, %v17575_v50 }
0x4960   :  { %13757 = vtanh.f32 %v8010_v2  ;;  %v7850_v39 = vadd.f32 %v17575_v50, %v7849_v59  ;;  %v17588_v30 = vpop.f32.mrb[206].mxu0 }
0x4961   :  { %v7852_v51 = vpop.f32.mrb[207].mxu0  ;;  %v7861_v37 = vadd.f32 %v17588_v30, %v17575_v50  ;;  %v7934_v35 = vmul.f32 %v7858_v28, %v14178_v22 }
0x4962   :  { %v7853_v38 = vadd.f32 %v17575_v50, %v7852_v51  ;;  %v7932_v62 = vmul.f32 %v7850_v39, %v14178_v22 }
0x4963   :  { %v7935_v10 = vmul.f32 %v7861_v37, %v14178_v22 }
0x4964   :  { %v8013_v3 = vadd.f32 %v8002_v17, %v7932_v62  ;;  %v7933_v14 = vmul.f32 %v7853_v38, %v14178_v22 }
0x4966   :  { %13759 = vtanh.f32 %v8013_v3  ;;  %v8014_v12 = vadd.f32 %v8005_v20, %v7933_v14 }
0x4967   :  { %v13752_v5 = vpop.eup %13751 }
0x4968   :  { %v13754_v42 = vpop.eup %13753  ;;  %13761 = vtanh.f32 %v8014_v12  ;;  %v8023_v15 = vmul.f32 %v13752_v5, %v14178_v22 }
0x4969   :  { %v13756_v23 = vpop.eup %13755  ;;  %v8021_v31 = vmul.f32 %v13754_v42, %v14178_v22 }
0x496a   :  { %v13758_v47 = vpop.eup %13757  ;;  %v8024_v20 = vmul.f32 %v13756_v23, %v14178_v22  ;;  %v17608_v56 = vadd.f32 %v8023_v15, %v14229_v1 }
0x496b   :  { %v17595_v32 = vadd.f32 %v8021_v31, %v14229_v1  ;;  %v8022_v34 = vmul.f32 %v13758_v47, %v14178_v22 }
0x496c   :  { %v17613_v27 = vadd.f32 %v8024_v20, %v14229_v1  ;;  %v8035_v15 = vmul.f32 0.0, %v17608_v56 }
0x496d   :  { %8045 = vrot.lane.b32.xlu1 %v17595_v32, %s19233_s0  ;;  %v17602_v17 = vadd.f32 %v8022_v34, %v14229_v1  ;;  %v8033_v5 = vmul.f32 0.0, %v17595_v32 }
0x496f   :  { %8047 = vrot.lane.b32.xlu0 %v17602_v17, %s19233_s0  ;;  %v8034_v31 = vmul.f32 0.0, %v17602_v17 }
0x4970   :  { %v13760_v19 = vpop.eup %13759 }
0x4971   :  { %8049 = vrot.lane.b32.xlu1 %v17608_v56, %s19233_s0  ;;  %v8025_v0 = vmul.f32 %v13760_v19, %v14178_v22 }
0x4972   :  { %v13762_v33 = vpop.eup %13761 }
0x4973   :  { %8051 = vrot.lane.b32.xlu0 %v17613_v27, %s19233_s0  ;;  %v17619_v25 = vadd.f32 %v8025_v0, %v14229_v1  ;;  %v8026_v49 = vmul.f32 %v13762_v33, %v14178_v22  ;;  %v8036_v0 = vmul.f32 0.0, %v17613_v27 }
0x4975   :  { %8053 = vrot.lane.b32.xlu1 %v17619_v25, %s19233_s0  ;;  %v17625_v7 = vadd.f32 %v8026_v49, %v14229_v1 }
0x4977   :  { %8055 = vrot.lane.b32.xlu0 %v17625_v7, %s19233_s0 }
0x49df   :  { %v8046_v8 = vpop.permute.xlu1 %8045 }
0x49e0   :  { %v8063_v6 = vmul.f32 %v8046_v8, %v17595_v32  ;;  %v8037_v8 = vmul.f32 0.0, %v17619_v25 }
0x49e1   :  { %v8048_v48 = vpop.permute.xlu0 %8047 }
0x49e2   :  { %v8064_v2 = vmul.f32 %v8048_v48, %v17602_v17  ;;  %8075 = vrot.lane.b32.xlu1 %v8063_v6, %s14013_s29 }
0x49e3   :  { %v8050_v59 = vpop.permute.xlu1 %8049 }
0x49e4   :  { %v8065_v39 = vmul.f32 %v8050_v59, %v17608_v56  ;;  %8077 = vrot.lane.b32.xlu0 %v8064_v2, %s14013_s29  ;;  %v8038_v2 = vmul.f32 0.0, %v17625_v7 }
0x49e5   :  { %v8052_v51 = vpop.permute.xlu0 %8051 }
0x49e6   :  { %v8066_v38 = vmul.f32 %v8052_v51, %v17613_v27  ;;  %8079 = vrot.lane.b32.xlu1 %v8065_v39, %s14013_s29 }
0x49e7   :  { %v8054_v62 = vpop.permute.xlu1 %8053 }
0x49e8   :  { %v8067_v3 = vmul.f32 %v8054_v62, %v17619_v25  ;;  %8081 = vrot.lane.b32.xlu0 %v8066_v38, %s14013_s29 }
0x49e9   :  { %v8056_v14 = vpop.permute.xlu0 %8055 }
0x49ea   :  { %v8068_v12 = vmul.f32 %v8056_v14, %v17625_v7  ;;  %8083 = vrot.lane.b32.xlu1 %v8067_v3, %s14013_s29 }
0x49ec   :  { %8085 = vrot.lane.b32.xlu0 %v8068_v12, %s14013_s29 }
0x4a54   :  { %v8076_v42 = vpop.permute.xlu1 %8075 }
0x4a55   :  { %v17642_v23 = vadd.f32 %v8076_v42, %v8033_v5  ;;  %v7710_v5 = vld [vmem:[%s19150_s14] sm:$0xff]  ;;  %v7711_v42 = vld [vmem:[%s19150_s14 + $0x8] sm:$0xff] }
0x4a56   :  { %v8078_v47 = vpop.permute.xlu0 %8077 }
0x4a57   :  { %13763 = vtanh.f32 %v17642_v23  ;;  %v17646_v34 = vadd.f32 %v8078_v47, %v8034_v31  ;;  %v7712_v31 = vld [vmem:[%s19150_s14 + $0x10] sm:$0xff]  ;;  %v17680_v47 = vpack.c.bf16 %v7711_v42, %v7710_v5 }
0x4a58   :  { %v8080_v20 = vpop.permute.xlu1 %8079 }
0x4a59   :  { %13765 = vtanh.f32 %v17646_v34  ;;  %v17650_v19 = vadd.f32 %v8080_v20, %v8035_v15  ;;  %v7713_v15 = vld [vmem:[%s19150_s14 + $0x18] sm:$0xff]  ;;  %12941 = vmatprep.subr.bf16.mxu1 %v17680_v47 }
0x4a5a   :  { %v8082_v33 = vpop.permute.xlu0 %8081  ;;  %v17685_v20 = vpack.c.bf16 %v7713_v15, %v7712_v31  ;;  %12943 = vmatpush3.bf16.msra.mxu1 %v17680_v47 }
0x4a5b   :  { %13767 = vtanh.f32 %v17650_v19  ;;  %v17654_v49 = vadd.f32 %v8082_v33, %v8036_v0 }
0x4a5c   :  { %v8084_v6 = vpop.permute.xlu1 %8083  ;;  %12945 = vmatprep.subr.bf16.mxu1 %v17685_v20 }
0x4a5d   :  { %13769 = vtanh.f32 %v17654_v49  ;;  %v17658_v48 = vadd.f32 %v8084_v6, %v8037_v8 }
0x4a5e   :  { %v8086_v59 = vpop.permute.xlu0 %8085  ;;  %12947 = vmatpush3.bf16.msra.mxu1 %v17685_v20 }
0x4a5f   :  { %13771 = vtanh.f32 %v17658_v48  ;;  %v17662_v39 = vadd.f32 %v8086_v59, %v8038_v2 }
0x4a61   :  { %v13764_v51 = vpop.eup %13763  ;;  %13773 = vtanh.f32 %v17662_v39 }
0x4a62   :  { %8111 = vrot.lane.b32.xlu1 %v13764_v51, %s19233_s0 }
0x4a63   :  { %v13766_v38 = vpop.eup %13765 }
0x4a64   :  { %8113 = vrot.lane.b32.xlu0 %v13766_v38, %s19233_s0 }
0x4a65   :  { %v13768_v62 = vpop.eup %13767 }
0x4a66   :  { %8115 = vrot.lane.b32.xlu1 %v13768_v62, %s19233_s0 }
0x4a67   :  { %v13770_v3 = vpop.eup %13769 }
0x4a68   :  { %8117 = vrot.lane.b32.xlu0 %v13770_v3, %s19233_s0 }
0x4a69   :  { %v13772_v14 = vpop.eup %13771 }
0x4a6a   :  { %8119 = vrot.lane.b32.xlu1 %v13772_v14, %s19233_s0 }
0x4a6b   :  { %v13774_v12 = vpop.eup %13773 }
0x4a6c   :  { %8121 = vrot.lane.b32.xlu0 %v13774_v12, %s19233_s0 }
0x4ad4   :  { %v8112_v0 = vpop.permute.xlu1 %8111 }
0x4ad5   :  { %v17692_v33 = vmul.f32 %v8112_v0, %v17595_v32 }
0x4ad6   :  { %v8114_v8 = vpop.permute.xlu0 %8113 }
0x4ad7   :  { %13775 = vtanh.f32 %v17692_v33  ;;  %v17696_v6 = vmul.f32 %v8114_v8, %v17602_v17 }
0x4ad8   :  { %v8116_v2 = vpop.permute.xlu1 %8115 }
0x4ad9   :  { %13777 = vtanh.f32 %v17696_v6  ;;  %v17700_v59 = vmul.f32 %v8116_v2, %v17608_v56 }
0x4ada   :  { %v8118_v51 = vpop.permute.xlu0 %8117 }
0x4adb   :  { %13779 = vtanh.f32 %v17700_v59  ;;  %v17704_v38 = vmul.f32 %v8118_v51, %v17613_v27 }
0x4adc   :  { %v8120_v32 = vpop.permute.xlu1 %8119 }
0x4add   :  { %13781 = vtanh.f32 %v17704_v38  ;;  %v17708_v62 = vmul.f32 %v8120_v32, %v17619_v25 }
0x4ade   :  { %v8122_v17 = vpop.permute.xlu0 %8121 }
0x4adf   :  { %13783 = vtanh.f32 %v17708_v62  ;;  %v17712_v3 = vmul.f32 %v8122_v17, %v17625_v7 }
0x4ae1   :  { %v13776_v56 = vpop.eup %13775  ;;  %13785 = vtanh.f32 %v17712_v3 }
0x4ae2   :  { %8147 = vrot.lane.b32.xlu1 %v13776_v56, %s14013_s29 }
0x4ae3   :  { %v13778_v14 = vpop.eup %13777 }
0x4ae4   :  { %8149 = vrot.lane.b32.xlu0 %v13778_v14, %s14013_s29 }
0x4ae5   :  { %v13780_v27 = vpop.eup %13779 }
0x4ae6   :  { %8151 = vrot.lane.b32.xlu1 %v13780_v27, %s14013_s29  ;;  %v7726_v27 = vld [vmem:[%s19148_s2 + $0x40] sm:$0xff] }
0x4ae7   :  { %v13782_v12 = vpop.eup %13781 }
0x4ae8   :  { %8153 = vrot.lane.b32.xlu0 %v13782_v12, %s14013_s29  ;;  %v7727_v12 = vld [vmem:[%s19148_s2 + $0x48] sm:$0xff] }
0x4ae9   :  { %v13784_v25 = vpop.eup %13783 }
0x4aea   :  { %8155 = vrot.lane.b32.xlu1 %v13784_v25, %s14013_s29  ;;  %v7728_v25 = vld [vmem:[%s19148_s2 + $0x50] sm:$0xff] }
0x4aeb   :  { %v13786_v5 = vpop.eup %13785 }
0x4aec   :  { %8157 = vrot.lane.b32.xlu0 %v13786_v5, %s14013_s29  ;;  %v7746_v5 = vpack.c.bf16 %v7727_v12, %v7726_v27  ;;  %v7737_v27 = vld [vmem:[%s19148_s2 + $0x98] sm:$0xff]  ;;  %v7738_v12 = vld [vmem:[%s19148_s2 + $0xa0] sm:$0xff] }
0x4aee   :  { %12529 = vmatprep.mubr.msk.bf16.mxu0 %vm3987_vm8, %v7746_v5 }
0x4b54   :  { %v8148_v7 = vpop.permute.xlu1 %8147 }
0x4b55   :  { %12569 = vmatprep.mubr.msk.f32.mxu1 %vm523_vm5, %v8148_v7  ;;  %v7729_v7 = vld [vmem:[%s19148_s2 + $0x58] sm:$0xff] }
0x4b56   :  { %v8150_v42 = vpop.permute.xlu0 %8149 }
0x4b57   :  { %12570 = vmatmul.mubr.msk.f32.vlgmr.msra.gmra.mrb[186].mxu1 %vm523_vm5, %v8150_v42  ;;  %v7730_v42 = vld [vmem:[%s19148_s2 + $0x60] sm:$0xff] }
0x4b58   :  { %v8152_v31 = vpop.permute.xlu1 %8151 }
0x4b59   :  { %12572 = vmatprep.mubr.msk.f32.mxu1 %vm523_vm5, %v8152_v31  ;;  %v7731_v31 = vld [vmem:[%s19148_s2 + $0x68] sm:$0xff] }
0x4b5a   :  { %v8154_v15 = vpop.permute.xlu0 %8153 }
0x4b5b   :  { %12573 = vmatmul.mubr.msk.f32.gmra.mrb[212].mxu1 %vm523_vm5, %v8154_v15  ;;  %v7747_v15 = vpack.c.bf16 %v7729_v7, %v7728_v25  ;;  %v7739_v25 = vld [vmem:[%s19148_s2 + $0xa8] sm:$0xff] }
0x4b5c   :  { %v8156_v0 = vpop.permute.xlu1 %8155  ;;  %v7752_v7 = vpack.c.bf16 %v7739_v25, %v7738_v12 }
0x4b5d   :  { %12575 = vmatprep.mubr.msk.f32.mxu1 %vm523_vm5, %v8156_v0  ;;  %v7748_v0 = vpack.c.bf16 %v7731_v31, %v7730_v42  ;;  %12530 = vmatmul.mubr.msk.bf16.gmra.mrb[208].mxu0 %vm3987_vm8, %v7747_v15  ;;  %v7740_v42 = vld [vmem:[%s19148_s2 + $0xb0] sm:$0xff]  ;;  %v7741_v31 = vld [vmem:[%s19148_s2 + $0xb8] sm:$0xff] }
0x4b5e   :  { %v8158_v8 = vpop.permute.xlu0 %8157  ;;  %v7753_v15 = vpack.c.bf16 %v7741_v31, %v7740_v42 }
0x4b5f   :  { %12576 = vmatmul.mubr.msk.f32.gmra.mrb[214].mxu1 %vm523_vm5, %v8158_v8  ;;  %12533 = vmatprep.mubr.msk.bf16.mxu0 %vm3987_vm8, %v7748_v0  ;;  %v7732_v8 = vld [vmem:[%s19148_s2 + $0x70] sm:$0xff] }
0x4c2a   :  { %v12571_v2 = vpop.f32.mrb[186].mxu1 }
0x4c2b   :  { %8273 = vperm.xlu0 %13082, %v12571_v2   ;;  %v8237_v51 = vpop.f32.mrb[187].mxu1  ;;  %v7733_v2 = vld [vmem:[%s19148_s2 + $0x78] sm:$0xff] }
0x4c2c   :  { %8268 = vperm.xlu1 %13085, %v8237_v51   ;;  %v7734_v51 = vld [vmem:[%s19148_s2 + $0x80] sm:$0xff] }
0x4c2e   :  { %v12574_v32 = vpop.f32.mrb[212].mxu1 }
0x4c2f   :  { %8283 = vperm.xlu0 %13082, %v12574_v32   ;;  %v8247_v17 = vpop.f32.mrb[213].mxu1  ;;  %v7735_v32 = vld [vmem:[%s19148_s2 + $0x88] sm:$0xff] }
0x4c30   :  { %8278 = vperm.xlu1 %13085, %v8247_v17   ;;  %v7749_v17 = vpack.c.bf16 %v7733_v2, %v7732_v8 }
0x4c32   :  { %v12577_v56 = vpop.f32.mrb[214].mxu1  ;;  %12534 = vmatmul.mubr.msk.bf16.gmra.mrb[212].mxu0 %vm3987_vm8, %v7749_v17 }
0x4c33   :  { %8293 = vperm.xlu0 %13082, %v12577_v56   ;;  %v8257_v14 = vpop.f32.mrb[215].mxu1  ;;  %v7750_v56 = vpack.c.bf16 %v7735_v32, %v7734_v51 }
0x4c34   :  { %8288 = vperm.xlu1 %13085, %v8257_v14   ;;  %v7736_v14 = vld [vmem:[%s19148_s2 + $0x90] sm:$0xff] }
0x4c35   :  { %12537 = vmatprep.mubr.msk.bf16.mxu0 %vm3987_vm8, %v7750_v56  ;;  %v7751_v5 = vpack.c.bf16 %v7737_v27, %v7736_v14 }
0x4c3a   :  { %12538 = vmatmul.mubr.msk.bf16.gmra.mrb[216].mxu0 %vm3987_vm8, %v7751_v5 }
0x4c3b   :  { %12541 = vmatprep.mubr.msk.bf16.mxu0 %vm3987_vm8, %v7752_v7 }
0x4c42   :  { %12542 = vmatmul.mubr.msk.bf16.gmra.mrb[220].mxu0 %vm3987_vm8, %v7753_v15 }
0x4c43   :  { %12599 = vmatprep.mubr.msk.bf16.mxu0 %vm14009_vm1, %v19260_v29 }
0x4caa   :  { %v8274_v0 = vpop.permute.xlu0 %8273 }
0x4cab   :  { %v8297_v8 = vmul.f32 0.0, %v8274_v0  ;;  %v8269_v2 = vpop.permute.xlu1 %8268 }
0x4cac   :  { %v8296_v51 = vmul.f32 0.0, %v8269_v2 }
0x4cad   :  { %v17786_v32 = vadd.f32 %v8297_v8, %v17696_v6 }
0x4cae   :  { %v17789_v17 = vadd.f32 %v8296_v51, %v17692_v33  ;;  %v8284_v56 = vpop.permute.xlu0 %8283 }
0x4caf   :  { %v8299_v14 = vmul.f32 0.0, %v8284_v56  ;;  %v8279_v27 = vpop.permute.xlu1 %8278 }
0x4cb0   :  { %v8298_v12 = vmul.f32 0.0, %v8279_v27  ;;  %v8439_v25 = vpack.c.bf16 %v17786_v32, %v17789_v17 }
0x4cb1   :  { %v17794_v5 = vadd.f32 %v8299_v14, %v17704_v38  ;;  %v12531_v38 = vpop.f32.mrb[208].mxu0 }
0x4cb2   :  { %v17797_v7 = vadd.f32 %v8298_v12, %v17700_v59  ;;  %v8294_v42 = vpop.permute.xlu0 %8293  ;;  %8445 = vrot.lane.b32.xlu1 %v8439_v25, %s14013_s29  ;;  %v7865_v2 = vpop.f32.mrb[209].mxu0 }
0x4cb3   :  { %v8301_v6 = vmul.f32 0.0, %v8294_v42  ;;  %v8289_v31 = vpop.permute.xlu1 %8288  ;;  %v12532_v51 = vpop.f32.mrb[210].mxu0  ;;  %v7866_v43 = vadd.f32 %v17575_v50, %v7865_v2 }
0x4cb4   :  { %v8300_v33 = vmul.f32 0.0, %v8289_v31  ;;  %v8440_v15 = vpack.c.bf16 %v17794_v5, %v17797_v7  ;;  %v7868_v56 = vpop.f32.mrb[211].mxu0 }
0x4cb5   :  { %v17803_v0 = vadd.f32 %v8301_v6, %v17712_v3  ;;  %v7869_v44 = vadd.f32 %v17575_v50, %v7868_v56  ;;  %v7936_v52 = vmul.f32 %v7866_v43, %v14178_v22 }
0x4cb6   :  { %v17806_v8 = vadd.f32 %v8300_v33, %v17708_v62  ;;  %8447 = vrot.lane.b32.xlu0 %v8440_v15, %s14013_s29 }
0x4cb7   :  { %v7937_v28 = vmul.f32 %v7869_v44, %v14178_v22 }
0x4cb8   :  { %v8441_v59 = vpack.c.bf16 %v17803_v0, %v17806_v8 }
0x4cba   :  { %8449 = vrot.lane.b32.xlu1 %v8441_v59, %s14013_s29 }
0x4d05   :  { %v17812_v14 = vpop.f32.mrb[212].mxu0 }
0x4d06   :  { %v17814_v27 = vpop.f32.mrb[213].mxu0 }
0x4d07   :  { %v17816_v3 = vpop.f32.mrb[214].mxu0 }
0x4d08   :  { %v17818_v12 = vpop.f32.mrb[215].mxu0 }
0x4d0d   :  { %v17820_v62 = vpop.f32.mrb[216].mxu0 }
0x4d0e   :  { %v17822_v25 = vpop.f32.mrb[217].mxu0 }
0x4d0f   :  { %v17824_v42 = vpop.f32.mrb[218].mxu0 }
0x4d10   :  { %v17826_v31 = vpop.f32.mrb[219].mxu0 }
0x4d15   :  { %v17833_v33 = vpop.f32.mrb[220].mxu0 }
0x4d16   :  { %v17835_v15 = vpop.f32.mrb[221].mxu0 }
0x4d17   :  { %v17838_v59 = vpop.f32.mrb[222].mxu0 }
0x4d18   :  { %v17841_v58 = vpop.f32.mrb[223].mxu0 }
0x4d24   :  { %v8446_v6 = vpop.permute.xlu1 %8445 }
0x4d25   :  { %12600 = vmatmul.mubr.msk.bf16.vlgmr.msra.gmra.mrb[224].mxu0 %vm523_vm5, %v8446_v6 }
0x4d26   :  { %12603 = vmatprep.mubr.msk.bf16.mxu0 %vm14009_vm1, %v19260_v29  ;;  %12646 = vmatpush3.bf16.msra.mxu0 %v17469_v26 }
0x4d27   :  { %12647 = vmatprep.subr.bf16.mxu0 %v19260_v29 }
0x4d28   :  { %v8448_v57 = vpop.permute.xlu0 %8447 }
0x4d2a   :  { %12648 = vmatpush3.bf16.msra.mxu0 %v17473_v4 }
0x4d2b   :  { %12695 = vmatprep.subr.bf16.mxu0 %v19260_v29 }
0x4d2c   :  { %v8450_v6 = vpop.permute.xlu1 %8449 }
0x4d2d   :  { %12604 = vmatmul.mubr.msk.bf16.gmra.mrb[228].mxu0 %vm523_vm5, %v8448_v57 }
0x4d2e   :  { %12607 = vmatprep.mubr.msk.bf16.mxu0 %vm14009_vm1, %v19260_v29 }
0x4d35   :  { %12608 = vmatmul.mubr.msk.bf16.gmra.mrb[232].mxu0 %vm523_vm5, %v8450_v6 }
0x4d36   :  { %12649 = vmatprep.mubr.msk.bf16.mxu0 %vm14009_vm1, %v19260_v29 }
0x4df8   :  { %v8494_v18 = vpop.f32.mrb[224].mxu0 }
0x4df9   :  { %v8517_v24 = vadd.f32 %v8494_v18, %v7934_v35  ;;  %v12601_v57 = vpop.f32.mrb[225].mxu0  ;;  %v7874_v35 = vadd.f32 %v12531_v38, %v17575_v50 }
0x4dfa   :  { %v8497_v21 = vpop.f32.mrb[226].mxu0 }
0x4dfb   :  { %13787 = vtanh.f32 %v8517_v24  ;;  %v8518_v6 = vadd.f32 %v8497_v21, %v7935_v10  ;;  %v12602_v13 = vpop.f32.mrb[227].mxu0  ;;  %v7877_v21 = vadd.f32 %v12532_v51, %v17575_v50  ;;  %v7938_v43 = vmul.f32 %v7874_v35, %v14178_v22 }
0x4dfd   :  { %13789 = vtanh.f32 %v8518_v6  ;;  %v7939_v56 = vmul.f32 %v7877_v21, %v14178_v22 }
0x4e00   :  { %v8502_v41 = vpop.f32.mrb[228].mxu0 }
0x4e01   :  { %v8519_v30 = vadd.f32 %v8502_v41, %v7936_v52  ;;  %v12605_v11 = vpop.f32.mrb[229].mxu0 }
0x4e02   :  { %v8505_v18 = vpop.f32.mrb[230].mxu0 }
0x4e03   :  { %13791 = vtanh.f32 %v8519_v30  ;;  %v8520_v37 = vadd.f32 %v8505_v18, %v7937_v28  ;;  %v12606_v57 = vpop.f32.mrb[231].mxu0 }
0x4e05   :  { %v13788_v2 = vpop.eup %13787  ;;  %13793 = vtanh.f32 %v8520_v37 }
0x4e06   :  { %v8529_v13 = vmul.f32 %v13788_v2, %v14178_v22 }
0x4e07   :  { %v13790_v10 = vpop.eup %13789 }
0x4e08   :  { %v8510_v24 = vpop.f32.mrb[232].mxu0  ;;  %v17864_v41 = vadd.f32 %v8529_v13, %v14229_v1  ;;  %v8530_v44 = vmul.f32 %v13790_v10, %v14178_v22 }
0x4e09   :  { %v8521_v11 = vadd.f32 %v8510_v24, %v7938_v43  ;;  %v12609_v38 = vpop.f32.mrb[233].mxu0 }
0x4e0a   :  { %8553 = vrot.lane.b32.xlu0 %v17864_v41, %s19233_s0  ;;  %v8513_v50 = vpop.f32.mrb[234].mxu0  ;;  %v17871_v51 = vadd.f32 %v8530_v44, %v14229_v1 }
0x4e0b   :  { %13795 = vtanh.f32 %v8521_v11  ;;  %v8522_v6 = vadd.f32 %v8513_v50, %v7939_v56  ;;  %v12610_v52 = vpop.f32.mrb[235].mxu0 }
0x4e0c   :  { %8555 = vrot.lane.b32.xlu1 %v17871_v51, %s19233_s0 }
0x4e0d   :  { %v13792_v30 = vpop.eup %13791  ;;  %13797 = vtanh.f32 %v8522_v6 }
0x4e0e   :  { %v8531_v28 = vmul.f32 %v13792_v30, %v14178_v22 }
0x4e0f   :  { %v13794_v18 = vpop.eup %13793 }
0x4e10   :  { %v17877_v35 = vadd.f32 %v8531_v28, %v14229_v1  ;;  %v8532_v37 = vmul.f32 %v13794_v18, %v14178_v22 }
0x4e12   :  { %8557 = vrot.lane.b32.xlu0 %v17877_v35, %s19233_s0  ;;  %v17883_v57 = vadd.f32 %v8532_v37, %v14229_v1 }
0x4e14   :  { %8559 = vrot.lane.b32.xlu1 %v17883_v57, %s19233_s0 }
0x4e15   :  { %v13796_v2 = vpop.eup %13795 }
0x4e16   :  { %v8533_v21 = vmul.f32 %v13796_v2, %v14178_v22 }
0x4e17   :  { %v13798_v13 = vpop.eup %13797 }
0x4e18   :  { %v17889_v10 = vadd.f32 %v8533_v21, %v14229_v1  ;;  %v8534_v43 = vmul.f32 %v13798_v13, %v14178_v22  ;;  %v8541_v21 = vmul.f32 %v17864_v41, %v17642_v23  ;;  %v8544_v23 = vmul.f32 %v17883_v57, %v17654_v49 }
0x4e1a   :  { %8561 = vrot.lane.b32.xlu0 %v17889_v10, %s19233_s0  ;;  %v17895_v24 = vadd.f32 %v8534_v43, %v14229_v1 }
0x4e1c   :  { %8563 = vrot.lane.b32.xlu1 %v17895_v24, %s19233_s0 }
0x4e7c   :  { %v8554_v44 = vpop.permute.xlu0 %8553 }
0x4e7d   :  { %v8571_v11 = vmul.f32 %v8554_v44, %v17864_v41  ;;  %v8542_v44 = vmul.f32 %v17871_v51, %v17646_v34 }
0x4e7e   :  { %v8556_v38 = vpop.permute.xlu1 %8555 }
0x4e7f   :  { %v8572_v56 = vmul.f32 %v8556_v38, %v17871_v51  ;;  %8583 = vrot.lane.b32.xlu0 %v8571_v11, %s14013_s29 }
0x4e81   :  { %8585 = vrot.lane.b32.xlu1 %v8572_v56, %s14013_s29  ;;  %v8543_v56 = vmul.f32 %v17877_v35, %v17650_v19 }
0x4e84   :  { %v8558_v50 = vpop.permute.xlu0 %8557 }
0x4e85   :  { %v8573_v6 = vmul.f32 %v8558_v50, %v17877_v35 }
0x4e86   :  { %v8560_v52 = vpop.permute.xlu1 %8559 }
0x4e87   :  { %v8574_v30 = vmul.f32 %v8560_v52, %v17883_v57  ;;  %8587 = vrot.lane.b32.xlu0 %v8573_v6, %s14013_s29 }
0x4e89   :  { %8589 = vrot.lane.b32.xlu1 %v8574_v30, %s14013_s29  ;;  %v7714_v30 = vld [vmem:[%s19150_s14 + $0x20] sm:$0xff] }
0x4e8c   :  { %v8562_v28 = vpop.permute.xlu0 %8561 }
0x4e8d   :  { %v8575_v18 = vmul.f32 %v8562_v28, %v17889_v10  ;;  %v7715_v28 = vld [vmem:[%s19150_s14 + $0x28] sm:$0xff] }
0x4e8e   :  { %v8564_v37 = vpop.permute.xlu1 %8563 }
0x4e8f   :  { %v8576_v2 = vmul.f32 %v8564_v37, %v17895_v24  ;;  %8591 = vrot.lane.b32.xlu0 %v8575_v18, %s14013_s29  ;;  %v17937_v18 = vpack.c.bf16 %v7715_v28, %v7714_v30  ;;  %v8545_v37 = vmul.f32 %v17889_v10, %v17658_v48  ;;  %v8546_v48 = vmul.f32 %v17895_v24, %v17662_v39 }
0x4e91   :  { %8593 = vrot.lane.b32.xlu1 %v8576_v2, %s14013_s29  ;;  %12949 = vmatprep.subr.bf16.mxu1 %v17937_v18 }
0x4e92   :  { %12951 = vmatpush3.bf16.msra.mxu1 %v17937_v18 }
0x4ef1   :  { %v8584_v13 = vpop.permute.xlu0 %8583 }
0x4ef2   :  { %v17913_v43 = vadd.f32 %v8584_v13, %v8541_v21  ;;  %v7716_v21 = vld [vmem:[%s19150_s14 + $0x30] sm:$0xff]  ;;  %v7717_v13 = vld [vmem:[%s19150_s14 + $0x38] sm:$0xff] }
0x4ef3   :  { %v8586_v11 = vpop.permute.xlu1 %8585 }
0x4ef4   :  { %13799 = vtanh.f32 %v17913_v43  ;;  %v17918_v38 = vadd.f32 %v8586_v11, %v8542_v44  ;;  %v17955_v11 = vpack.c.bf16 %v7717_v13, %v7716_v21 }
0x4ef6   :  { %13801 = vtanh.f32 %v17918_v38  ;;  %12953 = vmatprep.subr.bf16.mxu1 %v17955_v11 }
0x4ef7   :  { %12955 = vmatpush3.bf16.msra.mxu1 %v17955_v11 }
0x4ef8   :  { %12957 = vmatprep.subr.bf16.mxu1 %v17680_v47 }
0x4ef9   :  { %v8588_v50 = vpop.permute.xlu0 %8587 }
0x4efa   :  { %v17923_v6 = vadd.f32 %v8588_v50, %v8543_v56 }
0x4efb   :  { %v8590_v52 = vpop.permute.xlu1 %8589 }
0x4efc   :  { %13803 = vtanh.f32 %v17923_v6  ;;  %v17928_v34 = vadd.f32 %v8590_v52, %v8544_v23 }
0x4efe   :  { %v13800_v19 = vpop.eup %13799  ;;  %13805 = vtanh.f32 %v17928_v34 }
0x4eff   :  { %8619 = vrot.lane.b32.xlu0 %v13800_v19, %s19233_s0 }
0x4f00   :  { %v13802_v49 = vpop.eup %13801 }
0x4f01   :  { %v8592_v2 = vpop.permute.xlu0 %8591  ;;  %8621 = vrot.lane.b32.xlu1 %v13802_v49, %s19233_s0 }
0x4f02   :  { %v17951_v44 = vadd.f32 %v8592_v2, %v8545_v37 }
0x4f03   :  { %v8594_v56 = vpop.permute.xlu1 %8593 }
0x4f04   :  { %13807 = vtanh.f32 %v17951_v44  ;;  %v17958_v50 = vadd.f32 %v8594_v56, %v8546_v48 }
0x4f06   :  { %v13804_v23 = vpop.eup %13803  ;;  %13809 = vtanh.f32 %v17958_v50 }
0x4f07   :  { %8623 = vrot.lane.b32.xlu0 %v13804_v23, %s19233_s0  ;;  %13811 = vtanh.f32 %v17789_v17 }
0x4f08   :  { %v13806_v52 = vpop.eup %13805  ;;  %13813 = vtanh.f32 %v17786_v32 }
0x4f09   :  { %8625 = vrot.lane.b32.xlu1 %v13806_v52, %s19233_s0  ;;  %13815 = vtanh.f32 %v17797_v7 }
0x4f0a   :  { %13817 = vtanh.f32 %v17794_v5 }
0x4f0b   :  { %13819 = vtanh.f32 %v17806_v8 }
0x4f0c   :  { %13821 = vtanh.f32 %v17803_v0 }
0x4f0e   :  { %v13808_v39 = vpop.eup %13807 }
0x4f0f   :  { %8627 = vrot.lane.b32.xlu0 %v13808_v39, %s19233_s0 }
0x4f10   :  { %v13810_v30 = vpop.eup %13809 }
0x4f11   :  { %8629 = vrot.lane.b32.xlu1 %v13810_v30, %s19233_s0  ;;  %v13812_v28 = vpop.eup %13811 }
0x4f12   :  { %v13814_v19 = vpop.eup %13813 }
0x4f13   :  { %8320 = vrot.lane.b32.xlu0 %v13812_v28, %s14013_s29  ;;  %v13816_v49 = vpop.eup %13815 }
0x4f14   :  { %v13818_v37 = vpop.eup %13817 }
0x4f15   :  { %8322 = vrot.lane.b32.xlu1 %v13814_v19, %s14013_s29  ;;  %v13820_v2 = vpop.eup %13819 }
0x4f16   :  { %v13822_v21 = vpop.eup %13821 }
0x4f17   :  { %8324 = vrot.lane.b32.xlu0 %v13816_v49, %s14013_s29 }
0x4f19   :  { %8326 = vrot.lane.b32.xlu1 %v13818_v37, %s14013_s29 }
0x4f1b   :  { %8328 = vrot.lane.b32.xlu0 %v13820_v2, %s14013_s29 }
0x4f1d   :  { %8330 = vrot.lane.b32.xlu1 %v13822_v21, %s14013_s29 }
0x4f71   :  { %v8620_v13 = vpop.permute.xlu0 %8619 }
0x4f72   :  { %v17981_v48 = vmul.f32 %v8620_v13, %v17864_v41 }
0x4f73   :  { %v8622_v56 = vpop.permute.xlu1 %8621 }
0x4f74   :  { %13823 = vtanh.f32 %v17981_v48  ;;  %v17985_v23 = vmul.f32 %v8622_v56, %v17871_v51 }
0x4f76   :  { %13825 = vtanh.f32 %v17985_v23 }
0x4f79   :  { %v8624_v52 = vpop.permute.xlu0 %8623 }
0x4f7a   :  { %v17989_v39 = vmul.f32 %v8624_v52, %v17877_v35 }
0x4f7b   :  { %v8626_v30 = vpop.permute.xlu1 %8625 }
0x4f7c   :  { %13827 = vtanh.f32 %v17989_v39  ;;  %v17993_v28 = vmul.f32 %v8626_v30, %v17883_v57 }
0x4f7e   :  { %v13824_v41 = vpop.eup %13823  ;;  %13829 = vtanh.f32 %v17993_v28 }
0x4f7f   :  { %8655 = vrot.lane.b32.xlu0 %v13824_v41, %s14013_s29 }
0x4f80   :  { %v13826_v19 = vpop.eup %13825 }
0x4f81   :  { %v8628_v51 = vpop.permute.xlu0 %8627  ;;  %8657 = vrot.lane.b32.xlu1 %v13826_v19, %s14013_s29 }
0x4f82   :  { %v17999_v49 = vmul.f32 %v8628_v51, %v17889_v10 }
0x4f83   :  { %v8630_v35 = vpop.permute.xlu1 %8629 }
0x4f84   :  { %13831 = vtanh.f32 %v17999_v49  ;;  %v18003_v37 = vmul.f32 %v8630_v35, %v17895_v24 }
0x4f85   :  { %v8321_v57 = vpop.permute.xlu0 %8320 }
0x4f86   :  { %v13828_v2 = vpop.eup %13827  ;;  %13833 = vtanh.f32 %v18003_v37  ;;  %12586 = vmatprep.mubr.msk.f32.mxu1 %vm523_vm5, %v8321_v57 }
0x4f87   :  { %8659 = vrot.lane.b32.xlu0 %v13828_v2, %s14013_s29  ;;  %v8323_v21 = vpop.permute.xlu1 %8322 }
0x4f88   :  { %v13830_v13 = vpop.eup %13829  ;;  %12587 = vmatmul.mubr.msk.f32.vlgmr.msra.gmra.mrb[216].mxu1 %vm523_vm5, %v8323_v21 }
0x4f89   :  { %v8325_v10 = vpop.permute.xlu0 %8324  ;;  %8661 = vrot.lane.b32.xlu1 %v13830_v13, %s14013_s29  ;;  %12959 = vmatpush3.bf16.msra.mxu1 %v17680_v47 }
0x4f8a   :  { %12589 = vmatprep.mubr.msk.f32.mxu1 %vm523_vm5, %v8325_v10  ;;  %12961 = vmatprep.subr.bf16.mxu1 %v17685_v20 }
0x4f8b   :  { %v8327_v24 = vpop.permute.xlu1 %8326 }
0x4f8c   :  { %12590 = vmatmul.mubr.msk.f32.gmra.mrb[218].mxu1 %vm523_vm5, %v8327_v24 }
0x4f8d   :  { %v8329_v56 = vpop.permute.xlu0 %8328  ;;  %12963 = vmatpush3.bf16.msra.mxu1 %v17685_v20 }
0x4f8e   :  { %v13832_v52 = vpop.eup %13831  ;;  %12592 = vmatprep.mubr.msk.f32.mxu1 %vm523_vm5, %v8329_v56  ;;  %12965 = vmatprep.subr.bf16.mxu1 %v17937_v18 }
0x4f8f   :  { %8663 = vrot.lane.b32.xlu0 %v13832_v52, %s14013_s29  ;;  %v8331_v30 = vpop.permute.xlu1 %8330 }
0x4f90   :  { %v13834_v41 = vpop.eup %13833  ;;  %12593 = vmatmul.mubr.msk.f32.gmra.mrb[220].mxu1 %vm523_vm5, %v8331_v30 }
0x4f91   :  { %8665 = vrot.lane.b32.xlu1 %v13834_v41, %s14013_s29 }
0x4ff1   :  { %v8656_v19 = vpop.permute.xlu0 %8655 }
0x4ff2   :  { %12619 = vmatprep.mubr.msk.f32.mxu1 %vm523_vm5, %v8656_v19 }
0x4ff3   :  { %v8658_v51 = vpop.permute.xlu1 %8657 }
0x4ff4   :  { %12620 = vmatmul.mubr.msk.f32.vlgmr.msra.gmra.mrb[222].mxu1 %vm523_vm5, %v8658_v51 }
0x4ff5   :  { %12967 = vmatpush3.bf16.msra.mxu1 %v17937_v18 }
0x4ff6   :  { %12969 = vmatprep.subr.bf16.mxu1 %v17955_v11 }
0x4ff9   :  { %v8660_v35 = vpop.permute.xlu0 %8659  ;;  %12971 = vmatpush3.bf16.msra.mxu1 %v17955_v11 }
0x4ffa   :  { %12622 = vmatprep.mubr.msk.f32.mxu1 %vm523_vm5, %v8660_v35  ;;  %12973 = vmatprep.subr.bf16.mxu1 %v17680_v47 }
0x4ffb   :  { %v8662_v57 = vpop.permute.xlu1 %8661 }
0x4ffc   :  { %12623 = vmatmul.mubr.msk.f32.gmra.mrb[224].mxu1 %vm523_vm5, %v8662_v57 }
0x5001   :  { %v8664_v2 = vpop.permute.xlu0 %8663 }
0x5002   :  { %12625 = vmatprep.mubr.msk.f32.mxu1 %vm523_vm5, %v8664_v2 }
0x5003   :  { %v8666_v21 = vpop.permute.xlu1 %8665 }
0x5004   :  { %12626 = vmatmul.mubr.msk.f32.gmra.mrb[226].mxu1 %vm523_vm5, %v8666_v21 }
0x505b   :  { %v18030_v13 = vpop.f32.mrb[216].mxu1 }
0x505c   :  { %v18032_v10 = vpop.f32.mrb[217].mxu1 }
0x505f   :  { %v18034_v24 = vpop.f32.mrb[218].mxu1 }
0x5060   :  { %v18036_v56 = vpop.f32.mrb[219].mxu1 }
0x5061   :  { %19285 = vst [vmem:[#allocation50_spill] sm:$0xff] %v18036_v56 }
0x5063   :  { %v18038_v52 = vpop.f32.mrb[220].mxu1 }
0x5064   :  { %v18040_v30 = vpop.f32.mrb[221].mxu1 }
0x5065   :  { %19286 = vst [vmem:[#allocation51_spill] sm:$0xff] %v18040_v30 }
0x50c7   :  { %v12621_v41 = vpop.f32.mrb[222].mxu1 }
0x50c8   :  { %v8781_v19 = vadd.f32 %v12621_v41, %v18030_v13  ;;  %v8745_v51 = vpop.f32.mrb[223].mxu1 }
0x50c9   :  { %v8780_v35 = vadd.f32 %v8745_v51, %v18032_v10 }
0x50ca   :  { %8794 = vrot.lane.b32.xlu1 %v8781_v19, %s14014_s8 }
0x50cb   :  { %8792 = vrot.lane.b32.xlu0 %v8780_v35, %s14014_s8 }
0x50cf   :  { %v12624_v57 = vpop.f32.mrb[224].mxu1 }
0x50d0   :  { %v8783_v2 = vadd.f32 %v12624_v57, %v18034_v24  ;;  %v8755_v21 = vpop.f32.mrb[225].mxu1 }
0x50d1   :  { %v8782_v36 = vadd.f32 %v8755_v21, %v18036_v56 }
0x50d2   :  { %8798 = vrot.lane.b32.xlu1 %v8783_v2, %s14014_s8 }
0x50d3   :  { %8796 = vrot.lane.b32.xlu0 %v8782_v36, %s14014_s8 }
0x50d7   :  { %v12627_v55 = vpop.f32.mrb[226].mxu1 }
0x50d8   :  { %v8785_v46 = vadd.f32 %v12627_v55, %v18038_v52  ;;  %v8765_v16 = vpop.f32.mrb[227].mxu1 }
0x50d9   :  { %v8784_v40 = vadd.f32 %v8765_v16, %v18040_v30 }
0x50da   :  { %8802 = vrot.lane.b32.xlu1 %v8785_v46, %s14014_s8 }
0x50db   :  { %8800 = vrot.lane.b32.xlu0 %v8784_v40, %s14014_s8 }
0x513c   :  { %v8795_v19 = vpop.permute.xlu1 %8794 }
0x513d   :  { %v8811_v35 = vsel %vm2893_vm6, %v12621_v41, %v8795_v19  ;;  %v8793_v61 = vpop.permute.xlu0 %8792 }
0x513e   :  { %v8810_v60 = vsel %vm2893_vm6, %v8745_v51, %v8793_v61  ;;  %8823 = vperm.xlu1 %13085, %v8811_v35  }
0x513f   :  { %8818 = vperm.xlu0 %13082, %v8810_v60  }
0x5142   :  { %13086 = vset.pattern.permute.xlu1 %v19267_v54 }
0x5143   :  { %13087 = vset.pattern.permute.xlu0 %v19267_v54  ;;  %8857 = vperm.xlu1 %13086, %v8811_v35  }
0x5144   :  { %8853 = vperm.xlu0 %13087, %v8810_v60   ;;  %v8799_v36 = vpop.permute.xlu1 %8798 }
0x5145   :  { %v8813_v2 = vsel %vm2893_vm6, %v12624_v57, %v8799_v36  ;;  %v8797_v46 = vpop.permute.xlu0 %8796 }
0x5146   :  { %v8812_v40 = vsel %vm2893_vm6, %v8755_v21, %v8797_v46 }
0x5147   :  { %8865 = vperm.xlu1 %13086, %v8813_v2  }
0x5148   :  { %13088 = vset.pattern.permute.xlu0 %v19240_v45 }
0x5149   :  { %8833 = vperm.xlu0 %13088, %v8813_v2  }
0x514b   :  { %13089 = vset.pattern.permute.xlu1 %v19240_v45 }
0x514c   :  { %8828 = vperm.xlu1 %13089, %v8812_v40   ;;  %v8803_v60 = vpop.permute.xlu1 %8802 }
0x514d   :  { %v8801_v61 = vpop.permute.xlu0 %8800  ;;  %v8815_v51 = vsel %vm2893_vm6, %v12627_v55, %v8803_v60 }
0x514e   :  { %v8814_v41 = vsel %vm2893_vm6, %v8765_v16, %v8801_v61 }
0x514f   :  { %8838 = vperm.xlu0 %13088, %v8814_v41  }
0x5150   :  { %13090 = vset.pattern.permute.xlu1 %v19267_v54 }
0x5151   :  { %8861 = vperm.xlu1 %13090, %v8812_v40  }
0x5153   :  { %13092 = vset.pattern.permute.xlu0 %v19267_v54 }
0x5154   :  { %8869 = vperm.xlu0 %13092, %v8814_v41  }
0x5155   :  { %13091 = vset.pattern.permute.xlu1 %v19240_v45 }
0x5156   :  { %8843 = vperm.xlu1 %13091, %v8815_v51  }
0x515a   :  { %13093 = vset.pattern.permute.xlu1 %v19267_v54 }
0x515b   :  { %8873 = vperm.xlu1 %13093, %v8815_v51  }
0x515f   :  { %13094 = vset.pattern.permute.xlu1 %v19240_v45 }
0x51bd   :  { %v8824_v57 = vpop.permute.xlu1 %8823 }
0x51be   :  { %v8819_v16 = vpop.permute.xlu0 %8818  ;;  %v8847_v19 = vmul.f32 0.0, %v8824_v57 }
0x51bf   :  { %v8846_v2 = vmul.f32 0.0, %v8819_v16 }
0x51c2   :  { %v8858_v21 = vpop.permute.xlu1 %8857 }
0x51c3   :  { %v8877_v35 = vmul.f32 %v8858_v21, %v17786_v32  ;;  %v8854_v36 = vpop.permute.xlu0 %8853 }
0x51c4   :  { %v8876_v46 = vmul.f32 %v8854_v36, %v17789_v17 }
0x51c5   :  { %v8883_v40 = vadd.f32 %v8877_v35, %v8847_v19 }
0x51c6   :  { %v8882_v55 = vadd.f32 %v8876_v46, %v8846_v2  ;;  %v8866_v61 = vpop.permute.xlu1 %8865 }
0x51c7   :  { %v18072_v41 = vadd.f32 %v8883_v40, %v17985_v23  ;;  %v8879_v36 = vmul.f32 %v8866_v61, %v17794_v5 }
0x51c8   :  { %v18075_v60 = vadd.f32 %v8882_v55, %v17981_v48  ;;  %v8834_v51 = vpop.permute.xlu0 %8833 }
0x51c9   :  { %v8849_v21 = vmul.f32 0.0, %v8834_v51 }
0x51ca   :  { %19287 = vst [vmem:[#allocation52_spill] sm:$0xff] %v18075_v60  ;;  %v9025_v53 = vpack.c.bf16 %v18072_v41, %v18075_v60 }
0x51cb   :  { %v8829_v57 = vpop.permute.xlu1 %8828  ;;  %v8885_v35 = vadd.f32 %v8879_v36, %v8849_v21 }
0x51cc   :  { %9031 = vrot.lane.b32.xlu1 %v9025_v53, %s14013_s29  ;;  %v8848_v2 = vmul.f32 0.0, %v8829_v57 }
0x51cd   :  { %v18083_v48 = vadd.f32 %v8885_v35, %v17993_v28 }
0x51ce   :  { %v8839_v16 = vpop.permute.xlu0 %8838 }
0x51cf   :  { %v8850_v61 = vmul.f32 0.0, %v8839_v16 }
0x51d0   :  { %v8862_v19 = vpop.permute.xlu1 %8861 }
0x51d1   :  { %v8878_v23 = vmul.f32 %v8862_v19, %v17797_v7 }
0x51d3   :  { %v8884_v46 = vadd.f32 %v8878_v23, %v8848_v2  ;;  %v8870_v40 = vpop.permute.xlu0 %8869 }
0x51d4   :  { %v8880_v53 = vmul.f32 %v8870_v40, %v17806_v8 }
0x51d5   :  { %v18086_v55 = vadd.f32 %v8884_v46, %v17989_v39  ;;  %v8844_v63 = vpop.permute.xlu1 %8843 }
0x51d6   :  { %v8886_v21 = vadd.f32 %v8880_v53, %v8850_v61  ;;  %v8851_v36 = vmul.f32 0.0, %v8844_v63 }
0x51d7   :  { %v9026_v51 = vpack.c.bf16 %v18083_v48, %v18086_v55 }
0x51d8   :  { %v18094_v28 = vadd.f32 %v8886_v21, %v17999_v49 }
0x51d9   :  { %9033 = vrot.lane.b32.xlu0 %v9026_v51, %s14013_s29 }
0x51da   :  { %v8874_v57 = vpop.permute.xlu1 %8873 }
0x51db   :  { %v8881_v19 = vmul.f32 %v8874_v57, %v17803_v0 }
0x51dd   :  { %v8887_v2 = vadd.f32 %v8881_v19, %v8851_v36 }
0x51df   :  { %v18097_v39 = vadd.f32 %v8887_v2, %v18003_v37 }
0x51e1   :  { %v9027_v35 = vpack.c.bf16 %v18097_v39, %v18094_v28 }
0x51e3   :  { %9035 = vrot.lane.b32.xlu1 %v9027_v35, %s14013_s29 }
0x523e   :  { %v9032_v16 = vpop.permute.xlu1 %9031 }
0x523f   :  { %12650 = vmatmul.mubr.msk.bf16.vlgmr.msra.gmra.mrb[236].mxu0 %vm523_vm5, %v9032_v16 }
0x5240   :  { %12653 = vmatprep.mubr.msk.bf16.mxu0 %vm14009_vm1, %v19260_v29  ;;  %12696 = vmatpush3.bf16.msra.mxu0 %v17469_v26  ;;  %v18117_v26 = vld [vmem:[%s19149_s13] ss:$0 sm:$0xff]  ;;  %s14016_s13 = smov 2  }
0x5241   :  { %12697 = vmatprep.subr.bf16.mxu0 %v19260_v29  ;;  %v7885_v37 = vadd.f32 %v18117_v26, %v17818_v12  ;;  %v7890_v36 = vadd.f32 %v18117_v26, %v17812_v14 }
0x5243   :  { %v7941_v51 = vmul.f32 %v7885_v37, %v14178_v22  ;;  %v7942_v12 = vmul.f32 %v7890_v36, %v14178_v22 }
0x5244   :  { %12698 = vmatpush3.bf16.msra.mxu0 %v17473_v4  ;;  %v7882_v4 = vadd.f32 %v18117_v26, %v17814_v27  ;;  %v7893_v27 = vadd.f32 %v18117_v26, %v17816_v3 }
0x5246   :  { %v7940_v23 = vmul.f32 %v7882_v4, %v14178_v22 }
0x524b   :  { %v9034_v63 = vpop.permute.xlu0 %9033 }
0x524c   :  { %12654 = vmatmul.mubr.msk.bf16.gmra.mrb[240].mxu0 %vm523_vm5, %v9034_v63  ;;  %v7943_v63 = vmul.f32 %v7893_v27, %v14178_v22 }
0x524d   :  { %12657 = vmatprep.mubr.msk.bf16.mxu0 %vm14009_vm1, %v19260_v29 }
0x5255   :  { %v9036_v49 = vpop.permute.xlu1 %9035 }
0x5256   :  { %12658 = vmatmul.mubr.msk.bf16.gmra.mrb[244].mxu0 %vm523_vm5, %v9036_v49 }
0x5257   :  { %12699 = vmatprep.mubr.msk.bf16.mxu0 %vm14009_vm1, %v19260_v29 }
0x5312   :  { %v9080_v46 = vpop.f32.mrb[236].mxu0 }
0x5313   :  { %v9103_v40 = vadd.f32 %v9080_v46, %v7940_v23  ;;  %v12651_v53 = vpop.f32.mrb[237].mxu0 }
0x5314   :  { %v9083_v61 = vpop.f32.mrb[238].mxu0 }
0x5315   :  { %13835 = vtanh.f32 %v9103_v40  ;;  %v9104_v57 = vadd.f32 %v9083_v61, %v7941_v51  ;;  %v12652_v21 = vpop.f32.mrb[239].mxu0  ;;  %v7898_v40 = vadd.f32 %v18117_v26, %v17822_v25  ;;  %v7901_v51 = vadd.f32 %v18117_v26, %v17826_v31 }
0x5317   :  { %13837 = vtanh.f32 %v9104_v57  ;;  %v7944_v61 = vmul.f32 %v7898_v40, %v14178_v22  ;;  %v7945_v25 = vmul.f32 %v7901_v51, %v14178_v22 }
0x531f   :  { %v13836_v19 = vpop.eup %13835  ;;  %v9088_v2 = vpop.f32.mrb[240].mxu0 }
0x5320   :  { %v9105_v35 = vadd.f32 %v9088_v2, %v7942_v12  ;;  %v12655_v16 = vpop.f32.mrb[241].mxu0  ;;  %v9115_v49 = vmul.f32 %v13836_v19, %v14178_v22 }
0x5321   :  { %v13838_v4 = vpop.eup %13837  ;;  %v9091_v37 = vpop.f32.mrb[242].mxu0 }
0x5322   :  { %13839 = vtanh.f32 %v9105_v35  ;;  %v9106_v23 = vadd.f32 %v9091_v37, %v7943_v63  ;;  %v12656_v46 = vpop.f32.mrb[243].mxu0  ;;  %v18133_v14 = vadd.f32 %v9115_v49, %v14229_v1  ;;  %v9116_v3 = vmul.f32 %v13838_v4, %v14178_v22 }
0x5324   :  { %13841 = vtanh.f32 %v9106_v23  ;;  %9139 = vrot.lane.b32.xlu0 %v18133_v14, %s19233_s0  ;;  %v18141_v53 = vadd.f32 %v9116_v3, %v14229_v1 }
0x5326   :  { %9141 = vrot.lane.b32.xlu1 %v18141_v53, %s19233_s0 }
0x5329   :  { %v9096_v57 = vpop.f32.mrb[244].mxu0 }
0x532a   :  { %v9107_v21 = vadd.f32 %v9096_v57, %v7944_v61  ;;  %v12659_v36 = vpop.f32.mrb[245].mxu0 }
0x532b   :  { %v9099_v27 = vpop.f32.mrb[246].mxu0 }
0x532c   :  { %v13840_v12 = vpop.eup %13839  ;;  %13843 = vtanh.f32 %v9107_v21  ;;  %v9108_v19 = vadd.f32 %v9099_v27, %v7945_v25  ;;  %v12660_v2 = vpop.f32.mrb[247].mxu0 }
0x532d   :  { %v9117_v35 = vmul.f32 %v13840_v12, %v14178_v22 }
0x532e   :  { %v13842_v16 = vpop.eup %13841  ;;  %13845 = vtanh.f32 %v9108_v19 }
0x532f   :  { %v18151_v31 = vadd.f32 %v9117_v35, %v14229_v1  ;;  %v9118_v63 = vmul.f32 %v13842_v16, %v14178_v22 }
0x5331   :  { %9143 = vrot.lane.b32.xlu0 %v18151_v31, %s19233_s0  ;;  %v18157_v49 = vadd.f32 %v9118_v63, %v14229_v1  ;;  %v9127_v63 = vmul.f32 %v18133_v14, %v17913_v43 }
0x5333   :  { %9145 = vrot.lane.b32.xlu1 %v18157_v49, %s19233_s0  ;;  %v9130_v43 = vmul.f32 %v18157_v49, %v17928_v34 }
0x5336   :  { %v13844_v4 = vpop.eup %13843 }
0x5337   :  { %v9119_v37 = vmul.f32 %v13844_v4, %v14178_v22 }
0x5338   :  { %v13846_v23 = vpop.eup %13845 }
0x5339   :  { %v18163_v46 = vadd.f32 %v9119_v37, %v14229_v1  ;;  %v9120_v3 = vmul.f32 %v13846_v23, %v14178_v22  ;;  %v9128_v23 = vmul.f32 %v18141_v53, %v17918_v38 }
0x533b   :  { %9147 = vrot.lane.b32.xlu0 %v18163_v46, %s19233_s0  ;;  %v18169_v40 = vadd.f32 %v9120_v3, %v14229_v1 }
0x533d   :  { %9149 = vrot.lane.b32.xlu1 %v18169_v40, %s19233_s0 }
0x5396   :  { %v9140_v51 = vpop.permute.xlu0 %9139 }
0x5397   :  { %v9157_v61 = vmul.f32 %v9140_v51, %v18133_v14 }
0x5398   :  { %v9142_v57 = vpop.permute.xlu1 %9141 }
0x5399   :  { %v9158_v21 = vmul.f32 %v9142_v57, %v18141_v53  ;;  %9169 = vrot.lane.b32.xlu0 %v9157_v61, %s14013_s29  ;;  %v9129_v61 = vmul.f32 %v18151_v31, %v17923_v6  ;;  %v9131_v6 = vmul.f32 %v18163_v46, %v17951_v44 }
0x539b   :  { %9171 = vrot.lane.b32.xlu1 %v9158_v21, %s14013_s29 }
0x53a3   :  { %v9144_v36 = vpop.permute.xlu0 %9143 }
0x53a4   :  { %v9159_v25 = vmul.f32 %v9144_v36, %v18151_v31 }
0x53a5   :  { %v9146_v27 = vpop.permute.xlu1 %9145 }
0x53a6   :  { %v9160_v12 = vmul.f32 %v9146_v27, %v18157_v49  ;;  %9173 = vrot.lane.b32.xlu0 %v9159_v25, %s14013_s29 }
0x53a8   :  { %9175 = vrot.lane.b32.xlu1 %v9160_v12, %s14013_s29 }
0x53ad   :  { %v9148_v19 = vpop.permute.xlu0 %9147 }
0x53ae   :  { %v9161_v2 = vmul.f32 %v9148_v19, %v18163_v46 }
0x53af   :  { %v9150_v35 = vpop.permute.xlu1 %9149 }
0x53b0   :  { %v9162_v16 = vmul.f32 %v9150_v35, %v18169_v40  ;;  %9177 = vrot.lane.b32.xlu0 %v9161_v2, %s14013_s29  ;;  %v9132_v2 = vmul.f32 %v18169_v40, %v17958_v50 }
0x53b2   :  { %9179 = vrot.lane.b32.xlu1 %v9162_v16, %s14013_s29 }
0x540b   :  { %v9170_v4 = vpop.permute.xlu0 %9169 }
0x540c   :  { %v18187_v37 = vadd.f32 %v9170_v4, %v9127_v63 }
0x540d   :  { %v9172_v3 = vpop.permute.xlu1 %9171 }
0x540e   :  { %13847 = vtanh.f32 %v18187_v37  ;;  %v18192_v51 = vadd.f32 %v9172_v3, %v9128_v23 }
0x5410   :  { %13849 = vtanh.f32 %v18192_v51 }
0x5418   :  { %v13848_v57 = vpop.eup %13847  ;;  %v9174_v21 = vpop.permute.xlu0 %9173 }
0x5419   :  { %v18197_v36 = vadd.f32 %v9174_v21, %v9129_v61  ;;  %9205 = vrot.lane.b32.xlu0 %v13848_v57, %s19233_s0 }
0x541a   :  { %v13850_v38 = vpop.eup %13849  ;;  %v9176_v25 = vpop.permute.xlu1 %9175 }
0x541b   :  { %13851 = vtanh.f32 %v18197_v36  ;;  %v18203_v27 = vadd.f32 %v9176_v25, %v9130_v43  ;;  %9207 = vrot.lane.b32.xlu1 %v13850_v38, %s19233_s0 }
0x541d   :  { %13853 = vtanh.f32 %v18203_v27 }
0x5422   :  { %v9178_v12 = vpop.permute.xlu0 %9177 }
0x5423   :  { %v18209_v19 = vadd.f32 %v9178_v12, %v9131_v6 }
0x5424   :  { %v9180_v34 = vpop.permute.xlu1 %9179 }
0x5425   :  { %v13852_v35 = vpop.eup %13851  ;;  %13855 = vtanh.f32 %v18209_v19  ;;  %v18214_v16 = vadd.f32 %v9180_v34, %v9132_v2 }
0x5426   :  { %9209 = vrot.lane.b32.xlu0 %v13852_v35, %s19233_s0 }
0x5427   :  { %v13854_v63 = vpop.eup %13853  ;;  %13857 = vtanh.f32 %v18214_v16 }
0x5428   :  { %9211 = vrot.lane.b32.xlu1 %v13854_v63, %s19233_s0  ;;  %13859 = vtanh.f32 %v18075_v60 }
0x5429   :  { %13861 = vtanh.f32 %v18072_v41 }
0x542a   :  { %13863 = vtanh.f32 %v18086_v55 }
0x542b   :  { %13865 = vtanh.f32 %v18083_v48 }
0x542c   :  { %13867 = vtanh.f32 %v18094_v28 }
0x542d   :  { %13869 = vtanh.f32 %v18097_v39 }
0x542f   :  { %v13856_v44 = vpop.eup %13855 }
0x5430   :  { %9213 = vrot.lane.b32.xlu0 %v13856_v44, %s19233_s0 }
0x5431   :  { %v13858_v50 = vpop.eup %13857 }
0x5432   :  { %9215 = vrot.lane.b32.xlu1 %v13858_v50, %s19233_s0  ;;  %v13860_v4 = vpop.eup %13859 }
0x5433   :  { %v13862_v23 = vpop.eup %13861 }
0x5434   :  { %8906 = vrot.lane.b32.xlu0 %v13860_v4, %s14013_s29  ;;  %v13864_v3 = vpop.eup %13863 }
0x5435   :  { %v13866_v61 = vpop.eup %13865 }
0x5436   :  { %8908 = vrot.lane.b32.xlu1 %v13862_v23, %s14013_s29  ;;  %v13868_v57 = vpop.eup %13867 }
0x5437   :  { %v13870_v21 = vpop.eup %13869 }
0x5438   :  { %8910 = vrot.lane.b32.xlu0 %v13864_v3, %s14013_s29 }
0x543a   :  { %8912 = vrot.lane.b32.xlu1 %v13866_v61, %s14013_s29 }
0x543c   :  { %8914 = vrot.lane.b32.xlu0 %v13868_v57, %s14013_s29 }
0x543e   :  { %8916 = vrot.lane.b32.xlu1 %v13870_v21, %s14013_s29 }
0x548b   :  { %v9206_v43 = vpop.permute.xlu0 %9205 }
0x548c   :  { %v18234_v38 = vmul.f32 %v9206_v43, %v18133_v14 }
0x548d   :  { %v9208_v25 = vpop.permute.xlu1 %9207 }
0x548e   :  { %13871 = vtanh.f32 %v18234_v38  ;;  %v18238_v6 = vmul.f32 %v9208_v25, %v18141_v53 }
0x5490   :  { %13873 = vtanh.f32 %v18238_v6 }
0x5498   :  { %v13872_v12 = vpop.eup %13871  ;;  %v9210_v2 = vpop.permute.xlu0 %9209 }
0x5499   :  { %v18242_v34 = vmul.f32 %v9210_v2, %v18151_v31  ;;  %9241 = vrot.lane.b32.xlu0 %v13872_v12, %s14013_s29 }
0x549a   :  { %v13874_v35 = vpop.eup %13873  ;;  %v9212_v63 = vpop.permute.xlu1 %9211 }
0x549b   :  { %13875 = vtanh.f32 %v18242_v34  ;;  %v18247_v14 = vmul.f32 %v9212_v63, %v18157_v49  ;;  %9243 = vrot.lane.b32.xlu1 %v13874_v35, %s14013_s29 }
0x549d   :  { %13877 = vtanh.f32 %v18247_v14 }
0x54a2   :  { %v9214_v53 = vpop.permute.xlu0 %9213 }
0x54a3   :  { %v18252_v44 = vmul.f32 %v9214_v53, %v18163_v46 }
0x54a4   :  { %v9216_v50 = vpop.permute.xlu1 %9215 }
0x54a5   :  { %v13876_v31 = vpop.eup %13875  ;;  %13879 = vtanh.f32 %v18252_v44  ;;  %v18256_v4 = vmul.f32 %v9216_v50, %v18169_v40 }
0x54a6   :  { %9245 = vrot.lane.b32.xlu0 %v13876_v31, %s14013_s29  ;;  %v8907_v23 = vpop.permute.xlu0 %8906 }
0x54a7   :  { %v13878_v49 = vpop.eup %13877  ;;  %13881 = vtanh.f32 %v18256_v4  ;;  %12636 = vmatprep.mubr.msk.f32.mxu1 %vm523_vm5, %v8907_v23 }
0x54a8   :  { %9247 = vrot.lane.b32.xlu1 %v13878_v49, %s14013_s29  ;;  %v8909_v3 = vpop.permute.xlu1 %8908 }
0x54a9   :  { %12637 = vmatmul.mubr.msk.f32.vlgmr.msra.gmra.mrb[228].mxu1 %vm523_vm5, %v8909_v3 }
0x54aa   :  { %v8911_v46 = vpop.permute.xlu0 %8910  ;;  %12975 = vmatpush3.bf16.msra.mxu1 %v17680_v47 }
0x54ab   :  { %12639 = vmatprep.mubr.msk.f32.mxu1 %vm523_vm5, %v8911_v46  ;;  %12977 = vmatprep.subr.bf16.mxu1 %v17685_v20 }
0x54ac   :  { %v8913_v40 = vpop.permute.xlu1 %8912 }
0x54ad   :  { %12640 = vmatmul.mubr.msk.f32.gmra.mrb[230].mxu1 %vm523_vm5, %v8913_v40 }
0x54ae   :  { %v8915_v61 = vpop.permute.xlu0 %8914  ;;  %12979 = vmatpush3.bf16.msra.mxu1 %v17685_v20 }
0x54af   :  { %v13880_v57 = vpop.eup %13879  ;;  %12642 = vmatprep.mubr.msk.f32.mxu1 %vm523_vm5, %v8915_v61  ;;  %12981 = vmatprep.subr.bf16.mxu1 %v17937_v18 }
0x54b0   :  { %9249 = vrot.lane.b32.xlu0 %v13880_v57, %s14013_s29  ;;  %v8917_v21 = vpop.permute.xlu1 %8916 }
0x54b1   :  { %v13882_v43 = vpop.eup %13881  ;;  %12643 = vmatmul.mubr.msk.f32.gmra.mrb[232].mxu1 %vm523_vm5, %v8917_v21 }
0x54b2   :  { %9251 = vrot.lane.b32.xlu1 %v13882_v43, %s14013_s29 }
0x550b   :  { %v9242_v25 = vpop.permute.xlu0 %9241 }
0x550c   :  { %12669 = vmatprep.mubr.msk.f32.mxu1 %vm523_vm5, %v9242_v25 }
0x550d   :  { %v9244_v12 = vpop.permute.xlu1 %9243 }
0x550e   :  { %12670 = vmatmul.mubr.msk.f32.vlgmr.msra.gmra.mrb[234].mxu1 %vm523_vm5, %v9244_v12 }
0x550f   :  { %12983 = vmatpush3.bf16.msra.mxu1 %v17937_v18 }
0x5510   :  { %12985 = vmatprep.subr.bf16.mxu1 %v17955_v11 }
0x5513   :  { %12987 = vmatpush3.bf16.msra.mxu1 %v17955_v11 }
0x5514   :  { %12989 = vmatprep.subr.bf16.mxu1 %v17680_v47 }
0x5518   :  { %v9246_v2 = vpop.permute.xlu0 %9245 }
0x5519   :  { %12672 = vmatprep.mubr.msk.f32.mxu1 %vm523_vm5, %v9246_v2 }
0x551a   :  { %v9248_v35 = vpop.permute.xlu1 %9247 }
0x551b   :  { %12673 = vmatmul.mubr.msk.f32.gmra.mrb[236].mxu1 %vm523_vm5, %v9248_v35 }
0x5522   :  { %v9250_v63 = vpop.permute.xlu0 %9249 }
0x5523   :  { %12675 = vmatprep.mubr.msk.f32.mxu1 %vm523_vm5, %v9250_v63 }
0x5524   :  { %v9252_v53 = vpop.permute.xlu1 %9251 }
0x5525   :  { %12676 = vmatmul.mubr.msk.f32.gmra.mrb[238].mxu1 %vm523_vm5, %v9252_v53 }
0x557c   :  { %v18283_v50 = vpop.f32.mrb[228].mxu1 }
0x557d   :  { %v18285_v18 = vpop.f32.mrb[229].mxu1 }
0x5580   :  { %v18287_v31 = vpop.f32.mrb[230].mxu1 }
0x5581   :  { %v18289_v11 = vpop.f32.mrb[231].mxu1 }
0x5584   :  { %v18291_v23 = vpop.f32.mrb[232].mxu1 }
0x5585   :  { %19288 = vst [vmem:[#allocation53_spill] sm:$0xff] %v18291_v23  ;;  %v18293_v49 = vpop.f32.mrb[233].mxu1 }
0x5586   :  { %19289 = vst [vmem:[#allocation54_spill] sm:$0xff] %v18293_v49 }
0x55e1   :  { %v12671_v3 = vpop.f32.mrb[234].mxu1 }
0x55e2   :  { %v9367_v46 = vadd.f32 %v12671_v3, %v18030_v13  ;;  %v9373_v40 = vadd.f32 %v12671_v3, %v18283_v50  ;;  %v9331_v61 = vpop.f32.mrb[235].mxu1 }
0x55e3   :  { %v9366_v57 = vadd.f32 %v9331_v61, %v18032_v10  ;;  %v9372_v21 = vadd.f32 %v9331_v61, %v18285_v18 }
0x55e4   :  { %9386 = vrot.lane.b32.xlu1 %v9367_v46, %s14014_s8 }
0x55e5   :  { %9384 = vrot.lane.b32.xlu0 %v9366_v57, %s14014_s8 }
0x55e8   :  { %9410 = vrot.lane.b32.xlu1 %v9373_v40, %s14016_s13 }
0x55e9   :  { %9408 = vrot.lane.b32.xlu0 %v9372_v21, %s14016_s13 }
0x55ee   :  { %v12674_v43 = vpop.f32.mrb[236].mxu1 }
0x55ef   :  { %v9369_v25 = vadd.f32 %v12674_v43, %v18034_v24  ;;  %v9375_v12 = vadd.f32 %v12674_v43, %v18287_v31  ;;  %v9341_v2 = vpop.f32.mrb[237].mxu1 }
0x55f0   :  { %v9368_v35 = vadd.f32 %v9341_v2, %v18036_v56  ;;  %v9374_v63 = vadd.f32 %v9341_v2, %v18289_v11 }
0x55f1   :  { %9390 = vrot.lane.b32.xlu1 %v9369_v25, %s14014_s8 }
0x55f2   :  { %9388 = vrot.lane.b32.xlu0 %v9368_v35, %s14014_s8 }
0x55f5   :  { %9414 = vrot.lane.b32.xlu1 %v9375_v12, %s14016_s13 }
0x55f6   :  { %9412 = vrot.lane.b32.xlu0 %v9374_v63, %s14016_s13 }
0x55f8   :  { %v12677_v53 = vpop.f32.mrb[238].mxu1 }
0x55f9   :  { %v9371_v46 = vadd.f32 %v12677_v53, %v18038_v52  ;;  %v9377_v40 = vadd.f32 %v12677_v53, %v18291_v23  ;;  %v9351_v57 = vpop.f32.mrb[239].mxu1 }
0x55fa   :  { %v9370_v21 = vadd.f32 %v9351_v57, %v18040_v30  ;;  %v9376_v56 = vadd.f32 %v9351_v57, %v18293_v49 }
0x55fb   :  { %9394 = vrot.lane.b32.xlu1 %v9371_v46, %s14014_s8 }
0x55fc   :  { %9392 = vrot.lane.b32.xlu0 %v9370_v21, %s14014_s8 }
0x55ff   :  { %9418 = vrot.lane.b32.xlu1 %v9377_v40, %s14016_s13  ;;  %v19212_v40 = vmov 2  }
0x5600   :  { %9416 = vrot.lane.b32.xlu0 %v9376_v56, %s14016_s13 }
0x5656   :  { %v9387_v25 = vpop.permute.xlu1 %9386 }
0x5657   :  { %v9385_v12 = vpop.permute.xlu0 %9384  ;;  %v9427_v35 = vsel %vm2893_vm6, %v12671_v3, %v9387_v25 }
0x5658   :  { %v9426_v49 = vsel %vm2893_vm6, %v9331_v61, %v9385_v12 }
0x565a   :  { %v9411_v63 = vpop.permute.xlu1 %9410 }
0x565b   :  { %v9434_v23 = vsel %vm9432_vm9, %v9427_v35, %v9411_v63  ;;  %v9409_v30 = vpop.permute.xlu0 %9408 }
0x565c   :  { %9480 = vperm.xlu0 %13092, %v9434_v23   ;;  %9446 = vperm.xlu1 %13094, %v9434_v23   ;;  %v9433_v46 = vsel %vm9432_vm9, %v9426_v49, %v9409_v30 }
0x5660   :  { %13096 = vset.pattern.permute.xlu0 %v19240_v45  ;;  %13095 = vset.pattern.permute.xlu1 %v19212_v40 }
0x5661   :  { %9441 = vperm.xlu0 %13096, %v9433_v46   ;;  %9516 = vperm.xlu1 %13095, %v9434_v23  }
0x5663   :  { %v9391_v56 = vpop.permute.xlu1 %9390 }
0x5664   :  { %v9389_v21 = vpop.permute.xlu0 %9388  ;;  %v9429_v3 = vsel %vm2893_vm6, %v12674_v43, %v9391_v56 }
0x5665   :  { %13097 = vset.pattern.permute.xlu1 %v19267_v54  ;;  %13100 = vset.pattern.permute.xlu0 %v19267_v54  ;;  %v9428_v49 = vsel %vm2893_vm6, %v9341_v2, %v9389_v21 }
0x5666   :  { %9476 = vperm.xlu1 %13097, %v9433_v46  }
0x5667   :  { %v9415_v25 = vpop.permute.xlu1 %9414 }
0x5668   :  { %v9436_v61 = vsel %vm9432_vm9, %v9429_v3, %v9415_v25  ;;  %v9413_v30 = vpop.permute.xlu0 %9412 }
0x5669   :  { %9488 = vperm.xlu0 %13100, %v9436_v61   ;;  %v9435_v23 = vsel %vm9432_vm9, %v9428_v49, %v9413_v30 }
0x566a   :  { %13098 = vset.pattern.permute.xlu1 %v19212_v40 }
0x566b   :  { %9512 = vperm.xlu1 %13098, %v9433_v46  }
0x566d   :  { %13102 = vset.pattern.permute.xlu0 %v19240_v45  ;;  %v9395_v35 = vpop.permute.xlu1 %9394 }
0x566e   :  { %v9393_v12 = vpop.permute.xlu0 %9392  ;;  %9451 = vperm.xlu0 %13102, %v9435_v23   ;;  %v9431_v2 = vsel %vm2893_vm6, %v12677_v53, %v9395_v35 }
0x566f   :  { %13099 = vset.pattern.permute.xlu1 %v19240_v45  ;;  %v9430_v43 = vsel %vm2893_vm6, %v9351_v57, %v9393_v12 }
0x5670   :  { %9456 = vperm.xlu1 %13099, %v9436_v61  }
0x5671   :  { %v9419_v46 = vpop.permute.xlu1 %9418 }
0x5672   :  { %v9417_v63 = vpop.permute.xlu0 %9416  ;;  %v9438_v21 = vsel %vm9432_vm9, %v9431_v2, %v9419_v46 }
0x5673   :  { %v9437_v56 = vsel %vm9432_vm9, %v9430_v43, %v9417_v63 }
0x5674   :  { %9461 = vperm.xlu0 %13102, %v9437_v56   ;;  %13101 = vset.pattern.permute.xlu1 %v19212_v40 }
0x5675   :  { %9524 = vperm.xlu1 %13101, %v9436_v61  }
0x5678   :  { %13106 = vset.pattern.permute.xlu0 %v19267_v54 }
0x5679   :  { %13103 = vset.pattern.permute.xlu1 %v19267_v54  ;;  %9496 = vperm.xlu0 %13106, %v9438_v21  }
0x567a   :  { %9484 = vperm.xlu1 %13103, %v9435_v23  }
0x567d   :  { %13110 = vset.pattern.permute.xlu0 %v19240_v45 }
0x567e   :  { %13104 = vset.pattern.permute.xlu1 %v19212_v40 }
0x567f   :  { %9520 = vperm.xlu1 %13104, %v9435_v23  }
0x5683   :  { %13105 = vset.pattern.permute.xlu1 %v19240_v45 }
0x5684   :  { %9466 = vperm.xlu1 %13105, %v9438_v21  }
0x5688   :  { %13107 = vset.pattern.permute.xlu1 %v19267_v54 }
0x5689   :  { %9492 = vperm.xlu1 %13107, %v9437_v56  }
0x568d   :  { %13108 = vset.pattern.permute.xlu1 %v19212_v40 }
0x568e   :  { %9528 = vperm.xlu1 %13108, %v9437_v56  }
0x5692   :  { %9532 = vperm.xlu1 %13108, %v9438_v21  }
0x5696   :  { %13109 = vset.pattern.permute.xlu1 %v19240_v45 }
0x56db   :  { %v9447_v53 = vpop.permute.xlu1 %9446  ;;  %v9481_v57 = vpop.permute.xlu0 %9480 }
0x56dc   :  { %v9500_v25 = vmul.f32 %v9481_v57, %v17786_v32  ;;  %v9470_v61 = vmul.f32 0.0, %v9447_v53 }
0x56de   :  { %v9506_v35 = vadd.f32 %v9500_v25, %v9470_v61 }
0x56e0   :  { %v9517_v3 = vpop.permute.xlu1 %9516  ;;  %v9442_v49 = vpop.permute.xlu0 %9441 }
0x56e1   :  { %v9536_v23 = vmul.f32 %v9517_v3, %v18072_v41  ;;  %v9469_v43 = vmul.f32 0.0, %v9442_v49 }
0x56e3   :  { %v9542_v46 = vadd.f32 %v9536_v23, %v9506_v35 }
0x56e5   :  { %v9477_v30 = vpop.permute.xlu1 %9476  ;;  %v18352_v40 = vadd.f32 %v9542_v46, %v18238_v6 }
0x56e6   :  { %v9499_v12 = vmul.f32 %v9477_v30, %v17789_v17 }
0x56e8   :  { %v9505_v56 = vadd.f32 %v9499_v12, %v9469_v43  ;;  %v9489_v25 = vpop.permute.xlu0 %9488 }
0x56e9   :  { %v9502_v12 = vmul.f32 %v9489_v25, %v17794_v5 }
0x56ea   :  { %v9513_v63 = vpop.permute.xlu1 %9512 }
0x56eb   :  { %v9535_v2 = vmul.f32 %v9513_v63, %v18075_v60 }
0x56ed   :  { %v9541_v21 = vadd.f32 %v9535_v2, %v9505_v56  ;;  %v9452_v23 = vpop.permute.xlu0 %9451 }
0x56ee   :  { %v9471_v43 = vmul.f32 0.0, %v9452_v23 }
0x56ef   :  { %v18355_v57 = vadd.f32 %v9541_v21, %v18234_v38  ;;  %v9457_v53 = vpop.permute.xlu1 %9456 }
0x56f0   :  { %v9472_v30 = vmul.f32 0.0, %v9457_v53 }
0x56f1   :  { %v9684_v3 = vpack.c.bf16 %v18352_v40, %v18355_v57 }
0x56f2   :  { %v9508_v38 = vadd.f32 %v9502_v12, %v9472_v30 }
0x56f3   :  { %9690 = vrot.lane.b32.xlu0 %v9684_v3, %s14013_s29 }
0x56f4   :  { %v9525_v61 = vpop.permute.xlu1 %9524 }
0x56f5   :  { %v9538_v35 = vmul.f32 %v9525_v61, %v18083_v48  ;;  %v9462_v61 = vpop.permute.xlu0 %9461 }
0x56f7   :  { %v9544_v46 = vadd.f32 %v9538_v35, %v9508_v38  ;;  %v9473_v35 = vmul.f32 0.0, %v9462_v61 }
0x56f9   :  { %v9485_v49 = vpop.permute.xlu1 %9484  ;;  %v18365_v3 = vadd.f32 %v9544_v46, %v18247_v14  ;;  %v9497_v23 = vpop.permute.xlu0 %9496 }
0x56fa   :  { %v9501_v6 = vmul.f32 %v9485_v49, %v17797_v7 }
0x56fc   :  { %v9507_v56 = vadd.f32 %v9501_v6, %v9471_v43  ;;  %v9504_v43 = vmul.f32 %v9497_v23, %v17803_v0 }
0x56fe   :  { %v9521_v63 = vpop.permute.xlu1 %9520 }
0x56ff   :  { %v9537_v2 = vmul.f32 %v9521_v63, %v18086_v55 }
0x5701   :  { %v9543_v21 = vadd.f32 %v9537_v2, %v9507_v56 }
0x5703   :  { %v18368_v53 = vadd.f32 %v9543_v21, %v18242_v34  ;;  %v9467_v60 = vpop.permute.xlu1 %9466 }
0x5704   :  { %v9474_v6 = vmul.f32 0.0, %v9467_v60 }
0x5705   :  { %v9685_v25 = vpack.c.bf16 %v18365_v3, %v18368_v53 }
0x5706   :  { %v9510_v63 = vadd.f32 %v9504_v43, %v9474_v6 }
0x5707   :  { %9692 = vrot.lane.b32.xlu1 %v9685_v25, %s14013_s29 }
0x5708   :  { %v9493_v30 = vpop.permute.xlu1 %9492 }
0x5709   :  { %v9503_v49 = vmul.f32 %v9493_v30, %v17806_v8 }
0x570b   :  { %v9509_v34 = vadd.f32 %v9503_v49, %v9473_v35  ;;  %v7909_v49 = vadd.f32 %v18117_v26, %v17824_v42 }
0x570d   :  { %v9529_v12 = vpop.permute.xlu1 %9528 }
0x570e   :  { %v9539_v14 = vmul.f32 %v9529_v12, %v18094_v28 }
0x5710   :  { %v9545_v46 = vadd.f32 %v9539_v14, %v9509_v34  ;;  %v7947_v14 = vmul.f32 %v7909_v49, %v14178_v22 }
0x5711   :  { %v9533_v38 = vpop.permute.xlu1 %9532 }
0x5712   :  { %v9540_v56 = vmul.f32 %v9533_v38, %v18097_v39  ;;  %v18378_v21 = vadd.f32 %v9545_v46, %v18252_v44 }
0x5714   :  { %v9546_v2 = vadd.f32 %v9540_v56, %v9510_v63 }
0x5716   :  { %v18381_v25 = vadd.f32 %v9546_v2, %v18256_v4  ;;  %v7906_v4 = vadd.f32 %v18117_v26, %v17820_v62  ;;  %v7914_v62 = vadd.f32 %v18117_v26, %v17835_v15  ;;  %v7917_v2 = vadd.f32 %v18117_v26, %v17841_v58 }
0x5718   :  { %19290 = vst [vmem:[#allocation55_spill] sm:$0xff] %v18381_v25  ;;  %v9686_v60 = vpack.c.bf16 %v18381_v25, %v18378_v21  ;;  %v7946_v23 = vmul.f32 %v7906_v4, %v14178_v22  ;;  %v7949_v4 = vmul.f32 %v7917_v2, %v14178_v22 }
0x571a   :  { %9694 = vrot.lane.b32.xlu0 %v9686_v60, %s14013_s29 }
0x5765   :  { %v9691_v61 = vpop.permute.xlu0 %9690 }
0x5766   :  { %12700 = vmatmul.mubr.msk.bf16.vlgmr.msra.gmra.mrb[248].mxu0 %vm523_vm5, %v9691_v61  ;;  %v7948_v61 = vmul.f32 %v7914_v62, %v14178_v22 }
0x5767   :  { %12703 = vmatprep.mubr.msk.bf16.mxu0 %vm14009_vm1, %v19260_v29 }
0x5779   :  { %v9693_v30 = vpop.permute.xlu1 %9692 }
0x577a   :  { %12704 = vmatmul.mubr.msk.bf16.gmra.mrb[252].mxu0 %vm523_vm5, %v9693_v30 }
0x577b   :  { %12707 = vmatprep.mubr.msk.bf16.mxu0 %vm14009_vm1, %v19260_v29 }
0x578c   :  { %v9695_v44 = vpop.permute.xlu0 %9694 }
0x578d   :  { %12708 = vmatmul.mubr.msk.bf16.gmra.mrb[0].mxu0 %vm523_vm5, %v9695_v44 }
0x5839   :  { %v9739_v12 = vpop.f32.mrb[248].mxu0 }
0x583a   :  { %v9762_v35 = vadd.f32 %v9739_v12, %v7946_v23  ;;  %v12701_v6 = vpop.f32.mrb[249].mxu0 }
0x583b   :  { %v9742_v43 = vpop.f32.mrb[250].mxu0 }
0x583c   :  { %13883 = vtanh.f32 %v9762_v35  ;;  %v9763_v34 = vadd.f32 %v9742_v43, %v7947_v14  ;;  %v12702_v29 = vpop.f32.mrb[251].mxu0  ;;  %v7922_v35 = vadd.f32 %v18117_v26, %v17833_v33  ;;  %v7925_v43 = vadd.f32 %v18117_v26, %v17838_v59 }
0x583e   :  { %13885 = vtanh.f32 %v9763_v34  ;;  %v7951_v59 = vmul.f32 %v7925_v43, %v14178_v22 }
0x5846   :  { %v13884_v38 = vpop.eup %13883 }
0x5847   :  { %v9774_v63 = vmul.f32 %v13884_v38, %v14178_v22  ;;  %v7950_v38 = vmul.f32 %v7922_v35, %v14178_v22 }
0x5848   :  { %v13886_v46 = vpop.eup %13885 }
0x5849   :  { %v18403_v42 = vadd.f32 %v9774_v63, %v14229_v1  ;;  %v9775_v56 = vmul.f32 %v13886_v46, %v14178_v22 }
0x584b   :  { %9798 = vrot.lane.b32.xlu1 %v18403_v42, %s19233_s0  ;;  %v18411_v60 = vadd.f32 %v9775_v56, %v14229_v1 }
0x584d   :  { %9800 = vrot.lane.b32.xlu0 %v18411_v60, %s19233_s0  ;;  %v9747_v15 = vpop.f32.mrb[252].mxu0 }
0x584e   :  { %v9764_v30 = vadd.f32 %v9747_v15, %v7948_v61  ;;  %v12705_v44 = vpop.f32.mrb[253].mxu0 }
0x584f   :  { %v9750_v49 = vpop.f32.mrb[254].mxu0 }
0x5850   :  { %13887 = vtanh.f32 %v9764_v30  ;;  %v9765_v23 = vadd.f32 %v9750_v49, %v7949_v4  ;;  %v12706_v58 = vpop.f32.mrb[255].mxu0 }
0x5852   :  { %13889 = vtanh.f32 %v9765_v23 }
0x585a   :  { %v13888_v12 = vpop.eup %13887 }
0x585b   :  { %v9776_v6 = vmul.f32 %v13888_v12, %v14178_v22 }
0x585c   :  { %v13890_v14 = vpop.eup %13889 }
0x585d   :  { %v18423_v34 = vadd.f32 %v9776_v6, %v14229_v1  ;;  %v9777_v29 = vmul.f32 %v13890_v14, %v14178_v22 }
0x585f   :  { %9802 = vrot.lane.b32.xlu1 %v18423_v34, %s19233_s0  ;;  %v18430_v63 = vadd.f32 %v9777_v29, %v14229_v1 }
0x5860   :  { %v9755_v33 = vpop.f32.mrb[0].mxu0 }
0x5861   :  { %v9766_v46 = vadd.f32 %v9755_v33, %v7950_v38  ;;  %9804 = vrot.lane.b32.xlu0 %v18430_v63, %s19233_s0  ;;  %v12709_v62 = vpop.f32.mrb[1].mxu0 }
0x5862   :  { %v9758_v26 = vpop.f32.mrb[2].mxu0 }
0x5863   :  { %13891 = vtanh.f32 %v9766_v46  ;;  %v9767_v56 = vadd.f32 %v9758_v26, %v7951_v59  ;;  %v12710_v2 = vpop.f32.mrb[3].mxu0  ;;  %v9786_v46 = vmul.f32 %v18403_v42, %v18187_v37  ;;  %v9787_v26 = vmul.f32 %v18411_v60, %v18192_v51 }
0x5865   :  { %13893 = vtanh.f32 %v9767_v56 }
0x586d   :  { %v13892_v61 = vpop.eup %13891 }
0x586e   :  { %v9778_v15 = vmul.f32 %v13892_v61, %v14178_v22 }
0x586f   :  { %v13894_v30 = vpop.eup %13893 }
0x5870   :  { %v18437_v44 = vadd.f32 %v9778_v15, %v14229_v1  ;;  %v9779_v4 = vmul.f32 %v13894_v30, %v14178_v22  ;;  %v9788_v30 = vmul.f32 %v18423_v34, %v18197_v36 }
0x5872   :  { %9806 = vrot.lane.b32.xlu1 %v18437_v44, %s19233_s0  ;;  %v18443_v49 = vadd.f32 %v9779_v4, %v14229_v1 }
0x5874   :  { %9808 = vrot.lane.b32.xlu0 %v18443_v49, %s19233_s0 }
0x58bd   :  { %v9799_v23 = vpop.permute.xlu1 %9798 }
0x58be   :  { %v9816_v58 = vmul.f32 %v9799_v23, %v18403_v42  ;;  %v9789_v23 = vmul.f32 %v18430_v63, %v18203_v27 }
0x58bf   :  { %v9801_v12 = vpop.permute.xlu0 %9800 }
0x58c0   :  { %v9817_v35 = vmul.f32 %v9801_v12, %v18411_v60  ;;  %9828 = vrot.lane.b32.xlu1 %v9816_v58, %s14013_s29 }
0x58c2   :  { %9830 = vrot.lane.b32.xlu0 %v9817_v35, %s14013_s29 }
0x58d1   :  { %v9803_v22 = vpop.permute.xlu1 %9802 }
0x58d2   :  { %v9818_v6 = vmul.f32 %v9803_v22, %v18423_v34  ;;  %v9790_v22 = vmul.f32 %v18437_v44, %v18209_v19 }
0x58d3   :  { %v9805_v14 = vpop.permute.xlu0 %9804 }
0x58d4   :  { %v9819_v1 = vmul.f32 %v9805_v14, %v18430_v63  ;;  %9832 = vrot.lane.b32.xlu1 %v9818_v6, %s14013_s29  ;;  %v9791_v14 = vmul.f32 %v18443_v49, %v18214_v16 }
0x58d6   :  { %9834 = vrot.lane.b32.xlu0 %v9819_v1, %s14013_s29 }
0x58e4   :  { %v9807_v43 = vpop.permute.xlu1 %9806 }
0x58e5   :  { %v9820_v29 = vmul.f32 %v9807_v43, %v18437_v44 }
0x58e6   :  { %v9809_v38 = vpop.permute.xlu0 %9808 }
0x58e7   :  { %v9821_v33 = vmul.f32 %v9809_v38, %v18443_v49  ;;  %9836 = vrot.lane.b32.xlu1 %v9820_v29, %s14013_s29 }
0x58e9   :  { %9838 = vrot.lane.b32.xlu0 %v9821_v33, %s14013_s29 }
0x5932   :  { %v9829_v62 = vpop.permute.xlu1 %9828 }
0x5933   :  { %v9846_v59 = vadd.f32 %v9829_v62, %v9786_v46 }
0x5934   :  { %v9831_v56 = vpop.permute.xlu0 %9830 }
0x5935   :  { %13895 = vtanh.f32 %v9846_v59  ;;  %v9847_v2 = vadd.f32 %v9831_v56, %v9787_v26 }
0x5937   :  { %13897 = vtanh.f32 %v9847_v2 }
0x593f   :  { %v13896_v61 = vpop.eup %13895 }
0x5940   :  { %9864 = vrot.lane.b32.xlu1 %v13896_v61, %s19233_s0 }
0x5941   :  { %v13898_v15 = vpop.eup %13897 }
0x5942   :  { %9866 = vrot.lane.b32.xlu0 %v13898_v15, %s19233_s0 }
0x5946   :  { %v9833_v4 = vpop.permute.xlu1 %9832 }
0x5947   :  { %v9848_v37 = vadd.f32 %v9833_v4, %v9788_v30 }
0x5948   :  { %v9835_v58 = vpop.permute.xlu0 %9834 }
0x5949   :  { %13899 = vtanh.f32 %v9848_v37  ;;  %v9849_v51 = vadd.f32 %v9835_v58, %v9789_v23 }
0x594b   :  { %13901 = vtanh.f32 %v9849_v51 }
0x5953   :  { %v13900_v12 = vpop.eup %13899 }
0x5954   :  { %9868 = vrot.lane.b32.xlu1 %v13900_v12, %s19233_s0 }
0x5955   :  { %v13902_v35 = vpop.eup %13901 }
0x5956   :  { %9870 = vrot.lane.b32.xlu0 %v13902_v35, %s19233_s0 }
0x5959   :  { %v9837_v6 = vpop.permute.xlu1 %9836 }
0x595a   :  { %v9850_v36 = vadd.f32 %v9837_v6, %v9790_v22 }
0x595b   :  { %v9839_v1 = vpop.permute.xlu0 %9838 }
0x595c   :  { %13903 = vtanh.f32 %v9850_v36  ;;  %v9851_v27 = vadd.f32 %v9839_v1, %v9791_v14  ;;  %v19294_v1 = vld [vmem:[#allocation16_spill] sm:$0xff] }
0x595e   :  { %13905 = vtanh.f32 %v9851_v27  ;;  %v19295_v27 = vld [vmem:[#allocation22_spill] sm:$0xff] }
0x595f   :  { %13907 = vtanh.f32 %v18355_v57 }
0x5960   :  { %13909 = vtanh.f32 %v18352_v40 }
0x5961   :  { %13911 = vtanh.f32 %v18368_v53 }
0x5962   :  { %13913 = vtanh.f32 %v18365_v3 }
0x5963   :  { %13915 = vtanh.f32 %v18378_v21 }
0x5964   :  { %13917 = vtanh.f32 %v18381_v25 }
0x5966   :  { %v13904_v43 = vpop.eup %13903 }
0x5967   :  { %9872 = vrot.lane.b32.xlu1 %v13904_v43, %s19233_s0  ;;  %v19297_v43 = vld [vmem:[#allocation24_spill] sm:$0xff] }
0x5968   :  { %v13906_v19 = vpop.eup %13905 }
0x5969   :  { %9874 = vrot.lane.b32.xlu0 %v13906_v19, %s19233_s0  ;;  %v13908_v16 = vpop.eup %13907  ;;  %v19298_v19 = vld [vmem:[#allocation26_spill] sm:$0xff]  ;;  %s14018_s0 = smov 3  }
0x596a   :  { %v13910_v29 = vpop.eup %13909 }
0x596b   :  { %9565 = vrot.lane.b32.xlu1 %v13908_v16, %s14013_s29  ;;  %v13912_v38 = vpop.eup %13911  ;;  %v19299_v16 = vld [vmem:[#allocation41_spill] sm:$0xff] }
0x596c   :  { %v13914_v33 = vpop.eup %13913 }
0x596d   :  { %9567 = vrot.lane.b32.xlu0 %v13910_v29, %s14013_s29  ;;  %v13916_v46 = vpop.eup %13915  ;;  %v19300_v29 = vld [vmem:[#allocation43_spill] sm:$0xff] }
0x596e   :  { %v13918_v62 = vpop.eup %13917 }
0x596f   :  { %9569 = vrot.lane.b32.xlu1 %v13912_v38, %s14013_s29  ;;  %v19301_v38 = vld [vmem:[#allocation45_spill] sm:$0xff] }
0x5971   :  { %9571 = vrot.lane.b32.xlu0 %v13914_v33, %s14013_s29  ;;  %v19302_v33 = vld [vmem:[#allocation49_spill] sm:$0xff] }
0x5973   :  { %9573 = vrot.lane.b32.xlu1 %v13916_v46, %s14013_s29  ;;  %v19303_v46 = vld [vmem:[#allocation47_spill] sm:$0xff] }
0x5975   :  { %9575 = vrot.lane.b32.xlu0 %v13918_v62, %s14013_s29 }
0x59b2   :  { %v9865_v59 = vpop.permute.xlu1 %9864 }
0x59b3   :  { %v18490_v26 = vmul.f32 %v9865_v59, %v18403_v42 }
0x59b4   :  { %v9867_v56 = vpop.permute.xlu0 %9866 }
0x59b5   :  { %13919 = vtanh.f32 %v18490_v26  ;;  %v18494_v2 = vmul.f32 %v9867_v56, %v18411_v60 }
0x59b7   :  { %13921 = vtanh.f32 %v18494_v2 }
0x59bf   :  { %v13920_v61 = vpop.eup %13919 }
0x59c0   :  { %9900 = vrot.lane.b32.xlu1 %v13920_v61, %s14013_s29 }
0x59c1   :  { %v13922_v15 = vpop.eup %13921 }
0x59c2   :  { %9902 = vrot.lane.b32.xlu0 %v13922_v15, %s14013_s29 }
0x59c6   :  { %v9869_v30 = vpop.permute.xlu1 %9868 }
0x59c7   :  { %v18500_v4 = vmul.f32 %v9869_v30, %v18423_v34 }
0x59c8   :  { %v9871_v42 = vpop.permute.xlu0 %9870 }
0x59c9   :  { %13923 = vtanh.f32 %v18500_v4  ;;  %v18504_v37 = vmul.f32 %v9871_v42, %v18430_v63  ;;  %v19304_v42 = vld [vmem:[#allocation17_spill] sm:$0xff] }
0x59cb   :  { %13925 = vtanh.f32 %v18504_v37 }
0x59d3   :  { %v13924_v60 = vpop.eup %13923 }
0x59d4   :  { %9904 = vrot.lane.b32.xlu1 %v13924_v60, %s14013_s29 }
0x59d5   :  { %v13926_v23 = vpop.eup %13925 }
0x59d6   :  { %9906 = vrot.lane.b32.xlu0 %v13926_v23, %s14013_s29 }
0x59d9   :  { %v9873_v58 = vpop.permute.xlu1 %9872 }
0x59da   :  { %v18510_v51 = vmul.f32 %v9873_v58, %v18437_v44 }
0x59db   :  { %v9875_v34 = vpop.permute.xlu0 %9874 }
0x59dc   :  { %19291 = vst [vmem:[#allocation56_spill] sm:$0xff] %v18510_v51  ;;  %13927 = vtanh.f32 %v18510_v51  ;;  %v18514_v12 = vmul.f32 %v9875_v34, %v18443_v49  ;;  %v19305_v34 = vld [vmem:[#allocation15_spill] sm:$0xff] }
0x59dd   :  { %v9566_v63 = vpop.permute.xlu1 %9565 }
0x59de   :  { %19292 = vst [vmem:[#allocation57_spill] sm:$0xff] %v18514_v12  ;;  %13929 = vtanh.f32 %v18514_v12  ;;  %12686 = vmatprep.mubr.msk.f32.mxu1 %vm523_vm5, %v9566_v63 }
0x59df   :  { %v9568_v35 = vpop.permute.xlu0 %9567 }
0x59e0   :  { %12687 = vmatmul.mubr.msk.f32.vlgmr.msra.gmra.mrb[240].mxu1 %vm523_vm5, %v9568_v35 }
0x59e1   :  { %v9570_v22 = vpop.permute.xlu1 %9569  ;;  %12991 = vmatpush3.bf16.msra.mxu1 %v17680_v47  ;;  %v19293_v47 = vld [vmem:[#allocation18_spill] sm:$0xff] }
0x59e2   :  { %12689 = vmatprep.mubr.msk.f32.mxu1 %vm523_vm5, %v9570_v22  ;;  %12993 = vmatprep.subr.bf16.mxu1 %v17685_v20  ;;  %v19306_v22 = vld [vmem:[#allocation21_spill] sm:$0xff] }
0x59e3   :  { %v9572_v44 = vpop.permute.xlu0 %9571 }
0x59e4   :  { %12690 = vmatmul.mubr.msk.f32.gmra.mrb[242].mxu1 %vm523_vm5, %v9572_v44 }
0x59e5   :  { %v9574_v49 = vpop.permute.xlu1 %9573  ;;  %12995 = vmatpush3.bf16.msra.mxu1 %v17685_v20  ;;  %v19296_v20 = vld [vmem:[#allocation20_spill] sm:$0xff] }
0x59e6   :  { %v13928_v6 = vpop.eup %13927  ;;  %12692 = vmatprep.mubr.msk.f32.mxu1 %vm523_vm5, %v9574_v49 }
0x59e7   :  { %v9576_v36 = vpop.permute.xlu0 %9575  ;;  %9908 = vrot.lane.b32.xlu1 %v13928_v6, %s14013_s29 }
0x59e8   :  { %v13930_v14 = vpop.eup %13929  ;;  %12693 = vmatmul.mubr.msk.f32.gmra.mrb[244].mxu1 %vm523_vm5, %v9576_v36  ;;  %v19307_v36 = vld [vmem:[#allocation19_spill] sm:$0xff] }
0x59e9   :  { %9910 = vrot.lane.b32.xlu0 %v13930_v14, %s14013_s29 }
0x59eb   :  { %3786 = vrot.lane.b32.xlu1 %v19293_v47, %s14014_s8 }
0x59ed   :  { %3788 = vrot.lane.b32.xlu0 %v19294_v1, %s14014_s8  ;;  %v19308_v1 = vld [vmem:[#allocation40_spill] sm:$0xff] }
0x59ef   :  { %3790 = vrot.lane.b32.xlu1 %v19295_v27, %s14014_s8 }
0x59f1   :  { %3792 = vrot.lane.b32.xlu0 %v19296_v20, %s14014_s8 }
0x59f3   :  { %3796 = vrot.lane.b32.xlu1 %v19297_v43, %s14014_s8  ;;  %v19309_v43 = vld [vmem:[#allocation25_spill] sm:$0xff] }
0x59f5   :  { %3794 = vrot.lane.b32.xlu0 %v19298_v19, %s14014_s8 }
0x59f7   :  { %7597 = vrot.lane.b32.xlu1 %v17540_v9, %s14014_s8 }
0x59f9   :  { %7595 = vrot.lane.b32.xlu0 %v19299_v16, %s14014_s8  ;;  %v19310_v16 = vld [vmem:[#allocation39_spill] sm:$0xff] }
0x59fb   :  { %7601 = vrot.lane.b32.xlu1 %v19300_v29, %s14014_s8 }
0x59fd   :  { %7599 = vrot.lane.b32.xlu0 %v19301_v38, %s14014_s8 }
0x59ff   :  { %7603 = vrot.lane.b32.xlu1 %v19302_v33, %s14014_s8  ;;  %v19311_v33 = vld [vmem:[#allocation23_spill] sm:$0xff] }
0x5a01   :  { %7605 = vrot.lane.b32.xlu0 %v19303_v46, %s14014_s8 }
0x5a32   :  { %v9901_v62 = vpop.permute.xlu1 %9900 }
0x5a33   :  { %12719 = vmatprep.mubr.msk.f32.mxu1 %vm523_vm5, %v9901_v62 }
0x5a34   :  { %v9903_v59 = vpop.permute.xlu0 %9902 }
0x5a35   :  { %12720 = vmatmul.mubr.msk.f32.vlgmr.msra.gmra.mrb[246].mxu1 %vm523_vm5, %v9903_v59  ;;  %v19312_v59 = vld [vmem:[#allocation44_spill] sm:$0xff] }
0x5a46   :  { %v9905_v9 = vpop.permute.xlu1 %9904 }
0x5a47   :  { %12722 = vmatprep.mubr.msk.f32.mxu1 %vm523_vm5, %v9905_v9 }
0x5a48   :  { %v9907_v56 = vpop.permute.xlu0 %9906 }
0x5a49   :  { %12723 = vmatmul.mubr.msk.f32.gmra.mrb[248].mxu1 %vm523_vm5, %v9907_v56  ;;  %v19313_v56 = vld [vmem:[#allocation42_spill] sm:$0xff] }
0x5a59   :  { %v9909_v61 = vpop.permute.xlu1 %9908 }
0x5a5a   :  { %12725 = vmatprep.mubr.msk.f32.mxu1 %vm523_vm5, %v9909_v61 }
0x5a5b   :  { %v9911_v15 = vpop.permute.xlu0 %9910 }
0x5a5c   :  { %12726 = vmatmul.mubr.msk.f32.gmra.mrb[250].mxu1 %vm523_vm5, %v9911_v15 }
0x5a5d   :  { %v3787_v30 = vpop.permute.xlu1 %3786 }
0x5a5e   :  { %v3804_v60 = vsel %vm2893_vm6, %v19304_v42, %v3787_v30  ;;  %v19314_v30 = vld [vmem:[#allocation48_spill] sm:$0xff] }
0x5a5f   :  { %v3789_v23 = vpop.permute.xlu0 %3788  ;;  %3812 = vperm.xlu1 %13109, %v3804_v60  }
0x5a60   :  { %v3805_v63 = vsel %vm2893_vm6, %v19305_v34, %v3789_v23 }
0x5a61   :  { %v3791_v58 = vpop.permute.xlu1 %3790 }
0x5a62   :  { %v3806_v44 = vsel %vm2893_vm6, %v19306_v22, %v3791_v58  ;;  %v19315_v58 = vld [vmem:[#allocation46_spill] sm:$0xff] }
0x5a63   :  { %v3793_v35 = vpop.permute.xlu0 %3792  ;;  %3817 = vperm.xlu1 %13109, %v3805_v63  }
0x5a64   :  { %v3807_v14 = vsel %vm2893_vm6, %v19307_v36, %v3793_v35 }
0x5a65   :  { %v3797_v49 = vpop.permute.xlu1 %3796 }
0x5a66   :  { %v3809_v46 = vsel %vm2893_vm6, %v19311_v33, %v3797_v49 }
0x5a67   :  { %3822 = vperm.xlu1 %13109, %v3806_v44   ;;  %v3795_v6 = vpop.permute.xlu0 %3794 }
0x5a68   :  { %v3808_v19 = vsel %vm2893_vm6, %v19309_v43, %v3795_v6 }
0x5a69   :  { %v7598_v20 = vpop.permute.xlu1 %7597 }
0x5a6a   :  { %v7614_v29 = vsel %vm2893_vm6, %v19310_v16, %v7598_v20  ;;  %v19316_v16 = vld [vmem:[#allocation50_spill] sm:$0xff] }
0x5a6b   :  { %3827 = vperm.xlu1 %13109, %v3807_v14   ;;  %v7596_v47 = vpop.permute.xlu0 %7595 }
0x5a6c   :  { %v7613_v27 = vsel %vm2893_vm6, %v19308_v1, %v7596_v47 }
0x5a6d   :  { %7621 = vperm.xlu0 %13110, %v7613_v27   ;;  %v7602_v62 = vpop.permute.xlu1 %7601 }
0x5a6e   :  { %v7616_v61 = vsel %vm2893_vm6, %v19313_v56, %v7602_v62 }
0x5a6f   :  { %3832 = vperm.xlu1 %13109, %v3808_v19   ;;  %v7600_v38 = vpop.permute.xlu0 %7599 }
0x5a70   :  { %v7615_v9 = vsel %vm2893_vm6, %v19312_v59, %v7600_v38 }
0x5a71   :  { %7626 = vperm.xlu0 %13110, %v7614_v29   ;;  %v7604_v15 = vpop.permute.xlu1 %7603 }
0x5a72   :  { %v7617_v42 = vsel %vm2893_vm6, %v19314_v30, %v7604_v15 }
0x5a73   :  { %3837 = vperm.xlu1 %13109, %v3809_v46   ;;  %v7606_v23 = vpop.permute.xlu0 %7605 }
0x5a74   :  { %v18583_v34 = vsel %vm2893_vm6, %v19315_v58, %v7606_v23 }
0x5a75   :  { %7631 = vperm.xlu0 %13110, %v7615_v9  }
0x5a77   :  { %13111 = vset.pattern.permute.xlu1 %v19267_v54 }
0x5a78   :  { %7656 = vperm.xlu1 %13111, %v7613_v27  }
0x5a79   :  { %7636 = vperm.xlu0 %13110, %v7616_v61  }
0x5a7c   :  { %7660 = vperm.xlu1 %13111, %v7614_v29  }
0x5a7d   :  { %7641 = vperm.xlu0 %13110, %v7617_v42  }
0x5a80   :  { %7664 = vperm.xlu1 %13111, %v7615_v9   ;;  %v19318_v9 = vld [vmem:[#allocation51_spill] sm:$0xff] }
0x5a81   :  { %7646 = vperm.xlu0 %13110, %v18583_v34  }
0x5a84   :  { %7668 = vperm.xlu1 %13111, %v7616_v61   ;;  %v19319_v61 = vld [vmem:[#allocation54_spill] sm:$0xff] }
0x5a85   :  { %13112 = vset.pattern.permute.xlu0 %v19267_v54 }
0x5a86   :  { %3847 = vperm.xlu0 %13112, %v3804_v60  }
0x5a88   :  { %7672 = vperm.xlu1 %13111, %v7617_v42  }
0x5a8a   :  { %3851 = vperm.xlu0 %13112, %v3805_v63  }
0x5a8e   :  { %3855 = vperm.xlu0 %13112, %v3806_v44  }
0x5a92   :  { %3859 = vperm.xlu0 %13112, %v3807_v14  }
0x5a96   :  { %3863 = vperm.xlu0 %13112, %v3808_v19  }
0x5a9a   :  { %3867 = vperm.xlu0 %13112, %v3809_v46  }
0x5ab3   :  { %v12688_v35 = vpop.f32.mrb[240].mxu1 }
0x5ab4   :  { %v9655_v22 = vpop.f32.mrb[241].mxu1 }
0x5ab7   :  { %v12691_v49 = vpop.f32.mrb[242].mxu1 }
0x5ab8   :  { %v9665_v6 = vpop.f32.mrb[243].mxu1 }
0x5abb   :  { %v12694_v36 = vpop.f32.mrb[244].mxu1 }
0x5abc   :  { %v9675_v47 = vpop.f32.mrb[245].mxu1 }
0x5ade   :  { %v18649_v42 = vpop.permute.xlu1 %3812 }
0x5ae2   :  { %v18655_v58 = vpop.permute.xlu1 %3817 }
0x5b08   :  { %v18587_v1 = vpop.f32.mrb[246].mxu1 }
0x5b09   :  { %v10026_v27 = vadd.f32 %v18587_v1, %v18030_v13  ;;  %v10032_v60 = vadd.f32 %v18587_v1, %v18283_v50  ;;  %v10038_v63 = vadd.f32 %v18587_v1, %v12688_v35  ;;  %v18594_v44 = vpop.f32.mrb[247].mxu1 }
0x5b0a   :  { %v10025_v14 = vadd.f32 %v18594_v44, %v18032_v10  ;;  %v10031_v20 = vadd.f32 %v18594_v44, %v18285_v18  ;;  %v10037_v43 = vadd.f32 %v18594_v44, %v9655_v22  ;;  %v18659_v22 = vpop.permute.xlu1 %3822 }
0x5b0b   :  { %10075 = vrot.lane.b32.xlu1 %v10032_v60, %s14016_s13  ;;  %10051 = vrot.lane.b32.xlu0 %v10026_v27, %s14014_s8 }
0x5b0f   :  { %10049 = vrot.lane.b32.xlu1 %v10025_v14, %s14014_s8  ;;  %10099 = vrot.lane.b32.xlu0 %v10038_v63, %s14018_s0 }
0x5b13   :  { %10073 = vrot.lane.b32.xlu1 %v10031_v20, %s14016_s13  ;;  %10097 = vrot.lane.b32.xlu0 %v10037_v43, %s14018_s0 }
0x5b1c   :  { %v18607_v13 = vpop.f32.mrb[248].mxu1 }
0x5b1d   :  { %v10028_v10 = vadd.f32 %v18607_v13, %v18034_v24  ;;  %v10034_v50 = vadd.f32 %v18607_v13, %v18287_v31  ;;  %v10040_v18 = vadd.f32 %v18607_v13, %v12691_v49  ;;  %v18614_v19 = vpop.f32.mrb[249].mxu1 }
0x5b1e   :  { %v10027_v29 = vadd.f32 %v18614_v19, %v19316_v16  ;;  %v10033_v38 = vadd.f32 %v18614_v19, %v18289_v11  ;;  %v10039_v33 = vadd.f32 %v18614_v19, %v9665_v6  ;;  %v19317_v11 = vld [vmem:[#allocation53_spill] sm:$0xff]  ;;  %v18663_v6 = vpop.permute.xlu1 %3827 }
0x5b1f   :  { %10055 = vrot.lane.b32.xlu1 %v10028_v10, %s14014_s8  ;;  %10079 = vrot.lane.b32.xlu0 %v10034_v50, %s14016_s13 }
0x5b23   :  { %10053 = vrot.lane.b32.xlu1 %v10027_v29, %s14014_s8  ;;  %10103 = vrot.lane.b32.xlu0 %v10040_v18, %s14018_s0 }
0x5b27   :  { %10101 = vrot.lane.b32.xlu1 %v10039_v33, %s14018_s0  ;;  %10077 = vrot.lane.b32.xlu0 %v10033_v38, %s14016_s13 }
0x5b2f   :  { %v18627_v24 = vpop.f32.mrb[250].mxu1 }
0x5b30   :  { %v10030_v31 = vadd.f32 %v18627_v24, %v18038_v52  ;;  %v10036_v46 = vadd.f32 %v18627_v24, %v19317_v11  ;;  %v10042_v62 = vadd.f32 %v18627_v24, %v12694_v36  ;;  %v18634_v59 = vpop.f32.mrb[251].mxu1  ;;  %v18645_v52 = vpop.permute.xlu0 %7621 }
0x5b31   :  { %v10029_v56 = vadd.f32 %v18634_v59, %v19318_v9  ;;  %v10035_v15 = vadd.f32 %v18634_v59, %v19319_v61  ;;  %v10041_v30 = vadd.f32 %v18634_v59, %v9675_v47  ;;  %v18667_v47 = vpop.permute.xlu1 %3832 }
0x5b32   :  { %10059 = vrot.lane.b32.xlu1 %v10030_v31, %s14014_s8  ;;  %10083 = vrot.lane.b32.xlu0 %v10036_v46, %s14016_s13 }
0x5b34   :  { %v18651_v23 = vpop.permute.xlu0 %7626 }
0x5b35   :  { %v18671_v60 = vpop.permute.xlu1 %3837 }
0x5b36   :  { %10057 = vrot.lane.b32.xlu1 %v10029_v56, %s14014_s8  ;;  %10107 = vrot.lane.b32.xlu0 %v10042_v62, %s14018_s0 }
0x5b38   :  { %v18657_v35 = vpop.permute.xlu0 %7631 }
0x5b39   :  { %v18675_v63 = vpop.permute.xlu1 %7656 }
0x5b3a   :  { %10105 = vrot.lane.b32.xlu1 %v10041_v30, %s14018_s0  ;;  %10081 = vrot.lane.b32.xlu0 %v10035_v15, %s14016_s13  ;;  %v19216_v15 = vmov 3   ;;  %v19320_v30 = vmov 2  }
0x5b3c   :  { %v18661_v49 = vpop.permute.xlu0 %7636 }
0x5b3d   :  { %v18679_v20 = vpop.permute.xlu1 %7660 }
0x5b3e   :  { %7676 = vperm.xlu1 %13111, %v18583_v34  }
0x5b40   :  { %v18665_v36 = vpop.permute.xlu0 %7641 }
0x5b41   :  { %v18683_v10 = vpop.permute.xlu1 %7664 }
0x5b42   :  { %13113 = vset.pattern.permute.xlu1 %v19240_v45 }
0x5b44   :  { %v18669_v27 = vpop.permute.xlu0 %7646 }
0x5b45   :  { %v18687_v18 = vpop.permute.xlu1 %7668 }
0x5b48   :  { %v18673_v34 = vpop.permute.xlu0 %3847 }
0x5b49   :  { %v18691_v29 = vpop.permute.xlu1 %7672 }
0x5b4c   :  { %v18677_v14 = vpop.permute.xlu0 %3851 }
0x5b50   :  { %v18681_v43 = vpop.permute.xlu0 %3855 }
0x5b54   :  { %v18685_v50 = vpop.permute.xlu0 %3859 }
0x5b58   :  { %v18689_v16 = vpop.permute.xlu0 %3863 }
0x5b5c   :  { %v18693_v38 = vpop.permute.xlu0 %3867 }
0x5b7d   :  { %v10076_v33 = vpop.permute.xlu1 %10075  ;;  %v10052_v31 = vpop.permute.xlu0 %10051 }
0x5b7e   :  { %v10116_v11 = vsel %vm2893_vm6, %v18587_v1, %v10052_v31 }
0x5b7f   :  { %v10122_v62 = vsel %vm9432_vm9, %v10116_v11, %v10076_v33 }
0x5b81   :  { %v10050_v46 = vpop.permute.xlu1 %10049  ;;  %v10100_v9 = vpop.permute.xlu0 %10099 }
0x5b82   :  { %v10129_v56 = vsel %vm10127_vm10, %v10122_v62, %v10100_v9  ;;  %v10115_v12 = vsel %vm2893_vm6, %v18594_v44, %v10050_v46 }
0x5b83   :  { %10175 = vperm.xlu0 %13112, %v10129_v56   ;;  %10141 = vperm.xlu1 %13113, %v10129_v56  }
0x5b85   :  { %v10074_v61 = vpop.permute.xlu1 %10073  ;;  %v10098_v31 = vpop.permute.xlu0 %10097 }
0x5b86   :  { %v10121_v1 = vsel %vm9432_vm9, %v10115_v12, %v10074_v61 }
0x5b87   :  { %13115 = vset.pattern.permute.xlu0 %v19216_v15  ;;  %13114 = vset.pattern.permute.xlu1 %v19320_v30  ;;  %v10128_v33 = vsel %vm10127_vm10, %v10121_v1, %v10098_v31 }
0x5b88   :  { %10247 = vperm.xlu0 %13115, %v10129_v56   ;;  %10211 = vperm.xlu1 %13114, %v10129_v56  }
0x5b8c   :  { %13117 = vset.pattern.permute.xlu0 %v19267_v54  ;;  %13116 = vset.pattern.permute.xlu1 %v19240_v45 }
0x5b8d   :  { %10171 = vperm.xlu0 %13117, %v10128_v33   ;;  %10136 = vperm.xlu1 %13116, %v10128_v33  }
0x5b91   :  { %v10056_v11 = vpop.permute.xlu1 %10055  ;;  %13119 = vset.pattern.permute.xlu0 %v19216_v15  ;;  %13118 = vset.pattern.permute.xlu1 %v19320_v30  ;;  %v10080_v62 = vpop.permute.xlu0 %10079 }
0x5b92   :  { %v10118_v44 = vsel %vm2893_vm6, %v18607_v13, %v10056_v11  ;;  %10243 = vperm.xlu0 %13119, %v10128_v33   ;;  %10207 = vperm.xlu1 %13118, %v10128_v33   ;;  %v19321_v33 = vmov 3  }
0x5b93   :  { %v10124_v12 = vsel %vm9432_vm9, %v10118_v44, %v10080_v62 }
0x5b95   :  { %v10054_v46 = vpop.permute.xlu1 %10053  ;;  %v10104_v9 = vpop.permute.xlu0 %10103 }
0x5b96   :  { %v10131_v56 = vsel %vm10127_vm10, %v10124_v12, %v10104_v9  ;;  %13120 = vset.pattern.permute.xlu1 %v19240_v45  ;;  %v10117_v61 = vsel %vm2893_vm6, %v18614_v19, %v10054_v46 }
0x5b97   :  { %10255 = vperm.xlu0 %13119, %v10131_v56   ;;  %10151 = vperm.xlu1 %13120, %v10131_v56  }
0x5b99   :  { %v10102_v1 = vpop.permute.xlu1 %10101  ;;  %v10078_v31 = vpop.permute.xlu0 %10077 }
0x5b9a   :  { %v10123_v15 = vsel %vm9432_vm9, %v10117_v61, %v10078_v31  ;;  %v19322_v61 = vld [vmem:[#allocation3_spill] sm:$0xff] }
0x5b9b   :  { %13123 = vset.pattern.permute.xlu0 %v19240_v45  ;;  %13121 = vset.pattern.permute.xlu1 %v19267_v54  ;;  %v10130_v13 = vsel %vm10127_vm10, %v10123_v15, %v10102_v1  ;;  %v3871_v1 = vmul.f32 %v18677_v14, %v19322_v61  ;;  %v3843_v14 = vmul.f32 0.0, %v18663_v6  ;;  %v19326_v6 = vld [vmem:[#allocation27_spill] sm:$0xff]  ;;  %v7650_v61 = vmul.f32 0.0, %v18651_v23  ;;  %v19330_v23 = vld [vmem:[#allocation34_spill] sm:$0xff] }
0x5b9c   :  { %10183 = vperm.xlu1 %13121, %v10131_v56   ;;  %10146 = vperm.xlu0 %13123, %v10130_v13  }
0x5ba0   :  { %13122 = vset.pattern.permute.xlu1 %v19320_v30  ;;  %13126 = vset.pattern.permute.xlu0 %v19321_v33 }
0x5ba1   :  { %10219 = vperm.xlu1 %13122, %v10131_v56   ;;  %10251 = vperm.xlu0 %13126, %v10130_v13  }
0x5ba4   :  { %v10060_v11 = vpop.permute.xlu1 %10059  ;;  %v10084_v19 = vpop.permute.xlu0 %10083 }
0x5ba5   :  { %13124 = vset.pattern.permute.xlu1 %v19267_v54  ;;  %13130 = vset.pattern.permute.xlu0 %v19240_v45  ;;  %v10120_v15 = vsel %vm2893_vm6, %v18627_v24, %v10060_v11  ;;  %v3841_v24 = vmul.f32 0.0, %v18655_v58 }
0x5ba6   :  { %10179 = vperm.xlu1 %13124, %v10130_v13   ;;  %v10126_v31 = vsel %vm9432_vm9, %v10120_v15, %v10084_v19  ;;  %v19324_v19 = vld [vmem:[#allocation10_spill] sm:$0xff]  ;;  %v19325_v15 = vld [vmem:[#allocation7_spill] sm:$0xff] }
0x5ba7   :  { %v3875_v58 = vmul.f32 %v18693_v38, %v19325_v15  ;;  %v19328_v38 = vld [vmem:[#allocation29_spill] sm:$0xff]  ;;  %v7654_v15 = vmul.f32 0.0, %v18669_v27 }
0x5ba8   :  { %v10058_v62 = vpop.permute.xlu1 %10057  ;;  %v10108_v44 = vpop.permute.xlu0 %10107 }
0x5ba9   :  { %v10119_v12 = vsel %vm2893_vm6, %v18634_v59, %v10058_v62  ;;  %v10133_v25 = vsel %vm10127_vm10, %v10126_v31, %v10108_v44  ;;  %v3877_v59 = vadd.f32 %v3871_v1, %v3841_v24  ;;  %v7682_v1 = vmul.f32 %v18687_v18, %v19328_v38  ;;  %v19329_v31 = vld [vmem:[#allocation14_spill] sm:$0xff] }
0x5baa   :  { %13125 = vset.pattern.permute.xlu1 %v19320_v30  ;;  %v19335_v38 = vld [vmem:[#allocation38_spill] sm:$0xff] }
0x5bab   :  { %10215 = vperm.xlu1 %13125, %v10130_v13   ;;  %v19323_v13 = vld [vmem:[#allocation5_spill] sm:$0xff]  ;;  %v18743_v62 = vadd.f32 %v3877_v59, %v19324_v19  ;;  %v7652_v59 = vmul.f32 0.0, %v18661_v49  ;;  %v10284_v49 = vld [vmem:[%s19151_s15] sm:$0xff] }
0x5bac   :  { %v10106_v46 = vpop.permute.xlu1 %10105  ;;  %v10082_v9 = vpop.permute.xlu0 %10081  ;;  %v3873_v11 = vmul.f32 %v18685_v50, %v19323_v13  ;;  %v7680_v50 = vmul.f32 %v18679_v20, %v19326_v6 }
0x5bad   :  { %v10125_v56 = vsel %vm9432_vm9, %v10119_v12, %v10082_v9  ;;  %v3845_v12 = vmul.f32 0.0, %v18671_v60 }
0x5bae   :  { %v10132_v51 = vsel %vm10127_vm10, %v10125_v56, %v10106_v46  ;;  %v3879_v44 = vadd.f32 %v3873_v11, %v3843_v14  ;;  %v19327_v46 = vld [vmem:[#allocation12_spill] sm:$0xff]  ;;  %v7686_v60 = vadd.f32 %v7680_v50, %v7650_v61  ;;  %v7688_v11 = vadd.f32 %v7682_v1, %v7652_v59  ;;  %v19331_v14 = vld [vmem:[#allocation31_spill] sm:$0xff]  ;;  %v10287_v61 = vld [vmem:[%s19151_s15 + $0x18] sm:$0xff] }
0x5baf   :  { %13127 = vset.pattern.permute.xlu1 %v19240_v45  ;;  %10156 = vperm.xlu0 %13130, %v10132_v51   ;;  %v3881_v56 = vadd.f32 %v3875_v58, %v3845_v12  ;;  %v10285_v58 = vld [vmem:[%s19151_s15 + $0x8] sm:$0xff]  ;;  %v3840_v12 = vmul.f32 0.0, %v18649_v42  ;;  %v10286_v42 = vld [vmem:[%s19151_s15 + $0x10] sm:$0xff] }
0x5bb0   :  { %10161 = vperm.xlu1 %13127, %v10133_v25   ;;  %v18755_v9 = vadd.f32 %v3879_v44, %v19327_v46  ;;  %v18770_v13 = vadd.f32 %v7686_v60, %v19330_v23  ;;  %v19332_v44 = vld [vmem:[#allocation4_spill] sm:$0xff]  ;;  %v18786_v6 = vpack.c.bf16 %v10285_v58, %v10284_v49  ;;  %v19334_v46 = vld [vmem:[#allocation6_spill] sm:$0xff]  ;;  %v3842_v60 = vmul.f32 0.0, %v18659_v22  ;;  %v19336_v1 = vld [vmem:[#allocation9_spill] sm:$0xff] }
0x5bb1   :  { %v18763_v24 = vadd.f32 %v3881_v56, %v19329_v31  ;;  %v3870_v18 = vmul.f32 %v18673_v34, %v19332_v44  ;;  %v19333_v34 = vld [vmem:[#allocation36_spill] sm:$0xff]  ;;  %v3872_v56 = vmul.f32 %v18681_v43, %v19334_v46  ;;  %v18806_v43 = vpack.c.bf16 %v10287_v61, %v10286_v42  ;;  %v19341_v49 = vld [vmem:[#allocation13_spill] sm:$0xff] }
0x5bb2   :  { %v18789_v50 = vadd.f32 %v7688_v11, %v19333_v34  ;;  %12997 = vmatprep.subr.bf16.mxu1 %v18786_v6  ;;  %13005 = vmatprep.subr.bf16.mxu0 %v18786_v6  ;;  %v19337_v59 = vld [vmem:[#allocation8_spill] sm:$0xff]  ;;  %v19339_v11 = vld [vmem:[#allocation11_spill] sm:$0xff]  ;;  %v7653_v46 = vmul.f32 0.0, %v18665_v36 }
0x5bb3   :  { %13133 = vset.pattern.permute.xlu0 %v19321_v33  ;;  %12999 = vmatpush3.bf16.msra.mxu1 %v18786_v6  ;;  %v3874_v23 = vmul.f32 %v18689_v16, %v19337_v59  ;;  %v19338_v22 = vld [vmem:[#allocation28_spill] sm:$0xff] }
0x5bb4   :  { %13128 = vset.pattern.permute.xlu1 %v19267_v54  ;;  %10259 = vperm.xlu0 %13133, %v10132_v51   ;;  %v7679_v16 = vmul.f32 %v18675_v63, %v19338_v22  ;;  %v7651_v63 = vmul.f32 0.0, %v18657_v35  ;;  %v19345_v35 = vld [vmem:[#allocation37_spill] sm:$0xff] }
0x5bb5   :  { %10191 = vperm.xlu1 %13128, %v10133_v25   ;;  %13007 = vmatpush3.bf16.msra.mxu0 %v18786_v6 }
0x5bb6   :  { %13001 = vmatprep.subr.bf16.mxu1 %v18806_v43  ;;  %13009 = vmatprep.subr.bf16.mxu0 %v18806_v43 }
0x5bb7   :  { %13003 = vmatpush3.bf16.msra.mxu1 %v18806_v43 }
0x5bb8   :  { %10309 = vrot.lane.b32.xlu0 %v18743_v62, %s14013_s29  ;;  %13013 = vmatprep.subr.bf16.mxu1 %v18786_v6 }
0x5bb9   :  { %13129 = vset.pattern.permute.xlu1 %v19320_v30  ;;  %13138 = vset.pattern.permute.xlu0 %v19240_v45 }
0x5bba   :  { %10227 = vperm.xlu1 %13129, %v10133_v25   ;;  %13011 = vmatpush3.bf16.msra.mxu0 %v18806_v43 }
0x5bbc   :  { %10313 = vrot.lane.b32.xlu0 %v18755_v9, %s14013_s29 }
0x5bbd   :  { %v7677_v20 = vpop.permute.xlu1 %7676 }
0x5bbe   :  { %13131 = vset.pattern.permute.xlu1 %v19267_v54  ;;  %v7684_v19 = vmul.f32 %v7677_v20, %v19331_v14  ;;  %v3878_v20 = vadd.f32 %v3872_v56, %v3842_v60 }
0x5bbf   :  { %10187 = vperm.xlu1 %13131, %v10132_v51  }
0x5bc0   :  { %10317 = vrot.lane.b32.xlu0 %v18763_v24, %s14013_s29  ;;  %v7690_v27 = vadd.f32 %v7684_v19, %v7654_v15  ;;  %v18830_v14 = vadd.f32 %v3878_v20, %v19339_v11 }
0x5bc3   :  { %13132 = vset.pattern.permute.xlu1 %v19320_v30 }
0x5bc4   :  { %10223 = vperm.xlu1 %13132, %v10132_v51   ;;  %10464 = vrot.lane.b32.xlu0 %v18770_v13, %s14013_s29  ;;  %v3876_v51 = vadd.f32 %v3870_v18, %v3840_v12  ;;  %v19340_v18 = vld [vmem:[#allocation30_spill] sm:$0xff]  ;;  %v19342_v12 = vld [vmem:[#allocation33_spill] sm:$0xff] }
0x5bc5   :  { %v7681_v15 = vmul.f32 %v18683_v10, %v19340_v18  ;;  %v19344_v10 = vld [vmem:[#allocation35_spill] sm:$0xff] }
0x5bc6   :  { %v18813_v31 = vadd.f32 %v3876_v51, %v19336_v1 }
0x5bc8   :  { %13134 = vset.pattern.permute.xlu1 %v19321_v33  ;;  %10468 = vrot.lane.b32.xlu0 %v18789_v50, %s14013_s29  ;;  %v18809_v33 = vadd.f32 %v7690_v27, %v19335_v38  ;;  %v7687_v27 = vadd.f32 %v7681_v15, %v7651_v63  ;;  %v19346_v63 = vld [vmem:[#allocation52_spill] sm:$0xff] }
0x5bc9   :  { %10263 = vperm.xlu1 %13134, %v10133_v25   ;;  %v3844_v25 = vmul.f32 0.0, %v18667_v47  ;;  %v7649_v47 = vmul.f32 0.0, %v18645_v52  ;;  %v19343_v52 = vld [vmem:[#allocation32_spill] sm:$0xff] }
0x5bca   :  { %v7683_v51 = vmul.f32 %v18691_v29, %v19343_v52  ;;  %v18853_v56 = vadd.f32 %v7687_v27, %v19344_v10 }
0x5bcb   :  { %v3880_v19 = vadd.f32 %v3874_v23, %v3844_v25  ;;  %v7685_v44 = vadd.f32 %v7679_v16, %v7649_v47 }
0x5bcc   :  { %10472 = vrot.lane.b32.xlu0 %v18809_v33, %s14013_s29  ;;  %v7689_v42 = vadd.f32 %v7683_v51, %v7653_v46 }
0x5bcd   :  { %10307 = vrot.lane.b32.xlu1 %v18813_v31, %s14013_s29  ;;  %v18839_v58 = vadd.f32 %v3880_v19, %v19341_v49  ;;  %v18845_v34 = vadd.f32 %v7685_v44, %v19342_v12 }
0x5bce   :  { %13135 = vset.pattern.permute.xlu1 %v19240_v45  ;;  %v18858_v61 = vadd.f32 %v7689_v42, %v19345_v35 }
0x5bd1   :  { %10311 = vrot.lane.b32.xlu1 %v18830_v14, %s14013_s29 }
0x5bd5   :  { %10315 = vrot.lane.b32.xlu1 %v18839_v58, %s14013_s29 }
0x5bd9   :  { %10462 = vrot.lane.b32.xlu1 %v18845_v34, %s14013_s29 }
0x5bdd   :  { %10466 = vrot.lane.b32.xlu1 %v18853_v56, %s14013_s29 }
0x5be1   :  { %10470 = vrot.lane.b32.xlu1 %v18858_v61, %s14013_s29 }
0x5c02   :  { %v10142_v60 = vpop.permute.xlu1 %10141  ;;  %v10176_v29 = vpop.permute.xlu0 %10175 }
0x5c03   :  { %v10165_v38 = vmul.f32 0.0, %v10142_v60  ;;  %v10195_v36 = vmul.f32 %v10176_v29, %v17786_v32 }
0x5c05   :  { %v10201_v59 = vadd.f32 %v10195_v36, %v10165_v38 }
0x5c07   :  { %v10212_v1 = vpop.permute.xlu1 %10211  ;;  %v10248_v20 = vpop.permute.xlu0 %10247 }
0x5c08   :  { %v10231_v23 = vmul.f32 %v10212_v1, %v18072_v41  ;;  %v10267_v22 = vmul.f32 %v10248_v20, %v18352_v40 }
0x5c0a   :  { %v10237_v25 = vadd.f32 %v10231_v23, %v10201_v59 }
0x5c0c   :  { %v10273_v16 = vadd.f32 %v10267_v22, %v10237_v25  ;;  %v10137_v11 = vpop.permute.xlu1 %10136  ;;  %v10172_v19 = vpop.permute.xlu0 %10171 }
0x5c0d   :  { %v10164_v44 = vmul.f32 0.0, %v10137_v11  ;;  %v10194_v18 = vmul.f32 %v10172_v19, %v17789_v17 }
0x5c0e   :  { %v18866_v47 = vadd.f32 %v10273_v16, %v18494_v2 }
0x5c0f   :  { %v10200_v49 = vadd.f32 %v10194_v18, %v10164_v44 }
0x5c10   :  { %10619 = vrot.lane.b32.xlu0 %v18866_v47, %s14013_s29 }
0x5c11   :  { %v10208_v32 = vpop.permute.xlu1 %10207  ;;  %v10244_v15 = vpop.permute.xlu0 %10243 }
0x5c12   :  { %v10230_v41 = vmul.f32 %v10208_v32, %v19346_v63  ;;  %v10266_v40 = vmul.f32 %v10244_v15, %v18355_v57 }
0x5c14   :  { %v10236_v12 = vadd.f32 %v10230_v41, %v10200_v49 }
0x5c16   :  { %v10272_v27 = vadd.f32 %v10266_v40, %v10236_v12  ;;  %v10152_v52 = vpop.permute.xlu1 %10151  ;;  %v10256_v46 = vpop.permute.xlu0 %10255 }
0x5c17   :  { %v10167_v10 = vmul.f32 0.0, %v10152_v52  ;;  %v10269_v29 = vmul.f32 %v10256_v46, %v18365_v3 }
0x5c18   :  { %v18874_v51 = vadd.f32 %v10272_v27, %v18490_v26 }
0x5c1a   :  { %10617 = vrot.lane.b32.xlu1 %v18874_v51, %s14013_s29 }
0x5c1b   :  { %v10184_v17 = vpop.permute.xlu1 %10183  ;;  %v10147_v38 = vpop.permute.xlu0 %10146 }
0x5c1c   :  { %v10197_v2 = vmul.f32 %v10184_v17, %v17794_v5  ;;  %v10166_v59 = vmul.f32 0.0, %v10147_v38 }
0x5c1e   :  { %v10203_v35 = vadd.f32 %v10197_v2, %v10167_v10 }
0x5c20   :  { %v10220_v42 = vpop.permute.xlu1 %10219  ;;  %v10252_v5 = vpop.permute.xlu0 %10251 }
0x5c21   :  { %v10233_v60 = vmul.f32 %v10220_v42, %v18083_v48  ;;  %v10268_v3 = vmul.f32 %v10252_v5, %v18368_v53 }
0x5c23   :  { %v10239_v57 = vadd.f32 %v10233_v60, %v10203_v35  ;;  %v19348_v60 = vld [vmem:[#allocation56_spill] sm:$0xff] }
0x5c25   :  { %v10275_v36 = vadd.f32 %v10269_v29, %v10239_v57  ;;  %v10180_v1 = vpop.permute.xlu1 %10179 }
0x5c26   :  { %v10196_v20 = vmul.f32 %v10180_v1, %v17797_v7 }
0x5c27   :  { %v18882_v26 = vadd.f32 %v10275_v36, %v18504_v37 }
0x5c28   :  { %v10202_v25 = vadd.f32 %v10196_v20, %v10166_v59 }
0x5c29   :  { %10623 = vrot.lane.b32.xlu0 %v18882_v26, %s14013_s29 }
0x5c2a   :  { %v10216_v23 = vpop.permute.xlu1 %10215 }
0x5c2b   :  { %v10232_v48 = vmul.f32 %v10216_v23, %v18086_v55 }
0x5c2d   :  { %v10238_v22 = vadd.f32 %v10232_v48, %v10202_v25 }
0x5c2e   :  { %v10157_v37 = vpop.permute.xlu0 %10156 }
0x5c2f   :  { %v10274_v16 = vadd.f32 %v10268_v3, %v10238_v22  ;;  %v10162_v11 = vpop.permute.xlu1 %10161  ;;  %v10168_v49 = vmul.f32 0.0, %v10157_v37 }
0x5c31   :  { %v18890_v19 = vadd.f32 %v10274_v16, %v18500_v4  ;;  %v10169_v4 = vmul.f32 0.0, %v10162_v11  ;;  %v18934_v11 = vld [vmem:[%s19152_s16] ss:$0 sm:$0xff] }
0x5c33   :  { %10621 = vrot.lane.b32.xlu1 %v18890_v19, %s14013_s29  ;;  %v10260_v18 = vpop.permute.xlu0 %10259 }
0x5c34   :  { %v10192_v7 = vpop.permute.xlu1 %10191  ;;  %v10270_v27 = vmul.f32 %v10260_v18, %v18378_v21 }
0x5c35   :  { %v10199_v55 = vmul.f32 %v10192_v7, %v17803_v0 }
0x5c37   :  { %v10310_v53 = vpop.permute.xlu0 %10309  ;;  %v10205_v17 = vadd.f32 %v10199_v55, %v10169_v4 }
0x5c39   :  { %v10228_v44 = vpop.permute.xlu1 %10227 }
0x5c3a   :  { %v10235_v40 = vmul.f32 %v10228_v44, %v18097_v39 }
0x5c3b   :  { %v10314_v42 = vpop.permute.xlu0 %10313 }
0x5c3c   :  { %v10241_v10 = vadd.f32 %v10235_v40, %v10205_v17 }
0x5c3e   :  { %v10188_v32 = vpop.permute.xlu1 %10187 }
0x5c3f   :  { %v10198_v15 = vmul.f32 %v10188_v32, %v17806_v8  ;;  %v19347_v8 = vld [vmem:[#allocation55_spill] sm:$0xff]  ;;  %v10318_v21 = vpop.permute.xlu0 %10317 }
0x5c41   :  { %v10204_v41 = vadd.f32 %v10198_v15, %v10168_v49 }
0x5c43   :  { %v10224_v63 = vpop.permute.xlu1 %10223  ;;  %v10465_v1 = vpop.permute.xlu0 %10464 }
0x5c44   :  { %v10234_v12 = vmul.f32 %v10224_v63, %v18094_v28  ;;  %v19349_v28 = vld [vmem:[#allocation57_spill] sm:$0xff] }
0x5c46   :  { %v10240_v52 = vadd.f32 %v10234_v12, %v10204_v41  ;;  %v18942_v41 = vld [vmem:[%s19153_s17] sm:$0xff] }
0x5c48   :  { %v10276_v2 = vadd.f32 %v10270_v27, %v10240_v52  ;;  %v10264_v46 = vpop.permute.xlu1 %10263 }
0x5c49   :  { %v10271_v35 = vmul.f32 %v10264_v46, %v19347_v8 }
0x5c4a   :  { %v18901_v0 = vadd.f32 %v10276_v2, %v19348_v60 }
0x5c4b   :  { %v10277_v29 = vadd.f32 %v10271_v35, %v10241_v10 }
0x5c4c   :  { %v10308_v57 = vpop.permute.xlu1 %10307  ;;  %10625 = vrot.lane.b32.xlu1 %v18901_v0, %s14013_s29 }
0x5c4d   :  { %v18906_v39 = vadd.f32 %v10277_v29, %v19349_v28  ;;  %12736 = vmatprep.mubr.msk.f32.mxu1 %vm523_vm5, %v10308_v57 }
0x5c4e   :  { %12737 = vmatmul.mubr.msk.f32.vlgmr.msra.gmra.mrb[252].mxu1 %vm523_vm5, %v10310_v53 }
0x5c4f   :  { %10627 = vrot.lane.b32.xlu0 %v18906_v39, %s14013_s29  ;;  %13015 = vmatpush3.bf16.msra.mxu1 %v18786_v6  ;;  %v10469_v6 = vpop.permute.xlu0 %10468 }
0x5c50   :  { %v10312_v38 = vpop.permute.xlu1 %10311  ;;  %13017 = vmatprep.subr.bf16.mxu1 %v18806_v43 }
0x5c51   :  { %12739 = vmatprep.mubr.msk.f32.mxu1 %vm523_vm5, %v10312_v38 }
0x5c52   :  { %12740 = vmatmul.mubr.msk.f32.gmra.mrb[254].mxu1 %vm523_vm5, %v10314_v42 }
0x5c53   :  { %13019 = vmatpush3.bf16.msra.mxu1 %v18806_v43  ;;  %v10473_v23 = vpop.permute.xlu0 %10472 }
0x5c54   :  { %v10316_v36 = vpop.permute.xlu1 %10315 }
0x5c55   :  { %12742 = vmatprep.mubr.msk.f32.mxu1 %vm523_vm5, %v10316_v36 }
0x5c56   :  { %12743 = vmatmul.mubr.msk.f32.gmra.mrb[0].mxu1 %vm523_vm5, %v10318_v21 }
0x5c58   :  { %v10463_v20 = vpop.permute.xlu1 %10462 }
0x5c59   :  { %12753 = vmatprep.mubr.msk.f32.mxu0 %vm523_vm5, %v10463_v20  ;;  %v18960_v20 = vld [vmem:[%s19153_s17 + $0x20] sm:$0xff] }
0x5c5a   :  { %12754 = vmatmul.mubr.msk.f32.vlgmr.msra.gmra.mrb[198].mxu0 %vm523_vm5, %v10465_v1  ;;  %v10290_v1 = vld [vmem:[%s19153_s17 + $0x8] sm:$0xff] }
0x5c5c   :  { %v10467_v59 = vpop.permute.xlu1 %10466 }
0x5c5d   :  { %12756 = vmatprep.mubr.msk.f32.mxu0 %vm523_vm5, %v10467_v59 }
0x5c5e   :  { %12757 = vmatmul.mubr.msk.f32.gmra.mrb[4].mxu0 %vm523_vm5, %v10469_v6 }
0x5c60   :  { %v10471_v5 = vpop.permute.xlu1 %10470 }
0x5c61   :  { %12759 = vmatprep.mubr.msk.f32.mxu0 %vm523_vm5, %v10471_v5 }
0x5c62   :  { %12760 = vmatmul.mubr.msk.f32.gmra.mrb[6].mxu0 %vm523_vm5, %v10473_v23 }
0x5c82   :  { %v10620_v25 = vpop.permute.xlu0 %10619 }
0x5c8c   :  { %v10618_v43 = vpop.permute.xlu1 %10617 }
0x5c8d   :  { %12770 = vmatprep.mubr.msk.f32.mxu1 %vm523_vm5, %v10618_v43 }
0x5c8e   :  { %12771 = vmatmul.mubr.msk.f32.vlgmr.msra.gmra.mrb[2].mxu1 %vm523_vm5, %v10620_v25 }
0x5c9b   :  { %v10624_v3 = vpop.permute.xlu0 %10623 }
0x5ca5   :  { %v10622_v48 = vpop.permute.xlu1 %10621 }
0x5ca6   :  { %12773 = vmatprep.mubr.msk.f32.mxu1 %vm523_vm5, %v10622_v48 }
0x5ca7   :  { %12774 = vmatmul.mubr.msk.f32.gmra.mrb[4].mxu1 %vm523_vm5, %v10624_v3 }
0x5cbe   :  { %v10626_v22 = vpop.permute.xlu1 %10625 }
0x5cbf   :  { %12776 = vmatprep.mubr.msk.f32.mxu1 %vm523_vm5, %v10626_v22 }
0x5cc1   :  { %v10628_v16 = vpop.permute.xlu0 %10627 }
0x5cc2   :  { %12777 = vmatmul.mubr.msk.f32.gmra.mrb[6].mxu1 %vm523_vm5, %v10628_v16  ;;  %v10291_v16 = vld [vmem:[%s19153_s17 + $0x10] sm:$0xff] }
0x5d21   :  { %v12738_v7 = vpop.f32.mrb[252].mxu1 }
0x5d22   :  { %v10397_v37 = vpop.f32.mrb[253].mxu1  ;;  %v10403_v49 = vadd.f32 %v12738_v7, %v18934_v11 }
0x5d23   :  { %v10398_v44 = vadd.f32 %v18934_v11, %v10397_v37 }
0x5d25   :  { %13931 = vtanh.f32 %v10398_v44  ;;  %v12741_v18 = vpop.f32.mrb[254].mxu1 }
0x5d26   :  { %v10407_v32 = vpop.f32.mrb[255].mxu1  ;;  %13933 = vtanh.f32 %v10403_v49  ;;  %v10413_v28 = vadd.f32 %v12741_v18, %v18934_v11  ;;  %v18975_v49 = vld [vmem:[%s19153_s17 + $0x28] sm:$0xff] }
0x5d27   :  { %v10408_v17 = vadd.f32 %v18934_v11, %v10407_v32 }
0x5d29   :  { %v12744_v15 = vpop.f32.mrb[0].mxu1 }
0x5d2a   :  { %v10417_v55 = vpop.f32.mrb[1].mxu1  ;;  %v10423_v42 = vadd.f32 %v12744_v15, %v18934_v11 }
0x5d2b   :  { %v10418_v53 = vadd.f32 %v18934_v11, %v10417_v55 }
0x5d2d   :  { %v12755_v63 = vpop.f32.mrb[198].mxu0  ;;  %13935 = vtanh.f32 %v10418_v53 }
0x5d2e   :  { %v10558_v12 = vadd.f32 %v12755_v63, %v18934_v11  ;;  %v10552_v4 = vpop.f32.mrb[199].mxu0 }
0x5d2f   :  { %v13932_v40 = vpop.eup %13931  ;;  %v10553_v27 = vadd.f32 %v18934_v11, %v10552_v4 }
0x5d30   :  { %13937 = vtanh.f32 %v10558_v12  ;;  %v10432_v52 = vmul.f32 %v13932_v40, %v18942_v41  ;;  %v13934_v57 = vpop.eup %13933 }
0x5d31   :  { %13939 = vtanh.f32 %v10553_v27  ;;  %v12758_v2 = vpop.f32.mrb[4].mxu0  ;;  %v10433_v3 = vmul.f32 %v13934_v57, %v10290_v1 }
0x5d32   :  { %v10562_v46 = vpop.f32.mrb[5].mxu0  ;;  %v10438_v10 = vsel %vm177_vm0, %v10432_v52, 0.0  ;;  %13941 = vtanh.f32 %v10408_v17  ;;  %v10568_v23 = vadd.f32 %v12758_v2, %v18934_v11  ;;  %v10292_v52 = vld [vmem:[%s19153_s17 + $0x18] sm:$0xff] }
0x5d33   :  { %10439 = vadd.xlane.f32.xlu1 %v10438_v10  ;;  %v10563_v8 = vadd.f32 %v18934_v11, %v10562_v46  ;;  %13943 = vtanh.f32 %v10423_v42  ;;  %v10441_v18 = vsel %vm177_vm0, %v10433_v3, 0.0 }
0x5d35   :  { %v12761_v35 = vpop.f32.mrb[6].mxu0  ;;  %13945 = vtanh.f32 %v10563_v8 }
0x5d36   :  { %v10572_v60 = vpop.f32.mrb[7].mxu0  ;;  %v10578_v38 = vadd.f32 %v12761_v35, %v18934_v11 }
0x5d37   :  { %v10573_v29 = vadd.f32 %v18934_v11, %v10572_v60  ;;  %v13936_v21 = vpop.eup %13935 }
0x5d38   :  { %v10436_v25 = vmul.f32 %v13936_v21, %v18960_v20 }
0x5d39   :  { %13947 = vtanh.f32 %v10573_v29 }
0x5d3a   :  { %v13938_v36 = vpop.eup %13937  ;;  %13949 = vtanh.f32 %v10413_v28  ;;  %v10450_v37 = vsel %vm177_vm0, %v10436_v25, 0.0 }
0x5d3b   :  { %v13940_v6 = vpop.eup %13939  ;;  %v10588_v59 = vmul.f32 %v13938_v36, %v10290_v1  ;;  %13951 = vtanh.f32 %v10578_v38 }
0x5d3c   :  { %v10587_v5 = vmul.f32 %v13940_v6, %v18942_v41  ;;  %v13942_v22 = vpop.eup %13941  ;;  %13953 = vtanh.f32 %v10568_v23 }
0x5d3d   :  { %v10596_v43 = vsel %vm177_vm0, %v10588_v59, 0.0  ;;  %v13944_v7 = vpop.eup %13943  ;;  %v10434_v32 = vmul.f32 %v13942_v22, %v10291_v16 }
0x5d3e   :  { %10597 = vadd.xlane.f32.xlu1 %v10596_v43  ;;  %v10593_v48 = vsel %vm177_vm0, %v10587_v5, 0.0  ;;  %v10437_v40 = vmul.f32 %v13944_v7, %v18975_v49 }
0x5d3f   :  { %10594 = vadd.xlane.f32.xlu0 %v10593_v48  ;;  %v13946_v44 = vpop.eup %13945  ;;  %v10444_v63 = vsel %vm177_vm0, %v10434_v32, 0.0 }
0x5d40   :  { %v10589_v4 = vmul.f32 %v13946_v44, %v10291_v16  ;;  %v10453_v2 = vsel %vm177_vm0, %v10437_v40, 0.0 }
0x5d42   :  { %10451 = vadd.xlane.f32.xlu1 %v10450_v37  ;;  %v10599_v17 = vsel %vm177_vm0, %v10589_v4, 0.0 }
0x5d43   :  { %v13948_v15 = vpop.eup %13947  ;;  %10442 = vadd.xlane.f32.xlu0 %v10441_v18 }
0x5d44   :  { %v10591_v55 = vmul.f32 %v13948_v15, %v18960_v20  ;;  %v13950_v53 = vpop.eup %13949 }
0x5d45   :  { %v13952_v27 = vpop.eup %13951  ;;  %v10435_v46 = vmul.f32 %v13950_v53, %v10292_v52 }
0x5d46   :  { %v10605_v12 = vsel %vm177_vm0, %v10591_v55, 0.0  ;;  %v10592_v10 = vmul.f32 %v13952_v27, %v18975_v49  ;;  %v13954_v42 = vpop.eup %13953 }
0x5d47   :  { %10445 = vadd.xlane.f32.xlu0 %v10444_v63  ;;  %10606 = vadd.xlane.f32.xlu1 %v10605_v12  ;;  %v10447_v8 = vsel %vm177_vm0, %v10435_v46, 0.0  ;;  %v10590_v60 = vmul.f32 %v13954_v42, %v10292_v52 }
0x5d48   :  { %v10608_v35 = vsel %vm177_vm0, %v10592_v10, 0.0 }
0x5d49   :  { %v10602_v29 = vsel %vm177_vm0, %v10590_v60, 0.0 }
0x5d4b   :  { %10600 = vadd.xlane.f32.xlu0 %v10599_v17  ;;  %10454 = vadd.xlane.f32.xlu1 %v10453_v2 }
0x5d4f   :  { %10448 = vadd.xlane.f32.xlu0 %v10447_v8  ;;  %10609 = vadd.xlane.f32.xlu1 %v10608_v35 }
0x5d53   :  { %10603 = vadd.xlane.f32.xlu0 %v10602_v29 }
0x5d61   :  { %v12772_v57 = vpop.f32.mrb[2].mxu1 }
0x5d62   :  { %v10713_v28 = vadd.f32 %v12772_v57, %v18934_v11  ;;  %v10707_v21 = vpop.f32.mrb[3].mxu1 }
0x5d63   :  { %v10708_v38 = vadd.f32 %v18934_v11, %v10707_v21 }
0x5d64   :  { %13955 = vtanh.f32 %v10713_v28 }
0x5d65   :  { %13957 = vtanh.f32 %v10708_v38 }
0x5d6e   :  { %v13956_v36 = vpop.eup %13955 }
0x5d6f   :  { %v13958_v6 = vpop.eup %13957  ;;  %v10743_v59 = vmul.f32 %v13956_v36, %v10290_v1 }
0x5d70   :  { %v10742_v5 = vmul.f32 %v13958_v6, %v18942_v41 }
0x5d71   :  { %v10751_v23 = vsel %vm177_vm0, %v10743_v59, 0.0 }
0x5d72   :  { %10752 = vadd.xlane.f32.xlu1 %v10751_v23  ;;  %v10748_v43 = vsel %vm177_vm0, %v10742_v5, 0.0 }
0x5d73   :  { %10749 = vadd.xlane.f32.xlu0 %v10748_v43 }
0x5d7a   :  { %v12775_v25 = vpop.f32.mrb[4].mxu1 }
0x5d7b   :  { %v10723_v48 = vadd.f32 %v12775_v25, %v18934_v11  ;;  %v10717_v3 = vpop.f32.mrb[5].mxu1 }
0x5d7c   :  { %v10718_v22 = vadd.f32 %v18934_v11, %v10717_v3 }
0x5d7d   :  { %13959 = vtanh.f32 %v10723_v48 }
0x5d7e   :  { %13961 = vtanh.f32 %v10718_v22 }
0x5d87   :  { %v13960_v7 = vpop.eup %13959 }
0x5d88   :  { %v13962_v37 = vpop.eup %13961  ;;  %v10745_v41 = vmul.f32 %v13960_v7, %v10292_v52 }
0x5d89   :  { %v10744_v44 = vmul.f32 %v13962_v37, %v10291_v16 }
0x5d8a   :  { %v10757_v18 = vsel %vm177_vm0, %v10745_v41, 0.0 }
0x5d8b   :  { %v10754_v1 = vsel %vm177_vm0, %v10744_v44, 0.0 }
0x5d8c   :  { %10755 = vadd.xlane.f32.xlu0 %v10754_v1 }
0x5d90   :  { %10758 = vadd.xlane.f32.xlu0 %v10757_v18 }
0x5d95   :  { %v12778_v32 = vpop.f32.mrb[6].mxu1 }
0x5d96   :  { %v10733_v15 = vadd.f32 %v12778_v32, %v18934_v11  ;;  %v10727_v55 = vpop.f32.mrb[7].mxu1 }
0x5d97   :  { %v10728_v53 = vadd.f32 %v18934_v11, %v10727_v55 }
0x5d98   :  { %13963 = vtanh.f32 %v10733_v15 }
0x5d99   :  { %13965 = vtanh.f32 %v10728_v53 }
0x5da2   :  { %v13964_v63 = vpop.eup %13963 }
0x5da3   :  { %v13966_v12 = vpop.eup %13965  ;;  %v10747_v40 = vmul.f32 %v13964_v63, %v18975_v49 }
0x5da4   :  { %v10746_v4 = vmul.f32 %v13966_v12, %v18960_v20 }
0x5da5   :  { %v10763_v27 = vsel %vm177_vm0, %v10747_v40, 0.0 }
0x5da6   :  { %v10760_v16 = vsel %vm177_vm0, %v10746_v4, 0.0 }
0x5da7   :  { %10761 = vadd.xlane.f32.xlu1 %v10760_v16 }
0x5dab   :  { %10764 = vadd.xlane.f32.xlu1 %v10763_v27 }
0x5dc0   :  { %v10440_v52 = vpop.xlane.xlu1 %10439 }
0x5dcb   :  { %v10598_v17 = vpop.xlane.xlu1 %10597 }
0x5dcc   :  { %v10595_v10 = vpop.xlane.xlu0 %10594 }
0x5dcd   :  { %v10766_v21 = vsel %vm2893_vm6, %v10440_v52, %v10595_v10 }
0x5dcf   :  { %v10452_v2 = vpop.xlane.xlu1 %10451 }
0x5dd0   :  { %v10443_v42 = vpop.xlane.xlu0 %10442 }
0x5dd1   :  { %v10767_v49 = vsel %vm2893_vm6, %v10443_v42, %v10598_v17 }
0x5dd4   :  { %v10607_v46 = vpop.xlane.xlu1 %10606  ;;  %v10446_v8 = vpop.xlane.xlu0 %10445 }
0x5dd5   :  { %v10770_v11 = vsel %vm2893_vm6, %v10452_v2, %v10607_v46 }
0x5dd8   :  { %v10601_v35 = vpop.xlane.xlu0 %10600  ;;  %v10455_v60 = vpop.xlane.xlu1 %10454 }
0x5dd9   :  { %v10768_v23 = vsel %vm2893_vm6, %v10446_v8, %v10601_v35 }
0x5ddc   :  { %v10449_v20 = vpop.xlane.xlu0 %10448  ;;  %v10610_v29 = vpop.xlane.xlu1 %10609 }
0x5ddd   :  { %v10771_v18 = vsel %vm2893_vm6, %v10455_v60, %v10610_v29 }
0x5de0   :  { %v10604_v57 = vpop.xlane.xlu0 %10603 }
0x5de1   :  { %v10769_v3 = vsel %vm2893_vm6, %v10449_v20, %v10604_v57 }
0x5dff   :  { %v10753_v28 = vpop.xlane.xlu1 %10752 }
0x5e00   :  { %v10773_v38 = vsel %vm9432_vm9, %v10767_v49, %v10753_v28  ;;  %v10750_v36 = vpop.xlane.xlu0 %10749 }
0x5e01   :  { %v10772_v6 = vsel %vm9432_vm9, %v10766_v21, %v10750_v36  ;;  %v10781_v59 = vsel %vm10127_vm10, %v10773_v38, -inf }
0x5e02   :  { %10782 = vmax.xlane.f32.xlu1 %v10781_v59  ;;  %v10778_v5 = vsel %vm10127_vm10, %v10772_v6, -inf }
0x5e03   :  { %10779 = vmax.xlane.f32.xlu0 %v10778_v5 }
0x5e19   :  { %v10756_v43 = vpop.xlane.xlu0 %10755 }
0x5e1a   :  { %v10774_v25 = vsel %vm9432_vm9, %v10768_v23, %v10756_v43 }
0x5e1b   :  { %v10784_v48 = vsel %vm10127_vm10, %v10774_v25, -inf }
0x5e1c   :  { %10785 = vmax.xlane.f32.xlu0 %v10784_v48 }
0x5e1d   :  { %v10759_v22 = vpop.xlane.xlu0 %10758 }
0x5e1e   :  { %v10775_v7 = vsel %vm9432_vm9, %v10769_v3, %v10759_v22 }
0x5e1f   :  { %v10787_v37 = vsel %vm10127_vm10, %v10775_v7, -inf }
0x5e20   :  { %10788 = vmax.xlane.f32.xlu0 %v10787_v37 }
0x5e34   :  { %v10762_v44 = vpop.xlane.xlu1 %10761 }
0x5e35   :  { %v10776_v1 = vsel %vm9432_vm9, %v10770_v11, %v10762_v44 }
0x5e36   :  { %v10790_v41 = vsel %vm10127_vm10, %v10776_v1, -inf }
0x5e37   :  { %10791 = vmax.xlane.f32.xlu1 %v10790_v41 }
0x5e38   :  { %v10765_v32 = vpop.xlane.xlu1 %10764 }
0x5e39   :  { %v10777_v15 = vsel %vm9432_vm9, %v10771_v18, %v10765_v32 }
0x5e3a   :  { %v10793_v55 = vsel %vm10127_vm10, %v10777_v15, -inf }
0x5e3b   :  { %10794 = vmax.xlane.f32.xlu1 %v10793_v55 }
0x5e8f   :  { %v10783_v53 = vpop.xlane.xlu1 %10782 }
0x5e90   :  { %v10797_v63 = vsub.f32 %v10773_v38, %v10783_v53  ;;  %v10780_v12 = vpop.xlane.xlu0 %10779 }
0x5e91   :  { %v10796_v4 = vsub.f32 %v10772_v6, %v10780_v12 }
0x5e92   :  { %v10804_v16 = vmul.f32 1.442695, %v10797_v63 }
0x5e93   :  { %v10802_v40 = vmul.f32 1.442695, %v10796_v4 }
0x5e94   :  { %13967 = vpow2.f32 %v10804_v16 }
0x5e95   :  { %13969 = vpow2.f32 %v10802_v40 }
0x5e9e   :  { %v13968_v27 = vpop.eup %13967 }
0x5e9f   :  { %v13970_v52 = vpop.eup %13969  ;;  %v10817_v17 = vsel %vm10127_vm10, %v13968_v27, 0.0 }
0x5ea0   :  { %10818 = vadd.xlane.f32.xlu1 %v10817_v17  ;;  %v10814_v2 = vsel %vm10127_vm10, %v13970_v52, 0.0 }
0x5ea1   :  { %10815 = vadd.xlane.f32.xlu0 %v10814_v2 }
0x5ea9   :  { %v10786_v46 = vpop.xlane.xlu0 %10785 }
0x5eaa   :  { %v10798_v11 = vsub.f32 %v10774_v25, %v10786_v46 }
0x5eac   :  { %v10806_v10 = vmul.f32 1.442695, %v10798_v11 }
0x5ead   :  { %v10789_v42 = vpop.xlane.xlu0 %10788 }
0x5eae   :  { %13971 = vpow2.f32 %v10806_v10  ;;  %v10799_v8 = vsub.f32 %v10775_v7, %v10789_v42 }
0x5eb0   :  { %v10808_v35 = vmul.f32 1.442695, %v10799_v8 }
0x5eb2   :  { %13973 = vpow2.f32 %v10808_v35 }
0x5eb8   :  { %v13972_v60 = vpop.eup %13971 }
0x5eb9   :  { %v10820_v20 = vsel %vm10127_vm10, %v13972_v60, 0.0 }
0x5eba   :  { %10821 = vadd.xlane.f32.xlu0 %v10820_v20 }
0x5ebc   :  { %v13974_v29 = vpop.eup %13973 }
0x5ebd   :  { %v10823_v57 = vsel %vm10127_vm10, %v13974_v29, 0.0 }
0x5ebe   :  { %10824 = vadd.xlane.f32.xlu0 %v10823_v57 }
0x5ec4   :  { %v10792_v49 = vpop.xlane.xlu1 %10791 }
0x5ec5   :  { %v10800_v28 = vsub.f32 %v10776_v1, %v10792_v49 }
0x5ec7   :  { %v10810_v21 = vmul.f32 1.442695, %v10800_v28 }
0x5ec8   :  { %v10795_v38 = vpop.xlane.xlu1 %10794 }
0x5ec9   :  { %13975 = vpow2.f32 %v10810_v21  ;;  %v10801_v36 = vsub.f32 %v10777_v15, %v10795_v38 }
0x5ecb   :  { %v10812_v6 = vmul.f32 1.442695, %v10801_v36 }
0x5ecd   :  { %13977 = vpow2.f32 %v10812_v6 }
0x5ed3   :  { %v13976_v59 = vpop.eup %13975 }
0x5ed4   :  { %v10826_v5 = vsel %vm10127_vm10, %v13976_v59, 0.0 }
0x5ed5   :  { %10827 = vadd.xlane.f32.xlu1 %v10826_v5 }
0x5ed7   :  { %v13978_v23 = vpop.eup %13977 }
0x5ed8   :  { %v10829_v43 = vsel %vm10127_vm10, %v13978_v23, 0.0 }
0x5ed9   :  { %10830 = vadd.xlane.f32.xlu1 %v10829_v43 }
0x5f2d   :  { %v10819_v25 = vpop.xlane.xlu1 %10818 }
0x5f2e   :  { %13979 = vrcp.f32 %v10819_v25  ;;  %v10816_v48 = vpop.xlane.xlu0 %10815 }
0x5f2f   :  { %13981 = vrcp.f32 %v10816_v48 }
0x5f38   :  { %v13980_v3 = vpop.eup %13979 }
0x5f39   :  { %v13982_v22 = vpop.eup %13981  ;;  %v10839_v7 = vmul.f32 %v13980_v3, %v13968_v27  ;;  %v10958_v27 = vld [vmem:[%s19155_s18] sm:$0xff] }
0x5f3a   :  { %v10838_v37 = vmul.f32 %v13982_v22, %v13970_v52  ;;  %v10959_v52 = vld [vmem:[%s19155_s18 + $0x8] sm:$0xff]  ;;  %v27_v22 = vstv %s19156_s19 }
0x5f3b   :  { %10857 = vperm.xlu1 %13135, %v10839_v7   ;;  %10845 = vst.msk [vmem:[%s19154_s21 + $0x8] sm:$0xff] %vm10127_vm10, %v10839_v7  ;;  %v13020_v17 = vpack.c.bf16 %v10959_v52, %v10958_v27  ;;  %28 = vst [vmem:[#allocation2] sm:$0x1] %v27_v22 }
0x5f3c   :  { %10852 = vperm.xlu0 %13138, %v10838_v37   ;;  %10844 = vst.msk [vmem:[%s19154_s21] sm:$0xff] %vm10127_vm10, %v10838_v37 }
0x5f3d   :  { %13021 = vmatprep.subr.bf16.mxu0 %v13020_v17  ;;  %13028 = vmatprep.subr.bf16.mxu1 %v13020_v17 }
0x5f3e   :  { %13023 = vmatpush3.bf16.msra.mxu0 %v13020_v17  ;;  %13030 = vmatpush3.bf16.msra.mxu1 %v13020_v17 }
0x5f3f   :  { %13136 = vset.pattern.permute.xlu1 %v19267_v54 }
0x5f40   :  { %10891 = vperm.xlu1 %13136, %v10839_v7   ;;  %13142 = vset.pattern.permute.xlu0 %v19267_v54 }
0x5f44   :  { %13137 = vset.pattern.permute.xlu1 %v19320_v30 }
0x5f45   :  { %10927 = vperm.xlu1 %13137, %v10839_v7  }
0x5f47   :  { %v10822_v44 = vpop.xlane.xlu0 %10821 }
0x5f48   :  { %13983 = vrcp.f32 %v10822_v44 }
0x5f49   :  { %13139 = vset.pattern.permute.xlu1 %v19267_v54 }
0x5f4a   :  { %10887 = vperm.xlu1 %13139, %v10838_v37  }
0x5f4b   :  { %v10825_v1 = vpop.xlane.xlu0 %10824 }
0x5f4c   :  { %13985 = vrcp.f32 %v10825_v1 }
0x5f4e   :  { %13140 = vset.pattern.permute.xlu1 %v19320_v30 }
0x5f4f   :  { %10923 = vperm.xlu1 %13140, %v10838_v37  }
0x5f52   :  { %v13984_v41 = vpop.eup %13983 }
0x5f53   :  { %13141 = vset.pattern.permute.xlu1 %v19240_v45  ;;  %v10840_v18 = vmul.f32 %v13984_v41, %v13972_v60 }
0x5f55   :  { %10846 = vst.msk [vmem:[%s19154_s21 + $0x10] sm:$0xff] %vm10127_vm10, %v10840_v18 }
0x5f56   :  { %v13986_v32 = vpop.eup %13985 }
0x5f57   :  { %v10841_v15 = vmul.f32 %v13986_v32, %v13974_v29 }
0x5f59   :  { %10899 = vperm.xlu0 %13142, %v10841_v15   ;;  %10847 = vst.msk [vmem:[%s19154_s21 + $0x18] sm:$0xff] %vm10127_vm10, %v10841_v15  ;;  %10867 = vperm.xlu1 %13141, %v10841_v15  }
0x5f5d   :  { %13144 = vset.pattern.permute.xlu0 %v19320_v30  ;;  %10862 = vperm.xlu1 %13141, %v10840_v18  }
0x5f5e   :  { %10931 = vperm.xlu0 %13144, %v10840_v18  }
0x5f61   :  { %13143 = vset.pattern.permute.xlu1 %v19267_v54 }
0x5f62   :  { %v10828_v55 = vpop.xlane.xlu1 %10827  ;;  %10895 = vperm.xlu1 %13143, %v10840_v18   ;;  %13148 = vset.pattern.permute.xlu0 %v19267_v54 }
0x5f63   :  { %13987 = vrcp.f32 %v10828_v55 }
0x5f66   :  { %v10831_v53 = vpop.xlane.xlu1 %10830  ;;  %13145 = vset.pattern.permute.xlu1 %v19240_v45 }
0x5f67   :  { %13989 = vrcp.f32 %v10831_v53 }
0x5f6d   :  { %v13988_v63 = vpop.eup %13987 }
0x5f6e   :  { %v10842_v12 = vmul.f32 %v13988_v63, %v13976_v59 }
0x5f70   :  { %10848 = vst.msk [vmem:[%s19154_s21 + $0x20] sm:$0xff] %vm10127_vm10, %v10842_v12  ;;  %10903 = vperm.xlu0 %13148, %v10842_v12  }
0x5f71   :  { %v13990_v4 = vpop.eup %13989 }
0x5f72   :  { %v10843_v16 = vmul.f32 %v13990_v4, %v13978_v23 }
0x5f74   :  { %13150 = vset.pattern.permute.xlu0 %v19320_v30  ;;  %10849 = vst.msk [vmem:[%s19154_s21 + $0x28] sm:$0xff] %vm10127_vm10, %v10843_v16  ;;  %10877 = vperm.xlu1 %13145, %v10843_v16  }
0x5f75   :  { %10943 = vperm.xlu0 %13150, %v10843_v16  }
0x5f78   :  { %13146 = vset.pattern.permute.xlu1 %v19267_v54  ;;  %v10960_v54 = vld [vmem:[%s19155_s18 + $0x10] sm:$0xff] }
0x5f79   :  { %10907 = vperm.xlu1 %13146, %v10843_v16  }
0x5f7d   :  { %13147 = vset.pattern.permute.xlu1 %v19240_v45  ;;  %v10961_v45 = vld [vmem:[%s19155_s18 + $0x18] sm:$0xff] }
0x5f7e   :  { %10872 = vperm.xlu1 %13147, %v10842_v12  }
0x5f82   :  { %13149 = vset.pattern.permute.xlu1 %v19320_v30  ;;  %v13024_v30 = vpack.c.bf16 %v10961_v45, %v10960_v54 }
0x5f83   :  { %10939 = vperm.xlu1 %13149, %v10842_v12   ;;  %v11397_v12 = vld [vmem:[#allocation2] ss:$0 sm:$0xff] }
0x5f84   :  { %13025 = vmatprep.subr.bf16.mxu0 %v13024_v30  ;;  %13029 = vmatprep.subr.bf16.mxu1 %v13024_v30 }
0x5f85   :  { %13027 = vmatpush3.bf16.msra.mxu0 %v13024_v30  ;;  %13031 = vmatpush3.bf16.msra.mxu1 %v13024_v30 }
0x5f87   :  { %10935 = vperm.xlu1 %13149, %v10841_v15  }
0x5fba   :  { %v10858_v40 = vpop.permute.xlu1 %10857 }
0x5fbb   :  { %v10881_v11 = vmul.f32 %v10858_v40, %v18743_v62  ;;  %v10853_v20 = vpop.permute.xlu0 %10852 }
0x5fbc   :  { %v10880_v57 = vmul.f32 %v10853_v20, %v18813_v31 }
0x5fbf   :  { %v10892_v2 = vpop.permute.xlu1 %10891 }
0x5fc0   :  { %v10911_v46 = vmul.f32 %v10892_v2, %v18770_v13 }
0x5fc2   :  { %v10917_v42 = vadd.f32 %v10911_v46, %v10881_v11 }
0x5fc4   :  { %v10928_v10 = vpop.permute.xlu1 %10927 }
0x5fc5   :  { %v10947_v8 = vmul.f32 %v10928_v10, %v18866_v47 }
0x5fc7   :  { %v10953_v35 = vadd.f32 %v10947_v8, %v10917_v42 }
0x5fc9   :  { %v10888_v60 = vpop.permute.xlu1 %10887  ;;  %10977 = vrot.lane.b32.xlu0 %v10953_v35, %s14013_s29 }
0x5fca   :  { %v10910_v29 = vmul.f32 %v10888_v60, %v18845_v34 }
0x5fcc   :  { %v10916_v49 = vadd.f32 %v10910_v29, %v10880_v57 }
0x5fce   :  { %v10924_v13 = vpop.permute.xlu1 %10923 }
0x5fcf   :  { %v10946_v28 = vmul.f32 %v10924_v13, %v18874_v51 }
0x5fd1   :  { %v10952_v62 = vadd.f32 %v10946_v28, %v10916_v49 }
0x5fd3   :  { %10975 = vrot.lane.b32.xlu1 %v10952_v62, %s14013_s29 }
0x5fd8   :  { %v10868_v21 = vpop.permute.xlu1 %10867  ;;  %v10900_v38 = vpop.permute.xlu0 %10899 }
0x5fd9   :  { %v10913_v37 = vmul.f32 %v10900_v38, %v18789_v50 }
0x5fdc   :  { %v10863_v36 = vpop.permute.xlu1 %10862 }
0x5fdd   :  { %v10932_v47 = vpop.permute.xlu0 %10931  ;;  %v10882_v59 = vmul.f32 %v10863_v36, %v18830_v14 }
0x5fde   :  { %v10948_v34 = vmul.f32 %v10932_v47, %v18890_v19  ;;  %v10883_v19 = vmul.f32 %v10868_v21, %v18755_v9 }
0x5fe0   :  { %v10919_v55 = vadd.f32 %v10913_v37, %v10883_v19 }
0x5fe1   :  { %v10896_v6 = vpop.permute.xlu1 %10895 }
0x5fe2   :  { %v10912_v5 = vmul.f32 %v10896_v6, %v18853_v56 }
0x5fe4   :  { %v10918_v23 = vadd.f32 %v10912_v5, %v10882_v59 }
0x5fe6   :  { %v10954_v31 = vadd.f32 %v10948_v34, %v10918_v23 }
0x5fe8   :  { %10979 = vrot.lane.b32.xlu1 %v10954_v31, %s14013_s29 }
0x5fef   :  { %v10904_v48 = vpop.permute.xlu0 %10903 }
0x5ff0   :  { %v10914_v14 = vmul.f32 %v10904_v48, %v18858_v61 }
0x5ff3   :  { %v10878_v43 = vpop.permute.xlu1 %10877 }
0x5ff4   :  { %v10885_v44 = vmul.f32 %v10878_v43, %v18763_v24 }
0x5ff8   :  { %v10908_v51 = vpop.permute.xlu1 %10907 }
0x5ff9   :  { %v10915_v56 = vmul.f32 %v10908_v51, %v18809_v33 }
0x5ffb   :  { %v10921_v18 = vadd.f32 %v10915_v56, %v10885_v44 }
0x5ffd   :  { %v10873_v25 = vpop.permute.xlu1 %10872 }
0x5ffe   :  { %v10884_v3 = vmul.f32 %v10873_v25, %v18839_v58  ;;  %v10944_v58 = vpop.permute.xlu0 %10943 }
0x5fff   :  { %v10951_v53 = vmul.f32 %v10944_v58, %v18906_v39 }
0x6000   :  { %v10920_v1 = vadd.f32 %v10914_v14, %v10884_v3 }
0x6001   :  { %v10957_v9 = vadd.f32 %v10951_v53, %v10921_v18 }
0x6002   :  { %v10940_v7 = vpop.permute.xlu1 %10939 }
0x6003   :  { %v10950_v41 = vmul.f32 %v10940_v7, %v18901_v0 }
0x6005   :  { %v10956_v32 = vadd.f32 %v10950_v41, %v10920_v1 }
0x6006   :  { %v10936_v15 = vpop.permute.xlu1 %10935 }
0x6007   :  { %v10949_v61 = vmul.f32 %v10936_v15, %v18882_v26  ;;  %10983 = vrot.lane.b32.xlu0 %v10956_v32, %s14013_s29 }
0x6009   :  { %v10955_v33 = vadd.f32 %v10949_v61, %v10919_v55 }
0x600b   :  { %10981 = vrot.lane.b32.xlu1 %v10955_v33, %s14013_s29  ;;  %10985 = vrot.lane.b32.xlu0 %v10957_v9, %s14013_s29 }
0x603b   :  { %v10978_v50 = vpop.permute.xlu0 %10977 }
0x6045   :  { %v10976_v24 = vpop.permute.xlu1 %10975 }
0x6046   :  { %12787 = vmatprep.mubr.msk.f32.mxu0 %vm523_vm5, %v10976_v24 }
0x6047   :  { %12788 = vmatmul.mubr.msk.f32.vlgmr.msra.gmra.mrb[8].mxu0 %vm523_vm5, %v10978_v50 }
0x605a   :  { %v10980_v0 = vpop.permute.xlu1 %10979 }
0x605b   :  { %12790 = vmatprep.mubr.msk.f32.mxu0 %vm523_vm5, %v10980_v0 }
0x6079   :  { %v10984_v39 = vpop.permute.xlu0 %10983 }
0x607a   :  { %12793 = vmatprep.mubr.msk.f32.mxu1 %vm523_vm5, %v10984_v39 }
0x607d   :  { %v10982_v26 = vpop.permute.xlu1 %10981  ;;  %v10986_v63 = vpop.permute.xlu0 %10985 }
0x607e   :  { %12791 = vmatmul.mubr.msk.f32.gmra.mrb[10].mxu0 %vm523_vm5, %v10982_v26  ;;  %12794 = vmatmul.mubr.msk.f32.vlgmr.msra.gmra.mrb[8].mxu1 %vm523_vm5, %v10986_v63 }
0x611a   :  { %v12789_v4 = vpop.f32.mrb[8].mxu0 }
0x611b   :  { %v11071_v16 = vadd.f32 %v12789_v4, %v11397_v12  ;;  %v11065_v40 = vpop.f32.mrb[9].mxu0 }
0x611c   :  { %v11066_v27 = vadd.f32 %v11397_v12, %v11065_v40 }
0x611d   :  { %13991 = vtanh.f32 %v11071_v16 }
0x611e   :  { %13993 = vtanh.f32 %v11066_v27 }
0x6127   :  { %v13992_v52 = vpop.eup %13991 }
0x6128   :  { %v13994_v54 = vpop.eup %13993  ;;  %11101 = vst.msk [vmem:[%s19157_s20 + $0x8] sm:$0xff] %vm2893_vm6, %v13992_v52 }
0x6129   :  { %11100 = vst.msk [vmem:[%s19157_s20] sm:$0xff] %vm2893_vm6, %v13994_v54 }
0x6151   :  { %v12792_v17 = vpop.f32.mrb[10].mxu0  ;;  %v12795_v45 = vpop.f32.mrb[8].mxu1 }
0x6152   :  { %v11081_v30 = vadd.f32 %v12792_v17, %v11397_v12  ;;  %v11091_v2 = vadd.f32 %v12795_v45, %v11397_v12  ;;  %v11075_v46 = vpop.f32.mrb[11].mxu0  ;;  %v11085_v11 = vpop.f32.mrb[9].mxu1 }
0x6153   :  { %v11076_v10 = vadd.f32 %v11397_v12, %v11075_v46  ;;  %v11086_v42 = vadd.f32 %v11397_v12, %v11085_v11 }
0x6154   :  { %13995 = vtanh.f32 %v11081_v30 }
0x6155   :  { %13997 = vtanh.f32 %v11091_v2 }
0x6156   :  { %13999 = vtanh.f32 %v11076_v10 }
0x6157   :  { %14001 = vtanh.f32 %v11086_v42 }
0x615e   :  { %v13996_v8 = vpop.eup %13995 }
0x615f   :  { %v13998_v35 = vpop.eup %13997  ;;  %11103 = vst.msk [vmem:[%s19157_s20 + $0x18] sm:$0xff] %vm2893_vm6, %v13996_v8 }
0x6160   :  { %v14000_v60 = vpop.eup %13999  ;;  %11105 = vst.msk [vmem:[%s19157_s20 + $0x28] sm:$0xff] %vm2893_vm6, %v13998_v35 }
0x6161   :  { %v14002_v20 = vpop.eup %14001  ;;  %11102 = vst.msk [vmem:[%s19157_s20 + $0x10] sm:$0xff] %vm2893_vm6, %v14000_v60 }
0x6162   :  { %11104 = vst.msk [vmem:[%s19157_s20 + $0x20] sm:$0xff] %vm2893_vm6, %v14002_v20 }

</bundles_post_ra>
